<compile_context>
chip_gen: v6e
topology: v6e:2x2x1
jax: 0.10.0
libtpu: 0.0.40
codegen_flags: <defaults>
</compile_context>

<pallas_src>
import jax
import jax.numpy as jnp
from jax.experimental import pallas as pl
from jax.experimental.pallas import tpu as pltpu

EPS = 1e-6
PERCEPTUAL_WEIGHT = 0.1
TV_WEIGHT = 0.1

CONFIG = {
    "training": {
        "loss_weights": {"boundary": 0.5},
        "modes": {
            "human_guided": {
                "human_feedback_weight": 0.3,
                "base_loss_weight": 0.7,
            }
        },
    }
}
BOUNDARY_WEIGHT = CONFIG["training"]["loss_weights"]["boundary"]
HUMAN_FEEDBACK_WEIGHT = CONFIG["training"]["modes"]["human_guided"]["human_feedback_weight"]
BASE_LOSS_WEIGHT = CONFIG["training"]["modes"]["human_guided"]["base_loss_weight"]

NEG = -1e30  # stands in for the -inf padding of F.max_pool2d


# --------------------------------------------------------------------------------------
# Pallas kernels
# --------------------------------------------------------------------------------------
def conv_mm_relu_kernel(x_ref, w_ref, b_ref, o_ref):
    # 3x3 "same" conv as a single im2col matmul per batch item.
    # x_ref: (1, M, 9*Cin) bf16   w_ref: (9*Cin, Cout) bf16   b_ref: (1, Cout) f32
    # o_ref: (1, M, Cout) bf16
    y = jnp.dot(x_ref[0], w_ref[...], preferred_element_type=jnp.float32)
    y = jnp.maximum(y + b_ref[...], 0.0)
    o_ref[0] = y.astype(o_ref.dtype)


def conv_final_absdiff_kernel(xp_ref, xt_ref, w_ref, b_ref, o_ref):
    # Last VGG conv for the pred and target im2col slabs, fused with the perceptual
    # L1 reduction so the feature maps never leave VMEM.
    # xp/xt: (B*M, K) bf16   w: (K, Cout) bf16   b: (1, Cout) f32   o: SMEM (1,) f32
    w = w_ref[...]
    b = b_ref[...]
    fp = jnp.maximum(jnp.dot(xp_ref[...], w, preferred_element_type=jnp.float32) + b, 0.0)
    ft = jnp.maximum(jnp.dot(xt_ref[...], w, preferred_element_type=jnp.float32) + b, 0.0)
    o_ref[0] = jnp.sum(jnp.abs(fp - ft))


def loss_reduce_kernel(p_ref, t_ref, m_ref, h_ref, sp_ref, out_ref):
    # All per-pixel reductions in one launch (kept in f32 for fidelity).
    # p/t/m/h: (B, H, W) f32.  sp: (4, B, H+2, W+2) = [m, -m, h, -h] padded with NEG.
    # out (SMEM, 9): [l1, h_tv, w_tv, bnd_m_sum, bnd_m_l1, h_sum, h_l1, bnd_h_sum, bnd_h_l1]
    p = p_ref[...]
    t = t_ref[...]
    m = m_ref[...]
    h = h_ref[...]
    B, H, W = p.shape

    absdiff = jnp.abs(p - t)
    out_ref[0] = jnp.sum(absdiff)                       # sum |pred - target|

    # total-variation terms on pred * (1 - mask)
    xh = p * (1.0 - m)
    dh = xh[:, 1:, :] - xh[:, :-1, :]
    dw = xh[:, :, 1:] - xh[:, :, :-1]
    out_ref[1] = jnp.sum(dh * dh)                       # h_tv
    out_ref[2] = jnp.sum(dw * dw)                       # w_tv

    # Separable 3x3 valid-window max over all 4 stacked maps at once:
    #   c[0] = dilate(m), c[1] = -erode(m), c[2] = dilate(h), c[3] = -erode(h)
    # (erode = min over the valid window = -max of the negated, NEG-padded map)
    sp = sp_ref[...]
    r = jnp.maximum(jnp.maximum(sp[:, :, 0:H, :], sp[:, :, 1:H + 1, :]),
                    sp[:, :, 2:H + 2, :])               # rows pass: (4, B, H, W+2)
    c = jnp.maximum(jnp.maximum(r[:, :, :, 0:W], r[:, :, :, 1:W + 1]),
                    r[:, :, :, 2:W + 2])                # cols pass: (4, B, H, W)
    bnd_m = jnp.clip(c[0] + c[1], 0.0, 1.0)             # clamp(dilated - eroded, 0, 1)
    bnd_h = jnp.clip(c[2] + c[3], 0.0, 1.0)

    out_ref[3] = jnp.sum(bnd_m)
    out_ref[4] = jnp.sum(absdiff * bnd_m)
    out_ref[5] = jnp.sum(h)                             # human mask coverage
    out_ref[6] = jnp.sum(absdiff * h)                   # == sum|p*h - t*h| (h is {0,1})
    out_ref[7] = jnp.sum(bnd_h)
    out_ref[8] = jnp.sum(absdiff * bnd_h)


# --------------------------------------------------------------------------------------
# Wrappers
# --------------------------------------------------------------------------------------
def im2col_3x3(x):
    # (N, H, W, C) -> (N, H*W, 9*C), tap-major channel order (kh*3+kw blocks of C).
    N, H, W, C = x.shape
    xp = jnp.pad(x, ((0, 0), (1, 1), (1, 1), (0, 0)))
    cols = [xp[:, kh:kh + H, kw:kw + W, :] for kh in range(3) for kw in range(3)]
    return jnp.concatenate(cols, axis=-1).reshape(N, H * W, 9 * C)


def conv3x3_relu(slab, w, b, H, W):
    # slab: (N, M, K) bf16, w: (K, Cout) bf16, b: (1, Cout) f32  ->  (N, H, W, Cout) bf16
    N, M, K = slab.shape
    Cout = w.shape[1]
    out = pl.pallas_call(
        conv_mm_relu_kernel,
        out_shape=jax.ShapeDtypeStruct((N, M, Cout), jnp.bfloat16),
        grid=(N,),
        in_specs=[
            pl.BlockSpec((1, M, K), lambda i: (i, 0, 0)),
            pl.BlockSpec((K, Cout), lambda i: (0, 0)),
            pl.BlockSpec((1, Cout), lambda i: (0, 0)),
        ],
        out_specs=pl.BlockSpec((1, M, Cout), lambda i: (i, 0, 0)),
        compiler_params=pltpu.CompilerParams(dimension_semantics=("parallel",)),
    )(slab, w, b)
    return out.reshape(N, H, W, Cout)


def final_conv_absdiff_sum(xp, xt, w, b):
    # Final feature maps are tiny (post two 2x2 pools); at large sizes this would be
    # gridded over row blocks with an accumulating output instead of whole-tensor VMEM.
    return pl.pallas_call(
        conv_final_absdiff_kernel,
        out_shape=jax.ShapeDtypeStruct((1,), jnp.float32),
        in_specs=[pl.BlockSpec(memory_space=pltpu.MemorySpace.VMEM) for _ in range(4)],
        out_specs=pl.BlockSpec(memory_space=pltpu.MemorySpace.SMEM),
    )(xp, xt, w, b)


def loss_reduce(p, t, m, h, sp):
    return pl.pallas_call(
        loss_reduce_kernel,
        out_shape=jax.ShapeDtypeStruct((9,), jnp.float32),
        in_specs=[pl.BlockSpec(memory_space=pltpu.MemorySpace.VMEM) for _ in range(5)],
        out_specs=pl.BlockSpec(memory_space=pltpu.MemorySpace.SMEM),
    )(p, t, m, h, sp)


def perceptual_l1(x, params, B):
    # Mean |VGG(pred) - VGG(target)| with a single stack over the concatenated 2B batch.
    h = x
    n_layers = len(params)
    for li, (w, b) in enumerate(params):
        N, Hc, Wc, _ = h.shape
        slab = im2col_3x3(h)                                  # (N, Hc*Wc, 9*Cin)
        if li < n_layers - 1:
            h = conv3x3_relu(slab, w, b, Hc, Wc)
            if li in (1, 3):
                # TODO(synk): 2x2 stride-2 max-pool kept in XLA; fusing it into the conv
                # epilogue needs strided sublane reshapes that Mosaic lowers poorly here.
                h = jax.lax.reduce_window(h, jnp.array(-jnp.inf, h.dtype), jax.lax.max,
                                          (1, 2, 2, 1), (1, 2, 2, 1), "VALID")
        else:
            M = Hc * Wc
            K = slab.shape[2]
            Cout = w.shape[1]
            xp = slab[:B].reshape(B * M, K)                   # pred half
            xt = slab[B:].reshape(B * M, K)                   # target half
            s = final_conv_absdiff_sum(xp, xt, w, b)
            return s[0] / (B * M * Cout)


def init_vgg_params(key):
    # Synthetic VGG16 features[:16] weights (no checkpoint load), stored pre-flattened
    # as (9*Cin, Cout) bf16 for the im2col matmul; biases stay f32.
    cfg = [(3, 64), (64, 64), (64, 128), (128, 128), (128, 256), (256, 256), (256, 256)]
    params = []
    for layer, (cin, cout) in enumerate(cfg):
        key, kw, kb = jax.random.split(key, 3)
        w = jax.random.normal(kw, (9, cin, cout), jnp.float32) * jnp.sqrt(2.0 / (9 * cin))
        b = jax.random.normal(kb, (1, cout), jnp.float32) * 0.01
        if layer == 0:
            # input.repeat(1, 3, 1, 1) gives 3 identical channels -> fold into weights.
            w = jnp.sum(w, axis=1, keepdims=True)             # (9, 1, 64)
        params.append((w.reshape(-1, cout).astype(jnp.bfloat16), b))
    return params


@jax.jit
def human_guided_loss(pred, target, mask, human_mask, vgg_params):
    """pred/target/mask/human_mask: (B, 1, H, W) float32 (PyTorch NCHW convention)."""
    B, C, H, W = pred.shape

    p = pred[:, 0]
    t = target[:, 0]
    m = mask[:, 0]
    hgr = (human_mask[:, 0] > 0).astype(jnp.float32)

    # One consolidated aux array: [m, -m, hgr, -hgr] padded with NEG feeds both dilation
    # (max) and erosion (min via max of the negated map) for both masks.
    sp = jnp.pad(jnp.stack([m, -m, hgr, -hgr], axis=0),
                 ((0, 0), (0, 0), (1, 1), (1, 1)), constant_values=NEG)

    stats = loss_reduce(p, t, m, hgr, sp)

    # ---- base InpaintingLoss ----
    l1 = stats[0] / (B * C * H * W)

    # perceptual loss: single-channel input (3x repeat folded into the first conv), both
    # pred and target concatenated along the batch so the VGG stack runs once.
    x = jnp.concatenate([p, t], axis=0)[..., None].astype(jnp.bfloat16)   # (2B, H, W, 1)
    perceptual = perceptual_l1(x, vgg_params, B)

    count_h = B * C * (H - 1) * W
    count_w = B * C * H * (W - 1)
    tv = 2.0 * (stats[1] / count_h + stats[2] / count_w) / B

    b_loss = jnp.where(stats[3] < 1.0, 0.0, stats[4] / (stats[3] + EPS))

    base_loss = l1 + PERCEPTUAL_WEIGHT * perceptual + TV_WEIGHT * tv + BOUNDARY_WEIGHT * b_loss

    # ---- human-feedback loss ----
    human_l1 = stats[6] / (B * C * H * W)
    human_b = jnp.where(stats[7] < 1.0, 0.0, stats[8] / (stats[7] + EPS))
    human_loss = jnp.where(stats[5] > 0.0,
                           human_l1 + BOUNDARY_WEIGHT * human_b,
                           0.0)

    return BASE_LOSS_WEIGHT * base_loss + HUMAN_FEEDBACK_WEIGHT * human_loss


# --------------------------------------------------------------------------------------
if __name__ == "__main__":
    key = jax.random.PRNGKey(0)
    k1, k2, k3, k4, k5 = jax.random.split(key, 5)

    B, C, H, W = 2, 1, 16, 16
    pred = jax.random.uniform(k1, (B, C, H, W), jnp.float32)
    target = jax.random.uniform(k2, (B, C, H, W), jnp.float32)
    mask = (jax.random.uniform(k3, (B, C, H, W)) > 0.5).astype(jnp.float32)
    human_mask = (jax.random.uniform(k4, (B, C, H, W)) > 0.7).astype(jnp.float32)
    vgg_params = init_vgg_params(k5)

    loss = human_guided_loss(pred, target, mask, human_mask, vgg_params)
    jax.block_until_ready(loss)
    assert loss.shape == () and jnp.isfinite(loss)
    print("KERNEL_OK")
</pallas_src>

<mosaic_0001>
module attributes {stable_mosaic.version = 11 : i64} {
  func.func @conv_mm_relu_kernel(%arg0: i32, %arg1: memref<1x256x9xbf16, #tpu.memory_space<vmem>>, %arg2: memref<9x64xbf16, #tpu.memory_space<vmem>>, %arg3: memref<1x64xf32, #tpu.memory_space<vmem>>, %arg4: memref<1x256x64xbf16, #tpu.memory_space<vmem>>) attributes {dimension_semantics = [#tpu.dimension_semantics<parallel>], iteration_bounds = array<i64: 4>, scalar_prefetch = 0 : i64, scratch_operands = 0 : i64, tpu.core_type = #tpu.core_type<tc>, window_params = [{transform_indices = @transform_0, window_bounds = array<i64: 1, 256, 9>}, {pipeline_mode = #tpu.pipeline_mode<synchronous>, transform_indices = @transform_1, window_bounds = array<i64: 9, 64>}, {pipeline_mode = #tpu.pipeline_mode<synchronous>, transform_indices = @transform_2, window_bounds = array<i64: 1, 64>}, {transform_indices = @transform_3, window_bounds = array<i64: 1, 256, 64>}]} {
    %c0 = arith.constant 0 : index
    %c0_0 = arith.constant 0 : index
    %c0_1 = arith.constant 0 : index
    %0 = vector.load %arg1[%c0, %c0_0, %c0_1] : memref<1x256x9xbf16, #tpu.memory_space<vmem>>, vector<1x256x9xbf16>
    %1 = vector.shape_cast %0 : vector<1x256x9xbf16> to vector<256x9xbf16>
    %c0_2 = arith.constant 0 : index
    %c0_3 = arith.constant 0 : index
    %2 = vector.load %arg2[%c0_2, %c0_3] : memref<9x64xbf16, #tpu.memory_space<vmem>>, vector<9x64xbf16>
    %cst = arith.constant dense<0.000000e+00> : vector<256x64xf32>
    %3 = tpu.matmul %1, %2, %cst {dimension_numbers = #tpu.dot_dimension_numbers<[1], [0], [0], [1], [0, 0, 1, 1], [], []>} : vector<256x9xbf16>, vector<9x64xbf16>, vector<256x64xf32> -> vector<256x64xf32>
    %c0_4 = arith.constant 0 : index
    %c0_5 = arith.constant 0 : index
    %4 = vector.load %arg3[%c0_4, %c0_5] : memref<1x64xf32, #tpu.memory_space<vmem>>, vector<1x64xf32>
    %5 = vector.broadcast %4 : vector<1x64xf32> to vector<256x64xf32>
    %6 = arith.addf %3, %5 : vector<256x64xf32>
    %cst_6 = arith.constant 0.000000e+00 : f32
    %7 = vector.broadcast %cst_6 : f32 to vector<256x64xf32>
    %8 = arith.maximumf %6, %7 : vector<256x64xf32>
    %9 = arith.truncf %8 : vector<256x64xf32> to vector<256x64xbf16>
    %c0_7 = arith.constant 0 : index
    %c0_8 = arith.constant 0 : index
    %c0_9 = arith.constant 0 : index
    %10 = vector.load %arg4[%c0_7, %c0_8, %c0_9] : memref<1x256x64xbf16, #tpu.memory_space<vmem>>, vector<1x256x64xbf16>
    %11 = vector.shape_cast %10 : vector<1x256x64xbf16> to vector<256x64xbf16>
    %12 = vector.shape_cast %9 : vector<256x64xbf16> to vector<1x256x64xbf16>
    tpu.vector_store %arg4[%c0_7, %c0_8, %c0_9], %12 {strides = array<i32>} : memref<1x256x64xbf16, #tpu.memory_space<vmem>>, vector<1x256x64xbf16>,
    return
  }
  func.func @transform_0(%arg0: i32) -> (i32, i32, i32) {
    %c0_i32 = arith.constant 0 : i32
    %c0_i32_0 = arith.constant 0 : i32
    %c0_i32_1 = arith.constant 0 : i32
    return %arg0, %c0_i32, %c0_i32_0 : i32, i32, i32
  }
  func.func @transform_1(%arg0: i32) -> (i32, i32) {
    %c0_i32 = arith.constant 0 : i32
    %c0_i32_0 = arith.constant 0 : i32
    %c0_i32_1 = arith.constant 0 : i32
    return %c0_i32, %c0_i32_0 : i32, i32
  }
  func.func @transform_2(%arg0: i32) -> (i32, i32) {
    %c0_i32 = arith.constant 0 : i32
    %c0_i32_0 = arith.constant 0 : i32
    %c0_i32_1 = arith.constant 0 : i32
    return %c0_i32, %c0_i32_0 : i32, i32
  }
  func.func @transform_3(%arg0: i32) -> (i32, i32, i32) {
    %c0_i32 = arith.constant 0 : i32
    %c0_i32_0 = arith.constant 0 : i32
    %c0_i32_1 = arith.constant 0 : i32
    return %arg0, %c0_i32, %c0_i32_0 : i32, i32, i32
  }
}

module attributes {stable_mosaic.version = 11 : i64} {
  func.func @conv_mm_relu_kernel(%arg0: i32, %arg1: memref<1x256x576xbf16, #tpu.memory_space<vmem>>, %arg2: memref<576x64xbf16, #tpu.memory_space<vmem>>, %arg3: memref<1x64xf32, #tpu.memory_space<vmem>>, %arg4: memref<1x256x64xbf16, #tpu.memory_space<vmem>>) attributes {dimension_semantics = [#tpu.dimension_semantics<parallel>], iteration_bounds = array<i64: 4>, scalar_prefetch = 0 : i64, scratch_operands = 0 : i64, tpu.core_type = #tpu.core_type<tc>, window_params = [{transform_indices = @transform_0, window_bounds = array<i64: 1, 256, 576>}, {pipeline_mode = #tpu.pipeline_mode<synchronous>, transform_indices = @transform_1, window_bounds = array<i64: 576, 64>}, {pipeline_mode = #tpu.pipeline_mode<synchronous>, transform_indices = @transform_2, window_bounds = array<i64: 1, 64>}, {transform_indices = @transform_3, window_bounds = array<i64: 1, 256, 64>}]} {
    %c0 = arith.constant 0 : index
    %c0_0 = arith.constant 0 : index
    %c0_1 = arith.constant 0 : index
    %0 = vector.load %arg1[%c0, %c0_0, %c0_1] : memref<1x256x576xbf16, #tpu.memory_space<vmem>>, vector<1x256x576xbf16>
    %1 = vector.shape_cast %0 : vector<1x256x576xbf16> to vector<256x576xbf16>
    %c0_2 = arith.constant 0 : index
    %c0_3 = arith.constant 0 : index
    %2 = vector.load %arg2[%c0_2, %c0_3] : memref<576x64xbf16, #tpu.memory_space<vmem>>, vector<576x64xbf16>
    %cst = arith.constant dense<0.000000e+00> : vector<256x64xf32>
    %3 = tpu.matmul %1, %2, %cst {dimension_numbers = #tpu.dot_dimension_numbers<[1], [0], [0], [1], [0, 0, 1, 1], [], []>} : vector<256x576xbf16>, vector<576x64xbf16>, vector<256x64xf32> -> vector<256x64xf32>
    %c0_4 = arith.constant 0 : index
    %c0_5 = arith.constant 0 : index
    %4 = vector.load %arg3[%c0_4, %c0_5] : memref<1x64xf32, #tpu.memory_space<vmem>>, vector<1x64xf32>
    %5 = vector.broadcast %4 : vector<1x64xf32> to vector<256x64xf32>
    %6 = arith.addf %3, %5 : vector<256x64xf32>
    %cst_6 = arith.constant 0.000000e+00 : f32
    %7 = vector.broadcast %cst_6 : f32 to vector<256x64xf32>
    %8 = arith.maximumf %6, %7 : vector<256x64xf32>
    %9 = arith.truncf %8 : vector<256x64xf32> to vector<256x64xbf16>
    %c0_7 = arith.constant 0 : index
    %c0_8 = arith.constant 0 : index
    %c0_9 = arith.constant 0 : index
    %10 = vector.load %arg4[%c0_7, %c0_8, %c0_9] : memref<1x256x64xbf16, #tpu.memory_space<vmem>>, vector<1x256x64xbf16>
    %11 = vector.shape_cast %10 : vector<1x256x64xbf16> to vector<256x64xbf16>
    %12 = vector.shape_cast %9 : vector<256x64xbf16> to vector<1x256x64xbf16>
    tpu.vector_store %arg4[%c0_7, %c0_8, %c0_9], %12 {strides = array<i32>} : memref<1x256x64xbf16, #tpu.memory_space<vmem>>, vector<1x256x64xbf16>,
    return
  }
  func.func @transform_0(%arg0: i32) -> (i32, i32, i32) {
    %c0_i32 = arith.constant 0 : i32
    %c0_i32_0 = arith.constant 0 : i32
    %c0_i32_1 = arith.constant 0 : i32
    return %arg0, %c0_i32, %c0_i32_0 : i32, i32, i32
  }
  func.func @transform_1(%arg0: i32) -> (i32, i32) {
    %c0_i32 = arith.constant 0 : i32
    %c0_i32_0 = arith.constant 0 : i32
    %c0_i32_1 = arith.constant 0 : i32
    return %c0_i32, %c0_i32_0 : i32, i32
  }
  func.func @transform_2(%arg0: i32) -> (i32, i32) {
    %c0_i32 = arith.constant 0 : i32
    %c0_i32_0 = arith.constant 0 : i32
    %c0_i32_1 = arith.constant 0 : i32
    return %c0_i32, %c0_i32_0 : i32, i32
  }
  func.func @transform_3(%arg0: i32) -> (i32, i32, i32) {
    %c0_i32 = arith.constant 0 : i32
    %c0_i32_0 = arith.constant 0 : i32
    %c0_i32_1 = arith.constant 0 : i32
    return %arg0, %c0_i32, %c0_i32_0 : i32, i32, i32
  }
}

module attributes {stable_mosaic.version = 11 : i64} {
  func.func @conv_mm_relu_kernel(%arg0: i32, %arg1: memref<1x64x576xbf16, #tpu.memory_space<vmem>>, %arg2: memref<576x128xbf16, #tpu.memory_space<vmem>>, %arg3: memref<1x128xf32, #tpu.memory_space<vmem>>, %arg4: memref<1x64x128xbf16, #tpu.memory_space<vmem>>) attributes {dimension_semantics = [#tpu.dimension_semantics<parallel>], iteration_bounds = array<i64: 4>, scalar_prefetch = 0 : i64, scratch_operands = 0 : i64, tpu.core_type = #tpu.core_type<tc>, window_params = [{transform_indices = @transform_0, window_bounds = array<i64: 1, 64, 576>}, {pipeline_mode = #tpu.pipeline_mode<synchronous>, transform_indices = @transform_1, window_bounds = array<i64: 576, 128>}, {pipeline_mode = #tpu.pipeline_mode<synchronous>, transform_indices = @transform_2, window_bounds = array<i64: 1, 128>}, {transform_indices = @transform_3, window_bounds = array<i64: 1, 64, 128>}]} {
    %c0 = arith.constant 0 : index
    %c0_0 = arith.constant 0 : index
    %c0_1 = arith.constant 0 : index
    %0 = vector.load %arg1[%c0, %c0_0, %c0_1] : memref<1x64x576xbf16, #tpu.memory_space<vmem>>, vector<1x64x576xbf16>
    %1 = vector.shape_cast %0 : vector<1x64x576xbf16> to vector<64x576xbf16>
    %c0_2 = arith.constant 0 : index
    %c0_3 = arith.constant 0 : index
    %2 = vector.load %arg2[%c0_2, %c0_3] : memref<576x128xbf16, #tpu.memory_space<vmem>>, vector<576x128xbf16>
    %cst = arith.constant dense<0.000000e+00> : vector<64x128xf32>
    %3 = tpu.matmul %1, %2, %cst {dimension_numbers = #tpu.dot_dimension_numbers<[1], [0], [0], [1], [0, 0, 1, 1], [], []>} : vector<64x576xbf16>, vector<576x128xbf16>, vector<64x128xf32> -> vector<64x128xf32>
    %c0_4 = arith.constant 0 : index
    %c0_5 = arith.constant 0 : index
    %4 = vector.load %arg3[%c0_4, %c0_5] : memref<1x128xf32, #tpu.memory_space<vmem>>, vector<1x128xf32>
    %5 = vector.broadcast %4 : vector<1x128xf32> to vector<64x128xf32>
    %6 = arith.addf %3, %5 : vector<64x128xf32>
    %cst_6 = arith.constant 0.000000e+00 : f32
    %7 = vector.broadcast %cst_6 : f32 to vector<64x128xf32>
    %8 = arith.maximumf %6, %7 : vector<64x128xf32>
    %9 = arith.truncf %8 : vector<64x128xf32> to vector<64x128xbf16>
    %c0_7 = arith.constant 0 : index
    %c0_8 = arith.constant 0 : index
    %c0_9 = arith.constant 0 : index
    %10 = vector.load %arg4[%c0_7, %c0_8, %c0_9] : memref<1x64x128xbf16, #tpu.memory_space<vmem>>, vector<1x64x128xbf16>
    %11 = vector.shape_cast %10 : vector<1x64x128xbf16> to vector<64x128xbf16>
    %12 = vector.shape_cast %9 : vector<64x128xbf16> to vector<1x64x128xbf16>
    tpu.vector_store %arg4[%c0_7, %c0_8, %c0_9], %12 {strides = array<i32>} : memref<1x64x128xbf16, #tpu.memory_space<vmem>>, vector<1x64x128xbf16>,
    return
  }
  func.func @transform_0(%arg0: i32) -> (i32, i32, i32) {
    %c0_i32 = arith.constant 0 : i32
    %c0_i32_0 = arith.constant 0 : i32
    %c0_i32_1 = arith.constant 0 : i32
    return %arg0, %c0_i32, %c0_i32_0 : i32, i32, i32
  }
  func.func @transform_1(%arg0: i32) -> (i32, i32) {
    %c0_i32 = arith.constant 0 : i32
    %c0_i32_0 = arith.constant 0 : i32
    %c0_i32_1 = arith.constant 0 : i32
    return %c0_i32, %c0_i32_0 : i32, i32
  }
  func.func @transform_2(%arg0: i32) -> (i32, i32) {
    %c0_i32 = arith.constant 0 : i32
    %c0_i32_0 = arith.constant 0 : i32
    %c0_i32_1 = arith.constant 0 : i32
    return %c0_i32, %c0_i32_0 : i32, i32
  }
  func.func @transform_3(%arg0: i32) -> (i32, i32, i32) {
    %c0_i32 = arith.constant 0 : i32
    %c0_i32_0 = arith.constant 0 : i32
    %c0_i32_1 = arith.constant 0 : i32
    return %arg0, %c0_i32, %c0_i32_0 : i32, i32, i32
  }
}

module attributes {stable_mosaic.version = 11 : i64} {
  func.func @conv_mm_relu_kernel(%arg0: i32, %arg1: memref<1x64x1152xbf16, #tpu.memory_space<vmem>>, %arg2: memref<1152x128xbf16, #tpu.memory_space<vmem>>, %arg3: memref<1x128xf32, #tpu.memory_space<vmem>>, %arg4: memref<1x64x128xbf16, #tpu.memory_space<vmem>>) attributes {dimension_semantics = [#tpu.dimension_semantics<parallel>], iteration_bounds = array<i64: 4>, scalar_prefetch = 0 : i64, scratch_operands = 0 : i64, tpu.core_type = #tpu.core_type<tc>, window_params = [{transform_indices = @transform_0, window_bounds = array<i64: 1, 64, 1152>}, {pipeline_mode = #tpu.pipeline_mode<synchronous>, transform_indices = @transform_1, window_bounds = array<i64: 1152, 128>}, {pipeline_mode = #tpu.pipeline_mode<synchronous>, transform_indices = @transform_2, window_bounds = array<i64: 1, 128>}, {transform_indices = @transform_3, window_bounds = array<i64: 1, 64, 128>}]} {
    %c0 = arith.constant 0 : index
    %c0_0 = arith.constant 0 : index
    %c0_1 = arith.constant 0 : index
    %0 = vector.load %arg1[%c0, %c0_0, %c0_1] : memref<1x64x1152xbf16, #tpu.memory_space<vmem>>, vector<1x64x1152xbf16>
    %1 = vector.shape_cast %0 : vector<1x64x1152xbf16> to vector<64x1152xbf16>
    %c0_2 = arith.constant 0 : index
    %c0_3 = arith.constant 0 : index
    %2 = vector.load %arg2[%c0_2, %c0_3] : memref<1152x128xbf16, #tpu.memory_space<vmem>>, vector<1152x128xbf16>
    %cst = arith.constant dense<0.000000e+00> : vector<64x128xf32>
    %3 = tpu.matmul %1, %2, %cst {dimension_numbers = #tpu.dot_dimension_numbers<[1], [0], [0], [1], [0, 0, 1, 1], [], []>} : vector<64x1152xbf16>, vector<1152x128xbf16>, vector<64x128xf32> -> vector<64x128xf32>
    %c0_4 = arith.constant 0 : index
    %c0_5 = arith.constant 0 : index
    %4 = vector.load %arg3[%c0_4, %c0_5] : memref<1x128xf32, #tpu.memory_space<vmem>>, vector<1x128xf32>
    %5 = vector.broadcast %4 : vector<1x128xf32> to vector<64x128xf32>
    %6 = arith.addf %3, %5 : vector<64x128xf32>
    %cst_6 = arith.constant 0.000000e+00 : f32
    %7 = vector.broadcast %cst_6 : f32 to vector<64x128xf32>
    %8 = arith.maximumf %6, %7 : vector<64x128xf32>
    %9 = arith.truncf %8 : vector<64x128xf32> to vector<64x128xbf16>
    %c0_7 = arith.constant 0 : index
    %c0_8 = arith.constant 0 : index
    %c0_9 = arith.constant 0 : index
    %10 = vector.load %arg4[%c0_7, %c0_8, %c0_9] : memref<1x64x128xbf16, #tpu.memory_space<vmem>>, vector<1x64x128xbf16>
    %11 = vector.shape_cast %10 : vector<1x64x128xbf16> to vector<64x128xbf16>
    %12 = vector.shape_cast %9 : vector<64x128xbf16> to vector<1x64x128xbf16>
    tpu.vector_store %arg4[%c0_7, %c0_8, %c0_9], %12 {strides = array<i32>} : memref<1x64x128xbf16, #tpu.memory_space<vmem>>, vector<1x64x128xbf16>,
    return
  }
  func.func @transform_0(%arg0: i32) -> (i32, i32, i32) {
    %c0_i32 = arith.constant 0 : i32
    %c0_i32_0 = arith.constant 0 : i32
    %c0_i32_1 = arith.constant 0 : i32
    return %arg0, %c0_i32, %c0_i32_0 : i32, i32, i32
  }
  func.func @transform_1(%arg0: i32) -> (i32, i32) {
    %c0_i32 = arith.constant 0 : i32
    %c0_i32_0 = arith.constant 0 : i32
    %c0_i32_1 = arith.constant 0 : i32
    return %c0_i32, %c0_i32_0 : i32, i32
  }
  func.func @transform_2(%arg0: i32) -> (i32, i32) {
    %c0_i32 = arith.constant 0 : i32
    %c0_i32_0 = arith.constant 0 : i32
    %c0_i32_1 = arith.constant 0 : i32
    return %c0_i32, %c0_i32_0 : i32, i32
  }
  func.func @transform_3(%arg0: i32) -> (i32, i32, i32) {
    %c0_i32 = arith.constant 0 : i32
    %c0_i32_0 = arith.constant 0 : i32
    %c0_i32_1 = arith.constant 0 : i32
    return %arg0, %c0_i32, %c0_i32_0 : i32, i32, i32
  }
}

module attributes {stable_mosaic.version = 11 : i64} {
  func.func @conv_mm_relu_kernel(%arg0: i32, %arg1: memref<1x16x1152xbf16, #tpu.memory_space<vmem>>, %arg2: memref<1152x256xbf16, #tpu.memory_space<vmem>>, %arg3: memref<1x256xf32, #tpu.memory_space<vmem>>, %arg4: memref<1x16x256xbf16, #tpu.memory_space<vmem>>) attributes {dimension_semantics = [#tpu.dimension_semantics<parallel>], iteration_bounds = array<i64: 4>, scalar_prefetch = 0 : i64, scratch_operands = 0 : i64, tpu.core_type = #tpu.core_type<tc>, window_params = [{transform_indices = @transform_0, window_bounds = array<i64: 1, 16, 1152>}, {pipeline_mode = #tpu.pipeline_mode<synchronous>, transform_indices = @transform_1, window_bounds = array<i64: 1152, 256>}, {pipeline_mode = #tpu.pipeline_mode<synchronous>, transform_indices = @transform_2, window_bounds = array<i64: 1, 256>}, {transform_indices = @transform_3, window_bounds = array<i64: 1, 16, 256>}]} {
    %c0 = arith.constant 0 : index
    %c0_0 = arith.constant 0 : index
    %c0_1 = arith.constant 0 : index
    %0 = vector.load %arg1[%c0, %c0_0, %c0_1] : memref<1x16x1152xbf16, #tpu.memory_space<vmem>>, vector<1x16x1152xbf16>
    %1 = vector.shape_cast %0 : vector<1x16x1152xbf16> to vector<16x1152xbf16>
    %c0_2 = arith.constant 0 : index
    %c0_3 = arith.constant 0 : index
    %2 = vector.load %arg2[%c0_2, %c0_3] : memref<1152x256xbf16, #tpu.memory_space<vmem>>, vector<1152x256xbf16>
    %cst = arith.constant dense<0.000000e+00> : vector<16x256xf32>
    %3 = tpu.matmul %1, %2, %cst {dimension_numbers = #tpu.dot_dimension_numbers<[1], [0], [0], [1], [0, 0, 1, 1], [], []>} : vector<16x1152xbf16>, vector<1152x256xbf16>, vector<16x256xf32> -> vector<16x256xf32>
    %c0_4 = arith.constant 0 : index
    %c0_5 = arith.constant 0 : index
    %4 = vector.load %arg3[%c0_4, %c0_5] : memref<1x256xf32, #tpu.memory_space<vmem>>, vector<1x256xf32>
    %5 = vector.broadcast %4 : vector<1x256xf32> to vector<16x256xf32>
    %6 = arith.addf %3, %5 : vector<16x256xf32>
    %cst_6 = arith.constant 0.000000e+00 : f32
    %7 = vector.broadcast %cst_6 : f32 to vector<16x256xf32>
    %8 = arith.maximumf %6, %7 : vector<16x256xf32>
    %9 = arith.truncf %8 : vector<16x256xf32> to vector<16x256xbf16>
    %c0_7 = arith.constant 0 : index
    %c0_8 = arith.constant 0 : index
    %c0_9 = arith.constant 0 : index
    %10 = vector.load %arg4[%c0_7, %c0_8, %c0_9] : memref<1x16x256xbf16, #tpu.memory_space<vmem>>, vector<1x16x256xbf16>
    %11 = vector.shape_cast %10 : vector<1x16x256xbf16> to vector<16x256xbf16>
    %12 = vector.shape_cast %9 : vector<16x256xbf16> to vector<1x16x256xbf16>
    tpu.vector_store %arg4[%c0_7, %c0_8, %c0_9], %12 {strides = array<i32>} : memref<1x16x256xbf16, #tpu.memory_space<vmem>>, vector<1x16x256xbf16>,
    return
  }
  func.func @transform_0(%arg0: i32) -> (i32, i32, i32) {
    %c0_i32 = arith.constant 0 : i32
    %c0_i32_0 = arith.constant 0 : i32
    %c0_i32_1 = arith.constant 0 : i32
    return %arg0, %c0_i32, %c0_i32_0 : i32, i32, i32
  }
  func.func @transform_1(%arg0: i32) -> (i32, i32) {
    %c0_i32 = arith.constant 0 : i32
    %c0_i32_0 = arith.constant 0 : i32
    %c0_i32_1 = arith.constant 0 : i32
    return %c0_i32, %c0_i32_0 : i32, i32
  }
  func.func @transform_2(%arg0: i32) -> (i32, i32) {
    %c0_i32 = arith.constant 0 : i32
    %c0_i32_0 = arith.constant 0 : i32
    %c0_i32_1 = arith.constant 0 : i32
    return %c0_i32, %c0_i32_0 : i32, i32
  }
  func.func @transform_3(%arg0: i32) -> (i32, i32, i32) {
    %c0_i32 = arith.constant 0 : i32
    %c0_i32_0 = arith.constant 0 : i32
    %c0_i32_1 = arith.constant 0 : i32
    return %arg0, %c0_i32, %c0_i32_0 : i32, i32, i32
  }
}

module attributes {stable_mosaic.version = 11 : i64} {
  func.func @conv_mm_relu_kernel(%arg0: i32, %arg1: memref<1x16x2304xbf16, #tpu.memory_space<vmem>>, %arg2: memref<2304x256xbf16, #tpu.memory_space<vmem>>, %arg3: memref<1x256xf32, #tpu.memory_space<vmem>>, %arg4: memref<1x16x256xbf16, #tpu.memory_space<vmem>>) attributes {dimension_semantics = [#tpu.dimension_semantics<parallel>], iteration_bounds = array<i64: 4>, scalar_prefetch = 0 : i64, scratch_operands = 0 : i64, tpu.core_type = #tpu.core_type<tc>, window_params = [{transform_indices = @transform_0, window_bounds = array<i64: 1, 16, 2304>}, {pipeline_mode = #tpu.pipeline_mode<synchronous>, transform_indices = @transform_1, window_bounds = array<i64: 2304, 256>}, {pipeline_mode = #tpu.pipeline_mode<synchronous>, transform_indices = @transform_2, window_bounds = array<i64: 1, 256>}, {transform_indices = @transform_3, window_bounds = array<i64: 1, 16, 256>}]} {
    %c0 = arith.constant 0 : index
    %c0_0 = arith.constant 0 : index
    %c0_1 = arith.constant 0 : index
    %0 = vector.load %arg1[%c0, %c0_0, %c0_1] : memref<1x16x2304xbf16, #tpu.memory_space<vmem>>, vector<1x16x2304xbf16>
    %1 = vector.shape_cast %0 : vector<1x16x2304xbf16> to vector<16x2304xbf16>
    %c0_2 = arith.constant 0 : index
    %c0_3 = arith.constant 0 : index
    %2 = vector.load %arg2[%c0_2, %c0_3] : memref<2304x256xbf16, #tpu.memory_space<vmem>>, vector<2304x256xbf16>
    %cst = arith.constant dense<0.000000e+00> : vector<16x256xf32>
    %3 = tpu.matmul %1, %2, %cst {dimension_numbers = #tpu.dot_dimension_numbers<[1], [0], [0], [1], [0, 0, 1, 1], [], []>} : vector<16x2304xbf16>, vector<2304x256xbf16>, vector<16x256xf32> -> vector<16x256xf32>
    %c0_4 = arith.constant 0 : index
    %c0_5 = arith.constant 0 : index
    %4 = vector.load %arg3[%c0_4, %c0_5] : memref<1x256xf32, #tpu.memory_space<vmem>>, vector<1x256xf32>
    %5 = vector.broadcast %4 : vector<1x256xf32> to vector<16x256xf32>
    %6 = arith.addf %3, %5 : vector<16x256xf32>
    %cst_6 = arith.constant 0.000000e+00 : f32
    %7 = vector.broadcast %cst_6 : f32 to vector<16x256xf32>
    %8 = arith.maximumf %6, %7 : vector<16x256xf32>
    %9 = arith.truncf %8 : vector<16x256xf32> to vector<16x256xbf16>
    %c0_7 = arith.constant 0 : index
    %c0_8 = arith.constant 0 : index
    %c0_9 = arith.constant 0 : index
    %10 = vector.load %arg4[%c0_7, %c0_8, %c0_9] : memref<1x16x256xbf16, #tpu.memory_space<vmem>>, vector<1x16x256xbf16>
    %11 = vector.shape_cast %10 : vector<1x16x256xbf16> to vector<16x256xbf16>
    %12 = vector.shape_cast %9 : vector<16x256xbf16> to vector<1x16x256xbf16>
    tpu.vector_store %arg4[%c0_7, %c0_8, %c0_9], %12 {strides = array<i32>} : memref<1x16x256xbf16, #tpu.memory_space<vmem>>, vector<1x16x256xbf16>,
    return
  }
  func.func @transform_0(%arg0: i32) -> (i32, i32, i32) {
    %c0_i32 = arith.constant 0 : i32
    %c0_i32_0 = arith.constant 0 : i32
    %c0_i32_1 = arith.constant 0 : i32
    return %arg0, %c0_i32, %c0_i32_0 : i32, i32, i32
  }
  func.func @transform_1(%arg0: i32) -> (i32, i32) {
    %c0_i32 = arith.constant 0 : i32
    %c0_i32_0 = arith.constant 0 : i32
    %c0_i32_1 = arith.constant 0 : i32
    return %c0_i32, %c0_i32_0 : i32, i32
  }
  func.func @transform_2(%arg0: i32) -> (i32, i32) {
    %c0_i32 = arith.constant 0 : i32
    %c0_i32_0 = arith.constant 0 : i32
    %c0_i32_1 = arith.constant 0 : i32
    return %c0_i32, %c0_i32_0 : i32, i32
  }
  func.func @transform_3(%arg0: i32) -> (i32, i32, i32) {
    %c0_i32 = arith.constant 0 : i32
    %c0_i32_0 = arith.constant 0 : i32
    %c0_i32_1 = arith.constant 0 : i32
    return %arg0, %c0_i32, %c0_i32_0 : i32, i32, i32
  }
}

module attributes {stable_mosaic.version = 11 : i64} {
  func.func @conv_final_absdiff_kernel(%arg0: memref<32x2304xbf16, #tpu.memory_space<vmem>>, %arg1: memref<32x2304xbf16, #tpu.memory_space<vmem>>, %arg2: memref<2304x256xbf16, #tpu.memory_space<vmem>>, %arg3: memref<1x256xf32, #tpu.memory_space<vmem>>, %arg4: memref<1xf32, #tpu.memory_space<smem>>) attributes {dimension_semantics = [], scalar_prefetch = 0 : i64, scratch_operands = 0 : i64, tpu.core_type = #tpu.core_type<tc>} {
    %c0 = arith.constant 0 : index
    %c0_0 = arith.constant 0 : index
    %0 = vector.load %arg2[%c0, %c0_0] : memref<2304x256xbf16, #tpu.memory_space<vmem>>, vector<2304x256xbf16>
    %c0_1 = arith.constant 0 : index
    %c0_2 = arith.constant 0 : index
    %1 = vector.load %arg3[%c0_1, %c0_2] : memref<1x256xf32, #tpu.memory_space<vmem>>, vector<1x256xf32>
    %c0_3 = arith.constant 0 : index
    %c0_4 = arith.constant 0 : index
    %2 = vector.load %arg0[%c0_3, %c0_4] : memref<32x2304xbf16, #tpu.memory_space<vmem>>, vector<32x2304xbf16>
    %cst = arith.constant dense<0.000000e+00> : vector<32x256xf32>
    %3 = tpu.matmul %2, %0, %cst {dimension_numbers = #tpu.dot_dimension_numbers<[1], [0], [0], [1], [0, 0, 1, 1], [], []>} : vector<32x2304xbf16>, vector<2304x256xbf16>, vector<32x256xf32> -> vector<32x256xf32>
    %4 = vector.broadcast %1 : vector<1x256xf32> to vector<32x256xf32>
    %5 = arith.addf %3, %4 : vector<32x256xf32>
    %cst_5 = arith.constant 0.000000e+00 : f32
    %6 = vector.broadcast %cst_5 : f32 to vector<32x256xf32>
    %7 = arith.maximumf %5, %6 : vector<32x256xf32>
    %c0_6 = arith.constant 0 : index
    %c0_7 = arith.constant 0 : index
    %8 = vector.load %arg1[%c0_6, %c0_7] : memref<32x2304xbf16, #tpu.memory_space<vmem>>, vector<32x2304xbf16>
    %cst_8 = arith.constant dense<0.000000e+00> : vector<32x256xf32>
    %9 = tpu.matmul %8, %0, %cst_8 {dimension_numbers = #tpu.dot_dimension_numbers<[1], [0], [0], [1], [0, 0, 1, 1], [], []>} : vector<32x2304xbf16>, vector<2304x256xbf16>, vector<32x256xf32> -> vector<32x256xf32>
    %10 = vector.broadcast %1 : vector<1x256xf32> to vector<32x256xf32>
    %11 = arith.addf %9, %10 : vector<32x256xf32>
    %cst_9 = arith.constant 0.000000e+00 : f32
    %12 = vector.broadcast %cst_9 : f32 to vector<32x256xf32>
    %13 = arith.maximumf %11, %12 : vector<32x256xf32>
    %14 = arith.subf %7, %13 : vector<32x256xf32>
    %15 = math.absf %14 : vector<32x256xf32>
    %16 = vector.shape_cast %15 : vector<32x256xf32> to vector<1x32x256xf32>
    %cst_10 = arith.constant dense<0.000000e+00> : vector<1xf32>
    %17 = vector.multi_reduction <add>, %16, %cst_10 [1, 2] : vector<1x32x256xf32> to vector<1xf32>
    %18 = vector.shape_cast %17 : vector<1xf32> to vector<1x1x1xf32>
    %19 = vector.extract %18[0, 0, 0] : f32 from vector<1x1x1xf32>
    %c0_11 = arith.constant 0 : index
    %20 = memref.load %arg4[%c0_11] : memref<1xf32, #tpu.memory_space<smem>>
    memref.store %19, %arg4[%c0_11] : memref<1xf32, #tpu.memory_space<smem>>
    return
  }
}

module attributes {stable_mosaic.version = 11 : i64} {
  func.func @loss_reduce_kernel(%arg0: memref<2x16x16xf32, #tpu.memory_space<vmem>>, %arg1: memref<2x16x16xf32, #tpu.memory_space<vmem>>, %arg2: memref<2x16x16xf32, #tpu.memory_space<vmem>>, %arg3: memref<2x16x16xf32, #tpu.memory_space<vmem>>, %arg4: memref<4x2x18x18xf32, #tpu.memory_space<vmem>>, %arg5: memref<9xf32, #tpu.memory_space<smem>>) attributes {dimension_semantics = [], scalar_prefetch = 0 : i64, scratch_operands = 0 : i64, tpu.core_type = #tpu.core_type<tc>} {
    %c0 = arith.constant 0 : index
    %c0_0 = arith.constant 0 : index
    %c0_1 = arith.constant 0 : index
    %0 = vector.load %arg0[%c0, %c0_0, %c0_1] : memref<2x16x16xf32, #tpu.memory_space<vmem>>, vector<2x16x16xf32>
    %c0_2 = arith.constant 0 : index
    %c0_3 = arith.constant 0 : index
    %c0_4 = arith.constant 0 : index
    %1 = vector.load %arg1[%c0_2, %c0_3, %c0_4] : memref<2x16x16xf32, #tpu.memory_space<vmem>>, vector<2x16x16xf32>
    %c0_5 = arith.constant 0 : index
    %c0_6 = arith.constant 0 : index
    %c0_7 = arith.constant 0 : index
    %2 = vector.load %arg2[%c0_5, %c0_6, %c0_7] : memref<2x16x16xf32, #tpu.memory_space<vmem>>, vector<2x16x16xf32>
    %c0_8 = arith.constant 0 : index
    %c0_9 = arith.constant 0 : index
    %c0_10 = arith.constant 0 : index
    %3 = vector.load %arg3[%c0_8, %c0_9, %c0_10] : memref<2x16x16xf32, #tpu.memory_space<vmem>>, vector<2x16x16xf32>
    %4 = arith.subf %0, %1 : vector<2x16x16xf32>
    %5 = math.absf %4 : vector<2x16x16xf32>
    %6 = vector.shape_cast %5 : vector<2x16x16xf32> to vector<1x2x16x16xf32>
    %cst = arith.constant dense<0.000000e+00> : vector<1xf32>
    %7 = vector.multi_reduction <add>, %6, %cst [1, 2, 3] : vector<1x2x16x16xf32> to vector<1xf32>
    %8 = vector.shape_cast %7 : vector<1xf32> to vector<1x1x1x1xf32>
    %9 = vector.extract %8[0, 0, 0, 0] : f32 from vector<1x1x1x1xf32>
    %c0_11 = arith.constant 0 : index
    %10 = memref.load %arg5[%c0_11] : memref<9xf32, #tpu.memory_space<smem>>
    memref.store %9, %arg5[%c0_11] : memref<9xf32, #tpu.memory_space<smem>>
    %cst_12 = arith.constant 1.000000e+00 : f32
    %11 = vector.broadcast %cst_12 : f32 to vector<2x16x16xf32>
    %12 = arith.subf %11, %2 : vector<2x16x16xf32>
    %13 = arith.mulf %0, %12 : vector<2x16x16xf32>
    %14 = vector.extract_strided_slice %13 {offsets = [0, 1, 0], sizes = [2, 15, 16], strides = [1, 1, 1]} : vector<2x16x16xf32> to vector<2x15x16xf32>
    %15 = vector.extract_strided_slice %13 {offsets = [0, 0, 0], sizes = [2, 15, 16], strides = [1, 1, 1]} : vector<2x16x16xf32> to vector<2x15x16xf32>
    %16 = arith.subf %14, %15 : vector<2x15x16xf32>
    %17 = vector.extract_strided_slice %13 {offsets = [0, 0, 1], sizes = [2, 16, 15], strides = [1, 1, 1]} : vector<2x16x16xf32> to vector<2x16x15xf32>
    %18 = vector.extract_strided_slice %13 {offsets = [0, 0, 0], sizes = [2, 16, 15], strides = [1, 1, 1]} : vector<2x16x16xf32> to vector<2x16x15xf32>
    %19 = arith.subf %17, %18 : vector<2x16x15xf32>
    %20 = arith.mulf %16, %16 : vector<2x15x16xf32>
    %21 = vector.shape_cast %20 : vector<2x15x16xf32> to vector<1x2x15x16xf32>
    %cst_13 = arith.constant dense<0.000000e+00> : vector<1xf32>
    %22 = vector.multi_reduction <add>, %21, %cst_13 [1, 2, 3] : vector<1x2x15x16xf32> to vector<1xf32>
    %23 = vector.shape_cast %22 : vector<1xf32> to vector<1x1x1x1xf32>
    %24 = vector.extract %23[0, 0, 0, 0] : f32 from vector<1x1x1x1xf32>
    %c1 = arith.constant 1 : index
    %25 = memref.load %arg5[%c1] : memref<9xf32, #tpu.memory_space<smem>>
    memref.store %24, %arg5[%c1] : memref<9xf32, #tpu.memory_space<smem>>
    %26 = arith.mulf %19, %19 : vector<2x16x15xf32>
    %27 = vector.shape_cast %26 : vector<2x16x15xf32> to vector<1x2x16x15xf32>
    %cst_14 = arith.constant dense<0.000000e+00> : vector<1xf32>
    %28 = vector.multi_reduction <add>, %27, %cst_14 [1, 2, 3] : vector<1x2x16x15xf32> to vector<1xf32>
    %29 = vector.shape_cast %28 : vector<1xf32> to vector<1x1x1x1xf32>
    %30 = vector.extract %29[0, 0, 0, 0] : f32 from vector<1x1x1x1xf32>
    %c2 = arith.constant 2 : index
    %31 = memref.load %arg5[%c2] : memref<9xf32, #tpu.memory_space<smem>>
    memref.store %30, %arg5[%c2] : memref<9xf32, #tpu.memory_space<smem>>
    %c0_15 = arith.constant 0 : index
    %c0_16 = arith.constant 0 : index
    %c0_17 = arith.constant 0 : index
    %c0_18 = arith.constant 0 : index
    %32 = vector.load %arg4[%c0_15, %c0_16, %c0_17, %c0_18] : memref<4x2x18x18xf32, #tpu.memory_space<vmem>>, vector<4x2x18x18xf32>
    %33 = vector.extract_strided_slice %32 {offsets = [0, 0, 0, 0], sizes = [4, 2, 16, 18], strides = [1, 1, 1, 1]} : vector<4x2x18x18xf32> to vector<4x2x16x18xf32>
    %34 = vector.extract_strided_slice %32 {offsets = [0, 0, 1, 0], sizes = [4, 2, 16, 18], strides = [1, 1, 1, 1]} : vector<4x2x18x18xf32> to vector<4x2x16x18xf32>
    %35 = arith.maximumf %33, %34 : vector<4x2x16x18xf32>
    %36 = vector.extract_strided_slice %32 {offsets = [0, 0, 2, 0], sizes = [4, 2, 16, 18], strides = [1, 1, 1, 1]} : vector<4x2x18x18xf32> to vector<4x2x16x18xf32>
    %37 = arith.maximumf %35, %36 : vector<4x2x16x18xf32>
    %38 = vector.extract_strided_slice %37 {offsets = [0, 0, 0, 0], sizes = [4, 2, 16, 16], strides = [1, 1, 1, 1]} : vector<4x2x16x18xf32> to vector<4x2x16x16xf32>
    %39 = vector.extract_strided_slice %37 {offsets = [0, 0, 0, 1], sizes = [4, 2, 16, 16], strides = [1, 1, 1, 1]} : vector<4x2x16x18xf32> to vector<4x2x16x16xf32>
    %40 = arith.maximumf %38, %39 : vector<4x2x16x16xf32>
    %41 = vector.extract_strided_slice %37 {offsets = [0, 0, 0, 2], sizes = [4, 2, 16, 16], strides = [1, 1, 1, 1]} : vector<4x2x16x18xf32> to vector<4x2x16x16xf32>
    %42 = arith.maximumf %40, %41 : vector<4x2x16x16xf32>
    %43 = vector.extract_strided_slice %42 {offsets = [0, 0, 0, 0], sizes = [1, 2, 16, 16], strides = [1, 1, 1, 1]} : vector<4x2x16x16xf32> to vector<1x2x16x16xf32>
    %44 = vector.shape_cast %43 : vector<1x2x16x16xf32> to vector<2x16x16xf32>
    %45 = vector.extract_strided_slice %42 {offsets = [1, 0, 0, 0], sizes = [1, 2, 16, 16], strides = [1, 1, 1, 1]} : vector<4x2x16x16xf32> to vector<1x2x16x16xf32>
    %46 = vector.shape_cast %45 : vector<1x2x16x16xf32> to vector<2x16x16xf32>
    %47 = arith.addf %44, %46 : vector<2x16x16xf32>
    %cst_19 = arith.constant 0.000000e+00 : f32
    %cst_20 = arith.constant 1.000000e+00 : f32
    %48 = vector.broadcast %cst_19 : f32 to vector<2x16x16xf32>
    %49 = arith.maximumf %48, %47 : vector<2x16x16xf32>
    %50 = vector.broadcast %cst_20 : f32 to vector<2x16x16xf32>
    %51 = arith.minimumf %50, %49 : vector<2x16x16xf32>
    %52 = vector.extract_strided_slice %42 {offsets = [2, 0, 0, 0], sizes = [1, 2, 16, 16], strides = [1, 1, 1, 1]} : vector<4x2x16x16xf32> to vector<1x2x16x16xf32>
    %53 = vector.shape_cast %52 : vector<1x2x16x16xf32> to vector<2x16x16xf32>
    %54 = vector.extract_strided_slice %42 {offsets = [3, 0, 0, 0], sizes = [1, 2, 16, 16], strides = [1, 1, 1, 1]} : vector<4x2x16x16xf32> to vector<1x2x16x16xf32>
    %55 = vector.shape_cast %54 : vector<1x2x16x16xf32> to vector<2x16x16xf32>
    %56 = arith.addf %53, %55 : vector<2x16x16xf32>
    %cst_21 = arith.constant 0.000000e+00 : f32
    %cst_22 = arith.constant 1.000000e+00 : f32
    %57 = vector.broadcast %cst_21 : f32 to vector<2x16x16xf32>
    %58 = arith.maximumf %57, %56 : vector<2x16x16xf32>
    %59 = vector.broadcast %cst_22 : f32 to vector<2x16x16xf32>
    %60 = arith.minimumf %59, %58 : vector<2x16x16xf32>
    %61 = vector.shape_cast %51 : vector<2x16x16xf32> to vector<1x2x16x16xf32>
    %cst_23 = arith.constant dense<0.000000e+00> : vector<1xf32>
    %62 = vector.multi_reduction <add>, %61, %cst_23 [1, 2, 3] : vector<1x2x16x16xf32> to vector<1xf32>
    %63 = vector.shape_cast %62 : vector<1xf32> to vector<1x1x1x1xf32>
    %64 = vector.extract %63[0, 0, 0, 0] : f32 from vector<1x1x1x1xf32>
    %c3 = arith.constant 3 : index
    %65 = memref.load %arg5[%c3] : memref<9xf32, #tpu.memory_space<smem>>
    memref.store %64, %arg5[%c3] : memref<9xf32, #tpu.memory_space<smem>>
    %66 = arith.mulf %5, %51 : vector<2x16x16xf32>
    %67 = vector.shape_cast %66 : vector<2x16x16xf32> to vector<1x2x16x16xf32>
    %cst_24 = arith.constant dense<0.000000e+00> : vector<1xf32>
    %68 = vector.multi_reduction <add>, %67, %cst_24 [1, 2, 3] : vector<1x2x16x16xf32> to vector<1xf32>
    %69 = vector.shape_cast %68 : vector<1xf32> to vector<1x1x1x1xf32>
    %70 = vector.extract %69[0, 0, 0, 0] : f32 from vector<1x1x1x1xf32>
    %c4 = arith.constant 4 : index
    %71 = memref.load %arg5[%c4] : memref<9xf32, #tpu.memory_space<smem>>
    memref.store %70, %arg5[%c4] : memref<9xf32, #tpu.memory_space<smem>>
    %72 = vector.shape_cast %3 : vector<2x16x16xf32> to vector<1x2x16x16xf32>
    %cst_25 = arith.constant dense<0.000000e+00> : vector<1xf32>
    %73 = vector.multi_reduction <add>, %72, %cst_25 [1, 2, 3] : vector<1x2x16x16xf32> to vector<1xf32>
    %74 = vector.shape_cast %73 : vector<1xf32> to vector<1x1x1x1xf32>
    %75 = vector.extract %74[0, 0, 0, 0] : f32 from vector<1x1x1x1xf32>
    %c5 = arith.constant 5 : index
    %76 = memref.load %arg5[%c5] : memref<9xf32, #tpu.memory_space<smem>>
    memref.store %75, %arg5[%c5] : memref<9xf32, #tpu.memory_space<smem>>
    %77 = arith.mulf %5, %3 : vector<2x16x16xf32>
    %78 = vector.shape_cast %77 : vector<2x16x16xf32> to vector<1x2x16x16xf32>
    %cst_26 = arith.constant dense<0.000000e+00> : vector<1xf32>
    %79 = vector.multi_reduction <add>, %78, %cst_26 [1, 2, 3] : vector<1x2x16x16xf32> to vector<1xf32>
    %80 = vector.shape_cast %79 : vector<1xf32> to vector<1x1x1x1xf32>
    %81 = vector.extract %80[0, 0, 0, 0] : f32 from vector<1x1x1x1xf32>
    %c6 = arith.constant 6 : index
    %82 = memref.load %arg5[%c6] : memref<9xf32, #tpu.memory_space<smem>>
    memref.store %81, %arg5[%c6] : memref<9xf32, #tpu.memory_space<smem>>
    %83 = vector.shape_cast %60 : vector<2x16x16xf32> to vector<1x2x16x16xf32>
    %cst_27 = arith.constant dense<0.000000e+00> : vector<1xf32>
    %84 = vector.multi_reduction <add>, %83, %cst_27 [1, 2, 3] : vector<1x2x16x16xf32> to vector<1xf32>
    %85 = vector.shape_cast %84 : vector<1xf32> to vector<1x1x1x1xf32>
    %86 = vector.extract %85[0, 0, 0, 0] : f32 from vector<1x1x1x1xf32>
    %c7 = arith.constant 7 : index
    %87 = memref.load %arg5[%c7] : memref<9xf32, #tpu.memory_space<smem>>
    memref.store %86, %arg5[%c7] : memref<9xf32, #tpu.memory_space<smem>>
    %88 = arith.mulf %5, %60 : vector<2x16x16xf32>
    %89 = vector.shape_cast %88 : vector<2x16x16xf32> to vector<1x2x16x16xf32>
    %cst_28 = arith.constant dense<0.000000e+00> : vector<1xf32>
    %90 = vector.multi_reduction <add>, %89, %cst_28 [1, 2, 3] : vector<1x2x16x16xf32> to vector<1xf32>
    %91 = vector.shape_cast %90 : vector<1xf32> to vector<1x1x1x1xf32>
    %92 = vector.extract %91[0, 0, 0, 0] : f32 from vector<1x1x1x1xf32>
    %c8 = arith.constant 8 : index
    %93 = memref.load %arg5[%c8] : memref<9xf32, #tpu.memory_space<smem>>
    memref.store %92, %arg5[%c8] : memref<9xf32, #tpu.memory_space<smem>>
    return
  }
}

</mosaic_0001>

<bundles_post_ra>
// kernel: human_guided_loss.9
= control target key start
LH: loop header
LB: loop body
LE: loop exit
PB: predicated region body
PF: predicated region fallthrough
CT: control target
= control target key end

     0   :  { %8 = vsyncpa [#allocation3], 0  ;;  %s1326_s0 = inlined_call_operand.vmem [shape: bf16[4,256,9], index: 0, kind: input, shape index: {}]   ;;  %s1327_s1 = inlined_call_operand.hbm [shape: bf16[9,64], index: 1, kind: input, shape index: {}]   ;;  %s1328_s2 = inlined_call_operand.hbm [shape: f32[1,64], index: 2, kind: input, shape index: {}]   ;;  %s1329_s3 = inlined_call_operand.vmem [shape: bf16[4,256,64], index: 3, kind: output, shape index: {}]  }
   0x1   :  { %9 = vsyncpa [#allocation5], 0  ;;  %s1123_s12 = smov 0  }
   0x2 LB: > { %s1129_s13 = sadd.s32 4294967295, %s1096_s12   ;;  %p815_p0 = scmp.ge.s32.totalorder %s1096_s12, 1  ;;  %s1096_s12 = sphi %s1123_s12, %s15_s12  }
   0x3   : > { %p114_p1 = scmp.lt.s32.totalorder %s1096_s12, 5  ;;  %s1098_s14 = smov [#allocation2]  }
   0x4   : > { %s126_s15 = sshll.u32 %s1098_s14, 4  ;;  %p996_p3 = scmp.eq.s32.totalorder %s1129_s13, 0  ;;  %s127_s15 = int_to_ptr.vmem [resolvable:$true] %s126_s15 }
   0x5   : > { %p1133_p2 = pnand %p815_p0, %p114_p1  ;;  %s1099_s17 = smov [#allocation4]  }
   0x6   : > { %s140_s18 = sshll.u32 %s1099_s17, 4  ;;  %s1041_s20 = scalar_lea.vmem %s127_s15, 128  ;;  %s141_s18 = int_to_ptr.vmem [resolvable:$true] %s140_s18 }
   0x7   : > { %p989_p4 = pneg %p1133_p2  ;;  %p1042_p7 = scmp.ne.s32.totalorder %s127_s15, %s1041_s20 }
   0x8   : > { %p1049_p10 = scmp.lt.s32.totalorder %s127_s15, %s127_s15  ;;  %p1050_p11 = scmp.lt.s32.totalorder %s1041_s20, %s1041_s20 }
   0x9   : > { %p1142_p5 = pnand %p996_p3, %p989_p4 }
   0xa   : > { %p1051_p12 = por %p1050_p11, %p1049_p10 }
   0xb   : > { %p1032_p6 = pneg %p1142_p5 }
   0xd   : > { %p1044_p8 = pnand %p1042_p7, %p1032_p6 }
   0xf   : > { %p1045_p9 = pneg %p1044_p8 }
  0x11   : > { %p1052_p13 = pnand %p1051_p12, %p1045_p9 }
  0x13   : > { %1055 = shalt.err (!%p1052_p13)
}
  0x14   : > { %s1100_s21 = smov 64   ;;  %s1101_s22 = smov 4  }
  0x15   : > { %992 = dma.hbm_to_vmem [thread:$0]  (!%p1142_p5), %s1327_s1, 128, %s127_s15, [#allocation3], %s1100_s21, %s1100_s21, %s1101_s22  }
  0x16   : > { %s1067_s25 = scalar_lea.vmem %s141_s18, 16  ;;  %s1074_s26 = scalar_lea.vmem %s141_s18, 32 }
  0x17   : > { %p1068_p0 = scmp.ne.s32.totalorder %s141_s18, %s1067_s25  ;;  %p1075_p7 = scmp.lt.s32.totalorder %s141_s18, %s141_s18 }
  0x18   : > { %p1076_p8 = scmp.lt.s32.totalorder %s1074_s26, %s1067_s25 }
  0x19   : > { %p1070_p1 = pnand %p1068_p0, %p1032_p6 }
  0x1a   : > { %p1077_p9 = por %p1076_p8, %p1075_p7 }
  0x1b   : > { %p1071_p4 = pneg %p1070_p1 }
  0x1d   : > { %p1078_p10 = pnand %p1077_p9, %p1071_p4 }
  0x1f   : > { %1081 = shalt.err (!%p1078_p10)
}
  0x20   : > { %995 = dma.hbm_to_vmem [thread:$0]  (!%p1142_p5), %s1328_s2, 16, %s141_s18, [#allocation5]  }
  0x21   : > { %161 = sbr.rel (%p1133_p2) target bundleno = 281 (0x119), region = 32 }
  0x26   : > { %1087 = dma.done.wait (%p996_p3), [#allocation3], 128  }
  0x27   : > { %1089 = vsyncadd (%p996_p3), [#allocation3], 4294967168 }
  0x28   : > { %1091 = dma.done.wait (%p996_p3), [#allocation5], 16  }
  0x29   : > { %1093 = vsyncadd (%p996_p3), [#allocation5], 4294967280  ;;  %vm375_vm0 = vcmask 1043456   ;;  %p189_p6 = scmp.lt.s32.totalorder %s1129_s13, 3  ;;  %vm376_vm1 = vcmask 1044480   ;;  %v1102_v0 = vmov 65535  }
  0x2a   : > { %v377_v1 = vsel %vm375_vm0, 4294967295, %v1102_v0  ;;  %vm326_vm2 = vcmask 72704   ;;  %v1013_v3 = vld [vmem:[#allocation2] sm:$0x1f]   ;;  %v1218_v21 = vld [vmem:[#allocation4] ss:$0 sm:$0xff] }
  0x2b   : > { %s1333_s13 = smov (!%p189_p6, %s1129_s13), 3  ;;  %v378_v2 = vsel %vm376_vm1, %v377_v1, 0  ;;  %vm703_vm3 = vcmask 519168  }
  0x2c   : > { %s894_s29 = sshll.u32 %s1333_s13, 7  ;;  %v380_v5 = vand.u32 %v1013_v3, %v378_v2 }
  0x2d   : > { %s1184_s5 = scalar_lea.vmem %s1326_s0, %s894_s29  ;;  %s1229_s8 = scalar_lea.vmem %s1329_s3, %s894_s29 }
  0x2e   : > { %v1014_v4 = vld [vmem:[%s1184_s5] sm:$0xff]   ;;  %v1016_v7 = vld [vmem:[%s1184_s5 + $0x8] sm:$0xff]   ;;  %945 = vmatprep.subr.bf16.mxu0 %v380_v5  ;;  %979 = vmatprep.subr.bf16.mxu1 %v380_v5  ;;  %v1018_v9 = vld [vmem:[%s1184_s5 + $0x10] sm:$0xff]  }
  0x2f   : > { %v1015_v6 = vld [vmem:[%s1184_s5 + $0x40] sm:$0xff]   ;;  %947 = vmatprep.mubr.msk.bf16.mxu0 %vm326_vm2, %v1014_v4  ;;  %v1017_v8 = vld [vmem:[%s1184_s5 + $0x48] sm:$0xff]   ;;  %946 = vmatpush3.bf16.msra.mxu0 %v380_v5  ;;  %v1019_v10 = vld [vmem:[%s1184_s5 + $0x50] sm:$0xff]  }
  0x30   : > { %980 = vmatpush3.bf16.msra.mxu1 %v380_v5  ;;  %963 = vmatprep.mubr.msk.bf16.mxu1 %vm326_vm2, %v1015_v6  ;;  %v1020_v11 = vld [vmem:[%s1184_s5 + $0x18] sm:$0xff]   ;;  %v1022_v13 = vld [vmem:[%s1184_s5 + $0x20] sm:$0xff]   ;;  %v1024_v15 = vld [vmem:[%s1184_s5 + $0x28] sm:$0xff]  }
  0x31   : > { %v1021_v12 = vld [vmem:[%s1184_s5 + $0x58] sm:$0xff]   ;;  %v1023_v14 = vld [vmem:[%s1184_s5 + $0x60] sm:$0xff]   ;;  %v1025_v16 = vld [vmem:[%s1184_s5 + $0x68] sm:$0xff]  }
  0x32   : > { %948 = vmatmul.mubr.msk.bf16.vlgmr.msra.gmra.mxu0 %vm326_vm2, %v1016_v7  ;;  %v1026_v17 = vld [vmem:[%s1184_s5 + $0x30] sm:$0xff]   ;;  %v1028_v19 = vld [vmem:[%s1184_s5 + $0x38] sm:$0xff]  }
  0x33   : > { %964 = vmatmul.mubr.msk.bf16.vlgmr.msra.gmra.mxu1 %vm326_vm2, %v1017_v8  ;;  %951 = vmatprep.mubr.msk.bf16.mxu0 %vm326_vm2, %v1018_v9  ;;  %v1027_v18 = vld [vmem:[%s1184_s5 + $0x70] sm:$0xff]   ;;  %v1029_v20 = vld [vmem:[%s1184_s5 + $0x78] sm:$0xff]  }
  0x34   : > { %967 = vmatprep.mubr.msk.bf16.mxu1 %vm326_vm2, %v1019_v10 }
  0x3a   : > { %952 = vmatmul.mubr.msk.bf16.gmra.mxu0 %vm326_vm2, %v1020_v11 }
  0x3b   : > { %968 = vmatmul.mubr.msk.bf16.gmra.mxu1 %vm326_vm2, %v1021_v12  ;;  %955 = vmatprep.mubr.msk.bf16.mxu0 %vm326_vm2, %v1022_v13 }
  0x3c   : > { %971 = vmatprep.mubr.msk.bf16.mxu1 %vm326_vm2, %v1023_v14 }
  0x42   : > { %956 = vmatmul.mubr.msk.bf16.gmra.mxu0 %vm326_vm2, %v1024_v15 }
  0x43   : > { %972 = vmatmul.mubr.msk.bf16.gmra.mxu1 %vm326_vm2, %v1025_v16  ;;  %959 = vmatprep.mubr.msk.bf16.mxu0 %vm326_vm2, %v1026_v17 }
  0x44   : > { %975 = vmatprep.mubr.msk.bf16.mxu1 %vm326_vm2, %v1027_v18 }
  0x4a   : > { %960 = vmatmul.mubr.msk.bf16.gmra.mxu0 %vm326_vm2, %v1028_v19 }
  0x4b   : > { %976 = vmatmul.mubr.msk.bf16.gmra.mxu1 %vm326_vm2, %v1029_v20 }
  0xf2   : > { %v949_v22 = vpop.f32.mrf.mxu0 }
  0xf3   : > { %v965_v23 = vpop.f32.mrf.mxu1  ;;  %v425_v24 = vadd.f32 %v949_v22, %v1218_v21 }
  0xf4   : > { %v489_v25 = vadd.f32 %v965_v23, %v1218_v21  ;;  %v416_v26 = vpop.f32.mrf.mxu0 }
  0xf5   : > { %v480_v27 = vpop.f32.mrf.mxu1  ;;  %v545_v28 = vmax.f32 %v425_v24, 0.0  ;;  %v417_v30 = vadd.f32 %v1218_v21, %v416_v26 }
  0xf6   : > { %v561_v29 = vmax.f32 %v489_v25, 0.0  ;;  %v481_v31 = vadd.f32 %v1218_v21, %v480_v27  ;;  %v950_v32 = vpop.f32.mrf.mxu0 }
  0xf7   : > { %v966_v33 = vpop.f32.mrf.mxu1  ;;  %v898_v34 = vpack.c.bf16 %v545_v28, %v545_v28  ;;  %v543_v36 = vmax.f32 %v417_v30, 0.0  ;;  %v428_v38 = vadd.f32 %v950_v32, %v1218_v21 }
  0xf8   : > { %v914_v35 = vpack.c.bf16 %v561_v29, %v561_v29  ;;  %v559_v37 = vmax.f32 %v481_v31, 0.0  ;;  %v492_v39 = vadd.f32 %v966_v33, %v1218_v21  ;;  %v419_v40 = vpop.f32.mrf.mxu0 }
  0xf9   : > { %v483_v41 = vpop.f32.mrf.mxu1  ;;  %706 = vst.msk [vmem:[%s1229_s8 + $0x8] sm:$0xf] %vm703_vm3, %v898_v34  ;;  %v896_v42 = vpack.c.bf16 %v543_v36, %v543_v36  ;;  %v420_v44 = vadd.f32 %v1218_v21, %v419_v40  ;;  %v546_v46 = vmax.f32 %v428_v38, 0.0 }
  0xfa   : > { %722 = vst.msk [vmem:[%s1229_s8 + $0x48] sm:$0xf] %vm703_vm3, %v914_v35  ;;  %v912_v43 = vpack.c.bf16 %v559_v37, %v559_v37  ;;  %v484_v45 = vadd.f32 %v1218_v21, %v483_v41  ;;  %v562_v47 = vmax.f32 %v492_v39, 0.0  ;;  %v953_v48 = vpop.f32.mrf.mxu0 }
  0xfb   : > { %v969_v49 = vpop.f32.mrf.mxu1  ;;  %704 = vst.msk [vmem:[%s1229_s8] sm:$0xf] %vm703_vm3, %v896_v42  ;;  %v544_v50 = vmax.f32 %v420_v44, 0.0  ;;  %v441_v52 = vadd.f32 %v953_v48, %v1218_v21  ;;  %v899_v54 = vpack.c.bf16 %v546_v46, %v546_v46 }
  0xfc   : > { %720 = vst.msk [vmem:[%s1229_s8 + $0x40] sm:$0xf] %vm703_vm3, %v912_v43  ;;  %v560_v51 = vmax.f32 %v484_v45, 0.0  ;;  %v505_v53 = vadd.f32 %v969_v49, %v1218_v21  ;;  %v915_v55 = vpack.c.bf16 %v562_v47, %v562_v47  ;;  %v432_v56 = vpop.f32.mrf.mxu0 }
  0xfd   : > { %v496_v57 = vpop.f32.mrf.mxu1  ;;  %v897_v58 = vpack.c.bf16 %v544_v50, %v544_v50  ;;  %v549_v60 = vmax.f32 %v441_v52, 0.0  ;;  %707 = vst.msk [vmem:[%s1229_s8 + $0xc] sm:$0xf] %vm703_vm3, %v899_v54  ;;  %v433_v62 = vadd.f32 %v1218_v21, %v432_v56 }
  0xfe   : > { %v913_v59 = vpack.c.bf16 %v560_v51, %v560_v51  ;;  %v565_v61 = vmax.f32 %v505_v53, 0.0  ;;  %723 = vst.msk [vmem:[%s1229_s8 + $0x4c] sm:$0xf] %vm703_vm3, %v915_v55  ;;  %v497_v63 = vadd.f32 %v1218_v21, %v496_v57  ;;  %v954_v0 = vpop.f32.mrf.mxu0 }
  0xff   : > { %v970_v1 = vpop.f32.mrf.mxu1  ;;  %705 = vst.msk [vmem:[%s1229_s8 + $0x4] sm:$0xf] %vm703_vm3, %v897_v58  ;;  %v902_v2 = vpack.c.bf16 %v549_v60, %v549_v60  ;;  %v444_v4 = vadd.f32 %v954_v0, %v1218_v21  ;;  %v547_v6 = vmax.f32 %v433_v62, 0.0 }
 0x100   : > { %721 = vst.msk [vmem:[%s1229_s8 + $0x44] sm:$0xf] %vm703_vm3, %v913_v59  ;;  %v918_v3 = vpack.c.bf16 %v565_v61, %v565_v61  ;;  %v508_v5 = vadd.f32 %v970_v1, %v1218_v21  ;;  %v563_v7 = vmax.f32 %v497_v63, 0.0  ;;  %v435_v8 = vpop.f32.mrf.mxu0 }
 0x101   : > { %v499_v9 = vpop.f32.mrf.mxu1  ;;  %710 = vst.msk [vmem:[%s1229_s8 + $0x18] sm:$0xf] %vm703_vm3, %v902_v2  ;;  %v550_v10 = vmax.f32 %v444_v4, 0.0  ;;  %v436_v12 = vadd.f32 %v1218_v21, %v435_v8  ;;  %v900_v14 = vpack.c.bf16 %v547_v6, %v547_v6 }
 0x102   : > { %726 = vst.msk [vmem:[%s1229_s8 + $0x58] sm:$0xf] %vm703_vm3, %v918_v3  ;;  %v566_v11 = vmax.f32 %v508_v5, 0.0  ;;  %v500_v13 = vadd.f32 %v1218_v21, %v499_v9  ;;  %v916_v15 = vpack.c.bf16 %v563_v7, %v563_v7  ;;  %v957_v16 = vpop.f32.mrf.mxu0 }
 0x103   : > { %v973_v17 = vpop.f32.mrf.mxu1  ;;  %v903_v18 = vpack.c.bf16 %v550_v10, %v550_v10  ;;  %v548_v20 = vmax.f32 %v436_v12, 0.0  ;;  %708 = vst.msk [vmem:[%s1229_s8 + $0x10] sm:$0xf] %vm703_vm3, %v900_v14  ;;  %v457_v23 = vadd.f32 %v957_v16, %v1218_v21 }
 0x104   : > { %v919_v19 = vpack.c.bf16 %v566_v11, %v566_v11  ;;  %v564_v22 = vmax.f32 %v500_v13, 0.0  ;;  %724 = vst.msk [vmem:[%s1229_s8 + $0x50] sm:$0xf] %vm703_vm3, %v916_v15  ;;  %v521_v24 = vadd.f32 %v973_v17, %v1218_v21  ;;  %v448_v25 = vpop.f32.mrf.mxu0 }
 0x105   : > { %v512_v26 = vpop.f32.mrf.mxu1  ;;  %711 = vst.msk [vmem:[%s1229_s8 + $0x1c] sm:$0xf] %vm703_vm3, %v903_v18  ;;  %v901_v27 = vpack.c.bf16 %v548_v20, %v548_v20  ;;  %v449_v29 = vadd.f32 %v1218_v21, %v448_v25  ;;  %v553_v31 = vmax.f32 %v457_v23, 0.0 }
 0x106   : > { %727 = vst.msk [vmem:[%s1229_s8 + $0x5c] sm:$0xf] %vm703_vm3, %v919_v19  ;;  %v917_v28 = vpack.c.bf16 %v564_v22, %v564_v22  ;;  %v513_v30 = vadd.f32 %v1218_v21, %v512_v26  ;;  %v569_v32 = vmax.f32 %v521_v24, 0.0  ;;  %v958_v33 = vpop.f32.mrf.mxu0 }
 0x107   : > { %v974_v34 = vpop.f32.mrf.mxu1  ;;  %709 = vst.msk [vmem:[%s1229_s8 + $0x14] sm:$0xf] %vm703_vm3, %v901_v27  ;;  %v551_v35 = vmax.f32 %v449_v29, 0.0  ;;  %v460_v37 = vadd.f32 %v958_v33, %v1218_v21  ;;  %v906_v39 = vpack.c.bf16 %v553_v31, %v553_v31 }
 0x108   : > { %725 = vst.msk [vmem:[%s1229_s8 + $0x54] sm:$0xf] %vm703_vm3, %v917_v28  ;;  %v567_v36 = vmax.f32 %v513_v30, 0.0  ;;  %v524_v38 = vadd.f32 %v974_v34, %v1218_v21  ;;  %v922_v40 = vpack.c.bf16 %v569_v32, %v569_v32  ;;  %v451_v41 = vpop.f32.mrf.mxu0 }
 0x109   : > { %v515_v42 = vpop.f32.mrf.mxu1  ;;  %v904_v43 = vpack.c.bf16 %v551_v35, %v551_v35  ;;  %v554_v45 = vmax.f32 %v460_v37, 0.0  ;;  %714 = vst.msk [vmem:[%s1229_s8 + $0x28] sm:$0xf] %vm703_vm3, %v906_v39  ;;  %v452_v47 = vadd.f32 %v1218_v21, %v451_v41 }
 0x10a   : > { %v920_v44 = vpack.c.bf16 %v567_v36, %v567_v36  ;;  %v570_v46 = vmax.f32 %v524_v38, 0.0  ;;  %730 = vst.msk [vmem:[%s1229_s8 + $0x68] sm:$0xf] %vm703_vm3, %v922_v40  ;;  %v516_v48 = vadd.f32 %v1218_v21, %v515_v42  ;;  %v961_v49 = vpop.f32.mrf.mxu0 }
 0x10b   : > { %v977_v50 = vpop.f32.mrf.mxu1  ;;  %712 = vst.msk [vmem:[%s1229_s8 + $0x20] sm:$0xf] %vm703_vm3, %v904_v43  ;;  %v907_v51 = vpack.c.bf16 %v554_v45, %v554_v45  ;;  %v473_v53 = vadd.f32 %v961_v49, %v1218_v21  ;;  %v552_v55 = vmax.f32 %v452_v47, 0.0 }
 0x10c   : > { %728 = vst.msk [vmem:[%s1229_s8 + $0x60] sm:$0xf] %vm703_vm3, %v920_v44  ;;  %v923_v52 = vpack.c.bf16 %v570_v46, %v570_v46  ;;  %v537_v54 = vadd.f32 %v977_v50, %v1218_v21  ;;  %v568_v56 = vmax.f32 %v516_v48, 0.0  ;;  %v464_v57 = vpop.f32.mrf.mxu0 }
 0x10d   : > { %v528_v58 = vpop.f32.mrf.mxu1  ;;  %715 = vst.msk [vmem:[%s1229_s8 + $0x2c] sm:$0xf] %vm703_vm3, %v907_v51  ;;  %v557_v59 = vmax.f32 %v473_v53, 0.0  ;;  %v465_v61 = vadd.f32 %v1218_v21, %v464_v57  ;;  %v905_v63 = vpack.c.bf16 %v552_v55, %v552_v55 }
 0x10e   : > { %731 = vst.msk [vmem:[%s1229_s8 + $0x6c] sm:$0xf] %vm703_vm3, %v923_v52  ;;  %v573_v60 = vmax.f32 %v537_v54, 0.0  ;;  %v529_v62 = vadd.f32 %v1218_v21, %v528_v58  ;;  %v921_v0 = vpack.c.bf16 %v568_v56, %v568_v56  ;;  %v962_v1 = vpop.f32.mrf.mxu0 }
 0x10f   : > { %v978_v2 = vpop.f32.mrf.mxu1  ;;  %v910_v3 = vpack.c.bf16 %v557_v59, %v557_v59  ;;  %v555_v5 = vmax.f32 %v465_v61, 0.0  ;;  %713 = vst.msk [vmem:[%s1229_s8 + $0x24] sm:$0xf] %vm703_vm3, %v905_v63  ;;  %v476_v7 = vadd.f32 %v962_v1, %v1218_v21 }
 0x110   : > { %v926_v4 = vpack.c.bf16 %v573_v60, %v573_v60  ;;  %v571_v6 = vmax.f32 %v529_v62, 0.0  ;;  %729 = vst.msk [vmem:[%s1229_s8 + $0x64] sm:$0xf] %vm703_vm3, %v921_v0  ;;  %v540_v8 = vadd.f32 %v978_v2, %v1218_v21  ;;  %v467_v9 = vpop.f32.mrf.mxu0 }
 0x111   : > { %v531_v10 = vpop.f32.mrf.mxu1  ;;  %718 = vst.msk [vmem:[%s1229_s8 + $0x38] sm:$0xf] %vm703_vm3, %v910_v3  ;;  %v908_v11 = vpack.c.bf16 %v555_v5, %v555_v5  ;;  %v468_v13 = vadd.f32 %v1218_v21, %v467_v9  ;;  %v558_v15 = vmax.f32 %v476_v7, 0.0 }
 0x112   : > { %734 = vst.msk [vmem:[%s1229_s8 + $0x78] sm:$0xf] %vm703_vm3, %v926_v4  ;;  %v924_v12 = vpack.c.bf16 %v571_v6, %v571_v6  ;;  %v532_v14 = vadd.f32 %v1218_v21, %v531_v10  ;;  %v574_v16 = vmax.f32 %v540_v8, 0.0 }
 0x113   : > { %716 = vst.msk [vmem:[%s1229_s8 + $0x30] sm:$0xf] %vm703_vm3, %v908_v11  ;;  %v556_v17 = vmax.f32 %v468_v13, 0.0  ;;  %v911_v19 = vpack.c.bf16 %v558_v15, %v558_v15 }
 0x114   : > { %732 = vst.msk [vmem:[%s1229_s8 + $0x70] sm:$0xf] %vm703_vm3, %v924_v12  ;;  %v572_v18 = vmax.f32 %v532_v14, 0.0  ;;  %v927_v20 = vpack.c.bf16 %v574_v16, %v574_v16 }
 0x115   : > { %v909_v22 = vpack.c.bf16 %v556_v17, %v556_v17  ;;  %719 = vst.msk [vmem:[%s1229_s8 + $0x3c] sm:$0xf] %vm703_vm3, %v911_v19 }
 0x116   : > { %v925_v23 = vpack.c.bf16 %v572_v18, %v572_v18  ;;  %735 = vst.msk [vmem:[%s1229_s8 + $0x7c] sm:$0xf] %vm703_vm3, %v927_v20 }
 0x117   : > { %717 = vst.msk [vmem:[%s1229_s8 + $0x34] sm:$0xf] %vm703_vm3, %v909_v22 }
 0x118   : > { %733 = vst.msk [vmem:[%s1229_s8 + $0x74] sm:$0xf] %vm703_vm3, %v925_v23 }
 0x119 PF: > { %s15_s12 = sadd.s32 1, %s1096_s12  }
 0x11a   : > { %p12_p2 = scmp.ge.s32.totalorder %s15_s12, 6  }
 0x11c   :  { %14 = sbr.rel (!%p12_p2) target bundleno = 2 (0x2), region = 71 }
 0x121   :  { %757 = vsyncpa [#allocation3], 1 }
 0x122   :  { %759 = vsyncpa [#allocation3 + $0x1], 1 }
 0x123   :  { %760 = vsyncpa [#allocation5], 1 }

// kernel: human_guided_loss.10
= control target key start
LH: loop header
LB: loop body
LE: loop exit
PB: predicated region body
PF: predicated region fallthrough
CT: control target
= control target key end

     0   :  { %s2436_s12 = smov 0   ;;  %s3006_s0 = inlined_call_operand.vmem [shape: bf16[4,256,576], index: 0, kind: input, shape index: {}]   ;;  %s3007_s1 = inlined_call_operand.vmem [shape: bf16[576,64], index: 1, kind: input, shape index: {}]   ;;  %s3008_s2 = inlined_call_operand.vmem [shape: f32[1,64], index: 2, kind: input, shape index: {}]   ;;  %s3009_s3 = inlined_call_operand.vmem [shape: bf16[4,256,64], index: 3, kind: output, shape index: {}]  }
   0x1 LB: > { %s1743_s13 = sadd.s32 4294967295, %s2414_s12   ;;  %p1747_p0 = scmp.ge.s32.totalorder %s2414_s12, 1  ;;  %s2414_s12 = sphi %s2436_s12, %s13_s12  }
   0x2   : > { %p137_p1 = scmp.lt.s32.totalorder %s2414_s12, 5 }
   0x4   : > { %p138_p2 = pnand %p1747_p0, %p137_p1 }
   0x6   : > { %141 = sbr.rel (%p138_p2) target bundleno = 406 (0x196), region = 32 }
   0xb   : > { %v2260_v0 = vld [vmem:[%s3007_s1 + $0x78] sm:$0xff]   ;;  %v2262_v2 = vld [vmem:[%s3007_s1 + $0x70] sm:$0xff]   ;;  %p161_p3 = scmp.lt.s32.totalorder %s1743_s13, 3  ;;  %v2264_v4 = vld [vmem:[%s3007_s1 + $0x68] sm:$0xff]   ;;  %vm963_vm0 = vcmask 523264   ;;  %vm1655_vm1 = vcmask 519168  }
   0xc   : > { %v2261_v1 = vld [vmem:[%s3007_s1 + $0x38] sm:$0xff]   ;;  %1951 = vmatprep.subr.bf16.mxu0 %v2260_v0  ;;  %2235 = vmatprep.subr.bf16.mxu1 %v2260_v0  ;;  %v2263_v3 = vld [vmem:[%s3007_s1 + $0x30] sm:$0xff]   ;;  %v2265_v5 = vld [vmem:[%s3007_s1 + $0x28] sm:$0xff]  }
   0xd   : > { %1952 = vmatpush3.bf16.msra.mxu0 %v2261_v1  ;;  %2243 = vmatpush3.bf16.msra.mxu1 %v2261_v1  ;;  %s3051_s13 = smov (!%p161_p3, %s1743_s13), 3  ;;  %v2266_v6 = vld [vmem:[%s3007_s1 + $0x60] sm:$0xff]   ;;  %v2268_v8 = vld [vmem:[%s3007_s1 + $0x58] sm:$0xff]   ;;  %v2270_v10 = vld [vmem:[%s3007_s1 + $0x50] sm:$0xff]  }
   0xe   : > { %1953 = vmatprep.subr.bf16.mxu0 %v2262_v2  ;;  %2236 = vmatprep.subr.bf16.mxu1 %v2262_v2  ;;  %s2251_s28 = smul.u32 640, %s3051_s13  ;;  %v2267_v7 = vld [vmem:[%s3007_s1 + $0x20] sm:$0xff]   ;;  %v2269_v9 = vld [vmem:[%s3007_s1 + $0x18] sm:$0xff]   ;;  %v2271_v13 = vld [vmem:[%s3007_s1 + $0x10] sm:$0xff]   ;;  %s1918_s18 = sshll.u32 %s3051_s13, 7 }
   0xf   : > { %v2272_v14 = vld [vmem:[%s3007_s1 + $0x48] sm:$0xff]   ;;  %v2274_v16 = vld [vmem:[%s3007_s1 + $0x40] sm:$0xff]   ;;  %v2282_v18 = vld [vmem:[%s3007_s1 + $0xf8] sm:$0xff]   ;;  %s2819_s21 = scalar_lea.vmem %s3009_s3, %s1918_s18 }
  0x10   : > { %s2477_s8 = scalar_lea.vmem %s3006_s0, %s2251_s28  ;;  %v2273_v15 = vld [vmem:[%s3007_s1 + $0x8] sm:$0xff]   ;;  %v2275_v17 = vld [vmem:[%s3007_s1] sm:$0xff]   ;;  %v2285_v19 = vld [vmem:[%s3007_s1 + $0x118] sm:$0xff]  }
  0x11   : > { %1954 = vmatpush3.bf16.msra.mxu0 %v2263_v3  ;;  %2244 = vmatpush3.bf16.msra.mxu1 %v2263_v3  ;;  %v2278_v11 = vld [vmem:[%s2477_s8 + $0x4] ss:$20 sps:$4 sm:$0xff]   ;;  %v2276_v20 = vld [vmem:[%s2477_s8] ss:$20 sps:$4 sm:$0xff]   ;;  %v2291_v27 = vld [vmem:[%s2477_s8 + $0x28] ss:$20 sps:$4 sm:$0xff]  }
  0x12   : > { %1955 = vmatprep.subr.bf16.mxu0 %v2264_v4  ;;  %2237 = vmatprep.subr.bf16.mxu1 %v2264_v4  ;;  %v2281_v12 = vld [vmem:[%s2477_s8 + $0x1e4] ss:$20 sps:$4 sm:$0xff]   ;;  %v2279_v21 = vld [vmem:[%s2477_s8 + $0x1e0] ss:$20 sps:$4 sm:$0xff]   ;;  %v2293_v28 = vld [vmem:[%s3007_s1 + $0xe8] sm:$0xff]  }
  0x13   : > { %1044 = vmatprep.mubr.bf16.mxu0 %v2278_v11  ;;  %1140 = vmatprep.mubr.bf16.mxu1 %v2281_v12  ;;  %v2283_v22 = vld [vmem:[%s3007_s1 + $0xb8] sm:$0xff]   ;;  %v2284_v23 = vld [vmem:[%s3007_s1 + $0xf0] sm:$0xff]   ;;  %v2287_v24 = vld [vmem:[%s2477_s8 + $0x2c] ss:$20 sps:$4 sm:$0xff]  }
  0x14   : > { %v2289_v25 = vld [vmem:[%s2477_s8 + $0x20c] ss:$20 sps:$4 sm:$0xff]   ;;  %v2286_v26 = vld [vmem:[%s3007_s1 + $0xb0] sm:$0xff]   ;;  %v2292_v29 = vld [vmem:[%s2477_s8 + $0x208] ss:$20 sps:$4 sm:$0xff]  }
  0x15   : > { %1956 = vmatpush3.bf16.msra.mxu0 %v2265_v5  ;;  %2245 = vmatpush3.bf16.msra.mxu1 %v2265_v5  ;;  %v2294_v30 = vld [vmem:[%s3007_s1 + $0xa8] sm:$0xff]   ;;  %v2295_v31 = vld [vmem:[%s3007_s1 + $0xe0] sm:$0xff]   ;;  %v2316_v35 = vld [vmem:[%s3007_s1 + $0x110] sm:$0xff]  }
  0x16   : > { %1957 = vmatprep.subr.bf16.mxu0 %v2266_v6  ;;  %2238 = vmatprep.subr.bf16.mxu1 %v2266_v6  ;;  %v2297_v32 = vld [vmem:[%s2477_s8 + $0x54] ss:$20 sps:$4 sm:$0xff]   ;;  %v2296_v34 = vld [vmem:[%s3007_s1 + $0xa0] sm:$0xff]   ;;  %v2303_v37 = vld [vmem:[%s3007_s1 + $0xd8] sm:$0xff]  }
  0x17   : > { %v2299_v33 = vld [vmem:[%s2477_s8 + $0x234] ss:$20 sps:$4 sm:$0xff]   ;;  %v2301_v36 = vld [vmem:[%s2477_s8 + $0x50] ss:$20 sps:$4 sm:$0xff]   ;;  %v2304_v39 = vld [vmem:[%s3007_s1 + $0x98] sm:$0xff]  }
  0x18   : > { %v2302_v38 = vld [vmem:[%s2477_s8 + $0x230] ss:$20 sps:$4 sm:$0xff]   ;;  %v2311_v44 = vld [vmem:[%s2477_s8 + $0x78] ss:$20 sps:$4 sm:$0xff]   ;;  %v2320_v53 = vld [vmem:[%s2477_s8 + $0x8] ss:$20 sps:$4 sm:$0xff]  }
  0x19   : > { %1958 = vmatpush3.bf16.msra.mxu0 %v2267_v7  ;;  %2246 = vmatpush3.bf16.msra.mxu1 %v2267_v7  ;;  %v2305_v40 = vld [vmem:[%s3007_s1 + $0xd0] sm:$0xff]   ;;  %v2312_v45 = vld [vmem:[%s2477_s8 + $0x258] ss:$20 sps:$4 sm:$0xff]   ;;  %v2315_v49 = vld [vmem:[%s3007_s1 + $0xc0] sm:$0xff]  }
  0x1a   : > { %1959 = vmatprep.subr.bf16.mxu0 %v2268_v8  ;;  %2239 = vmatprep.subr.bf16.mxu1 %v2268_v8  ;;  %v2307_v41 = vld [vmem:[%s2477_s8 + $0x7c] ss:$20 sps:$4 sm:$0xff]   ;;  %v2313_v46 = vld [vmem:[%s3007_s1 + $0xc8] sm:$0xff]   ;;  %v2318_v50 = vld [vmem:[%s2477_s8 + $0xa4] ss:$20 sps:$4 sm:$0xff]  }
  0x1b   : > { %v2309_v42 = vld [vmem:[%s2477_s8 + $0x25c] ss:$20 sps:$4 sm:$0xff]   ;;  %v2336_v47 = vld [vmem:[%s3007_s1 + $0x108] sm:$0xff]   ;;  %v2317_v52 = vld [vmem:[%s3007_s1 + $0x80] sm:$0xff]  }
  0x1c   : > { %v2306_v43 = vld [vmem:[%s3007_s1 + $0x90] sm:$0xff]   ;;  %v2314_v48 = vld [vmem:[%s3007_s1 + $0x88] sm:$0xff]   ;;  %v2355_v56 = vld [vmem:[%s3007_s1 + $0x100] sm:$0xff]  }
  0x1d   : > { %1960 = vmatpush3.bf16.msra.mxu0 %v2269_v9  ;;  %2247 = vmatpush3.bf16.msra.mxu1 %v2269_v9  ;;  %v2322_v51 = vld [vmem:[%s2477_s8 + $0xc] ss:$20 sps:$4 sm:$0xff]   ;;  %v2326_v57 = vld [vmem:[%s2477_s8 + $0x34] ss:$20 sps:$4 sm:$0xff]   ;;  %v2329_v59 = vld [vmem:[%s2477_s8 + $0x30] ss:$20 sps:$4 sm:$0xff]  }
  0x1e   : > { %1961 = vmatprep.subr.bf16.mxu0 %v2270_v10  ;;  %2240 = vmatprep.subr.bf16.mxu1 %v2270_v10  ;;  %v2323_v54 = vld [vmem:[%s2477_s8 + $0xa0] ss:$20 sps:$4 sm:$0xff]   ;;  %v2328_v58 = vld [vmem:[%s2477_s8 + $0xc8] ss:$20 sps:$4 sm:$0xff]   ;;  %v2334_v62 = vld [vmem:[%s2477_s8 + $0xf0] ss:$20 sps:$4 sm:$0xff]  }
  0x1f   : > { %v2324_v55 = vld [vmem:[%s2477_s8 + $0xcc] ss:$20 sps:$4 sm:$0xff]   ;;  %v2330_v60 = vld [vmem:[%s2477_s8 + $0xf4] ss:$20 sps:$4 sm:$0xff]   ;;  %v2332_v61 = vld [vmem:[%s2477_s8 + $0x5c] ss:$20 sps:$4 sm:$0xff]  }
  0x20   : > { %v2335_v63 = vld [vmem:[%s2477_s8 + $0x58] ss:$20 sps:$4 sm:$0xff]   ;;  %v2337_v0 = vld [vmem:[%s2477_s8 + $0x11c] ss:$20 sps:$4 sm:$0xff]   ;;  %v2342_v3 = vld [vmem:[%s2477_s8 + $0x80] ss:$20 sps:$4 sm:$0xff]  }
  0x21   : > { %1962 = vmatpush3.bf16.msra.mxu0 %v2271_v13  ;;  %2248 = vmatpush3.bf16.msra.mxu1 %v2271_v13  ;;  %v2339_v1 = vld [vmem:[%s2477_s8 + $0x84] ss:$20 sps:$4 sm:$0xff]   ;;  %v2345_v5 = vld [vmem:[%s2477_s8 + $0xac] ss:$20 sps:$4 sm:$0xff]   ;;  %v2348_v7 = vld [vmem:[%s2477_s8 + $0xa8] ss:$20 sps:$4 sm:$0xff]  }
  0x22   : > { %1963 = vmatprep.subr.bf16.mxu0 %v2272_v14  ;;  %2241 = vmatprep.subr.bf16.mxu1 %v2272_v14  ;;  %v2341_v2 = vld [vmem:[%s2477_s8 + $0x118] ss:$20 sps:$4 sm:$0xff]   ;;  %v2347_v6 = vld [vmem:[%s2477_s8 + $0x140] ss:$20 sps:$4 sm:$0xff]   ;;  %v2353_v10 = vld [vmem:[%s2477_s8 + $0x168] ss:$20 sps:$4 sm:$0xff]  }
  0x23   : > { %v2343_v4 = vld [vmem:[%s2477_s8 + $0x144] ss:$20 sps:$4 sm:$0xff]   ;;  %v2349_v8 = vld [vmem:[%s2477_s8 + $0x16c] ss:$20 sps:$4 sm:$0xff]   ;;  %v2351_v9 = vld [vmem:[%s2477_s8 + $0xd4] ss:$20 sps:$4 sm:$0xff]  }
  0x24   : > { %v2354_v11 = vld [vmem:[%s2477_s8 + $0xd0] ss:$20 sps:$4 sm:$0xff]   ;;  %v2356_v12 = vld [vmem:[%s2477_s8 + $0x194] ss:$20 sps:$4 sm:$0xff]  }
  0x25   : > { %1964 = vmatpush3.bf16.msra.mxu0 %v2273_v15  ;;  %2249 = vmatpush3.bf16.msra.mxu1 %v2273_v15  ;;  %v2358_v13 = vld [vmem:[%s2477_s8 + $0xfc] ss:$20 sps:$4 sm:$0xff]   ;;  %v2361_v15 = vld [vmem:[%s2477_s8 + $0xf8] ss:$20 sps:$4 sm:$0xff]  }
  0x26   : > { %1965 = vmatprep.subr.bf16.mxu0 %v2274_v16  ;;  %2242 = vmatprep.subr.bf16.mxu1 %v2274_v16  ;;  %v2360_v14 = vld [vmem:[%s2477_s8 + $0x190] ss:$20 sps:$4 sm:$0xff]  }
  0x27   : > { %v2362_v16 = vld [vmem:[%s2477_s8 + $0x1bc] ss:$20 sps:$4 sm:$0xff]  }
  0x29   : > { %1966 = vmatpush3.bf16.msra.mxu0 %v2275_v17  ;;  %2250 = vmatpush3.bf16.msra.mxu1 %v2275_v17  ;;  %v2364_v17 = vld [vmem:[%s2477_s8 + $0x124] ss:$20 sps:$4 sm:$0xff]  }
  0x2a   : > { %2063 = vmatprep.subr.bf16.mxu1 %v2282_v18  ;;  %2195 = vmatprep.subr.bf16.mxu0 %v2285_v19  ;;  %v2366_v18 = vld [vmem:[%s2477_s8 + $0x1b8] ss:$20 sps:$4 sm:$0xff]  }
  0x2c   : > { %1045 = vmatmul.mubr.bf16.vlgmr.msra.gmra.mxu0 %v2276_v20  ;;  %1141 = vmatmul.mubr.bf16.vlgmr.msra.gmra.mxu1 %v2279_v21  ;;  %v2368_v20 = vld [vmem:[%s2477_s8 + $0x14c] ss:$20 sps:$4 sm:$0xff]   ;;  %v2370_v21 = vld [vmem:[%s2477_s8 + $0x10] ss:$20 sps:$4 sm:$0xff]  }
  0x2d   : > { %2064 = vmatpush3.bf16.msra.mxu1 %v2283_v22  ;;  %2196 = vmatpush3.bf16.msra.mxu0 %v2285_v19  ;;  %v2367_v19 = vld [vmem:[%s2477_s8 + $0x120] ss:$20 sps:$4 sm:$0xff]   ;;  %v2371_v22 = vld [vmem:[%s2477_s8 + $0x148] ss:$20 sps:$4 sm:$0xff]  }
  0x2e   : > { %2065 = vmatprep.subr.bf16.mxu1 %v2284_v23  ;;  %1052 = vmatprep.mubr.bf16.mxu0 %v2287_v24  ;;  %v2372_v23 = vld [vmem:[%s2477_s8 + $0x38] ss:$20 sps:$4 sm:$0xff]   ;;  %v2373_v24 = vld [vmem:[%s2477_s8 + $0x174] ss:$20 sps:$4 sm:$0xff]  }
  0x2f   : > { %1148 = vmatprep.mubr.bf16.mxu1 %v2289_v25  ;;  %2197 = vmatprep.subr.bf16.mxu0 %v2316_v35  ;;  %v2375_v25 = vld [vmem:[%s2477_s8 + $0x60] ss:$20 sps:$4 sm:$0xff]  }
  0x31   : > { %2066 = vmatpush3.bf16.msra.mxu1 %v2286_v26  ;;  %2198 = vmatpush3.bf16.msra.mxu0 %v2316_v35  ;;  %v2376_v26 = vld [vmem:[%s2477_s8 + $0x170] ss:$20 sps:$4 sm:$0xff]   ;;  %v2387_v35 = vld [vmem:[%s2477_s8 + $0x128] ss:$20 sps:$4 sm:$0xff]  }
  0x32   : > { %2067 = vmatprep.subr.bf16.mxu1 %v2293_v28  ;;  %2199 = vmatprep.subr.bf16.mxu0 %v2336_v47  ;;  %v2378_v28 = vld [vmem:[%s2477_s8 + $0x19c] ss:$20 sps:$4 sm:$0xff]  }
  0x34   : > { %1053 = vmatmul.mubr.bf16.gmra.mxu0 %v2291_v27  ;;  %1149 = vmatmul.mubr.bf16.gmra.mxu1 %v2292_v29  ;;  %v2377_v27 = vld [vmem:[%s2477_s8 + $0x88] ss:$20 sps:$4 sm:$0xff]   ;;  %v2380_v29 = vld [vmem:[%s2477_s8 + $0xb0] ss:$20 sps:$4 sm:$0xff]  }
  0x35   : > { %2068 = vmatpush3.bf16.msra.mxu1 %v2294_v30  ;;  %1060 = vmatprep.mubr.bf16.mxu0 %v2297_v32  ;;  %v2381_v30 = vld [vmem:[%s2477_s8 + $0x198] ss:$20 sps:$4 sm:$0xff]  }
  0x36   : > { %2069 = vmatprep.subr.bf16.mxu1 %v2295_v31  ;;  %1156 = vmatprep.mubr.bf16.mxu1 %v2299_v33  ;;  %v2382_v31 = vld [vmem:[%s2477_s8 + $0xd8] ss:$20 sps:$4 sm:$0xff]   ;;  %v2385_v33 = vld [vmem:[%s2477_s8 + $0x100] ss:$20 sps:$4 sm:$0xff]  }
  0x37   : > { %2200 = vmatpush3.bf16.msra.mxu0 %v2336_v47  ;;  %v2383_v32 = vld [vmem:[%s2477_s8 + $0x1c4] ss:$20 sps:$4 sm:$0xff]  }
  0x38   : > { %2201 = vmatprep.subr.bf16.mxu0 %v2355_v56  ;;  %v2402_v47 = vld [vmem:[%s2477_s8 + $0x218] ss:$20 sps:$4 sm:$0xff]  }
  0x39   : > { %2070 = vmatpush3.bf16.msra.mxu1 %v2296_v34  ;;  %v2386_v34 = vld [vmem:[%s2477_s8 + $0x1c0] ss:$20 sps:$4 sm:$0xff]  }
  0x3a   : > { %2071 = vmatprep.subr.bf16.mxu1 %v2303_v37  ;;  %v2390_v37 = vld [vmem:[%s2477_s8 + $0x150] ss:$20 sps:$4 sm:$0xff]  }
  0x3b   : > { %2202 = vmatpush3.bf16.msra.mxu0 %v2355_v56 }
  0x3c   : > { %1061 = vmatmul.mubr.bf16.gmra.mxu0 %v2301_v36  ;;  %1157 = vmatmul.mubr.bf16.gmra.mxu1 %v2302_v38  ;;  %v2388_v36 = vld [vmem:[%s2477_s8 + $0x1ec] ss:$20 sps:$4 sm:$0xff]   ;;  %v2391_v38 = vld [vmem:[%s2477_s8 + $0x1e8] ss:$20 sps:$4 sm:$0xff]  }
  0x3d   : > { %2072 = vmatpush3.bf16.msra.mxu1 %v2304_v39  ;;  %1068 = vmatprep.mubr.bf16.mxu0 %v2307_v41  ;;  %v2392_v39 = vld [vmem:[%s2477_s8 + $0x178] ss:$20 sps:$4 sm:$0xff]   ;;  %v2395_v41 = vld [vmem:[%s2477_s8 + $0x1a0] ss:$20 sps:$4 sm:$0xff]  }
  0x3e   : > { %2073 = vmatprep.subr.bf16.mxu1 %v2305_v40  ;;  %1164 = vmatprep.mubr.bf16.mxu1 %v2309_v42  ;;  %v2393_v40 = vld [vmem:[%s2477_s8 + $0x214] ss:$20 sps:$4 sm:$0xff]   ;;  %v2396_v42 = vld [vmem:[%s2477_s8 + $0x210] ss:$20 sps:$4 sm:$0xff]  }
  0x41   : > { %2074 = vmatpush3.bf16.msra.mxu1 %v2306_v43  ;;  %v2397_v43 = vld [vmem:[%s2477_s8 + $0x1c8] ss:$20 sps:$4 sm:$0xff]  }
  0x42   : > { %2075 = vmatprep.subr.bf16.mxu1 %v2313_v46  ;;  %v2401_v46 = vld [vmem:[%s2477_s8 + $0x238] ss:$20 sps:$4 sm:$0xff]  }
  0x44   : > { %1069 = vmatmul.mubr.bf16.gmra.mxu0 %v2311_v44  ;;  %1165 = vmatmul.mubr.bf16.gmra.mxu1 %v2312_v45  ;;  %v2398_v44 = vld [vmem:[%s2477_s8 + $0x23c] ss:$20 sps:$4 sm:$0xff]  }
  0x45   : > { %2076 = vmatpush3.bf16.msra.mxu1 %v2314_v48  ;;  %1076 = vmatprep.mubr.bf16.mxu0 %v2318_v50  ;;  %v2400_v45 = vld [vmem:[%s2477_s8 + $0x1f0] ss:$20 sps:$4 sm:$0xff]   ;;  %v2406_v50 = vld [vmem:[%s2477_s8 + $0x260] ss:$20 sps:$4 sm:$0xff]  }
  0x46   : > { %2077 = vmatprep.subr.bf16.mxu1 %v2315_v49  ;;  %1205 = vmatprep.mubr.bf16.mxu1 %v2322_v51  ;;  %v2403_v48 = vld [vmem:[%s2477_s8 + $0x264] ss:$20 sps:$4 sm:$0xff]   ;;  %v2405_v49 = vld [vmem:[%s2477_s8 + $0x240] ss:$20 sps:$4 sm:$0xff]   ;;  %v2407_v51 = vld [vmem:[%s2477_s8 + $0x268] ss:$20 sps:$4 sm:$0xff]  }
  0x49   : > { %2078 = vmatpush3.bf16.msra.mxu1 %v2317_v52 }
  0x4c   : > { %1077 = vmatmul.mubr.bf16.gmra.mxu0 %v2323_v54  ;;  %1206 = vmatmul.mubr.bf16.vlgmr.msra.gmra.mxu1 %v2320_v53 }
  0x4d   : > { %1084 = vmatprep.mubr.bf16.mxu0 %v2324_v55  ;;  %1213 = vmatprep.mubr.bf16.mxu1 %v2326_v57 }
  0x54   : > { %1085 = vmatmul.mubr.bf16.gmra.mxu0 %v2328_v58  ;;  %1214 = vmatmul.mubr.bf16.gmra.mxu1 %v2329_v59 }
  0x55   : > { %1092 = vmatprep.mubr.bf16.mxu0 %v2330_v60  ;;  %1221 = vmatprep.mubr.bf16.mxu1 %v2332_v61 }
  0x5c   : > { %1093 = vmatmul.mubr.bf16.gmra.mxu0 %v2334_v62  ;;  %1222 = vmatmul.mubr.bf16.gmra.mxu1 %v2335_v63 }
  0x5d   : > { %1100 = vmatprep.mubr.bf16.mxu0 %v2337_v0  ;;  %1229 = vmatprep.mubr.bf16.mxu1 %v2339_v1 }
  0x64   : > { %1101 = vmatmul.mubr.bf16.gmra.mxu0 %v2341_v2  ;;  %1230 = vmatmul.mubr.bf16.gmra.mxu1 %v2342_v3 }
  0x65   : > { %1108 = vmatprep.mubr.bf16.mxu0 %v2343_v4  ;;  %1237 = vmatprep.mubr.bf16.mxu1 %v2345_v5 }
  0x6c   : > { %1109 = vmatmul.mubr.bf16.gmra.mxu0 %v2347_v6  ;;  %1238 = vmatmul.mubr.bf16.gmra.mxu1 %v2348_v7 }
  0x6d   : > { %1116 = vmatprep.mubr.bf16.mxu0 %v2349_v8  ;;  %1245 = vmatprep.mubr.bf16.mxu1 %v2351_v9 }
  0x74   : > { %1117 = vmatmul.mubr.bf16.gmra.mxu0 %v2353_v10  ;;  %1246 = vmatmul.mubr.bf16.gmra.mxu1 %v2354_v11 }
  0x75   : > { %1124 = vmatprep.mubr.bf16.mxu0 %v2356_v12  ;;  %1253 = vmatprep.mubr.bf16.mxu1 %v2358_v13 }
  0x7c   : > { %1125 = vmatmul.mubr.bf16.gmra.mxu0 %v2360_v14  ;;  %1254 = vmatmul.mubr.bf16.gmra.mxu1 %v2361_v15 }
  0x7d   : > { %1132 = vmatprep.mubr.bf16.mxu0 %v2362_v16  ;;  %1261 = vmatprep.mubr.bf16.mxu1 %v2364_v17 }
  0x84   : > { %1133 = vmatmul.mubr.bf16.gmra.mxu0 %v2366_v18  ;;  %1262 = vmatmul.mubr.bf16.gmra.mxu1 %v2367_v19 }
  0x85   : > { %1269 = vmatprep.mubr.bf16.mxu1 %v2368_v20  ;;  %2203 = vmatprep.mubr.msk.bf16.mxu0 %vm963_vm0, %v2370_v21 }
  0x8c   : > { %1270 = vmatmul.mubr.bf16.gmra.mxu1 %v2371_v22  ;;  %2204 = vmatmul.mubr.msk.bf16.vlgmr.msra.gmra.mxu0 %vm963_vm0, %v2372_v23 }
  0x8d   : > { %1277 = vmatprep.mubr.bf16.mxu1 %v2373_v24  ;;  %2207 = vmatprep.mubr.msk.bf16.mxu0 %vm963_vm0, %v2375_v25 }
  0x94   : > { %1278 = vmatmul.mubr.bf16.gmra.mxu1 %v2376_v26  ;;  %2208 = vmatmul.mubr.msk.bf16.gmra.mxu0 %vm963_vm0, %v2377_v27 }
  0x95   : > { %1285 = vmatprep.mubr.bf16.mxu1 %v2378_v28  ;;  %2211 = vmatprep.mubr.msk.bf16.mxu0 %vm963_vm0, %v2380_v29 }
  0x9c   : > { %1286 = vmatmul.mubr.bf16.gmra.mxu1 %v2381_v30  ;;  %2212 = vmatmul.mubr.msk.bf16.gmra.mxu0 %vm963_vm0, %v2382_v31 }
  0x9d   : > { %1293 = vmatprep.mubr.bf16.mxu1 %v2383_v32  ;;  %2215 = vmatprep.mubr.msk.bf16.mxu0 %vm963_vm0, %v2385_v33 }
  0xa4   : > { %1294 = vmatmul.mubr.bf16.gmra.mxu1 %v2386_v34  ;;  %2216 = vmatmul.mubr.msk.bf16.gmra.mxu0 %vm963_vm0, %v2387_v35 }
  0xa5   : > { %1301 = vmatprep.mubr.bf16.mxu1 %v2388_v36  ;;  %2219 = vmatprep.mubr.msk.bf16.mxu0 %vm963_vm0, %v2390_v37 }
  0xac   : > { %1302 = vmatmul.mubr.bf16.gmra.mxu1 %v2391_v38  ;;  %2220 = vmatmul.mubr.msk.bf16.gmra.mxu0 %vm963_vm0, %v2392_v39 }
  0xad   : > { %1309 = vmatprep.mubr.bf16.mxu1 %v2393_v40  ;;  %2223 = vmatprep.mubr.msk.bf16.mxu0 %vm963_vm0, %v2395_v41 }
  0xb4   : > { %1310 = vmatmul.mubr.bf16.gmra.mxu1 %v2396_v42  ;;  %2224 = vmatmul.mubr.msk.bf16.gmra.mxu0 %vm963_vm0, %v2397_v43 }
  0xb5   : > { %1317 = vmatprep.mubr.bf16.mxu1 %v2398_v44  ;;  %2227 = vmatprep.mubr.msk.bf16.mxu0 %vm963_vm0, %v2400_v45 }
  0xbc   : > { %1318 = vmatmul.mubr.bf16.gmra.mxu1 %v2401_v46  ;;  %2228 = vmatmul.mubr.msk.bf16.gmra.mxu0 %vm963_vm0, %v2402_v47 }
  0xbd   : > { %1325 = vmatprep.mubr.bf16.mxu1 %v2403_v48  ;;  %2231 = vmatprep.mubr.msk.bf16.mxu0 %vm963_vm0, %v2405_v49 }
  0xc4   : > { %1326 = vmatmul.mubr.bf16.gmra.mxu1 %v2406_v50  ;;  %2232 = vmatmul.mubr.msk.bf16.gmra.mxu0 %vm963_vm0, %v2407_v51 }
  0xec   : > { %v1967_v52 = vpop.f32.mrf.mxu0  ;;  %v2039_v53 = vpop.f32.mrf.mxu1 }
  0xee   : > { %v1968_v54 = vpop.f32.mrf.mxu0  ;;  %v2040_v55 = vpop.f32.mrf.mxu1 }
  0xef   : > { %v2656_v56 = vadd.f32 %v1968_v54, %v1967_v52  ;;  %v2658_v57 = vadd.f32 %v2040_v55, %v2039_v53 }
  0xf0   : > { %v1970_v58 = vpop.f32.mrf.mxu0  ;;  %v2042_v59 = vpop.f32.mrf.mxu1 }
  0xf1   : > { %3010 = vst [vmem:[#allocation2_spill] sm:$0xff] %v2658_v57 }
  0xf2   : > { %v1971_v60 = vpop.f32.mrf.mxu0  ;;  %v2043_v61 = vpop.f32.mrf.mxu1 }
  0xf3   : > { %v2660_v62 = vadd.f32 %v1971_v60, %v1970_v58  ;;  %v2662_v63 = vadd.f32 %v2043_v61, %v2042_v59 }
  0xf4   : > { %v1973_v0 = vpop.f32.mrf.mxu0  ;;  %v2045_v1 = vpop.f32.mrf.mxu1 }
  0xf5   : > { %3011 = vst [vmem:[#allocation3_spill] sm:$0xff] %v2662_v63 }
  0xf6   : > { %v1974_v2 = vpop.f32.mrf.mxu0  ;;  %v2046_v3 = vpop.f32.mrf.mxu1 }
  0xf7   : > { %v2664_v4 = vadd.f32 %v1974_v2, %v1973_v0  ;;  %v2666_v5 = vadd.f32 %v2046_v3, %v2045_v1 }
  0xf8   : > { %v1976_v6 = vpop.f32.mrf.mxu0  ;;  %v2048_v7 = vpop.f32.mrf.mxu1 }
  0xf9   : > { %3012 = vst [vmem:[#allocation4_spill] sm:$0xff] %v2666_v5  ;;  %v2787_v5 = vld [vmem:[%s3008_s2] ss:$0 sm:$0xff] }
  0xfa   : > { %v1977_v8 = vpop.f32.mrf.mxu0  ;;  %v2049_v9 = vpop.f32.mrf.mxu1 }
  0xfb   : > { %v2668_v10 = vadd.f32 %v1977_v8, %v1976_v6  ;;  %v2670_v11 = vadd.f32 %v2049_v9, %v2048_v7 }
  0xfc   : > { %v1979_v12 = vpop.f32.mrf.mxu0  ;;  %v2051_v13 = vpop.f32.mrf.mxu1 }
  0xfd   : > { %3013 = vst [vmem:[#allocation5_spill] sm:$0xff] %v2670_v11 }
  0xfe   : > { %v1980_v14 = vpop.f32.mrf.mxu0  ;;  %v2052_v15 = vpop.f32.mrf.mxu1 }
  0xff   : > { %v2672_v16 = vadd.f32 %v1980_v14, %v1979_v12  ;;  %v2674_v17 = vadd.f32 %v2052_v15, %v2051_v13 }
 0x100   : > { %v1982_v18 = vpop.f32.mrf.mxu0  ;;  %v2054_v19 = vpop.f32.mrf.mxu1 }
 0x101   : > { %3014 = vst [vmem:[#allocation6_spill] sm:$0xff] %v2674_v17 }
 0x102   : > { %v1983_v20 = vpop.f32.mrf.mxu0  ;;  %v2055_v21 = vpop.f32.mrf.mxu1 }
 0x103   : > { %v2676_v22 = vadd.f32 %v1983_v20, %v1982_v18  ;;  %v2678_v23 = vadd.f32 %v2055_v21, %v2054_v19 }
 0x104   : > { %v1985_v24 = vpop.f32.mrf.mxu0  ;;  %v2057_v25 = vpop.f32.mrf.mxu1 }
 0x105   : > { %3015 = vst [vmem:[#allocation7_spill] sm:$0xff] %v2678_v23 }
 0x106   : > { %v1986_v26 = vpop.f32.mrf.mxu0  ;;  %v2058_v27 = vpop.f32.mrf.mxu1 }
 0x107   : > { %v2680_v28 = vadd.f32 %v1986_v26, %v1985_v24  ;;  %v2682_v29 = vadd.f32 %v2058_v27, %v2057_v25 }
 0x108   : > { %v1988_v30 = vpop.f32.mrf.mxu0  ;;  %v2060_v31 = vpop.f32.mrf.mxu1 }
 0x109   : > { %3016 = vst [vmem:[#allocation8_spill] sm:$0xff] %v2682_v29 }
 0x10a   : > { %v1989_v32 = vpop.f32.mrf.mxu0  ;;  %v2061_v33 = vpop.f32.mrf.mxu1 }
 0x10b   : > { %v2684_v34 = vadd.f32 %v1989_v32, %v1988_v30  ;;  %v2686_v35 = vadd.f32 %v2061_v33, %v2060_v31 }
 0x10c   : > { %v1991_v36 = vpop.f32.mrf.mxu0  ;;  %v2688_v37 = vpop.f32.mrf.mxu1 }
 0x10d   : > { %3017 = vst [vmem:[#allocation9_spill] sm:$0xff] %v2686_v35 }
 0x10e   : > { %v1992_v38 = vpop.f32.mrf.mxu0  ;;  %v2690_v39 = vpop.f32.mrf.mxu1 }
 0x10f   : > { %v2692_v40 = vadd.f32 %v1992_v38, %v1991_v36 }
 0x110   : > { %v1994_v41 = vpop.f32.mrf.mxu0  ;;  %v2694_v42 = vpop.f32.mrf.mxu1 }
 0x112   : > { %v1995_v43 = vpop.f32.mrf.mxu0  ;;  %v2696_v44 = vpop.f32.mrf.mxu1 }
 0x113   : > { %v2698_v45 = vadd.f32 %v1995_v43, %v1994_v41 }
 0x114   : > { %v1997_v46 = vpop.f32.mrf.mxu0  ;;  %v2085_v47 = vpop.f32.mrf.mxu1 }
 0x116   : > { %v1998_v48 = vpop.f32.mrf.mxu0  ;;  %v2086_v49 = vpop.f32.mrf.mxu1 }
 0x117   : > { %v2700_v50 = vadd.f32 %v1998_v48, %v1997_v46  ;;  %v2087_v57 = vadd.f32 %v2086_v49, %v2085_v47  ;;  %v1047_v47 = vadd.f32 %v2656_v56, %v2787_v5 }
 0x118   : > { %v2000_v51 = vpop.f32.mrf.mxu0  ;;  %v2088_v52 = vpop.f32.mrf.mxu1 }
 0x11a   : > { %v2001_v53 = vpop.f32.mrf.mxu0  ;;  %v2089_v54 = vpop.f32.mrf.mxu1 }
 0x11b   : > { %v2702_v55 = vadd.f32 %v2001_v53, %v2000_v51  ;;  %v2090_v49 = vadd.f32 %v2089_v54, %v2088_v52 }
 0x11c   : > { %v2003_v58 = vpop.f32.mrf.mxu0  ;;  %v2704_v59 = vpop.f32.mrf.mxu1 }
 0x11e   : > { %v2004_v60 = vpop.f32.mrf.mxu0  ;;  %v2706_v61 = vpop.f32.mrf.mxu1 }
 0x11f   : > { %v2708_v0 = vadd.f32 %v2004_v60, %v2003_v58 }
 0x120   : > { %v2006_v1 = vpop.f32.mrf.mxu0  ;;  %v2710_v2 = vpop.f32.mrf.mxu1 }
 0x122   : > { %v2007_v3 = vpop.f32.mrf.mxu0  ;;  %v2712_v6 = vpop.f32.mrf.mxu1 }
 0x123   : > { %v2714_v7 = vadd.f32 %v2007_v3, %v2006_v1 }
 0x124   : > { %v2716_v8 = vpop.f32.mrf.mxu0  ;;  %v2097_v9 = vpop.f32.mrf.mxu1 }
 0x126   : > { %v2718_v12 = vpop.f32.mrf.mxu0  ;;  %v2098_v13 = vpop.f32.mrf.mxu1 }
 0x127   : > { %v2099_v52 = vadd.f32 %v2098_v13, %v2097_v9  ;;  %v2093_v9 = vadd.f32 %v2706_v61, %v2704_v59  ;;  %v1074_v61 = vadd.f32 %v2684_v34, %v2787_v5 }
 0x128   : > { %v2720_v14 = vpop.f32.mrf.mxu0  ;;  %v2722_v15 = vpop.f32.mrf.mxu1 }
 0x12a   : > { %v2724_v18 = vpop.f32.mrf.mxu0  ;;  %v2726_v19 = vpop.f32.mrf.mxu1 }
 0x12c   : > { %v2728_v20 = vpop.f32.mrf.mxu0  ;;  %v2730_v21 = vpop.f32.mrf.mxu1 }
 0x12e   : > { %v2732_v24 = vpop.f32.mrf.mxu0  ;;  %v2734_v25 = vpop.f32.mrf.mxu1 }
 0x130   : > { %v2736_v26 = vpop.f32.mrf.mxu0  ;;  %v2738_v27 = vpop.f32.mrf.mxu1 }
 0x131   : > { %3018 = vst [vmem:[#allocation10_spill] sm:$0xff] %v2736_v26 }
 0x132   : > { %v2740_v30 = vpop.f32.mrf.mxu0  ;;  %v2742_v31 = vpop.f32.mrf.mxu1 }
 0x133   : > { %3019 = vst [vmem:[#allocation11_spill] sm:$0xff] %v2740_v30 }
 0x134   : > { %v2744_v32 = vpop.f32.mrf.mxu0  ;;  %v2746_v33 = vpop.f32.mrf.mxu1 }
 0x136   : > { %v2748_v36 = vpop.f32.mrf.mxu0  ;;  %v2750_v38 = vpop.f32.mrf.mxu1 }
 0x138   : > { %v2752_v41 = vpop.f32.mrf.mxu0  ;;  %v2754_v43 = vpop.f32.mrf.mxu1 }
 0x139   : > { %3020 = vst [vmem:[#allocation12_spill] sm:$0xff] %v2752_v41 }
 0x13a   : > { %v2756_v46 = vpop.f32.mrf.mxu0  ;;  %v2758_v48 = vpop.f32.mrf.mxu1 }
 0x13b   : > { %3021 = vst [vmem:[#allocation13_spill] sm:$0xff] %v2756_v46 }
 0x13c   : > { %v2760_v51 = vpop.f32.mrf.mxu0  ;;  %v2762_v53 = vpop.f32.mrf.mxu1 }
 0x13d   : > { %3022 = vst [vmem:[#allocation14_spill] sm:$0xff] %v2760_v51  ;;  %v2081_v51 = vadd.f32 %v2690_v39, %v2688_v37 }
 0x13e   : > { %v2764_v58 = vpop.f32.mrf.mxu0  ;;  %v2766_v60 = vpop.f32.mrf.mxu1 }
 0x13f   : > { %3023 = vst [vmem:[#allocation15_spill] sm:$0xff] %v2764_v58  ;;  %v1055_v58 = vadd.f32 %v2664_v4, %v2787_v5  ;;  %v1058_v4 = vadd.f32 %v2668_v10, %v2787_v5  ;;  %v1208_v39 = vadd.f32 %v2081_v51, %v1047_v47  ;;  %v2102_v51 = vadd.f32 %v2726_v19, %v2722_v15 }
 0x140   : > { %v2768_v1 = vpop.f32.mrf.mxu0  ;;  %v2770_v3 = vpop.f32.mrf.mxu1 }
 0x141   : > { %3024 = vst [vmem:[#allocation16_spill] sm:$0xff] %v2768_v1  ;;  %v1216_v30 = vadd.f32 %v2087_v57, %v1055_v58  ;;  %v1219_v58 = vadd.f32 %v2090_v49, %v1058_v4  ;;  %v1235_v34 = vadd.f32 %v2102_v51, %v1074_v61  ;;  %v2114_v51 = vadd.f32 %v2758_v48, %v2754_v43 }
 0x142   : > { %v2772_v35 = vpop.f32.mrf.mxu0  ;;  %v2774_v29 = vpop.f32.mrf.mxu1 }
 0x143   : > { %3025 = vst [vmem:[#allocation17_spill] sm:$0xff] %v2772_v35 }
 0x144   : > { %v2776_v23 = vpop.f32.mrf.mxu0  ;;  %v2778_v17 = vpop.f32.mrf.mxu1 }
 0x145   : > { %3026 = vst [vmem:[#allocation18_spill] sm:$0xff] %v2776_v23 }
 0x146   : > { %v2780_v63 = vpop.f32.mrf.mxu0  ;;  %v2782_v11 = vpop.f32.mrf.mxu1 }
 0x147   : > { %3027 = vst [vmem:[#allocation19_spill] sm:$0xff] %v2780_v63 }
 0x148   : > { %v2789_v1 = vpop.f32.mrf.mxu0  ;;  %v2791_v35 = vpop.f32.mrf.mxu1 }
 0x149   : > { %3028 = vst [vmem:[#allocation20_spill] sm:$0xff] %v2789_v1  ;;  %v2084_v1 = vadd.f32 %v2696_v44, %v2694_v42  ;;  %v1071_v42 = vadd.f32 %v2680_v28, %v2787_v5  ;;  %v1063_v28 = vadd.f32 %v2672_v16, %v2787_v5 }
 0x14a   : > { %v2797_v63 = vpop.f32.mrf.mxu0  ;;  %v2799_v23 = vpop.f32.mrf.mxu1 }
 0x14b   : > { %3029 = vst [vmem:[#allocation21_spill] sm:$0xff] %v2797_v63  ;;  %v1050_v63 = vadd.f32 %v2660_v62, %v2787_v5  ;;  %v1232_v59 = vadd.f32 %v2099_v52, %v1071_v42 }
 0x14c   : > { %v2805_v26 = vpop.f32.mrf.mxu1  ;;  %v2205_v46 = vpop.f32.mrf.mxu0 }
 0x14d   : > { %v1377_v37 = vadd.f32 %v2205_v46, %v1216_v30  ;;  %v1211_v44 = vadd.f32 %v2084_v1, %v1050_v63 }
 0x14e   : > { %v2812_v41 = vpop.f32.mrf.mxu1  ;;  %v1368_v56 = vpop.f32.mrf.mxu0 }
 0x14f   : > { %v1497_v57 = vmax.f32 %v1377_v37, 0.0  ;;  %v1369_v54 = vadd.f32 %v1368_v56, %v1208_v39  ;;  %v2096_v37 = vadd.f32 %v2712_v6, %v2710_v2  ;;  %v2111_v2 = vadd.f32 %v2750_v38, %v2746_v33 }
 0x150   : > { %v2821_v10 = vpop.f32.mrf.mxu1  ;;  %v2206_v62 = vpop.f32.mrf.mxu0 }
 0x151   : > { %v1921_v13 = vpack.c.bf16 %v1497_v57, %v1497_v57  ;;  %v1495_v30 = vmax.f32 %v1369_v54, 0.0  ;;  %v1380_v46 = vadd.f32 %v2206_v62, %v1219_v58  ;;  %v1224_v57 = vadd.f32 %v2093_v9, %v1063_v28 }
 0x152   : > { %v2829_v47 = vpop.f32.mrf.mxu1  ;;  %v1371_v49 = vpop.f32.mrf.mxu0  ;;  %v1066_v54 = vadd.f32 %v2676_v22, %v2787_v5  ;;  %v1079_v28 = vadd.f32 %v2692_v40, %v2787_v5  ;;  %v2108_v40 = vadd.f32 %v2742_v31, %v2738_v27 }
 0x153   : > { %1658 = vst.msk [vmem:[%s2819_s21 + $0x8] sm:$0xf] %vm1655_vm1, %v1921_v13  ;;  %v1919_v4 = vpack.c.bf16 %v1495_v30, %v1495_v30  ;;  %v1498_v63 = vmax.f32 %v1380_v46, 0.0  ;;  %v1372_v1 = vadd.f32 %v1371_v49, %v1211_v44  ;;  %v1087_v44 = vadd.f32 %v2700_v50, %v2787_v5 }
 0x154   : > { %v2837_v16 = vpop.f32.mrf.mxu1  ;;  %v2209_v39 = vpop.f32.mrf.mxu0  ;;  %v1227_v22 = vadd.f32 %v2096_v37, %v1066_v54  ;;  %v2105_v30 = vadd.f32 %v2734_v25, %v2730_v21 }
 0x155   : > { %1656 = vst.msk [vmem:[%s2819_s21] sm:$0xf] %vm1655_vm1, %v1919_v4  ;;  %v1922_v15 = vpack.c.bf16 %v1498_v63, %v1498_v63  ;;  %v1496_v19 = vmax.f32 %v1372_v1, 0.0  ;;  %v1393_v56 = vadd.f32 %v2209_v39, %v1232_v59  ;;  %v1248_v25 = vadd.f32 %v2111_v2, %v1087_v44 }
 0x156   : > { %v2843_v52 = vpop.f32.mrf.mxu1  ;;  %v1384_v58 = vpop.f32.mrf.mxu0  ;;  %v1090_v1 = vadd.f32 %v2702_v55, %v2787_v5  ;;  %v2011_v59 = vadd.f32 %v2718_v12, %v2716_v8  ;;  %v2123_v12 = vadd.f32 %v2782_v11, %v2778_v17  ;;  %v2126_v44 = vadd.f32 %v2799_v23, %v2791_v35 }
 0x157   : > { %1659 = vst.msk [vmem:[%s2819_s21 + $0xc] sm:$0xf] %vm1655_vm1, %v1922_v15  ;;  %v1920_v6 = vpack.c.bf16 %v1496_v19, %v1496_v19  ;;  %v1501_v42 = vmax.f32 %v1393_v56, 0.0  ;;  %v1385_v62 = vadd.f32 %v1384_v58, %v1224_v57  ;;  %v1240_v15 = vadd.f32 %v2105_v30, %v1079_v28 }
 0x158   : > { %v2851_v9 = vpop.f32.mrf.mxu1  ;;  %v2210_v13 = vpop.f32.mrf.mxu0  ;;  %v1082_v19 = vadd.f32 %v2698_v45, %v2787_v5  ;;  %v1251_v8 = vadd.f32 %v2114_v51, %v1090_v1  ;;  %v1103_v54 = vadd.f32 %v2011_v59, %v2787_v5  ;;  %v2014_v58 = vadd.f32 %v2724_v18, %v2720_v14  ;;  %v3030_v59 = vld [vmem:[#allocation12_spill] sm:$0xff] }
 0x159   : > { %1657 = vst.msk [vmem:[%s2819_s21 + $0x4] sm:$0xf] %vm1655_vm1, %v1920_v6  ;;  %v1925_v46 = vpack.c.bf16 %v1501_v42, %v1501_v42  ;;  %v1499_v33 = vmax.f32 %v1385_v62, 0.0  ;;  %v1396_v38 = vadd.f32 %v2210_v13, %v1235_v34  ;;  %v2117_v6 = vadd.f32 %v2766_v60, %v2762_v53 }
 0x15a   : > { %v2861_v50 = vpop.f32.mrf.mxu1  ;;  %v1387_v49 = vpop.f32.mrf.mxu0  ;;  %v1243_v2 = vadd.f32 %v2108_v40, %v1082_v19  ;;  %v1095_v62 = vadd.f32 %v2708_v0, %v2787_v5  ;;  %v1264_v60 = vadd.f32 %v2123_v12, %v1103_v54  ;;  %v1106_v30 = vadd.f32 %v2014_v58, %v2787_v5  ;;  %v3033_v19 = vld [vmem:[#allocation11_spill] sm:$0xff]  ;;  %v3034_v58 = vld [vmem:[#allocation18_spill] sm:$0xff] }
 0x15b   : > { %1662 = vst.msk [vmem:[%s2819_s21 + $0x18] sm:$0xf] %vm1655_vm1, %v1925_v46  ;;  %v1923_v4 = vpack.c.bf16 %v1499_v33, %v1499_v33  ;;  %v1502_v63 = vmax.f32 %v1396_v38, 0.0  ;;  %v1388_v21 = vadd.f32 %v1387_v49, %v1227_v22  ;;  %v2023_v46 = vadd.f32 %v2748_v36, %v2744_v32 }
 0x15c   : > { %v2871_v43 = vpop.f32.mrf.mxu1  ;;  %v2213_v48 = vpop.f32.mrf.mxu0  ;;  %v2120_v0 = vadd.f32 %v2774_v29, %v2770_v3  ;;  %v1256_v51 = vadd.f32 %v2117_v6, %v1095_v62  ;;  %v1098_v49 = vadd.f32 %v2714_v7, %v2787_v5  ;;  %v1267_v36 = vadd.f32 %v2126_v44, %v1106_v30  ;;  %v3031_v7 = vld [vmem:[#allocation13_spill] sm:$0xff] }
 0x15d   : > { %1660 = vst.msk [vmem:[%s2819_s21 + $0x10] sm:$0xf] %vm1655_vm1, %v1923_v4  ;;  %v1926_v61 = vpack.c.bf16 %v1502_v63, %v1502_v63  ;;  %v1500_v37 = vmax.f32 %v1388_v21, 0.0  ;;  %v1409_v39 = vadd.f32 %v2213_v48, %v1248_v25  ;;  %v2017_v4 = vadd.f32 %v2732_v24, %v2728_v20 }
 0x15e   : > { %v2877_v55 = vpop.f32.mrf.mxu1  ;;  %v1400_v56 = vpop.f32.mrf.mxu0  ;;  %v2135_v29 = vadd.f32 %v2843_v52, %v2837_v16  ;;  %v1119_v1 = vadd.f32 %v2023_v46, %v2787_v5  ;;  %v2026_v40 = vadd.f32 %v3031_v7, %v3030_v59  ;;  %v1259_v20 = vadd.f32 %v2120_v0, %v1098_v49 }
 0x15f   : > { %1663 = vst.msk [vmem:[%s2819_s21 + $0x1c] sm:$0xf] %vm1655_vm1, %v1926_v61  ;;  %v1924_v27 = vpack.c.bf16 %v1500_v37, %v1500_v37  ;;  %v1505_v31 = vmax.f32 %v1409_v39, 0.0  ;;  %v1401_v57 = vadd.f32 %v1400_v56, %v1240_v15  ;;  %v2129_v24 = vadd.f32 %v2812_v41, %v2805_v26  ;;  %v3032_v15 = vld [vmem:[#allocation10_spill] sm:$0xff] }
 0x160   : > { %v2886_v34 = vpop.f32.mrf.mxu1  ;;  %v2214_v45 = vpop.f32.mrf.mxu0  ;;  %v1111_v39 = vadd.f32 %v2017_v4, %v2787_v5  ;;  %v2020_v56 = vadd.f32 %v3033_v19, %v3032_v15  ;;  %v1122_v54 = vadd.f32 %v2026_v40, %v2787_v5  ;;  %v2132_v6 = vadd.f32 %v2829_v47, %v2821_v10 }
 0x161   : > { %1661 = vst.msk [vmem:[%s2819_s21 + $0x14] sm:$0xf] %vm1655_vm1, %v1924_v27  ;;  %v1929_v11 = vpack.c.bf16 %v1505_v31, %v1505_v31  ;;  %v1503_v17 = vmax.f32 %v1401_v57, 0.0  ;;  %v1412_v42 = vadd.f32 %v2214_v45, %v1251_v8  ;;  %v2138_v8 = vadd.f32 %v2861_v50, %v2851_v9  ;;  %v3035_v45 = vld [vmem:[#allocation19_spill] sm:$0xff] }
 0x162   : > { %v2896_v14 = vpop.f32.mrf.mxu1  ;;  %v1403_v18 = vpop.f32.mrf.mxu0  ;;  %v1280_v57 = vadd.f32 %v2135_v29, %v1119_v1  ;;  %v1272_v62 = vadd.f32 %v2129_v24, %v1111_v39  ;;  %v1114_v44 = vadd.f32 %v2020_v56, %v2787_v5 }
 0x163   : > { %1666 = vst.msk [vmem:[%s2819_s21 + $0x28] sm:$0xf] %vm1655_vm1, %v1929_v11  ;;  %v1927_v13 = vpack.c.bf16 %v1503_v17, %v1503_v17  ;;  %v1506_v22 = vmax.f32 %v1412_v42, 0.0  ;;  %v1404_v53 = vadd.f32 %v1403_v18, %v1243_v2  ;;  %v2035_v2 = vadd.f32 %v3035_v45, %v3034_v58  ;;  %v3036_v18 = vld [vmem:[#allocation14_spill] sm:$0xff] }
 0x164   : > { %v2145_v33 = vpop.f32.mrf.mxu1  ;;  %v2217_v23 = vpop.f32.mrf.mxu0  ;;  %v1283_v30 = vadd.f32 %v2138_v8, %v1122_v54  ;;  %v1275_v4 = vadd.f32 %v2132_v6, %v1114_v44  ;;  %v2144_v24 = vadd.f32 %v2896_v14, %v2886_v34 }
 0x165   : > { %1664 = vst.msk [vmem:[%s2819_s21 + $0x20] sm:$0xf] %vm1655_vm1, %v1927_v13  ;;  %v1930_v35 = vpack.c.bf16 %v1506_v22, %v1506_v22  ;;  %v1504_v38 = vmax.f32 %v1404_v53, 0.0  ;;  %v1425_v28 = vadd.f32 %v2217_v23, %v1264_v60  ;;  %v3037_v13 = vld [vmem:[#allocation15_spill] sm:$0xff]  ;;  %v1135_v23 = vadd.f32 %v2035_v2, %v2787_v5 }
 0x166   : > { %v2146_v63 = vpop.f32.mrf.mxu1  ;;  %v1416_v32 = vpop.f32.mrf.mxu0  ;;  %v2029_v22 = vadd.f32 %v3037_v13, %v3036_v18 }
 0x167   : > { %1667 = vst.msk [vmem:[%s2819_s21 + $0x2c] sm:$0xf] %vm1655_vm1, %v1930_v35  ;;  %v1928_v3 = vpack.c.bf16 %v1504_v38, %v1504_v38  ;;  %v1509_v21 = vmax.f32 %v1425_v28, 0.0  ;;  %v1417_v25 = vadd.f32 %v1416_v32, %v1256_v51  ;;  %v2147_v46 = vadd.f32 %v2146_v63, %v2145_v33  ;;  %v3038_v35 = vld [vmem:[#allocation20_spill] sm:$0xff]  ;;  %v3039_v38 = vld [vmem:[#allocation21_spill] sm:$0xff] }
 0x168   : > { %v2148_v48 = vpop.f32.mrf.mxu1  ;;  %v2218_v61 = vpop.f32.mrf.mxu0  ;;  %v2038_v28 = vadd.f32 %v3039_v38, %v3038_v35  ;;  %v2141_v32 = vadd.f32 %v2877_v55, %v2871_v43  ;;  %v1127_v29 = vadd.f32 %v2029_v22, %v2787_v5  ;;  %v3045_v38 = vld [vmem:[#allocation3_spill] sm:$0xff] }
 0x169   : > { %1665 = vst.msk [vmem:[%s2819_s21 + $0x24] sm:$0xf] %vm1655_vm1, %v1928_v3  ;;  %v1933_v16 = vpack.c.bf16 %v1509_v21, %v1509_v21  ;;  %v1507_v52 = vmax.f32 %v1417_v25, 0.0  ;;  %v1428_v37 = vadd.f32 %v2218_v61, %v1267_v36  ;;  %v3040_v3 = vld [vmem:[#allocation16_spill] sm:$0xff]  ;;  %v3041_v21 = vld [vmem:[#allocation17_spill] sm:$0xff]  ;;  %v1296_v55 = vadd.f32 %v2147_v46, %v1135_v23 }
 0x16a   : > { %v2149_v12 = vpop.f32.mrf.mxu1  ;;  %v1419_v27 = vpop.f32.mrf.mxu0  ;;  %v2032_v25 = vadd.f32 %v3041_v21, %v3040_v3  ;;  %v1288_v15 = vadd.f32 %v2141_v32, %v1127_v29 }
 0x16b   : > { %1670 = vst.msk [vmem:[%s2819_s21 + $0x38] sm:$0xf] %vm1655_vm1, %v1933_v16  ;;  %v1931_v31 = vpack.c.bf16 %v1507_v52, %v1507_v52  ;;  %v1510_v26 = vmax.f32 %v1428_v37, 0.0  ;;  %v1420_v41 = vadd.f32 %v1419_v27, %v1259_v20  ;;  %v2150_v1 = vadd.f32 %v2149_v12, %v2148_v48 }
 0x16c   : > { %v2151_v11 = vpop.f32.mrf.mxu1  ;;  %v2221_v17 = vpop.f32.mrf.mxu0  ;;  %v1138_v20 = vadd.f32 %v2038_v28, %v2787_v5  ;;  %v1130_v19 = vadd.f32 %v2032_v25, %v2787_v5  ;;  %v1146_v28 = vadd.f32 %v3045_v38, %v2787_v5 }
 0x16d   : > { %1668 = vst.msk [vmem:[%s2819_s21 + $0x30] sm:$0xf] %vm1655_vm1, %v1931_v31  ;;  %v1934_v9 = vpack.c.bf16 %v1510_v26, %v1510_v26  ;;  %v1508_v50 = vmax.f32 %v1420_v41, 0.0  ;;  %v1441_v42 = vadd.f32 %v2221_v17, %v1280_v57  ;;  %v3042_v26 = vld [vmem:[#allocation4_spill] sm:$0xff] }
 0x16e   : > { %v2152_v53 = vpop.f32.mrf.mxu1  ;;  %v1432_v60 = vpop.f32.mrf.mxu0  ;;  %v1299_v12 = vadd.f32 %v2150_v1, %v1138_v20  ;;  %v1151_v41 = vadd.f32 %v3042_v26, %v2787_v5  ;;  %v1291_v58 = vadd.f32 %v2144_v24, %v1130_v19  ;;  %v3047_v19 = vld [vmem:[#allocation7_spill] sm:$0xff] }
 0x16f   : > { %1671 = vst.msk [vmem:[%s2819_s21 + $0x3c] sm:$0xf] %vm1655_vm1, %v1934_v9  ;;  %v1932_v10 = vpack.c.bf16 %v1508_v50, %v1508_v50  ;;  %v1513_v47 = vmax.f32 %v1441_v42, 0.0  ;;  %v1433_v0 = vadd.f32 %v1432_v60, %v1272_v62  ;;  %v2153_v45 = vadd.f32 %v2152_v53, %v2151_v11  ;;  %v3043_v9 = vld [vmem:[#allocation2_spill] sm:$0xff]  ;;  %v3044_v11 = vld [vmem:[#allocation5_spill] sm:$0xff] }
 0x170   : > { %v2154_v51 = vpop.f32.mrf.mxu1  ;;  %v2222_v49 = vpop.f32.mrf.mxu0  ;;  %v1143_v50 = vadd.f32 %v3043_v9, %v2787_v5  ;;  %v1154_v53 = vadd.f32 %v3044_v11, %v2787_v5 }
 0x171   : > { %1669 = vst.msk [vmem:[%s2819_s21 + $0x34] sm:$0xf] %vm1655_vm1, %v1932_v10  ;;  %v1937_v33 = vpack.c.bf16 %v1513_v47, %v1513_v47  ;;  %v1511_v63 = vmax.f32 %v1433_v0, 0.0  ;;  %v1444_v36 = vadd.f32 %v2222_v49, %v1283_v30 }
 0x172   : > { %v2155_v59 = vpop.f32.mrf.mxu1  ;;  %v1435_v7 = vpop.f32.mrf.mxu0  ;;  %v1304_v35 = vadd.f32 %v2153_v45, %v1143_v50 }
 0x173   : > { %1674 = vst.msk [vmem:[%s2819_s21 + $0x48] sm:$0xf] %vm1655_vm1, %v1937_v33  ;;  %v1935_v40 = vpack.c.bf16 %v1511_v63, %v1511_v63  ;;  %v1514_v61 = vmax.f32 %v1444_v36, 0.0  ;;  %v1436_v43 = vadd.f32 %v1435_v7, %v1275_v4  ;;  %v2156_v30 = vadd.f32 %v2155_v59, %v2154_v51 }
 0x174   : > { %v2157_v16 = vpop.f32.mrf.mxu1  ;;  %v2225_v52 = vpop.f32.mrf.mxu0 }
 0x175   : > { %1672 = vst.msk [vmem:[%s2819_s21 + $0x40] sm:$0xf] %vm1655_vm1, %v1935_v40  ;;  %v1938_v37 = vpack.c.bf16 %v1514_v61, %v1514_v61  ;;  %v1512_v48 = vmax.f32 %v1436_v43, 0.0  ;;  %v1457_v39 = vadd.f32 %v2225_v52, %v1296_v55  ;;  %v1307_v3 = vadd.f32 %v2156_v30, %v1146_v28  ;;  %v3046_v61 = vld [vmem:[#allocation6_spill] sm:$0xff] }
 0x176   : > { %v2158_v56 = vpop.f32.mrf.mxu1  ;;  %v1448_v8 = vpop.f32.mrf.mxu0  ;;  %v1159_v43 = vadd.f32 %v3046_v61, %v2787_v5 }
 0x177   : > { %1675 = vst.msk [vmem:[%s2819_s21 + $0x4c] sm:$0xf] %vm1655_vm1, %v1938_v37  ;;  %v1936_v27 = vpack.c.bf16 %v1512_v48, %v1512_v48  ;;  %v1517_v31 = vmax.f32 %v1457_v39, 0.0  ;;  %v2159_v34 = vadd.f32 %v2158_v56, %v2157_v16  ;;  %v1449_v14 = vadd.f32 %v1448_v8, %v1288_v15 }
 0x178   : > { %v2160_v57 = vpop.f32.mrf.mxu1  ;;  %v2226_v54 = vpop.f32.mrf.mxu0  ;;  %v1162_v56 = vadd.f32 %v3047_v19, %v2787_v5 }
 0x179   : > { %1673 = vst.msk [vmem:[%s2819_s21 + $0x44] sm:$0xf] %vm1655_vm1, %v1936_v27  ;;  %v1941_v2 = vpack.c.bf16 %v1517_v31, %v1517_v31  ;;  %v1515_v6 = vmax.f32 %v1449_v14, 0.0  ;;  %v1460_v17 = vadd.f32 %v2226_v54, %v1299_v12  ;;  %v1312_v44 = vadd.f32 %v2159_v34, %v1151_v41  ;;  %v3048_v27 = vld [vmem:[#allocation8_spill] sm:$0xff] }
 0x17a   : > { %v2161_v42 = vpop.f32.mrf.mxu1  ;;  %v1451_v62 = vpop.f32.mrf.mxu0  ;;  %v1167_v31 = vadd.f32 %v3048_v27, %v2787_v5 }
 0x17b   : > { %1678 = vst.msk [vmem:[%s2819_s21 + $0x58] sm:$0xf] %vm1655_vm1, %v1941_v2  ;;  %v1939_v18 = vpack.c.bf16 %v1515_v6, %v1515_v6  ;;  %v1518_v13 = vmax.f32 %v1460_v17, 0.0  ;;  %v2162_v22 = vadd.f32 %v2161_v42, %v2160_v57  ;;  %v1452_v60 = vadd.f32 %v1451_v62, %v1291_v58  ;;  %v3049_v2 = vld [vmem:[#allocation9_spill] sm:$0xff] }
 0x17c   : > { %v2163_v46 = vpop.f32.mrf.mxu1  ;;  %v2229_v10 = vpop.f32.mrf.mxu0  ;;  %v1170_v6 = vadd.f32 %v3049_v2, %v2787_v5 }
 0x17d   : > { %1676 = vst.msk [vmem:[%s2819_s21 + $0x50] sm:$0xf] %vm1655_vm1, %v1939_v18  ;;  %v1942_v47 = vpack.c.bf16 %v1518_v13, %v1518_v13  ;;  %v1516_v0 = vmax.f32 %v1452_v60, 0.0  ;;  %v1473_v23 = vadd.f32 %v2229_v10, %v1312_v44  ;;  %v1315_v63 = vadd.f32 %v2162_v22, %v1154_v53 }
 0x17e   : > { %v2164_v49 = vpop.f32.mrf.mxu1  ;;  %v1464_v4 = vpop.f32.mrf.mxu0 }
 0x17f   : > { %1679 = vst.msk [vmem:[%s2819_s21 + $0x5c] sm:$0xf] %vm1655_vm1, %v1942_v47  ;;  %v1940_v32 = vpack.c.bf16 %v1516_v0, %v1516_v0  ;;  %v1521_v33 = vmax.f32 %v1473_v23, 0.0  ;;  %v1465_v51 = vadd.f32 %v1464_v4, %v1304_v35  ;;  %v2165_v25 = vadd.f32 %v2164_v49, %v2163_v46 }
 0x180   : > { %v2166_v36 = vpop.f32.mrf.mxu1  ;;  %v2230_v29 = vpop.f32.mrf.mxu0 }
 0x181   : > { %1677 = vst.msk [vmem:[%s2819_s21 + $0x54] sm:$0xf] %vm1655_vm1, %v1940_v32  ;;  %v1945_v21 = vpack.c.bf16 %v1521_v33, %v1521_v33  ;;  %v1519_v1 = vmax.f32 %v1465_v51, 0.0  ;;  %v1476_v59 = vadd.f32 %v2230_v29, %v1315_v63  ;;  %v1320_v15 = vadd.f32 %v2165_v25, %v1159_v43 }
 0x182   : > { %v2167_v7 = vpop.f32.mrf.mxu1  ;;  %v1467_v40 = vpop.f32.mrf.mxu0 }
 0x183   : > { %1682 = vst.msk [vmem:[%s2819_s21 + $0x68] sm:$0xf] %vm1655_vm1, %v1945_v21  ;;  %v1943_v55 = vpack.c.bf16 %v1519_v1, %v1519_v1  ;;  %v1522_v20 = vmax.f32 %v1476_v59, 0.0  ;;  %v1468_v24 = vadd.f32 %v1467_v40, %v1307_v3  ;;  %v2168_v48 = vadd.f32 %v2167_v7, %v2166_v36 }
 0x184   : > { %v2169_v16 = vpop.f32.mrf.mxu1  ;;  %v2233_v52 = vpop.f32.mrf.mxu0 }
 0x185   : > { %1680 = vst.msk [vmem:[%s2819_s21 + $0x60] sm:$0xf] %vm1655_vm1, %v1943_v55  ;;  %v1946_v37 = vpack.c.bf16 %v1522_v20, %v1522_v20  ;;  %v1520_v39 = vmax.f32 %v1468_v24, 0.0  ;;  %v1323_v45 = vadd.f32 %v2168_v48, %v1162_v56 }
 0x186   : > { %v2170_v8 = vpop.f32.mrf.mxu1  ;;  %v1480_v12 = vpop.f32.mrf.mxu0 }
 0x187   : > { %1683 = vst.msk [vmem:[%s2819_s21 + $0x6c] sm:$0xf] %vm1655_vm1, %v1946_v37  ;;  %v1944_v34 = vpack.c.bf16 %v1520_v39, %v1520_v39  ;;  %v2171_v14 = vadd.f32 %v2170_v8, %v2169_v16  ;;  %v1481_v26 = vadd.f32 %v1480_v12, %v1320_v15 }
 0x188   : > { %v2172_v41 = vpop.f32.mrf.mxu1  ;;  %v2234_v57 = vpop.f32.mrf.mxu0 }
 0x189   : > { %1681 = vst.msk [vmem:[%s2819_s21 + $0x64] sm:$0xf] %vm1655_vm1, %v1944_v34  ;;  %v1328_v54 = vadd.f32 %v2171_v14, %v1167_v31  ;;  %v1523_v58 = vmax.f32 %v1481_v26, 0.0 }
 0x18a   : > { %v2173_v17 = vpop.f32.mrf.mxu1  ;;  %v1483_v9 = vpop.f32.mrf.mxu0 }
 0x18b   : > { %v1489_v50 = vadd.f32 %v2233_v52, %v1328_v54  ;;  %v1947_v42 = vpack.c.bf16 %v1523_v58, %v1523_v58  ;;  %v2174_v62 = vadd.f32 %v2173_v17, %v2172_v41  ;;  %v1484_v44 = vadd.f32 %v1483_v9, %v1323_v45 }
 0x18d   : > { %v1525_v18 = vmax.f32 %v1489_v50, 0.0  ;;  %1684 = vst.msk [vmem:[%s2819_s21 + $0x70] sm:$0xf] %vm1655_vm1, %v1947_v42  ;;  %v1331_v13 = vadd.f32 %v2174_v62, %v1170_v6  ;;  %v1524_v22 = vmax.f32 %v1484_v44, 0.0 }
 0x18f   : > { %v1949_v60 = vpack.c.bf16 %v1525_v18, %v1525_v18  ;;  %v1492_v11 = vadd.f32 %v2234_v57, %v1331_v13  ;;  %v1948_v53 = vpack.c.bf16 %v1524_v22, %v1524_v22 }
 0x191   : > { %1686 = vst.msk [vmem:[%s2819_s21 + $0x78] sm:$0xf] %vm1655_vm1, %v1949_v60  ;;  %v1526_v30 = vmax.f32 %v1492_v11, 0.0  ;;  %1685 = vst.msk [vmem:[%s2819_s21 + $0x74] sm:$0xf] %vm1655_vm1, %v1948_v53 }
 0x193   : > { %v1950_v5 = vpack.c.bf16 %v1526_v30, %v1526_v30 }
 0x195   : > { %1687 = vst.msk [vmem:[%s2819_s21 + $0x7c] sm:$0xf] %vm1655_vm1, %v1950_v5 }
 0x196 PF: > { %s13_s12 = sadd.s32 1, %s2414_s12  }
 0x197   : > { %p10_p4 = scmp.ge.s32.totalorder %s13_s12, 6  }
 0x199   :  { %12 = sbr.rel (!%p10_p4) target bundleno = 1 (0x1), region = 62 }

// kernel: human_guided_loss.11
= control target key start
LH: loop header
LB: loop body
LE: loop exit
PB: predicated region body
PF: predicated region fallthrough
CT: control target
= control target key end

     0   :  { %s1226_s12 = smov 0   ;;  %s1384_s0 = inlined_call_operand.vmem [shape: bf16[4,64,576], index: 0, kind: input, shape index: {}]   ;;  %s1385_s1 = inlined_call_operand.vmem [shape: bf16[576,128], index: 1, kind: input, shape index: {}]   ;;  %s1386_s2 = inlined_call_operand.vmem [shape: f32[1,128], index: 2, kind: input, shape index: {}]   ;;  %s1387_s3 = inlined_call_operand.vmem [shape: bf16[4,64,128], index: 3, kind: output, shape index: {}]  }
   0x1 LB: > { %s902_s13 = sadd.s32 4294967295, %s1204_s12   ;;  %p906_p0 = scmp.ge.s32.totalorder %s1204_s12, 1  ;;  %s1204_s12 = sphi %s1226_s12, %s13_s12  }
   0x2   : > { %p137_p1 = scmp.lt.s32.totalorder %s1204_s12, 5 }
   0x4   : > { %p138_p2 = pnand %p906_p0, %p137_p1 }
   0x5   : > { %p161_p3 = scmp.lt.s32.totalorder (!%p138_p2), %s902_s13, 3 }
   0x6   : > { %141 = sbr.rel (%p138_p2) target bundleno = 284 (0x11c), region = 32 }
   0xb   : > { %v1134_v0 = vld [vmem:[%s1385_s1 + $0x78] sm:$0xff]   ;;  %v1138_v4 = vld [vmem:[%s1385_s1 + $0x70] sm:$0xff]   ;;  %v1142_v8 = vld [vmem:[%s1385_s1 + $0x68] sm:$0xff]   ;;  %s1389_s13 = smov (!%p161_p3, %s902_s13), 3  ;;  %vm591_vm0 = vcmask 523264  }
   0xc   : > { %v1135_v1 = vld [vmem:[%s1385_s1 + $0xf8] sm:$0xff]   ;;  %1013 = vmatprep.subr.bf16.mxu0 %v1134_v0  ;;  %v1139_v5 = vld [vmem:[%s1385_s1 + $0xf0] sm:$0xff]   ;;  %v1143_v9 = vld [vmem:[%s1385_s1 + $0xe8] sm:$0xff]   ;;  %s1125_s16 = smul.u32 160, %s1389_s13  ;;  %s981_s17 = sshll.u32 %s1389_s13, 5 }
   0xd   : > { %v1136_v2 = vld [vmem:[%s1385_s1 + $0x38] sm:$0xff]   ;;  %1053 = vmatprep.subr.bf16.mxu1 %v1135_v1  ;;  %v1140_v6 = vld [vmem:[%s1385_s1 + $0x30] sm:$0xff]   ;;  %v1144_v10 = vld [vmem:[%s1385_s1 + $0x28] sm:$0xff]   ;;  %s170_s20 = scalar_lea.vmem %s1387_s3, %s981_s17 }
   0xe   : > { %v1137_v3 = vld [vmem:[%s1385_s1 + $0xb8] sm:$0xff]   ;;  %1014 = vmatpush3.bf16.msra.mxu0 %v1136_v2  ;;  %v1141_v7 = vld [vmem:[%s1385_s1 + $0xb0] sm:$0xff]   ;;  %v1145_v11 = vld [vmem:[%s1385_s1 + $0xa8] sm:$0xff]   ;;  %s1334_s27 = scalar_lea.vmem %s1384_s0, %s1125_s16 }
   0xf   : > { %1054 = vmatpush3.bf16.msra.mxu1 %v1137_v3  ;;  %1015 = vmatprep.subr.bf16.mxu0 %v1138_v4  ;;  %v1146_v12 = vld [vmem:[%s1385_s1 + $0x60] sm:$0xff]   ;;  %v1150_v16 = vld [vmem:[%s1385_s1 + $0x58] sm:$0xff]   ;;  %v1154_v20 = vld [vmem:[%s1385_s1 + $0x50] sm:$0xff]  }
  0x10   : > { %1055 = vmatprep.subr.bf16.mxu1 %v1139_v5  ;;  %v1147_v13 = vld [vmem:[%s1385_s1 + $0xe0] sm:$0xff]   ;;  %v1151_v17 = vld [vmem:[%s1385_s1 + $0xd8] sm:$0xff]   ;;  %v1155_v21 = vld [vmem:[%s1385_s1 + $0xd0] sm:$0xff]  }
  0x11   : > { %v1148_v14 = vld [vmem:[%s1385_s1 + $0x20] sm:$0xff]   ;;  %v1152_v18 = vld [vmem:[%s1385_s1 + $0x18] sm:$0xff]   ;;  %v1156_v22 = vld [vmem:[%s1385_s1 + $0x10] sm:$0xff]  }
  0x12   : > { %1016 = vmatpush3.bf16.msra.mxu0 %v1140_v6  ;;  %v1149_v15 = vld [vmem:[%s1385_s1 + $0xa0] sm:$0xff]   ;;  %v1153_v19 = vld [vmem:[%s1385_s1 + $0x98] sm:$0xff]   ;;  %v1157_v23 = vld [vmem:[%s1385_s1 + $0x90] sm:$0xff]  }
  0x13   : > { %1056 = vmatpush3.bf16.msra.mxu1 %v1141_v7  ;;  %1017 = vmatprep.subr.bf16.mxu0 %v1142_v8  ;;  %v1158_v24 = vld [vmem:[%s1385_s1 + $0x48] sm:$0xff]   ;;  %v1162_v28 = vld [vmem:[%s1385_s1 + $0x40] sm:$0xff]   ;;  %v1172_v36 = vld [vmem:[%s1385_s1 + $0x118] sm:$0xff]  }
  0x14   : > { %1057 = vmatprep.subr.bf16.mxu1 %v1143_v9  ;;  %v1159_v25 = vld [vmem:[%s1385_s1 + $0xc8] sm:$0xff]   ;;  %v1163_v29 = vld [vmem:[%s1385_s1 + $0xc0] sm:$0xff]   ;;  %v1179_v39 = vld [vmem:[%s1385_s1 + $0x110] sm:$0xff]  }
  0x15   : > { %v1160_v26 = vld [vmem:[%s1385_s1 + $0x8] sm:$0xff]   ;;  %v1164_v30 = vld [vmem:[%s1385_s1] sm:$0xff]   ;;  %v1182_v43 = vld [vmem:[%s1334_s27 + $0x5c] ss:$20 sps:$4 sm:$0xff]  }
  0x16   : > { %1018 = vmatpush3.bf16.msra.mxu0 %v1144_v10  ;;  %v1161_v27 = vld [vmem:[%s1385_s1 + $0x88] sm:$0xff]   ;;  %v1165_v31 = vld [vmem:[%s1385_s1 + $0x80] sm:$0xff]   ;;  %v1187_v48 = vld [vmem:[%s1334_s27 + $0x7c] ss:$20 sps:$4 sm:$0xff]  }
  0x17   : > { %1058 = vmatpush3.bf16.msra.mxu1 %v1145_v11  ;;  %1019 = vmatprep.subr.bf16.mxu0 %v1146_v12  ;;  %v1166_v32 = vld [vmem:[%s1334_s27] ss:$20 sps:$4 sm:$0xff]   ;;  %v1168_v33 = vld [vmem:[%s1334_s27 + $0x4] ss:$20 sps:$4 sm:$0xff]   ;;  %v1169_v34 = vld [vmem:[%s1334_s27 + $0x8] ss:$20 sps:$4 sm:$0xff]  }
  0x18   : > { %1059 = vmatprep.subr.bf16.mxu1 %v1147_v13  ;;  %v1171_v35 = vld [vmem:[%s1334_s27 + $0xc] ss:$20 sps:$4 sm:$0xff]   ;;  %636 = vmatprep.mubr.bf16.mxu0 %v1168_v33  ;;  %v1175_v38 = vld [vmem:[%s1334_s27 + $0x34] ss:$20 sps:$4 sm:$0xff]   ;;  %v1178_v41 = vld [vmem:[%s1334_s27 + $0x30] ss:$20 sps:$4 sm:$0xff]  }
  0x19   : > { %701 = vmatprep.mubr.bf16.mxu1 %v1171_v35  ;;  %v1173_v37 = vld [vmem:[%s1334_s27 + $0x2c] ss:$20 sps:$4 sm:$0xff]   ;;  %v1177_v40 = vld [vmem:[%s1334_s27 + $0x28] ss:$20 sps:$4 sm:$0xff]   ;;  %v1184_v46 = vld [vmem:[%s1334_s27 + $0x50] ss:$20 sps:$4 sm:$0xff]  }
  0x1a   : > { %1020 = vmatpush3.bf16.msra.mxu0 %v1148_v14  ;;  %v1180_v42 = vld [vmem:[%s1334_s27 + $0x54] ss:$20 sps:$4 sm:$0xff]   ;;  %v1193_v45 = vld [vmem:[%s1385_s1 + $0x100] sm:$0xff]   ;;  %v1185_v47 = vld [vmem:[%s1334_s27 + $0x58] ss:$20 sps:$4 sm:$0xff]  }
  0x1b   : > { %1060 = vmatpush3.bf16.msra.mxu1 %v1149_v15  ;;  %1021 = vmatprep.subr.bf16.mxu0 %v1150_v16  ;;  %v1186_v44 = vld [vmem:[%s1385_s1 + $0x108] sm:$0xff]   ;;  %v1189_v49 = vld [vmem:[%s1334_s27 + $0x84] ss:$20 sps:$4 sm:$0xff]   ;;  %v1192_v51 = vld [vmem:[%s1334_s27 + $0x80] ss:$20 sps:$4 sm:$0xff]  }
  0x1c   : > { %1061 = vmatprep.subr.bf16.mxu1 %v1151_v17  ;;  %v1191_v50 = vld [vmem:[%s1334_s27 + $0x78] ss:$20 sps:$4 sm:$0xff]   ;;  %v1194_v52 = vld [vmem:[%s1334_s27 + $0x10] ss:$20 sps:$4 sm:$0xff]   ;;  %v1195_v53 = vld [vmem:[%s1334_s27 + $0x60] ss:$20 sps:$4 sm:$0xff]  }
  0x1d   : > { %v1196_v54 = vld [vmem:[%s1334_s27 + $0x38] ss:$20 sps:$4 sm:$0xff]   ;;  %v1197_v55 = vld [vmem:[%s1334_s27 + $0x88] ss:$20 sps:$4 sm:$0xff]  }
  0x1e   : > { %1022 = vmatpush3.bf16.msra.mxu0 %v1152_v18 }
  0x1f   : > { %1062 = vmatpush3.bf16.msra.mxu1 %v1153_v19  ;;  %1023 = vmatprep.subr.bf16.mxu0 %v1154_v20 }
  0x20   : > { %1063 = vmatprep.subr.bf16.mxu1 %v1155_v21  ;;  %v910_v21 = vld [vmem:[%s1386_s2] ss:$0 sm:$0xff] }
  0x22   : > { %1024 = vmatpush3.bf16.msra.mxu0 %v1156_v22 }
  0x23   : > { %1064 = vmatpush3.bf16.msra.mxu1 %v1157_v23  ;;  %1025 = vmatprep.subr.bf16.mxu0 %v1158_v24 }
  0x24   : > { %1065 = vmatprep.subr.bf16.mxu1 %v1159_v25 }
  0x26   : > { %1026 = vmatpush3.bf16.msra.mxu0 %v1160_v26 }
  0x27   : > { %1066 = vmatpush3.bf16.msra.mxu1 %v1161_v27  ;;  %1027 = vmatprep.subr.bf16.mxu0 %v1162_v28 }
  0x28   : > { %1067 = vmatprep.subr.bf16.mxu1 %v1163_v29 }
  0x2a   : > { %1028 = vmatpush3.bf16.msra.mxu0 %v1164_v30 }
  0x2b   : > { %1068 = vmatpush3.bf16.msra.mxu1 %v1165_v31  ;;  %1101 = vmatprep.subr.bf16.mxu0 %v1172_v36 }
  0x2c   : > { %1117 = vmatprep.subr.bf16.mxu1 %v1172_v36 }
  0x2d   : > { %637 = vmatmul.mubr.bf16.vlgmr.msra.gmra.mxu0 %v1166_v32 }
  0x2e   : > { %702 = vmatmul.mubr.bf16.vlgmr.msra.gmra.mxu1 %v1169_v34  ;;  %1102 = vmatpush3.bf16.msra.mxu0 %v1172_v36 }
  0x2f   : > { %1121 = vmatpush3.bf16.msra.mxu1 %v1172_v36  ;;  %644 = vmatprep.mubr.bf16.mxu0 %v1173_v37 }
  0x30   : > { %709 = vmatprep.mubr.bf16.mxu1 %v1175_v38  ;;  %1103 = vmatprep.subr.bf16.mxu0 %v1179_v39 }
  0x31   : > { %1118 = vmatprep.subr.bf16.mxu1 %v1179_v39 }
  0x32   : > { %1104 = vmatpush3.bf16.msra.mxu0 %v1179_v39 }
  0x33   : > { %1122 = vmatpush3.bf16.msra.mxu1 %v1179_v39  ;;  %1105 = vmatprep.subr.bf16.mxu0 %v1186_v44 }
  0x34   : > { %1119 = vmatprep.subr.bf16.mxu1 %v1186_v44 }
  0x35   : > { %645 = vmatmul.mubr.bf16.gmra.mxu0 %v1177_v40 }
  0x36   : > { %710 = vmatmul.mubr.bf16.gmra.mxu1 %v1178_v41  ;;  %652 = vmatprep.mubr.bf16.mxu0 %v1180_v42 }
  0x37   : > { %717 = vmatprep.mubr.bf16.mxu1 %v1182_v43  ;;  %1106 = vmatpush3.bf16.msra.mxu0 %v1186_v44 }
  0x38   : > { %1123 = vmatpush3.bf16.msra.mxu1 %v1186_v44  ;;  %1107 = vmatprep.subr.bf16.mxu0 %v1193_v45 }
  0x39   : > { %1120 = vmatprep.subr.bf16.mxu1 %v1193_v45 }
  0x3b   : > { %1108 = vmatpush3.bf16.msra.mxu0 %v1193_v45 }
  0x3c   : > { %1124 = vmatpush3.bf16.msra.mxu1 %v1193_v45 }
  0x3d   : > { %653 = vmatmul.mubr.bf16.gmra.mxu0 %v1184_v46 }
  0x3e   : > { %718 = vmatmul.mubr.bf16.gmra.mxu1 %v1185_v47  ;;  %660 = vmatprep.mubr.bf16.mxu0 %v1187_v48 }
  0x3f   : > { %725 = vmatprep.mubr.bf16.mxu1 %v1189_v49 }
  0x45   : > { %661 = vmatmul.mubr.bf16.gmra.mxu0 %v1191_v50 }
  0x46   : > { %726 = vmatmul.mubr.bf16.gmra.mxu1 %v1192_v51  ;;  %1109 = vmatprep.mubr.msk.bf16.mxu0 %vm591_vm0, %v1194_v52 }
  0x47   : > { %1113 = vmatprep.mubr.msk.bf16.mxu1 %vm591_vm0, %v1195_v53 }
  0x4d   : > { %1110 = vmatmul.mubr.msk.bf16.vlgmr.msra.gmra.mxu0 %vm591_vm0, %v1196_v54 }
  0x4e   : > { %1114 = vmatmul.mubr.msk.bf16.vlgmr.msra.gmra.mxu1 %vm591_vm0, %v1197_v55 }
  0xed   : > { %v1029_v56 = vpop.f32.mrf.mxu0 }
  0xee   : > { %v1069_v57 = vpop.f32.mrf.mxu1 }
  0xef   : > { %v1030_v58 = vpop.f32.mrf.mxu0 }
  0xf0   : > { %v1070_v59 = vpop.f32.mrf.mxu1  ;;  %v1031_v19 = vadd.f32 %v1030_v58, %v1029_v56 }
  0xf1   : > { %v1032_v60 = vpop.f32.mrf.mxu0  ;;  %v1071_v39 = vadd.f32 %v1070_v59, %v1069_v57 }
  0xf2   : > { %v1072_v61 = vpop.f32.mrf.mxu1  ;;  %v639_v31 = vadd.f32 %v1031_v19, %v910_v21 }
  0xf3   : > { %v1033_v62 = vpop.f32.mrf.mxu0 }
  0xf4   : > { %v1073_v63 = vpop.f32.mrf.mxu1  ;;  %v1034_v25 = vadd.f32 %v1033_v62, %v1032_v60  ;;  %v704_v51 = vadd.f32 %v1071_v39, %v639_v31 }
  0xf5   : > { %v1035_v0 = vpop.f32.mrf.mxu0  ;;  %v1074_v53 = vadd.f32 %v1073_v63, %v1072_v61 }
  0xf6   : > { %v1075_v1 = vpop.f32.mrf.mxu1  ;;  %v642_v40 = vadd.f32 %v1034_v25, %v910_v21 }
  0xf7   : > { %v1036_v2 = vpop.f32.mrf.mxu0 }
  0xf8   : > { %v1076_v3 = vpop.f32.mrf.mxu1  ;;  %v1037_v17 = vadd.f32 %v1036_v2, %v1035_v0 }
  0xf9   : > { %v1038_v4 = vpop.f32.mrf.mxu0  ;;  %v1077_v35 = vadd.f32 %v1076_v3, %v1075_v1  ;;  %v707_v3 = vadd.f32 %v1074_v53, %v642_v40 }
  0xfa   : > { %v1078_v5 = vpop.f32.mrf.mxu1  ;;  %v647_v28 = vadd.f32 %v1037_v17, %v910_v21 }
  0xfb   : > { %v1039_v6 = vpop.f32.mrf.mxu0 }
  0xfc   : > { %v1079_v7 = vpop.f32.mrf.mxu1  ;;  %v1040_v22 = vadd.f32 %v1039_v6, %v1038_v4  ;;  %v712_v47 = vadd.f32 %v1077_v35, %v647_v28 }
  0xfd   : > { %v1041_v8 = vpop.f32.mrf.mxu0  ;;  %v1080_v44 = vadd.f32 %v1079_v7, %v1078_v5 }
  0xfe   : > { %v1081_v9 = vpop.f32.mrf.mxu1  ;;  %v650_v36 = vadd.f32 %v1040_v22, %v910_v21 }
  0xff   : > { %v1042_v10 = vpop.f32.mrf.mxu0 }
 0x100   : > { %v1082_v11 = vpop.f32.mrf.mxu1  ;;  %v1043_v26 = vadd.f32 %v1042_v10, %v1041_v8  ;;  %v715_v56 = vadd.f32 %v1080_v44, %v650_v36 }
 0x101   : > { %v1044_v12 = vpop.f32.mrf.mxu0  ;;  %v1083_v49 = vadd.f32 %v1082_v11, %v1081_v9 }
 0x102   : > { %v1084_v13 = vpop.f32.mrf.mxu1  ;;  %v655_v41 = vadd.f32 %v1043_v26, %v910_v21 }
 0x103   : > { %v1045_v14 = vpop.f32.mrf.mxu0 }
 0x104   : > { %v1085_v15 = vpop.f32.mrf.mxu1  ;;  %v1046_v32 = vadd.f32 %v1045_v14, %v1044_v12  ;;  %v720_v60 = vadd.f32 %v1083_v49, %v655_v41 }
 0x105   : > { %v1047_v16 = vpop.f32.mrf.mxu0  ;;  %v1086_v57 = vadd.f32 %v1085_v15, %v1084_v13 }
 0x106   : > { %v1087_v18 = vpop.f32.mrf.mxu1  ;;  %v658_v50 = vadd.f32 %v1046_v32, %v910_v21 }
 0x107   : > { %v1048_v20 = vpop.f32.mrf.mxu0 }
 0x108   : > { %v1049_v23 = vadd.f32 %v1048_v20, %v1047_v16  ;;  %v1088_v24 = vpop.f32.mrf.mxu1  ;;  %v723_v7 = vadd.f32 %v1086_v57, %v658_v50 }
 0x109   : > { %v1050_v27 = vpop.f32.mrf.mxu0  ;;  %v1089_v33 = vadd.f32 %v1088_v24, %v1087_v18 }
 0x10a   : > { %v663_v29 = vadd.f32 %v1049_v23, %v910_v21  ;;  %v1090_v30 = vpop.f32.mrf.mxu1 }
 0x10b   : > { %v1051_v34 = vpop.f32.mrf.mxu0 }
 0x10c   : > { %v1052_v37 = vadd.f32 %v1051_v34, %v1050_v27  ;;  %v1091_v38 = vpop.f32.mrf.mxu1  ;;  %v728_v43 = vadd.f32 %v1089_v33, %v663_v29 }
 0x10d   : > { %v1111_v42 = vpop.f32.mrf.mxu0  ;;  %v1092_v46 = vadd.f32 %v1091_v38, %v1090_v30 }
 0x10e   : > { %v666_v45 = vadd.f32 %v1052_v37, %v910_v21  ;;  %v1115_v48 = vpop.f32.mrf.mxu1  ;;  %v777_v54 = vadd.f32 %v1111_v42, %v712_v47 }
 0x10f   : > { %v768_v52 = vpop.f32.mrf.mxu0  ;;  %v793_v59 = vadd.f32 %v1115_v48, %v728_v43 }
 0x110   : > { %v784_v55 = vpop.f32.mrf.mxu1  ;;  %v731_v58 = vadd.f32 %v1092_v46, %v666_v45  ;;  %v769_v0 = vadd.f32 %v768_v52, %v704_v51  ;;  %v801_v8 = vmax.f32 %v777_v54, 0.0 }
 0x111   : > { %v1112_v62 = vpop.f32.mrf.mxu0  ;;  %v785_v4 = vadd.f32 %v784_v55, %v720_v60  ;;  %v805_v10 = vmax.f32 %v793_v59, 0.0 }
 0x112   : > { %v780_v1 = vadd.f32 %v1112_v62, %v715_v56  ;;  %v1116_v2 = vpop.f32.mrf.mxu1  ;;  %v799_v13 = vmax.f32 %v769_v0, 0.0 }
 0x113   : > { %v796_v5 = vadd.f32 %v1116_v2, %v731_v58  ;;  %v771_v6 = vpop.f32.mrf.mxu0  ;;  %v803_v16 = vmax.f32 %v785_v4, 0.0 }
 0x114   : > { %v802_v9 = vmax.f32 %v780_v1, 0.0  ;;  %v772_v61 = vadd.f32 %v771_v6, %v707_v3  ;;  %v787_v63 = vpop.f32.mrf.mxu1 }
 0x115   : > { %v806_v11 = vmax.f32 %v796_v5, 0.0  ;;  %v788_v12 = vadd.f32 %v787_v63, %v723_v7 }
 0x116   : > { %v998_v14 = vpack.c.bf16 %v802_v9, %v801_v8  ;;  %v800_v15 = vmax.f32 %v772_v61, 0.0 }
 0x117   : > { %v1008_v17 = vpack.c.bf16 %v806_v11, %v805_v10  ;;  %v804_v18 = vmax.f32 %v788_v12, 0.0 }
 0x118   : > { %1010 = vst [vmem:[%s170_s20 + $0x8] sm:$0xff] %v998_v14   ;;  %v993_v19 = vpack.c.bf16 %v800_v15, %v799_v13 }
 0x119   : > { %1012 = vst [vmem:[%s170_s20 + $0x18] sm:$0xff] %v1008_v17   ;;  %v1003_v20 = vpack.c.bf16 %v804_v18, %v803_v16 }
 0x11a   : > { %994 = vst [vmem:[%s170_s20] sm:$0xff] %v993_v19  }
 0x11b   : > { %1011 = vst [vmem:[%s170_s20 + $0x10] sm:$0xff] %v1003_v20  }
 0x11c PF: > { %s13_s12 = sadd.s32 1, %s1204_s12  }
 0x11d   : > { %p10_p4 = scmp.ge.s32.totalorder %s13_s12, 6  }
 0x11f   :  { %12 = sbr.rel (!%p10_p4) target bundleno = 1 (0x1), region = 62 }

// kernel: human_guided_loss.12
= control target key start
LH: loop header
LB: loop body
LE: loop exit
PB: predicated region body
PF: predicated region fallthrough
CT: control target
= control target key end

     0   :  { %s1939_s12 = smov 0   ;;  %s2284_s0 = inlined_call_operand.vmem [shape: bf16[4,64,1152], index: 0, kind: input, shape index: {}]   ;;  %s2285_s1 = inlined_call_operand.vmem [shape: bf16[1152,128], index: 1, kind: input, shape index: {}]   ;;  %s2286_s2 = inlined_call_operand.vmem [shape: f32[1,128], index: 2, kind: input, shape index: {}]   ;;  %s2287_s3 = inlined_call_operand.vmem [shape: bf16[4,64,128], index: 3, kind: output, shape index: {}]  }
   0x1 LB: > { %s1407_s13 = sadd.s32 4294967295, %s1917_s12   ;;  %p1411_p0 = scmp.ge.s32.totalorder %s1917_s12, 1  ;;  %s1917_s12 = sphi %s1939_s12, %s13_s12  }
   0x2   : > { %p137_p1 = scmp.lt.s32.totalorder %s1917_s12, 5 }
   0x4   : > { %p138_p2 = pnand %p1411_p0, %p137_p1 }
   0x6   : > { %141 = sbr.rel (%p138_p2) target bundleno = 317 (0x13d), region = 32 }
   0xb   : > { %v1787_v0 = vld [vmem:[%s2285_s1 + $0x78] sm:$0xff]   ;;  %v1791_v4 = vld [vmem:[%s2285_s1 + $0x70] sm:$0xff]   ;;  %v1795_v8 = vld [vmem:[%s2285_s1 + $0x68] sm:$0xff]   ;;  %p161_p3 = scmp.lt.s32.totalorder %s1407_s13, 3 }
   0xc   : > { %v1788_v1 = vld [vmem:[%s2285_s1 + $0xf8] sm:$0xff]   ;;  %1566 = vmatprep.subr.bf16.mxu0 %v1787_v0  ;;  %v1792_v5 = vld [vmem:[%s2285_s1 + $0xf0] sm:$0xff]   ;;  %v1796_v9 = vld [vmem:[%s2285_s1 + $0xe8] sm:$0xff]  }
   0xd   : > { %v1789_v2 = vld [vmem:[%s2285_s1 + $0x38] sm:$0xff]   ;;  %1606 = vmatprep.subr.bf16.mxu1 %v1788_v1  ;;  %v1793_v6 = vld [vmem:[%s2285_s1 + $0x30] sm:$0xff]   ;;  %v1797_v10 = vld [vmem:[%s2285_s1 + $0x28] sm:$0xff]   ;;  %s2299_s13 = smov (!%p161_p3, %s1407_s13), 3 }
   0xe   : > { %v1790_v3 = vld [vmem:[%s2285_s1 + $0xb8] sm:$0xff]   ;;  %1567 = vmatpush3.bf16.msra.mxu0 %v1789_v2  ;;  %v1794_v7 = vld [vmem:[%s2285_s1 + $0xb0] sm:$0xff]   ;;  %v1798_v11 = vld [vmem:[%s2285_s1 + $0xa8] sm:$0xff]   ;;  %s1778_s16 = smul.u32 288, %s2299_s13 }
   0xf   : > { %1607 = vmatpush3.bf16.msra.mxu1 %v1790_v3  ;;  %1568 = vmatprep.subr.bf16.mxu0 %v1791_v4  ;;  %v1799_v12 = vld [vmem:[%s2285_s1 + $0x60] sm:$0xff]   ;;  %v1803_v16 = vld [vmem:[%s2285_s1 + $0x58] sm:$0xff]   ;;  %v1807_v20 = vld [vmem:[%s2285_s1 + $0x50] sm:$0xff]  }
  0x10   : > { %1608 = vmatprep.subr.bf16.mxu1 %v1792_v5  ;;  %v1800_v13 = vld [vmem:[%s2285_s1 + $0xe0] sm:$0xff]   ;;  %v1804_v17 = vld [vmem:[%s2285_s1 + $0xd8] sm:$0xff]   ;;  %v1808_v21 = vld [vmem:[%s2285_s1 + $0xd0] sm:$0xff]   ;;  %s2047_s27 = scalar_lea.vmem %s2284_s0, %s1778_s16  ;;  %s1534_s16 = sshll.u32 %s2299_s13, 5 }
  0x11   : > { %v1801_v14 = vld [vmem:[%s2285_s1 + $0x20] sm:$0xff]   ;;  %v1805_v18 = vld [vmem:[%s2285_s1 + $0x18] sm:$0xff]   ;;  %v1809_v22 = vld [vmem:[%s2285_s1 + $0x10] sm:$0xff]   ;;  %s170_s19 = scalar_lea.vmem %s2287_s3, %s1534_s16 }
  0x12   : > { %1569 = vmatpush3.bf16.msra.mxu0 %v1793_v6  ;;  %v1802_v15 = vld [vmem:[%s2285_s1 + $0xa0] sm:$0xff]   ;;  %v1806_v19 = vld [vmem:[%s2285_s1 + $0x98] sm:$0xff]   ;;  %v1810_v23 = vld [vmem:[%s2285_s1 + $0x90] sm:$0xff]  }
  0x13   : > { %1609 = vmatpush3.bf16.msra.mxu1 %v1794_v7  ;;  %1570 = vmatprep.subr.bf16.mxu0 %v1795_v8  ;;  %v1811_v24 = vld [vmem:[%s2285_s1 + $0x48] sm:$0xff]   ;;  %v1815_v28 = vld [vmem:[%s2285_s1 + $0x40] sm:$0xff]   ;;  %v1825_v36 = vld [vmem:[%s2285_s1 + $0x178] sm:$0xff]  }
  0x14   : > { %1610 = vmatprep.subr.bf16.mxu1 %v1796_v9  ;;  %v1812_v25 = vld [vmem:[%s2285_s1 + $0xc8] sm:$0xff]   ;;  %v1816_v29 = vld [vmem:[%s2285_s1 + $0xc0] sm:$0xff]   ;;  %v1826_v37 = vld [vmem:[%s2285_s1 + $0x1f8] sm:$0xff]  }
  0x15   : > { %v1813_v26 = vld [vmem:[%s2285_s1 + $0x8] sm:$0xff]   ;;  %v1817_v30 = vld [vmem:[%s2285_s1] sm:$0xff]   ;;  %v1827_v38 = vld [vmem:[%s2285_s1 + $0x138] sm:$0xff]  }
  0x16   : > { %1571 = vmatpush3.bf16.msra.mxu0 %v1797_v10  ;;  %v1814_v27 = vld [vmem:[%s2285_s1 + $0x88] sm:$0xff]   ;;  %v1818_v31 = vld [vmem:[%s2285_s1 + $0x80] sm:$0xff]   ;;  %v1828_v39 = vld [vmem:[%s2285_s1 + $0x1b8] sm:$0xff]  }
  0x17   : > { %1611 = vmatpush3.bf16.msra.mxu1 %v1798_v11  ;;  %1572 = vmatprep.subr.bf16.mxu0 %v1799_v12  ;;  %v1819_v32 = vld [vmem:[%s2047_s27] ss:$36 sps:$4 sm:$0xff]   ;;  %v1822_v34 = vld [vmem:[%s2047_s27 + $0x8] ss:$36 sps:$4 sm:$0xff]   ;;  %v1829_v40 = vld [vmem:[%s2285_s1 + $0x170] sm:$0xff]  }
  0x18   : > { %1612 = vmatprep.subr.bf16.mxu1 %v1800_v13  ;;  %v1821_v33 = vld [vmem:[%s2047_s27 + $0x4] ss:$36 sps:$4 sm:$0xff]   ;;  %v1824_v35 = vld [vmem:[%s2047_s27 + $0xc] ss:$36 sps:$4 sm:$0xff]   ;;  %v1835_v45 = vld [vmem:[%s2047_s27 + $0x54] ss:$36 sps:$4 sm:$0xff]  }
  0x19   : > { %1011 = vmatprep.mubr.bf16.mxu0 %v1821_v33  ;;  %1076 = vmatprep.mubr.bf16.mxu1 %v1824_v35  ;;  %v1830_v41 = vld [vmem:[%s2285_s1 + $0x1f0] sm:$0xff]   ;;  %v1837_v46 = vld [vmem:[%s2047_s27 + $0x48] ss:$36 sps:$4 sm:$0xff]   ;;  %v1843_v52 = vld [vmem:[%s2285_s1 + $0x160] sm:$0xff]  }
  0x1a   : > { %1573 = vmatpush3.bf16.msra.mxu0 %v1801_v14  ;;  %v1831_v42 = vld [vmem:[%s2285_s1 + $0x130] sm:$0xff]   ;;  %v1839_v48 = vld [vmem:[%s2285_s1 + $0x168] sm:$0xff]   ;;  %v1844_v53 = vld [vmem:[%s2285_s1 + $0x1e0] sm:$0xff]  }
  0x1b   : > { %1613 = vmatpush3.bf16.msra.mxu1 %v1802_v15  ;;  %1574 = vmatprep.subr.bf16.mxu0 %v1803_v16  ;;  %v1832_v43 = vld [vmem:[%s2285_s1 + $0x1b0] sm:$0xff]   ;;  %v1840_v49 = vld [vmem:[%s2285_s1 + $0x1e8] sm:$0xff]   ;;  %v1845_v54 = vld [vmem:[%s2285_s1 + $0x120] sm:$0xff]  }
  0x1c   : > { %1614 = vmatprep.subr.bf16.mxu1 %v1804_v17  ;;  %v1833_v44 = vld [vmem:[%s2047_s27 + $0x4c] ss:$36 sps:$4 sm:$0xff]   ;;  %v1846_v55 = vld [vmem:[%s2285_s1 + $0x1a0] sm:$0xff]   ;;  %v1847_v56 = vld [vmem:[%s2047_s27 + $0x94] ss:$36 sps:$4 sm:$0xff]  }
  0x1d   : > { %v1838_v47 = vld [vmem:[%s2047_s27 + $0x50] ss:$36 sps:$4 sm:$0xff]   ;;  %v1841_v50 = vld [vmem:[%s2285_s1 + $0x128] sm:$0xff]   ;;  %v1849_v57 = vld [vmem:[%s2047_s27 + $0x9c] ss:$36 sps:$4 sm:$0xff]  }
  0x1e   : > { %1575 = vmatpush3.bf16.msra.mxu0 %v1805_v18  ;;  %v1842_v51 = vld [vmem:[%s2285_s1 + $0x1a8] sm:$0xff]   ;;  %v1851_v58 = vld [vmem:[%s2047_s27 + $0x90] ss:$36 sps:$4 sm:$0xff]   ;;  %v1852_v59 = vld [vmem:[%s2047_s27 + $0x98] ss:$36 sps:$4 sm:$0xff]  }
  0x1f   : > { %1615 = vmatpush3.bf16.msra.mxu1 %v1806_v19  ;;  %1576 = vmatprep.subr.bf16.mxu0 %v1807_v20  ;;  %v1853_v60 = vld [vmem:[%s2285_s1 + $0x158] sm:$0xff]   ;;  %v1857_v0 = vld [vmem:[%s2285_s1 + $0x150] sm:$0xff]   ;;  %v1863_v5 = vld [vmem:[%s2047_s27 + $0xe4] ss:$36 sps:$4 sm:$0xff]  }
  0x20   : > { %1616 = vmatprep.subr.bf16.mxu1 %v1808_v21  ;;  %v1854_v61 = vld [vmem:[%s2285_s1 + $0x1d8] sm:$0xff]   ;;  %v1858_v1 = vld [vmem:[%s2285_s1 + $0x1d0] sm:$0xff]   ;;  %v1866_v7 = vld [vmem:[%s2047_s27 + $0xe0] ss:$36 sps:$4 sm:$0xff]  }
  0x21   : > { %v1855_v62 = vld [vmem:[%s2285_s1 + $0x118] sm:$0xff]   ;;  %v1859_v2 = vld [vmem:[%s2285_s1 + $0x110] sm:$0xff]   ;;  %v1867_v8 = vld [vmem:[%s2285_s1 + $0x148] sm:$0xff]  }
  0x22   : > { %1577 = vmatpush3.bf16.msra.mxu0 %v1809_v22  ;;  %v1856_v63 = vld [vmem:[%s2285_s1 + $0x198] sm:$0xff]   ;;  %v1860_v3 = vld [vmem:[%s2285_s1 + $0x190] sm:$0xff]   ;;  %v1868_v9 = vld [vmem:[%s2285_s1 + $0x1c8] sm:$0xff]  }
  0x23   : > { %1617 = vmatpush3.bf16.msra.mxu1 %v1810_v23  ;;  %1578 = vmatprep.subr.bf16.mxu0 %v1811_v24  ;;  %v1861_v4 = vld [vmem:[%s2047_s27 + $0xdc] ss:$36 sps:$4 sm:$0xff]   ;;  %v1869_v10 = vld [vmem:[%s2285_s1 + $0x108] sm:$0xff]   ;;  %v1875_v16 = vld [vmem:[%s2047_s27 + $0x10] ss:$36 sps:$4 sm:$0xff]  }
  0x24   : > { %1618 = vmatprep.subr.bf16.mxu1 %v1812_v25  ;;  %v1865_v6 = vld [vmem:[%s2047_s27 + $0xd8] ss:$36 sps:$4 sm:$0xff]   ;;  %v1870_v11 = vld [vmem:[%s2285_s1 + $0x188] sm:$0xff]   ;;  %v1871_v12 = vld [vmem:[%s2285_s1 + $0x140] sm:$0xff]  }
  0x25   : > { %v1872_v13 = vld [vmem:[%s2285_s1 + $0x1c0] sm:$0xff]   ;;  %v1877_v17 = vld [vmem:[%s2047_s27 + $0x14] ss:$36 sps:$4 sm:$0xff]   ;;  %v1899_v33 = vld [vmem:[%s2047_s27 + $0xec] ss:$36 sps:$4 sm:$0xff]  }
  0x26   : > { %1579 = vmatpush3.bf16.msra.mxu0 %v1813_v26  ;;  %v1873_v14 = vld [vmem:[%s2285_s1 + $0x100] sm:$0xff]   ;;  %v1878_v18 = vld [vmem:[%s2047_s27 + $0x18] ss:$36 sps:$4 sm:$0xff]   ;;  %v1882_v21 = vld [vmem:[%s2285_s1 + $0x230] sm:$0xff]  }
  0x27   : > { %1619 = vmatpush3.bf16.msra.mxu1 %v1814_v27  ;;  %1580 = vmatprep.subr.bf16.mxu0 %v1815_v28  ;;  %v1874_v15 = vld [vmem:[%s2285_s1 + $0x180] sm:$0xff]   ;;  %v1881_v20 = vld [vmem:[%s2285_s1 + $0x238] sm:$0xff]   ;;  %v1889_v26 = vld [vmem:[%s2285_s1 + $0x228] sm:$0xff]  }
  0x28   : > { %1620 = vmatprep.subr.bf16.mxu1 %v1816_v29  ;;  %v1880_v19 = vld [vmem:[%s2047_s27 + $0x1c] ss:$36 sps:$4 sm:$0xff]   ;;  %v1885_v23 = vld [vmem:[%s2047_s27 + $0x64] ss:$36 sps:$4 sm:$0xff]   ;;  %v1893_v28 = vld [vmem:[%s2047_s27 + $0xac] ss:$36 sps:$4 sm:$0xff]  }
  0x29   : > { %v1883_v22 = vld [vmem:[%s2047_s27 + $0x5c] ss:$36 sps:$4 sm:$0xff]   ;;  %v1891_v27 = vld [vmem:[%s2047_s27 + $0xa4] ss:$36 sps:$4 sm:$0xff]   ;;  %v1898_v35 = vld [vmem:[%s2285_s1 + $0x210] sm:$0xff]  }
  0x2a   : > { %1581 = vmatpush3.bf16.msra.mxu0 %v1817_v30  ;;  %v1887_v24 = vld [vmem:[%s2047_s27 + $0x58] ss:$36 sps:$4 sm:$0xff]   ;;  %v1888_v25 = vld [vmem:[%s2047_s27 + $0x60] ss:$36 sps:$4 sm:$0xff]  }
  0x2b   : > { %1621 = vmatpush3.bf16.msra.mxu1 %v1818_v31  ;;  %1646 = vmatprep.subr.bf16.mxu0 %v1825_v36  ;;  %v1890_v29 = vld [vmem:[%s2285_s1 + $0x220] sm:$0xff]   ;;  %v1896_v31 = vld [vmem:[%s2047_s27 + $0xa8] ss:$36 sps:$4 sm:$0xff]  }
  0x2c   : > { %1686 = vmatprep.subr.bf16.mxu1 %v1826_v37  ;;  %v1895_v30 = vld [vmem:[%s2047_s27 + $0xa0] ss:$36 sps:$4 sm:$0xff]   ;;  %v1903_v36 = vld [vmem:[%s2047_s27 + $0xe8] ss:$36 sps:$4 sm:$0xff]  }
  0x2d   : > { %1012 = vmatmul.mubr.bf16.vlgmr.msra.gmra.mxu0 %v1819_v32  ;;  %v1897_v32 = vld [vmem:[%s2285_s1 + $0x218] sm:$0xff]   ;;  %v1905_v37 = vld [vmem:[%s2285_s1 + $0x208] sm:$0xff]  }
  0x2e   : > { %1077 = vmatmul.mubr.bf16.vlgmr.msra.gmra.mxu1 %v1822_v34  ;;  %1647 = vmatpush3.bf16.msra.mxu0 %v1827_v38  ;;  %v1901_v34 = vld [vmem:[%s2047_s27 + $0xf4] ss:$36 sps:$4 sm:$0xff]  }
  0x2f   : > { %1687 = vmatpush3.bf16.msra.mxu1 %v1828_v39  ;;  %1648 = vmatprep.subr.bf16.mxu0 %v1829_v40  ;;  %v1904_v38 = vld [vmem:[%s2047_s27 + $0xf0] ss:$36 sps:$4 sm:$0xff]   ;;  %v1907_v39 = vld [vmem:[%s2047_s27 + $0x20] ss:$36 sps:$4 sm:$0xff]  }
  0x30   : > { %1688 = vmatprep.subr.bf16.mxu1 %v1830_v41  ;;  %1019 = vmatprep.mubr.bf16.mxu0 %v1833_v44  ;;  %v1908_v40 = vld [vmem:[%s2047_s27 + $0xb0] ss:$36 sps:$4 sm:$0xff]   ;;  %v1906_v41 = vld [vmem:[%s2285_s1 + $0x200] sm:$0xff]  }
  0x31   : > { %1084 = vmatprep.mubr.bf16.mxu1 %v1835_v45 }
  0x32   : > { %1649 = vmatpush3.bf16.msra.mxu0 %v1831_v42  ;;  %v1909_v42 = vld [vmem:[%s2047_s27 + $0x68] ss:$36 sps:$4 sm:$0xff]  }
  0x33   : > { %1689 = vmatpush3.bf16.msra.mxu1 %v1832_v43  ;;  %1650 = vmatprep.subr.bf16.mxu0 %v1839_v48  ;;  %v1910_v43 = vld [vmem:[%s2047_s27 + $0xf8] ss:$36 sps:$4 sm:$0xff]  }
  0x34   : > { %1690 = vmatprep.subr.bf16.mxu1 %v1840_v49 }
  0x35   : > { %1020 = vmatmul.mubr.bf16.gmra.mxu0 %v1837_v46 }
  0x36   : > { %1085 = vmatmul.mubr.bf16.gmra.mxu1 %v1838_v47  ;;  %1651 = vmatpush3.bf16.msra.mxu0 %v1841_v50 }
  0x37   : > { %1691 = vmatpush3.bf16.msra.mxu1 %v1842_v51  ;;  %1652 = vmatprep.subr.bf16.mxu0 %v1843_v52 }
  0x38   : > { %1692 = vmatprep.subr.bf16.mxu1 %v1844_v53  ;;  %1027 = vmatprep.mubr.bf16.mxu0 %v1847_v56 }
  0x39   : > { %1092 = vmatprep.mubr.bf16.mxu1 %v1849_v57 }
  0x3a   : > { %1653 = vmatpush3.bf16.msra.mxu0 %v1845_v54 }
  0x3b   : > { %1693 = vmatpush3.bf16.msra.mxu1 %v1846_v55  ;;  %1654 = vmatprep.subr.bf16.mxu0 %v1853_v60 }
  0x3c   : > { %1694 = vmatprep.subr.bf16.mxu1 %v1854_v61 }
  0x3d   : > { %1028 = vmatmul.mubr.bf16.gmra.mxu0 %v1851_v58 }
  0x3e   : > { %1093 = vmatmul.mubr.bf16.gmra.mxu1 %v1852_v59  ;;  %1655 = vmatpush3.bf16.msra.mxu0 %v1855_v62 }
  0x3f   : > { %1695 = vmatpush3.bf16.msra.mxu1 %v1856_v63  ;;  %1656 = vmatprep.subr.bf16.mxu0 %v1857_v0 }
  0x40   : > { %1696 = vmatprep.subr.bf16.mxu1 %v1858_v1  ;;  %1035 = vmatprep.mubr.bf16.mxu0 %v1861_v4 }
  0x41   : > { %1100 = vmatprep.mubr.bf16.mxu1 %v1863_v5 }
  0x42   : > { %1657 = vmatpush3.bf16.msra.mxu0 %v1859_v2 }
  0x43   : > { %1697 = vmatpush3.bf16.msra.mxu1 %v1860_v3  ;;  %1658 = vmatprep.subr.bf16.mxu0 %v1867_v8 }
  0x44   : > { %1698 = vmatprep.subr.bf16.mxu1 %v1868_v9 }
  0x45   : > { %1036 = vmatmul.mubr.bf16.gmra.mxu0 %v1865_v6 }
  0x46   : > { %1101 = vmatmul.mubr.bf16.gmra.mxu1 %v1866_v7  ;;  %1659 = vmatpush3.bf16.msra.mxu0 %v1869_v10 }
  0x47   : > { %1699 = vmatpush3.bf16.msra.mxu1 %v1870_v11  ;;  %1660 = vmatprep.subr.bf16.mxu0 %v1871_v12 }
  0x48   : > { %1700 = vmatprep.subr.bf16.mxu1 %v1872_v13  ;;  %1141 = vmatprep.mubr.bf16.mxu0 %v1877_v17 }
  0x49   : > { %1206 = vmatprep.mubr.bf16.mxu1 %v1880_v19 }
  0x4a   : > { %1661 = vmatpush3.bf16.msra.mxu0 %v1873_v14 }
  0x4b   : > { %1701 = vmatpush3.bf16.msra.mxu1 %v1874_v15  ;;  %1738 = vmatprep.subr.bf16.mxu0 %v1881_v20 }
  0x4c   : > { %1762 = vmatprep.subr.bf16.mxu1 %v1881_v20 }
  0x4d   : > { %1142 = vmatmul.mubr.bf16.vlgmr.msra.gmra.mxu0 %v1875_v16 }
  0x4e   : > { %1207 = vmatmul.mubr.bf16.vlgmr.msra.gmra.mxu1 %v1878_v18  ;;  %1739 = vmatpush3.bf16.msra.mxu0 %v1881_v20 }
  0x4f   : > { %1770 = vmatpush3.bf16.msra.mxu1 %v1881_v20  ;;  %1740 = vmatprep.subr.bf16.mxu0 %v1882_v21 }
  0x50   : > { %1763 = vmatprep.subr.bf16.mxu1 %v1882_v21  ;;  %1149 = vmatprep.mubr.bf16.mxu0 %v1883_v22 }
  0x51   : > { %1214 = vmatprep.mubr.bf16.mxu1 %v1885_v23 }
  0x52   : > { %1741 = vmatpush3.bf16.msra.mxu0 %v1882_v21 }
  0x53   : > { %1771 = vmatpush3.bf16.msra.mxu1 %v1882_v21  ;;  %1742 = vmatprep.subr.bf16.mxu0 %v1889_v26 }
  0x54   : > { %1764 = vmatprep.subr.bf16.mxu1 %v1889_v26 }
  0x55   : > { %1150 = vmatmul.mubr.bf16.gmra.mxu0 %v1887_v24 }
  0x56   : > { %1215 = vmatmul.mubr.bf16.gmra.mxu1 %v1888_v25  ;;  %1157 = vmatprep.mubr.bf16.mxu0 %v1891_v27 }
  0x57   : > { %1743 = vmatpush3.bf16.msra.mxu0 %v1889_v26  ;;  %1222 = vmatprep.mubr.bf16.mxu1 %v1893_v28 }
  0x58   : > { %1772 = vmatpush3.bf16.msra.mxu1 %v1889_v26  ;;  %1744 = vmatprep.subr.bf16.mxu0 %v1890_v29 }
  0x59   : > { %1765 = vmatprep.subr.bf16.mxu1 %v1890_v29 }
  0x5b   : > { %1745 = vmatpush3.bf16.msra.mxu0 %v1890_v29 }
  0x5c   : > { %1773 = vmatpush3.bf16.msra.mxu1 %v1890_v29  ;;  %1746 = vmatprep.subr.bf16.mxu0 %v1897_v32 }
  0x5d   : > { %1158 = vmatmul.mubr.bf16.gmra.mxu0 %v1895_v30  ;;  %1766 = vmatprep.subr.bf16.mxu1 %v1897_v32  ;;  %v1415_v30 = vld [vmem:[%s2286_s2] ss:$0 sm:$0xff] }
  0x5e   : > { %1223 = vmatmul.mubr.bf16.gmra.mxu1 %v1896_v31  ;;  %1165 = vmatprep.mubr.bf16.mxu0 %v1899_v33 }
  0x5f   : > { %1747 = vmatpush3.bf16.msra.mxu0 %v1897_v32  ;;  %1230 = vmatprep.mubr.bf16.mxu1 %v1901_v34 }
  0x60   : > { %1774 = vmatpush3.bf16.msra.mxu1 %v1897_v32  ;;  %1748 = vmatprep.subr.bf16.mxu0 %v1898_v35 }
  0x61   : > { %1767 = vmatprep.subr.bf16.mxu1 %v1898_v35 }
  0x63   : > { %1749 = vmatpush3.bf16.msra.mxu0 %v1898_v35 }
  0x64   : > { %1775 = vmatpush3.bf16.msra.mxu1 %v1898_v35  ;;  %1750 = vmatprep.subr.bf16.mxu0 %v1905_v37 }
  0x65   : > { %1166 = vmatmul.mubr.bf16.gmra.mxu0 %v1903_v36  ;;  %1768 = vmatprep.subr.bf16.mxu1 %v1905_v37 }
  0x66   : > { %1231 = vmatmul.mubr.bf16.gmra.mxu1 %v1904_v38  ;;  %1754 = vmatprep.mubr.bf16.mxu0 %v1907_v39 }
  0x67   : > { %1751 = vmatpush3.bf16.msra.mxu0 %v1905_v37  ;;  %1758 = vmatprep.mubr.bf16.mxu1 %v1908_v40 }
  0x68   : > { %1776 = vmatpush3.bf16.msra.mxu1 %v1905_v37  ;;  %1752 = vmatprep.subr.bf16.mxu0 %v1906_v41 }
  0x69   : > { %1769 = vmatprep.subr.bf16.mxu1 %v1906_v41 }
  0x6b   : > { %1753 = vmatpush3.bf16.msra.mxu0 %v1906_v41 }
  0x6c   : > { %1777 = vmatpush3.bf16.msra.mxu1 %v1906_v41 }
  0x6e   : > { %1755 = vmatmul.mubr.bf16.vlgmr.msra.gmra.mxu0 %v1909_v42 }
  0x6f   : > { %1759 = vmatmul.mubr.bf16.vlgmr.msra.gmra.mxu1 %v1910_v43 }
  0xed   : > { %v1582_v44 = vpop.f32.mrf.mxu0 }
  0xee   : > { %v1622_v45 = vpop.f32.mrf.mxu1 }
  0xef   : > { %v1583_v46 = vpop.f32.mrf.mxu0 }
  0xf0   : > { %v1623_v47 = vpop.f32.mrf.mxu1  ;;  %v1584_v29 = vadd.f32 %v1583_v46, %v1582_v44 }
  0xf1   : > { %v1585_v48 = vpop.f32.mrf.mxu0  ;;  %v1624_v42 = vadd.f32 %v1623_v47, %v1622_v45 }
  0xf2   : > { %v2211_v49 = vpop.f32.mrf.mxu1  ;;  %v1014_v38 = vadd.f32 %v1584_v29, %v1415_v30 }
  0xf3   : > { %v1586_v50 = vpop.f32.mrf.mxu0 }
  0xf4   : > { %v2213_v51 = vpop.f32.mrf.mxu1  ;;  %v1587_v33 = vadd.f32 %v1586_v50, %v1585_v48 }
  0xf5   : > { %v1588_v52 = vpop.f32.mrf.mxu0  ;;  %v1627_v50 = vadd.f32 %v2213_v51, %v2211_v49 }
  0xf6   : > { %v2215_v53 = vpop.f32.mrf.mxu1  ;;  %v1017_v44 = vadd.f32 %v1587_v33, %v1415_v30 }
  0xf7   : > { %v1589_v54 = vpop.f32.mrf.mxu0 }
  0xf8   : > { %v1629_v55 = vpop.f32.mrf.mxu1  ;;  %v1590_v34 = vadd.f32 %v1589_v54, %v1588_v52 }
  0xf9   : > { %v1591_v56 = vpop.f32.mrf.mxu0  ;;  %v1630_v52 = vadd.f32 %v1629_v55, %v2215_v53 }
  0xfa   : > { %v2217_v57 = vpop.f32.mrf.mxu1  ;;  %v1022_v46 = vadd.f32 %v1590_v34, %v1415_v30 }
  0xfb   : > { %v1592_v58 = vpop.f32.mrf.mxu0 }
  0xfc   : > { %v2219_v59 = vpop.f32.mrf.mxu1  ;;  %v1593_v39 = vadd.f32 %v1592_v58, %v1591_v56 }
  0xfd   : > { %v1594_v60 = vpop.f32.mrf.mxu0  ;;  %v1633_v45 = vadd.f32 %v2219_v59, %v2217_v57 }
  0xfe   : > { %v2221_v61 = vpop.f32.mrf.mxu1  ;;  %v1025_v48 = vadd.f32 %v1593_v39, %v1415_v30 }
  0xff   : > { %v1595_v62 = vpop.f32.mrf.mxu0 }
 0x100   : > { %v2223_v63 = vpop.f32.mrf.mxu1 }
 0x101   : > { %v1597_v0 = vpop.f32.mrf.mxu0  ;;  %v1636_v55 = vadd.f32 %v2223_v63, %v2221_v61 }
 0x102   : > { %v2225_v1 = vpop.f32.mrf.mxu1 }
 0x103   : > { %v1598_v2 = vpop.f32.mrf.mxu0 }
 0x104   : > { %v2227_v3 = vpop.f32.mrf.mxu1  ;;  %v1599_v54 = vadd.f32 %v1598_v2, %v1597_v0 }
 0x105   : > { %v1600_v4 = vpop.f32.mrf.mxu0 }
 0x106   : > { %v1640_v5 = vpop.f32.mrf.mxu1  ;;  %v1033_v0 = vadd.f32 %v1599_v54, %v1415_v30 }
 0x107   : > { %v1601_v6 = vpop.f32.mrf.mxu0 }
 0x108   : > { %v1641_v7 = vpop.f32.mrf.mxu1  ;;  %v1602_v35 = vadd.f32 %v1601_v6, %v1600_v4 }
 0x109   : > { %v1603_v8 = vpop.f32.mrf.mxu0  ;;  %v1642_v56 = vadd.f32 %v1641_v7, %v1640_v5 }
 0x10a   : > { %v1643_v9 = vpop.f32.mrf.mxu1 }
 0x10b   : > { %v1604_v10 = vpop.f32.mrf.mxu0 }
 0x10c   : > { %v1644_v11 = vpop.f32.mrf.mxu1  ;;  %v1605_v43 = vadd.f32 %v1604_v10, %v1603_v8  ;;  %v1087_v8 = vadd.f32 %v1630_v52, %v1022_v46 }
 0x10d   : > { %v1662_v12 = vpop.f32.mrf.mxu0  ;;  %v1645_v49 = vadd.f32 %v1644_v11, %v1643_v9 }
 0x10e   : > { %v2229_v13 = vpop.f32.mrf.mxu1  ;;  %v1041_v47 = vadd.f32 %v1605_v43, %v1415_v30 }
 0x10f   : > { %v1663_v14 = vpop.f32.mrf.mxu0 }
 0x110   : > { %v2231_v15 = vpop.f32.mrf.mxu1  ;;  %v1664_v51 = vadd.f32 %v1663_v14, %v1662_v12  ;;  %v1106_v7 = vadd.f32 %v1645_v49, %v1041_v47 }
 0x111   : > { %v2233_v16 = vpop.f32.mrf.mxu0 }
 0x112   : > { %v2235_v17 = vpop.f32.mrf.mxu1 }
 0x113   : > { %2288 = vst [vmem:[#allocation2_spill] sm:$0xff] %v2235_v17  ;;  %v1666_v18 = vpop.f32.mrf.mxu0  ;;  %v1038_v17 = vadd.f32 %v1602_v35, %v1415_v30  ;;  %v1090_v35 = vadd.f32 %v1633_v45, %v1025_v48 }
 0x114   : > { %v2237_v19 = vpop.f32.mrf.mxu1 }
 0x115   : > { %2289 = vst [vmem:[#allocation3_spill] sm:$0xff] %v2237_v19  ;;  %v1668_v20 = vpop.f32.mrf.mxu0  ;;  %v1596_v19 = vadd.f32 %v1595_v62, %v1594_v60  ;;  %v1082_v62 = vadd.f32 %v1627_v50, %v1017_v44  ;;  %v1103_v29 = vadd.f32 %v1642_v56, %v1038_v17 }
 0x116   : > { %v2239_v21 = vpop.f32.mrf.mxu1 }
 0x117   : > { %v1669_v22 = vpop.f32.mrf.mxu0  ;;  %v1030_v10 = vadd.f32 %v1596_v19, %v1415_v30 }
 0x118   : > { %v2241_v23 = vpop.f32.mrf.mxu1  ;;  %v1670_v6 = vadd.f32 %v1669_v22, %v1668_v20  ;;  %v1667_v20 = vadd.f32 %v1666_v18, %v2233_v16  ;;  %v1704_v18 = vadd.f32 %v2231_v15, %v2229_v13 }
 0x119   : > { %v1671_v24 = vpop.f32.mrf.mxu0  ;;  %v1095_v17 = vadd.f32 %v1636_v55, %v1030_v10  ;;  %v1710_v61 = vadd.f32 %v2241_v23, %v2239_v21 }
 0x11a   : > { %v2243_v25 = vpop.f32.mrf.mxu1  ;;  %v1152_v22 = vadd.f32 %v1670_v6, %v1087_v8  ;;  %v2296_v44 = vld [vmem:[#allocation2_spill] sm:$0xff] }
 0x11b   : > { %2290 = vst [vmem:[#allocation4_spill] sm:$0xff] %v2243_v25  ;;  %v1672_v26 = vpop.f32.mrf.mxu0  ;;  %v1079_v25 = vadd.f32 %v1624_v42, %v1014_v38  ;;  %v1147_v38 = vadd.f32 %v1667_v20, %v1082_v62 }
 0x11c   : > { %v2245_v27 = vpop.f32.mrf.mxu1  ;;  %v1673_v53 = vadd.f32 %v1672_v26, %v1671_v24  ;;  %v2297_v46 = vld [vmem:[#allocation3_spill] sm:$0xff] }
 0x11d   : > { %2291 = vst [vmem:[#allocation5_spill] sm:$0xff] %v2245_v27  ;;  %v1674_v28 = vpop.f32.mrf.mxu0  ;;  %v1144_v14 = vadd.f32 %v1664_v51, %v1079_v25  ;;  %v1707_v48 = vadd.f32 %v2297_v46, %v2296_v44 }
 0x11e   : > { %v2250_v31 = vpop.f32.mrf.mxu1  ;;  %v1155_v63 = vadd.f32 %v1673_v53, %v1090_v35 }
 0x11f   : > { %2292 = vst [vmem:[#allocation6_spill] sm:$0xff] %v2250_v31  ;;  %v1675_v32 = vpop.f32.mrf.mxu0  ;;  %v1209_v52 = vadd.f32 %v1704_v18, %v1144_v14 }
 0x120   : > { %v2252_v36 = vpop.f32.mrf.mxu1  ;;  %v1676_v2 = vadd.f32 %v1675_v32, %v1674_v28 }
 0x121   : > { %v1677_v37 = vpop.f32.mrf.mxu0 }
 0x122   : > { %v2254_v40 = vpop.f32.mrf.mxu1  ;;  %v1160_v28 = vadd.f32 %v1676_v2, %v1095_v17  ;;  %v2293_v39 = vld [vmem:[#allocation4_spill] sm:$0xff] }
 0x123   : > { %v1678_v41 = vpop.f32.mrf.mxu0 }
 0x124   : > { %v1718_v27 = vpop.f32.mrf.mxu1  ;;  %v1679_v9 = vadd.f32 %v1678_v41, %v1677_v37  ;;  %v1217_v37 = vadd.f32 %v1710_v61, %v1152_v22 }
 0x125   : > { %v1680_v31 = vpop.f32.mrf.mxu0  ;;  %v1719_v15 = vadd.f32 %v1718_v27, %v2254_v40 }
 0x126   : > { %v1720_v58 = vpop.f32.mrf.mxu1  ;;  %v2295_v41 = vld [vmem:[#allocation6_spill] sm:$0xff] }
 0x127   : > { %v1681_v4 = vpop.f32.mrf.mxu0  ;;  %v1716_v21 = vadd.f32 %v2252_v36, %v2295_v41  ;;  %v1212_v36 = vadd.f32 %v1707_v48, %v1147_v38 }
 0x128   : > { %v1682_v60 = vadd.f32 %v1681_v4, %v1680_v31  ;;  %v1721_v33 = vpop.f32.mrf.mxu1  ;;  %v1639_v31 = vadd.f32 %v2227_v3, %v2225_v1  ;;  %v2294_v1 = vld [vmem:[#allocation5_spill] sm:$0xff] }
 0x129   : > { %v1683_v34 = vpop.f32.mrf.mxu0  ;;  %v1722_v11 = vadd.f32 %v1721_v33, %v1720_v58  ;;  %v1713_v3 = vadd.f32 %v2294_v1, %v2293_v39  ;;  %v1225_v58 = vadd.f32 %v1716_v21, %v1160_v28 }
 0x12a   : > { %v1168_v5 = vadd.f32 %v1682_v60, %v1103_v29  ;;  %v1723_v57 = vpop.f32.mrf.mxu1  ;;  %v1098_v26 = vadd.f32 %v1639_v31, %v1033_v0 }
 0x12b   : > { %v1684_v59 = vpop.f32.mrf.mxu0  ;;  %v1220_v13 = vadd.f32 %v1713_v3, %v1155_v63 }
 0x12c   : > { %v1685_v19 = vadd.f32 %v1684_v59, %v1683_v34  ;;  %v1724_v12 = vpop.f32.mrf.mxu1  ;;  %v1233_v16 = vadd.f32 %v1722_v11, %v1168_v5  ;;  %v1163_v23 = vadd.f32 %v1679_v9, %v1098_v26 }
 0x12d   : > { %v1725_v30 = vadd.f32 %v1724_v12, %v1723_v57 }
 0x12e   : > { %v1171_v24 = vadd.f32 %v1685_v19, %v1106_v7  ;;  %v1756_v32 = vpop.f32.mrf.mxu0  ;;  %v1228_v10 = vadd.f32 %v1719_v15, %v1163_v23 }
 0x12f   : > { %v1760_v25 = vpop.f32.mrf.mxu1  ;;  %v1282_v50 = vadd.f32 %v1756_v32, %v1217_v37 }
 0x130   : > { %v1273_v42 = vpop.f32.mrf.mxu0  ;;  %v1236_v43 = vadd.f32 %v1725_v30, %v1171_v24  ;;  %v1298_v56 = vadd.f32 %v1760_v25, %v1233_v16 }
 0x131   : > { %v1289_v54 = vpop.f32.mrf.mxu1  ;;  %v1274_v45 = vadd.f32 %v1273_v42, %v1209_v52  ;;  %v1306_v29 = vmax.f32 %v1282_v50, 0.0 }
 0x132   : > { %v1757_v4 = vpop.f32.mrf.mxu0  ;;  %v1290_v60 = vadd.f32 %v1289_v54, %v1225_v58  ;;  %v1310_v49 = vmax.f32 %v1298_v56, 0.0 }
 0x133   : > { %v1285_v47 = vadd.f32 %v1757_v4, %v1220_v13  ;;  %v1761_v6 = vpop.f32.mrf.mxu1  ;;  %v1304_v51 = vmax.f32 %v1274_v45, 0.0 }
 0x134   : > { %v1301_v62 = vadd.f32 %v1761_v6, %v1236_v43  ;;  %v1276_v8 = vpop.f32.mrf.mxu0  ;;  %v1308_v0 = vmax.f32 %v1290_v60, 0.0 }
 0x135   : > { %v1307_v33 = vmax.f32 %v1285_v47, 0.0  ;;  %v1277_v34 = vadd.f32 %v1276_v8, %v1212_v36  ;;  %v1292_v35 = vpop.f32.mrf.mxu1 }
 0x136   : > { %v1311_v27 = vmax.f32 %v1301_v62, 0.0  ;;  %v1293_v40 = vadd.f32 %v1292_v35, %v1228_v10 }
 0x137   : > { %v1551_v53 = vpack.c.bf16 %v1307_v33, %v1306_v29  ;;  %v1305_v55 = vmax.f32 %v1277_v34, 0.0 }
 0x138   : > { %v1561_v2 = vpack.c.bf16 %v1311_v27, %v1310_v49  ;;  %v1309_v5 = vmax.f32 %v1293_v40, 0.0 }
 0x139   : > { %1563 = vst [vmem:[%s170_s19 + $0x8] sm:$0xff] %v1551_v53   ;;  %v1546_v57 = vpack.c.bf16 %v1305_v55, %v1304_v51 }
 0x13a   : > { %1565 = vst [vmem:[%s170_s19 + $0x18] sm:$0xff] %v1561_v2   ;;  %v1556_v59 = vpack.c.bf16 %v1309_v5, %v1308_v0 }
 0x13b   : > { %1547 = vst [vmem:[%s170_s19] sm:$0xff] %v1546_v57  }
 0x13c   : > { %1564 = vst [vmem:[%s170_s19 + $0x10] sm:$0xff] %v1556_v59  }
 0x13d PF: > { %s13_s12 = sadd.s32 1, %s1917_s12  }
 0x13e   : > { %p10_p4 = scmp.ge.s32.totalorder %s13_s12, 6  }
 0x140   :  { %12 = sbr.rel (!%p10_p4) target bundleno = 1 (0x1), region = 62 }

// kernel: human_guided_loss.13
= control target key start
LH: loop header
LB: loop body
LE: loop exit
PB: predicated region body
PF: predicated region fallthrough
CT: control target
= control target key end

     0   :  { %s1828_s12 = smov 0   ;;  %s2299_s0 = inlined_call_operand.vmem [shape: bf16[4,16,1152], index: 0, kind: input, shape index: {}]   ;;  %s2300_s1 = inlined_call_operand.vmem [shape: bf16[1152,256], index: 1, kind: input, shape index: {}]   ;;  %s2301_s2 = inlined_call_operand.vmem [shape: f32[1,256], index: 2, kind: input, shape index: {}]   ;;  %s2302_s3 = inlined_call_operand.vmem [shape: bf16[4,16,256], index: 3, kind: output, shape index: {}]  }
   0x1 LB: > { %s1392_s13 = sadd.s32 4294967295, %s1805_s12   ;;  %p1396_p0 = scmp.ge.s32.totalorder %s1805_s12, 1  ;;  %s1805_s12 = sphi %s1828_s12, %s13_s12  }
   0x2   : > { %p137_p1 = scmp.lt.s32.totalorder %s1805_s12, 5 }
   0x4   : > { %p138_p2 = pnand %p1396_p0, %p137_p1 }
   0x5   : > { %p161_p3 = scmp.lt.s32.totalorder (!%p138_p2), %s1392_s13, 3 }
   0x6   : > { %141 = sbr.rel (%p138_p2) target bundleno = 378 (0x17a), region = 32 }
   0xb   : > { %v1570_v0 = vld [vmem:[%s2300_s1 + $0x74] ss:$8 sps:$4 sm:$0xff]   ;;  %v1572_v1 = vld [vmem:[%s2300_s1 + $0x70] ss:$8 sps:$4 sm:$0xff]   ;;  %v1576_v4 = vld [vmem:[%s2300_s1 + $0x64] ss:$8 sps:$4 sm:$0xff]  }
   0xc   : > { %1104 = vmatprep.subr.bf16.mxu0 %v1570_v0  ;;  %v1573_v2 = vld [vmem:[%s2300_s1 + $0x174] ss:$8 sps:$4 sm:$0xff]   ;;  %v1575_v3 = vld [vmem:[%s2300_s1 + $0x170] ss:$8 sps:$4 sm:$0xff]   ;;  %v1578_v5 = vld [vmem:[%s2300_s1 + $0x60] ss:$8 sps:$4 sm:$0xff]  }
   0xd   : > { %1105 = vmatpush1.bf16.msra.mxu0 %v1572_v1  ;;  %1147 = vmatprep.subr.bf16.mxu1 %v1573_v2  ;;  %v1579_v6 = vld [vmem:[%s2300_s1 + $0x164] ss:$8 sps:$4 sm:$0xff]   ;;  %v1581_v7 = vld [vmem:[%s2300_s1 + $0x160] ss:$8 sps:$4 sm:$0xff]   ;;  %v1582_v8 = vld [vmem:[%s2300_s1 + $0x54] ss:$8 sps:$4 sm:$0xff]  }
   0xe   : > { %1148 = vmatpush1.bf16.msra.mxu1 %v1575_v3  ;;  %1106 = vmatprep.subr.bf16.mxu0 %v1576_v4  ;;  %v1584_v9 = vld [vmem:[%s2300_s1 + $0x50] ss:$8 sps:$4 sm:$0xff]   ;;  %v1585_v10 = vld [vmem:[%s2300_s1 + $0x154] ss:$8 sps:$4 sm:$0xff]   ;;  %v1588_v11 = vld [vmem:[%s2300_s1 + $0x44] ss:$8 sps:$4 sm:$0xff]  }
   0xf   : > { %1149 = vmatprep.subr.bf16.mxu1 %v1579_v6  ;;  %v1587_v12 = vld [vmem:[%s2300_s1 + $0x150] ss:$8 sps:$4 sm:$0xff]   ;;  %v1591_v13 = vld [vmem:[%s2300_s1 + $0x144] ss:$8 sps:$4 sm:$0xff]   ;;  %v1590_v14 = vld [vmem:[%s2300_s1 + $0x40] ss:$8 sps:$4 sm:$0xff]  }
  0x10   : > { %v1594_v15 = vld [vmem:[%s2300_s1 + $0x34] ss:$8 sps:$4 sm:$0xff]   ;;  %v1593_v16 = vld [vmem:[%s2300_s1 + $0x140] ss:$8 sps:$4 sm:$0xff]   ;;  %v1596_v18 = vld [vmem:[%s2300_s1 + $0x30] ss:$8 sps:$4 sm:$0xff]  }
  0x11   : > { %1107 = vmatpush1.bf16.msra.mxu0 %v1578_v5  ;;  %v1597_v17 = vld [vmem:[%s2300_s1 + $0x134] ss:$8 sps:$4 sm:$0xff]   ;;  %v1600_v19 = vld [vmem:[%s2300_s1 + $0x24] ss:$8 sps:$4 sm:$0xff]   ;;  %v1599_v20 = vld [vmem:[%s2300_s1 + $0x130] ss:$8 sps:$4 sm:$0xff]  }
  0x12   : > { %1108 = vmatprep.subr.bf16.mxu0 %v1582_v8  ;;  %1150 = vmatpush1.bf16.msra.mxu1 %v1581_v7  ;;  %v1603_v21 = vld [vmem:[%s2300_s1 + $0x124] ss:$8 sps:$4 sm:$0xff]   ;;  %v1602_v22 = vld [vmem:[%s2300_s1 + $0x20] ss:$8 sps:$4 sm:$0xff]   ;;  %v1606_v23 = vld [vmem:[%s2300_s1 + $0x14] ss:$8 sps:$4 sm:$0xff]  }
  0x13   : > { %1151 = vmatprep.subr.bf16.mxu1 %v1585_v10  ;;  %v1605_v24 = vld [vmem:[%s2300_s1 + $0x120] ss:$8 sps:$4 sm:$0xff]   ;;  %v1609_v25 = vld [vmem:[%s2300_s1 + $0x114] ss:$8 sps:$4 sm:$0xff]   ;;  %v1608_v26 = vld [vmem:[%s2300_s1 + $0x10] ss:$8 sps:$4 sm:$0xff]  }
  0x14   : > { %v1612_v27 = vld [vmem:[%s2300_s1 + $0x4] ss:$8 sps:$4 sm:$0xff]   ;;  %v1611_v28 = vld [vmem:[%s2300_s1 + $0x110] ss:$8 sps:$4 sm:$0xff]   ;;  %v1614_v30 = vld [vmem:[%s2300_s1] ss:$8 sps:$4 sm:$0xff]  }
  0x15   : > { %1109 = vmatpush1.bf16.msra.mxu0 %v1584_v9  ;;  %v1615_v29 = vld [vmem:[%s2300_s1 + $0x104] ss:$8 sps:$4 sm:$0xff]   ;;  %v1618_v31 = vld [vmem:[%s2300_s1 + $0xf4] ss:$8 sps:$4 sm:$0xff]   ;;  %v1617_v32 = vld [vmem:[%s2300_s1 + $0x100] ss:$8 sps:$4 sm:$0xff]  }
  0x16   : > { %1110 = vmatprep.subr.bf16.mxu0 %v1588_v11  ;;  %1152 = vmatpush1.bf16.msra.mxu1 %v1587_v12  ;;  %v1621_v33 = vld [vmem:[%s2300_s1 + $0x1f4] ss:$8 sps:$4 sm:$0xff]   ;;  %v1620_v34 = vld [vmem:[%s2300_s1 + $0xf0] ss:$8 sps:$4 sm:$0xff]   ;;  %v1624_v35 = vld [vmem:[%s2300_s1 + $0xe4] ss:$8 sps:$4 sm:$0xff]  }
  0x17   : > { %1153 = vmatprep.subr.bf16.mxu1 %v1591_v13  ;;  %s2304_s13 = smov (!%p161_p3, %s1392_s13), 3  ;;  %v1623_v36 = vld [vmem:[%s2300_s1 + $0x1f0] ss:$8 sps:$4 sm:$0xff]   ;;  %v1627_v37 = vld [vmem:[%s2300_s1 + $0x1e4] ss:$8 sps:$4 sm:$0xff]  }
  0x18   : > { %v1626_v38 = vld [vmem:[%s2300_s1 + $0xe0] ss:$8 sps:$4 sm:$0xff]   ;;  %v1630_v39 = vld [vmem:[%s2300_s1 + $0xd4] ss:$8 sps:$4 sm:$0xff]   ;;  %s1560_s19 = smul.u32 72, %s2304_s13 }
  0x19   : > { %1111 = vmatpush1.bf16.msra.mxu0 %v1590_v14  ;;  %v1629_v40 = vld [vmem:[%s2300_s1 + $0x1e0] ss:$8 sps:$4 sm:$0xff]   ;;  %v1633_v41 = vld [vmem:[%s2300_s1 + $0x1d4] ss:$8 sps:$4 sm:$0xff]   ;;  %v1632_v42 = vld [vmem:[%s2300_s1 + $0xd0] ss:$8 sps:$4 sm:$0xff]  }
  0x1a   : > { %1112 = vmatprep.subr.bf16.mxu0 %v1594_v15  ;;  %1154 = vmatpush1.bf16.msra.mxu1 %v1593_v16  ;;  %v1636_v43 = vld [vmem:[%s2300_s1 + $0xc4] ss:$8 sps:$4 sm:$0xff]   ;;  %s1978_s30 = scalar_lea.vmem %s2299_s0, %s1560_s19  ;;  %v1635_v44 = vld [vmem:[%s2300_s1 + $0x1d0] ss:$8 sps:$4 sm:$0xff]   ;;  %v1638_v46 = vld [vmem:[%s2300_s1 + $0xc0] ss:$8 sps:$4 sm:$0xff]  }
  0x1b   : > { %1155 = vmatprep.subr.bf16.mxu1 %v1597_v17  ;;  %v1639_v45 = vld [vmem:[%s2300_s1 + $0x1c4] ss:$8 sps:$4 sm:$0xff]   ;;  %v1642_v48 = vld [vmem:[%s2300_s1 + $0xb4] ss:$8 sps:$4 sm:$0xff]   ;;  %v1641_v49 = vld [vmem:[%s2300_s1 + $0x1c0] ss:$8 sps:$4 sm:$0xff]  }
  0x1c   : > { %v1667_v47 = vld [vmem:[%s1978_s30 + $0x4] ss:$36 sps:$4 sm:$0xff]   ;;  %v1645_v50 = vld [vmem:[%s2300_s1 + $0x1b4] ss:$8 sps:$4 sm:$0xff]   ;;  %v1674_v51 = vld [vmem:[%s1978_s30 + $0xc] ss:$36 sps:$4 sm:$0xff]  }
  0x1d   : > { %1113 = vmatpush1.bf16.msra.mxu0 %v1596_v18  ;;  %1136 = vmatprep.mubr.bf16.mxu0 %v1667_v47  ;;  %v1644_v52 = vld [vmem:[%s2300_s1 + $0xb0] ss:$8 sps:$4 sm:$0xff]   ;;  %v1648_v53 = vld [vmem:[%s2300_s1 + $0xa4] ss:$8 sps:$4 sm:$0xff]   ;;  %v1650_v56 = vld [vmem:[%s2300_s1 + $0xa0] ss:$8 sps:$4 sm:$0xff]  }
  0x1e   : > { %1114 = vmatprep.subr.bf16.mxu0 %v1600_v19  ;;  %1156 = vmatpush1.bf16.msra.mxu1 %v1599_v20  ;;  %v1647_v54 = vld [vmem:[%s2300_s1 + $0x1b0] ss:$8 sps:$4 sm:$0xff]   ;;  %v1651_v55 = vld [vmem:[%s2300_s1 + $0x1a4] ss:$8 sps:$4 sm:$0xff]   ;;  %v1654_v57 = vld [vmem:[%s2300_s1 + $0x94] ss:$8 sps:$4 sm:$0xff]  }
  0x1f   : > { %1157 = vmatprep.subr.bf16.mxu1 %v1603_v21  ;;  %1179 = vmatprep.mubr.bf16.mxu1 %v1674_v51  ;;  %v1653_v58 = vld [vmem:[%s2300_s1 + $0x1a0] ss:$8 sps:$4 sm:$0xff]   ;;  %v1657_v59 = vld [vmem:[%s2300_s1 + $0x194] ss:$8 sps:$4 sm:$0xff]   ;;  %v1656_v60 = vld [vmem:[%s2300_s1 + $0x90] ss:$8 sps:$4 sm:$0xff]  }
  0x20   : > { %v1660_v61 = vld [vmem:[%s2300_s1 + $0x84] ss:$8 sps:$4 sm:$0xff]   ;;  %v1659_v62 = vld [vmem:[%s2300_s1 + $0x190] ss:$8 sps:$4 sm:$0xff]   ;;  %v1662_v0 = vld [vmem:[%s2300_s1 + $0x80] ss:$8 sps:$4 sm:$0xff]  }
  0x21   : > { %1115 = vmatpush1.bf16.msra.mxu0 %v1602_v22  ;;  %v1663_v63 = vld [vmem:[%s2300_s1 + $0x184] ss:$8 sps:$4 sm:$0xff]   ;;  %v1671_v1 = vld [vmem:[%s2300_s1 + $0x274] ss:$8 sps:$4 sm:$0xff]   ;;  %v1668_v2 = vld [vmem:[%s2300_s1 + $0x180] ss:$8 sps:$4 sm:$0xff]  }
  0x22   : > { %1116 = vmatprep.subr.bf16.mxu0 %v1606_v23  ;;  %1158 = vmatpush1.bf16.msra.mxu1 %v1605_v24  ;;  %v1665_v3 = vld [vmem:[%s1978_s30] ss:$36 sps:$4 sm:$0xff]   ;;  %v1677_v4 = vld [vmem:[%s2300_s1 + $0x374] ss:$8 sps:$4 sm:$0xff]   ;;  %v1669_v5 = vld [vmem:[%s2300_s1 + $0x270] ss:$8 sps:$4 sm:$0xff]  }
  0x23   : > { %1159 = vmatprep.subr.bf16.mxu1 %v1609_v25  ;;  %v1672_v6 = vld [vmem:[%s1978_s30 + $0x8] ss:$36 sps:$4 sm:$0xff]   ;;  %v1675_v8 = vld [vmem:[%s2300_s1 + $0x370] ss:$8 sps:$4 sm:$0xff]   ;;  %v1686_v11 = vld [vmem:[%s2300_s1 + $0x254] ss:$8 sps:$4 sm:$0xff]  }
  0x24   : > { %v1680_v7 = vld [vmem:[%s2300_s1 + $0x264] ss:$8 sps:$4 sm:$0xff]   ;;  %v1678_v10 = vld [vmem:[%s2300_s1 + $0x260] ss:$8 sps:$4 sm:$0xff]   ;;  %v1689_v13 = vld [vmem:[%s2300_s1 + $0x354] ss:$8 sps:$4 sm:$0xff]  }
  0x25   : > { %1117 = vmatpush1.bf16.msra.mxu0 %v1608_v26  ;;  %v1683_v9 = vld [vmem:[%s2300_s1 + $0x364] ss:$8 sps:$4 sm:$0xff]   ;;  %v1681_v12 = vld [vmem:[%s2300_s1 + $0x360] ss:$8 sps:$4 sm:$0xff]   ;;  %v1684_v14 = vld [vmem:[%s2300_s1 + $0x250] ss:$8 sps:$4 sm:$0xff]  }
  0x26   : > { %1118 = vmatprep.subr.bf16.mxu0 %v1612_v27  ;;  %1160 = vmatpush1.bf16.msra.mxu1 %v1611_v28  ;;  %v1692_v15 = vld [vmem:[%s2300_s1 + $0x244] ss:$8 sps:$4 sm:$0xff]   ;;  %v1687_v16 = vld [vmem:[%s2300_s1 + $0x350] ss:$8 sps:$4 sm:$0xff]   ;;  %v1690_v18 = vld [vmem:[%s2300_s1 + $0x240] ss:$8 sps:$4 sm:$0xff]  }
  0x27   : > { %1161 = vmatprep.subr.bf16.mxu1 %v1615_v29  ;;  %v1695_v17 = vld [vmem:[%s2300_s1 + $0x344] ss:$8 sps:$4 sm:$0xff]   ;;  %v1698_v19 = vld [vmem:[%s2300_s1 + $0x234] ss:$8 sps:$4 sm:$0xff]   ;;  %v1693_v20 = vld [vmem:[%s2300_s1 + $0x340] ss:$8 sps:$4 sm:$0xff]  }
  0x28   : > { %v1701_v21 = vld [vmem:[%s2300_s1 + $0x334] ss:$8 sps:$4 sm:$0xff]   ;;  %v1696_v22 = vld [vmem:[%s2300_s1 + $0x230] ss:$8 sps:$4 sm:$0xff]   ;;  %v1704_v23 = vld [vmem:[%s2300_s1 + $0x224] ss:$8 sps:$4 sm:$0xff]  }
  0x29   : > { %1119 = vmatpush1.bf16.msra.mxu0 %v1614_v30  ;;  %v1699_v24 = vld [vmem:[%s2300_s1 + $0x330] ss:$8 sps:$4 sm:$0xff]   ;;  %v1707_v25 = vld [vmem:[%s2300_s1 + $0x324] ss:$8 sps:$4 sm:$0xff]   ;;  %v1702_v26 = vld [vmem:[%s2300_s1 + $0x220] ss:$8 sps:$4 sm:$0xff]  }
  0x2a   : > { %1120 = vmatprep.subr.bf16.mxu0 %v1618_v31  ;;  %1162 = vmatpush1.bf16.msra.mxu1 %v1617_v32  ;;  %v1710_v27 = vld [vmem:[%s2300_s1 + $0x214] ss:$8 sps:$4 sm:$0xff]   ;;  %v1705_v28 = vld [vmem:[%s2300_s1 + $0x320] ss:$8 sps:$4 sm:$0xff]   ;;  %v1708_v30 = vld [vmem:[%s2300_s1 + $0x210] ss:$8 sps:$4 sm:$0xff]  }
  0x2b   : > { %1163 = vmatprep.subr.bf16.mxu1 %v1621_v33  ;;  %v1713_v29 = vld [vmem:[%s2300_s1 + $0x314] ss:$8 sps:$4 sm:$0xff]   ;;  %v1711_v31 = vld [vmem:[%s2300_s1 + $0x310] ss:$8 sps:$4 sm:$0xff]   ;;  %v1716_v32 = vld [vmem:[%s2300_s1 + $0x204] ss:$8 sps:$4 sm:$0xff]  }
  0x2c   : > { %v1770_v33 = vld [vmem:[%s1978_s30 + $0x14] ss:$36 sps:$4 sm:$0xff]   ;;  %v1743_v51 = vld [vmem:[%s2300_s1 + $0x3c4] ss:$8 sps:$4 sm:$0xff]  }
  0x2d   : > { %1121 = vmatpush2.bf16.msra.mxu0 %v1620_v34  ;;  %v1719_v34 = vld [vmem:[%s2300_s1 + $0x304] ss:$8 sps:$4 sm:$0xff]   ;;  %v1737_v47 = vld [vmem:[%s2300_s1 + $0x3d4] ss:$8 sps:$4 sm:$0xff]  }
  0x2e   : > { %1122 = vmatprep.subr.bf16.mxu0 %v1624_v35  ;;  %1164 = vmatpush2.bf16.msra.mxu1 %v1623_v36  ;;  %v1714_v35 = vld [vmem:[%s2300_s1 + $0x200] ss:$8 sps:$4 sm:$0xff]  }
  0x2f   : > { %1165 = vmatprep.subr.bf16.mxu1 %v1627_v37  ;;  %v1776_v36 = vld [vmem:[%s1978_s30 + $0x1c] ss:$36 sps:$4 sm:$0xff]  }
  0x30   : > { %v1722_v37 = vld [vmem:[%s2300_s1 + $0x2f4] ss:$8 sps:$4 sm:$0xff]  }
  0x31   : > { %1123 = vmatpush2.bf16.msra.mxu0 %v1626_v38  ;;  %v1717_v38 = vld [vmem:[%s2300_s1 + $0x300] ss:$8 sps:$4 sm:$0xff]  }
  0x32   : > { %1124 = vmatprep.subr.bf16.mxu0 %v1630_v39  ;;  %1166 = vmatpush2.bf16.msra.mxu1 %v1629_v40  ;;  %v1725_v39 = vld [vmem:[%s2300_s1 + $0x3f4] ss:$8 sps:$4 sm:$0xff]   ;;  %v1720_v40 = vld [vmem:[%s2300_s1 + $0x2f0] ss:$8 sps:$4 sm:$0xff]  }
  0x33   : > { %1167 = vmatprep.subr.bf16.mxu1 %v1633_v41  ;;  %v1728_v41 = vld [vmem:[%s2300_s1 + $0x2e4] ss:$8 sps:$4 sm:$0xff]  }
  0x35   : > { %1125 = vmatpush2.bf16.msra.mxu0 %v1632_v42  ;;  %v1723_v42 = vld [vmem:[%s2300_s1 + $0x3f0] ss:$8 sps:$4 sm:$0xff]  }
  0x36   : > { %1126 = vmatprep.subr.bf16.mxu0 %v1636_v43  ;;  %1168 = vmatpush2.bf16.msra.mxu1 %v1635_v44  ;;  %v1731_v43 = vld [vmem:[%s2300_s1 + $0x3e4] ss:$8 sps:$4 sm:$0xff]   ;;  %v1726_v44 = vld [vmem:[%s2300_s1 + $0x2e0] ss:$8 sps:$4 sm:$0xff]  }
  0x37   : > { %1169 = vmatprep.subr.bf16.mxu1 %v1639_v45  ;;  %v1734_v45 = vld [vmem:[%s2300_s1 + $0x2d4] ss:$8 sps:$4 sm:$0xff]  }
  0x39   : > { %1127 = vmatpush2.bf16.msra.mxu0 %v1638_v46  ;;  %v1729_v46 = vld [vmem:[%s2300_s1 + $0x3e0] ss:$8 sps:$4 sm:$0xff]  }
  0x3a   : > { %1128 = vmatprep.subr.bf16.mxu0 %v1642_v48  ;;  %1170 = vmatpush2.bf16.msra.mxu1 %v1641_v49  ;;  %v1732_v48 = vld [vmem:[%s2300_s1 + $0x2d0] ss:$8 sps:$4 sm:$0xff]   ;;  %v1740_v49 = vld [vmem:[%s2300_s1 + $0x2c4] ss:$8 sps:$4 sm:$0xff]  }
  0x3b   : > { %1171 = vmatprep.subr.bf16.mxu1 %v1645_v50  ;;  %v1735_v50 = vld [vmem:[%s2300_s1 + $0x3d0] ss:$8 sps:$4 sm:$0xff]  }
  0x3d   : > { %1129 = vmatpush2.bf16.msra.mxu0 %v1644_v52  ;;  %v1738_v52 = vld [vmem:[%s2300_s1 + $0x2c0] ss:$8 sps:$4 sm:$0xff]  }
  0x3e   : > { %1130 = vmatprep.subr.bf16.mxu0 %v1648_v53  ;;  %1172 = vmatpush2.bf16.msra.mxu1 %v1647_v54  ;;  %v1746_v53 = vld [vmem:[%s2300_s1 + $0x2b4] ss:$8 sps:$4 sm:$0xff]   ;;  %v1741_v54 = vld [vmem:[%s2300_s1 + $0x3c0] ss:$8 sps:$4 sm:$0xff]  }
  0x3f   : > { %1173 = vmatprep.subr.bf16.mxu1 %v1651_v55  ;;  %v1749_v55 = vld [vmem:[%s2300_s1 + $0x3b4] ss:$8 sps:$4 sm:$0xff]  }
  0x41   : > { %1131 = vmatpush2.bf16.msra.mxu0 %v1650_v56  ;;  %v1744_v56 = vld [vmem:[%s2300_s1 + $0x2b0] ss:$8 sps:$4 sm:$0xff]  }
  0x42   : > { %1132 = vmatprep.subr.bf16.mxu0 %v1654_v57  ;;  %1174 = vmatpush2.bf16.msra.mxu1 %v1653_v58  ;;  %v1752_v57 = vld [vmem:[%s2300_s1 + $0x2a4] ss:$8 sps:$4 sm:$0xff]   ;;  %v1747_v58 = vld [vmem:[%s2300_s1 + $0x3b0] ss:$8 sps:$4 sm:$0xff]  }
  0x43   : > { %1175 = vmatprep.subr.bf16.mxu1 %v1657_v59  ;;  %v1755_v59 = vld [vmem:[%s2300_s1 + $0x3a4] ss:$8 sps:$4 sm:$0xff]  }
  0x45   : > { %1133 = vmatpush2.bf16.msra.mxu0 %v1656_v60  ;;  %v1750_v60 = vld [vmem:[%s2300_s1 + $0x2a0] ss:$8 sps:$4 sm:$0xff]  }
  0x46   : > { %1134 = vmatprep.subr.bf16.mxu0 %v1660_v61  ;;  %1176 = vmatpush2.bf16.msra.mxu1 %v1659_v62  ;;  %v1758_v61 = vld [vmem:[%s2300_s1 + $0x294] ss:$8 sps:$4 sm:$0xff]   ;;  %v1753_v62 = vld [vmem:[%s2300_s1 + $0x3a0] ss:$8 sps:$4 sm:$0xff]  }
  0x47   : > { %1177 = vmatprep.subr.bf16.mxu1 %v1663_v63  ;;  %v1761_v63 = vld [vmem:[%s2300_s1 + $0x394] ss:$8 sps:$4 sm:$0xff]  }
  0x49   : > { %1135 = vmatpush2.bf16.msra.mxu0 %v1662_v0  ;;  %v1756_v0 = vld [vmem:[%s2300_s1 + $0x290] ss:$8 sps:$4 sm:$0xff]  }
  0x4a   : > { %1190 = vmatprep.subr.bf16.mxu0 %v1671_v1  ;;  %1178 = vmatpush2.bf16.msra.mxu1 %v1668_v2  ;;  %v1764_v1 = vld [vmem:[%s2300_s1 + $0x284] ss:$8 sps:$4 sm:$0xff]   ;;  %v1759_v2 = vld [vmem:[%s2300_s1 + $0x390] ss:$8 sps:$4 sm:$0xff]  }
  0x4b   : > { %1233 = vmatprep.subr.bf16.mxu1 %v1677_v4  ;;  %v1762_v4 = vld [vmem:[%s2300_s1 + $0x280] ss:$8 sps:$4 sm:$0xff]  }
  0x4c   : > { %1137 = vmatmul.mubr.bf16.vlgmr.msra.gmra.mxu0 %v1665_v3  ;;  %v1767_v3 = vld [vmem:[%s2300_s1 + $0x384] ss:$8 sps:$4 sm:$0xff]  }
  0x4d   : > { %1191 = vmatpush1.bf16.msra.mxu0 %v1669_v5  ;;  %1180 = vmatmul.mubr.bf16.vlgmr.msra.gmra.mxu1 %v1672_v6  ;;  %v1773_v5 = vld [vmem:[%s2300_s1 + $0x474] ss:$8 sps:$4 sm:$0xff]   ;;  %v1765_v6 = vld [vmem:[%s2300_s1 + $0x380] ss:$8 sps:$4 sm:$0xff]  }
  0x4e   : > { %1192 = vmatprep.subr.bf16.mxu0 %v1680_v7  ;;  %1234 = vmatpush1.bf16.msra.mxu1 %v1675_v8  ;;  %v1768_v7 = vld [vmem:[%s1978_s30 + $0x10] ss:$36 sps:$4 sm:$0xff]  }
  0x4f   : > { %1235 = vmatprep.subr.bf16.mxu1 %v1683_v9  ;;  %1222 = vmatprep.mubr.bf16.mxu0 %v1770_v33  ;;  %v1771_v8 = vld [vmem:[%s2300_s1 + $0x470] ss:$8 sps:$4 sm:$0xff]  }
  0x50   : > { %1265 = vmatprep.mubr.bf16.mxu1 %v1776_v36  ;;  %v1774_v9 = vld [vmem:[%s1978_s30 + $0x18] ss:$36 sps:$4 sm:$0xff]  }
  0x51   : > { %1193 = vmatpush1.bf16.msra.mxu0 %v1678_v10  ;;  %v1779_v10 = vld [vmem:[%s2300_s1 + $0x464] ss:$8 sps:$4 sm:$0xff]  }
  0x52   : > { %1194 = vmatprep.subr.bf16.mxu0 %v1686_v11  ;;  %1236 = vmatpush1.bf16.msra.mxu1 %v1681_v12  ;;  %v1777_v11 = vld [vmem:[%s2300_s1 + $0x460] ss:$8 sps:$4 sm:$0xff]   ;;  %v1807_v12 = vmov 0  }
  0x53   : > { %1237 = vmatprep.subr.bf16.mxu1 %v1689_v13  ;;  %v1782_v13 = vld [vmem:[%s2300_s1 + $0x454] ss:$8 sps:$4 sm:$0xff]  }
  0x55   : > { %1195 = vmatpush1.bf16.msra.mxu0 %v1684_v14  ;;  %v1780_v14 = vld [vmem:[%s2300_s1 + $0x450] ss:$8 sps:$4 sm:$0xff]  }
  0x56   : > { %1196 = vmatprep.subr.bf16.mxu0 %v1692_v15  ;;  %1238 = vmatpush1.bf16.msra.mxu1 %v1687_v16  ;;  %v1785_v15 = vld [vmem:[%s2300_s1 + $0x444] ss:$8 sps:$4 sm:$0xff]   ;;  %v1783_v16 = vld [vmem:[%s2300_s1 + $0x440] ss:$8 sps:$4 sm:$0xff]  }
  0x57   : > { %1239 = vmatprep.subr.bf16.mxu1 %v1695_v17  ;;  %v1788_v17 = vld [vmem:[%s2300_s1 + $0x434] ss:$8 sps:$4 sm:$0xff]  }
  0x59   : > { %1197 = vmatpush1.bf16.msra.mxu0 %v1690_v18  ;;  %v1786_v18 = vld [vmem:[%s2300_s1 + $0x430] ss:$8 sps:$4 sm:$0xff]  }
  0x5a   : > { %1198 = vmatprep.subr.bf16.mxu0 %v1698_v19  ;;  %1240 = vmatpush1.bf16.msra.mxu1 %v1693_v20  ;;  %v1791_v19 = vld [vmem:[%s2300_s1 + $0x424] ss:$8 sps:$4 sm:$0xff]   ;;  %v1789_v20 = vld [vmem:[%s2300_s1 + $0x420] ss:$8 sps:$4 sm:$0xff]  }
  0x5b   : > { %1241 = vmatprep.subr.bf16.mxu1 %v1701_v21  ;;  %v1794_v21 = vld [vmem:[%s2300_s1 + $0x414] ss:$8 sps:$4 sm:$0xff]  }
  0x5d   : > { %1199 = vmatpush1.bf16.msra.mxu0 %v1696_v22  ;;  %v1792_v22 = vld [vmem:[%s2300_s1 + $0x410] ss:$8 sps:$4 sm:$0xff]  }
  0x5e   : > { %1200 = vmatprep.subr.bf16.mxu0 %v1704_v23  ;;  %1242 = vmatpush1.bf16.msra.mxu1 %v1699_v24  ;;  %v1797_v23 = vld [vmem:[%s2300_s1 + $0x404] ss:$8 sps:$4 sm:$0xff]   ;;  %v1795_v24 = vld [vmem:[%s2300_s1 + $0x400] ss:$8 sps:$4 sm:$0xff]  }
  0x5f   : > { %1243 = vmatprep.subr.bf16.mxu1 %v1707_v25  ;;  %v1798_v25 = vld [vmem:[%s1978_s30 + $0x20] ss:$36 sps:$4 sm:$0xff]   ;;  %s1557_s30 = sshll.u32 %s2304_s13, 4 }
  0x60   : > { %s170_s18 = scalar_lea.vmem %s2302_s3, %s1557_s30 }
  0x61   : > { %1201 = vmatpush1.bf16.msra.mxu0 %v1702_v26 }
  0x62   : > { %1202 = vmatprep.subr.bf16.mxu0 %v1710_v27  ;;  %1244 = vmatpush1.bf16.msra.mxu1 %v1705_v28  ;;  %v328_v27 = vlaneseq }
  0x63   : > { %1245 = vmatprep.subr.bf16.mxu1 %v1713_v29 }
  0x65   : > { %1203 = vmatpush1.bf16.msra.mxu0 %v1708_v30  ;;  %v329_v30 = vshrl.u32 %v328_v27, 7 }
  0x66   : > { %1204 = vmatprep.subr.bf16.mxu0 %v1716_v32  ;;  %1246 = vmatpush1.bf16.msra.mxu1 %v1711_v31 }
  0x67   : > { %1247 = vmatprep.subr.bf16.mxu1 %v1719_v34  ;;  %v330_v33 = vsub.s32 0, %v329_v30  ;;  %v326_v34 = vld [vmem:[%s2301_s2] sm:$0x3] }
  0x69   : > { %1205 = vmatpush1.bf16.msra.mxu0 %v1714_v35  ;;  %v334_v35 = vsub.s32 1, %v329_v30 }
  0x6a   : > { %1206 = vmatprep.subr.bf16.mxu0 %v1722_v37  ;;  %1248 = vmatpush1.bf16.msra.mxu1 %v1717_v38  ;;  %v331_v38 = vrot.slane %v326_v34, %v330_v33 }
  0x6b   : > { %1249 = vmatprep.subr.bf16.mxu1 %v1725_v39 }
  0x6d   : > { %1207 = vmatpush2.bf16.msra.mxu0 %v1720_v40  ;;  %v335_v40 = vrot.slane %v326_v34, %v334_v35 }
  0x6e   : > { %1208 = vmatprep.subr.bf16.mxu0 %v1728_v41  ;;  %1250 = vmatpush2.bf16.msra.mxu1 %v1723_v42 }
  0x6f   : > { %1251 = vmatprep.subr.bf16.mxu1 %v1731_v43 }
  0x71   : > { %1209 = vmatpush2.bf16.msra.mxu0 %v1726_v44 }
  0x72   : > { %1210 = vmatprep.subr.bf16.mxu0 %v1734_v45  ;;  %1252 = vmatpush2.bf16.msra.mxu1 %v1729_v46 }
  0x73   : > { %1253 = vmatprep.subr.bf16.mxu1 %v1737_v47 }
  0x75   : > { %1211 = vmatpush2.bf16.msra.mxu0 %v1732_v48 }
  0x76   : > { %1212 = vmatprep.subr.bf16.mxu0 %v1740_v49  ;;  %1254 = vmatpush2.bf16.msra.mxu1 %v1735_v50 }
  0x77   : > { %1255 = vmatprep.subr.bf16.mxu1 %v1743_v51 }
  0x79   : > { %1213 = vmatpush2.bf16.msra.mxu0 %v1738_v52 }
  0x7a   : > { %1214 = vmatprep.subr.bf16.mxu0 %v1746_v53  ;;  %1256 = vmatpush2.bf16.msra.mxu1 %v1741_v54 }
  0x7b   : > { %1257 = vmatprep.subr.bf16.mxu1 %v1749_v55 }
  0x7d   : > { %1215 = vmatpush2.bf16.msra.mxu0 %v1744_v56 }
  0x7e   : > { %1216 = vmatprep.subr.bf16.mxu0 %v1752_v57  ;;  %1258 = vmatpush2.bf16.msra.mxu1 %v1747_v58 }
  0x7f   : > { %1259 = vmatprep.subr.bf16.mxu1 %v1755_v59 }
  0x81   : > { %1217 = vmatpush2.bf16.msra.mxu0 %v1750_v60 }
  0x82   : > { %1218 = vmatprep.subr.bf16.mxu0 %v1758_v61  ;;  %1260 = vmatpush2.bf16.msra.mxu1 %v1753_v62 }
  0x83   : > { %1261 = vmatprep.subr.bf16.mxu1 %v1761_v63 }
  0x85   : > { %1219 = vmatpush2.bf16.msra.mxu0 %v1756_v0 }
  0x86   : > { %1220 = vmatprep.subr.bf16.mxu0 %v1764_v1  ;;  %1262 = vmatpush2.bf16.msra.mxu1 %v1759_v2 }
  0x87   : > { %1263 = vmatprep.subr.bf16.mxu1 %v1767_v3 }
  0x89   : > { %1221 = vmatpush2.bf16.msra.mxu0 %v1762_v4 }
  0x8a   : > { %1276 = vmatprep.subr.bf16.mxu0 %v1773_v5  ;;  %1264 = vmatpush2.bf16.msra.mxu1 %v1765_v6 }
  0x8c   : > { %1223 = vmatmul.mubr.bf16.vlgmr.msra.gmra.mxu0 %v1768_v7 }
  0x8d   : > { %1277 = vmatpush1.bf16.msra.mxu0 %v1771_v8  ;;  %1308 = vmatprep.mubr.bf16.mxu0 %v1807_v12 }
  0x8e   : > { %1266 = vmatmul.mubr.bf16.vlgmr.msra.gmra.mxu1 %v1774_v9  ;;  %1278 = vmatprep.subr.bf16.mxu0 %v1779_v10 }
  0x91   : > { %1279 = vmatpush1.bf16.msra.mxu0 %v1777_v11 }
  0x92   : > { %1280 = vmatprep.subr.bf16.mxu0 %v1782_v13 }
  0x95   : > { %1281 = vmatpush1.bf16.msra.mxu0 %v1780_v14 }
  0x96   : > { %1282 = vmatprep.subr.bf16.mxu0 %v1785_v15 }
  0x99   : > { %1283 = vmatpush1.bf16.msra.mxu0 %v1783_v16 }
  0x9a   : > { %1284 = vmatprep.subr.bf16.mxu0 %v1788_v17 }
  0x9d   : > { %1285 = vmatpush1.bf16.msra.mxu0 %v1786_v18 }
  0x9e   : > { %1286 = vmatprep.subr.bf16.mxu0 %v1791_v19 }
  0xa1   : > { %1287 = vmatpush1.bf16.msra.mxu0 %v1789_v20 }
  0xa2   : > { %1288 = vmatprep.subr.bf16.mxu0 %v1794_v21 }
  0xa5   : > { %1289 = vmatpush1.bf16.msra.mxu0 %v1792_v22 }
  0xa6   : > { %1290 = vmatprep.subr.bf16.mxu0 %v1797_v23 }
  0xa9   : > { %1291 = vmatpush1.bf16.msra.mxu0 %v1795_v24 }
  0xac   : > { %1309 = vmatmul.mubr.bf16.vlgmr.msra.gmra.mxu0 %v1798_v25 }
 0x10c   : > { %v1138_v26 = vpop.f32.mrf.mxu0 }
 0x10d   : > { %v1181_v29 = vpop.f32.mrf.mxu1  ;;  %v1139_v42 = vadd.f32 %v1138_v26, %v331_v38 }
 0x10e   : > { %v1140_v28 = vpop.f32.mrf.mxu0 }
 0x10f   : > { %v1183_v32 = vpop.f32.mrf.mxu1  ;;  %v1141_v45 = vadd.f32 %v1140_v28, %v335_v40  ;;  %v1182_v46 = vadd.f32 %v1181_v29, %v1139_v42 }
 0x110   : > { %v1142_v31 = vpop.f32.mrf.mxu0 }
 0x111   : > { %v1185_v37 = vpop.f32.mrf.mxu1  ;;  %v1143_v47 = vadd.f32 %v1142_v31, %v331_v38  ;;  %v1184_v50 = vadd.f32 %v1183_v32, %v1141_v45 }
 0x112   : > { %v1144_v36 = vpop.f32.mrf.mxu0 }
 0x113   : > { %v1187_v41 = vpop.f32.mrf.mxu1  ;;  %v1145_v51 = vadd.f32 %v1144_v36, %v335_v40  ;;  %v1186_v53 = vadd.f32 %v1185_v37, %v1143_v47 }
 0x115   : > { %v1188_v57 = vadd.f32 %v1187_v41, %v1145_v51 }
 0x14c   : > { %v1224_v39 = vpop.f32.mrf.mxu0 }
 0x14d   : > { %v1225_v52 = vadd.f32 %v1224_v39, %v1182_v46 }
 0x14e   : > { %v1226_v43 = vpop.f32.mrf.mxu0  ;;  %v1267_v44 = vpop.f32.mrf.mxu1 }
 0x14f   : > { %v1227_v54 = vadd.f32 %v1226_v43, %v1184_v50  ;;  %v1268_v58 = vadd.f32 %v1267_v44, %v1225_v52 }
 0x150   : > { %v1228_v48 = vpop.f32.mrf.mxu0  ;;  %v1269_v49 = vpop.f32.mrf.mxu1 }
 0x151   : > { %v1229_v59 = vadd.f32 %v1228_v48, %v1186_v53  ;;  %v1270_v61 = vadd.f32 %v1269_v49, %v1227_v54 }
 0x152   : > { %v1230_v55 = vpop.f32.mrf.mxu0  ;;  %v1271_v56 = vpop.f32.mrf.mxu1 }
 0x153   : > { %v1231_v62 = vadd.f32 %v1230_v55, %v1188_v57  ;;  %v1272_v2 = vadd.f32 %v1271_v56, %v1229_v59 }
 0x154   : > { %v1273_v0 = vpop.f32.mrf.mxu1 }
 0x155   : > { %v1274_v5 = vadd.f32 %v1273_v0, %v1231_v62 }
 0x16c   : > { %v1310_v60 = vpop.f32.mrf.mxu0 }
 0x16d   : > { %v1311_v63 = vadd.f32 %v1310_v60, %v1268_v58 }
 0x16e   : > { %v1312_v1 = vpop.f32.mrf.mxu0 }
 0x16f   : > { %v1313_v3 = vadd.f32 %v1312_v1, %v1270_v61  ;;  %v1319_v6 = vmax.f32 %v1311_v63, 0.0 }
 0x170   : > { %v1314_v4 = vpop.f32.mrf.mxu0 }
 0x171   : > { %v1320_v7 = vmax.f32 %v1313_v3, 0.0  ;;  %v1315_v8 = vadd.f32 %v1314_v4, %v1272_v2 }
 0x172   : > { %v1316_v9 = vpop.f32.mrf.mxu0 }
 0x173   : > { %v1558_v10 = vpack.c.bf16 %v1320_v7, %v1319_v6  ;;  %v1317_v11 = vadd.f32 %v1316_v9, %v1274_v5  ;;  %v1321_v12 = vmax.f32 %v1315_v8, 0.0 }
 0x175   : > { %1335 = vst [vmem:[%s170_s18] sm:$0xff] %v1558_v10  ;;  %v1322_v13 = vmax.f32 %v1317_v11, 0.0 }
 0x177   : > { %v1559_v14 = vpack.c.bf16 %v1322_v13, %v1321_v12 }
 0x179   : > { %1336 = vst [vmem:[%s170_s18 + $0x8] sm:$0xff] %v1559_v14 }
 0x17a PF: > { %s13_s12 = sadd.s32 1, %s1805_s12  }
 0x17b   : > { %p10_p4 = scmp.ge.s32.totalorder %s13_s12, 6  }
 0x17d   :  { %12 = sbr.rel (!%p10_p4) target bundleno = 1 (0x1), region = 62 }

// kernel: human_guided_loss.14
= control target key start
LH: loop header
LB: loop body
LE: loop exit
PB: predicated region body
PF: predicated region fallthrough
CT: control target
= control target key end

     0   :  { %s3296_s12 = smov 0   ;;  %s4208_s0 = inlined_call_operand.vmem [shape: bf16[4,16,2304], index: 0, kind: input, shape index: {}]   ;;  %s4209_s1 = inlined_call_operand.vmem [shape: bf16[2304,256], index: 1, kind: input, shape index: {}]   ;;  %s4210_s2 = inlined_call_operand.vmem [shape: f32[1,256], index: 2, kind: input, shape index: {}]   ;;  %s4211_s3 = inlined_call_operand.vmem [shape: bf16[4,16,256], index: 3, kind: output, shape index: {}]  }
   0x1 LB: > { %s2479_s13 = sadd.s32 4294967295, %s3274_s12   ;;  %p2483_p0 = scmp.ge.s32.totalorder %s3274_s12, 1  ;;  %s3274_s12 = sphi %s3296_s12, %s13_s12  }
   0x2   : > { %p137_p1 = scmp.lt.s32.totalorder %s3274_s12, 5 }
   0x4   : > { %p138_p2 = pnand %p2483_p0, %p137_p1 }
   0x5   : > { %p161_p3 = scmp.lt.s32.totalorder (!%p138_p2), %s2479_s13, 3 }
   0x6   : > { %141 = sbr.rel (%p138_p2) target bundleno = 538 (0x21a), region = 32 }
   0xb   : > { %v2809_v0 = vld [vmem:[%s4209_s1 + $0x74] ss:$8 sps:$4 sm:$0xff]   ;;  %v2811_v1 = vld [vmem:[%s4209_s1 + $0x70] ss:$8 sps:$4 sm:$0xff]   ;;  %v2815_v4 = vld [vmem:[%s4209_s1 + $0x64] ss:$8 sps:$4 sm:$0xff]  }
   0xc   : > { %2019 = vmatprep.subr.bf16.mxu0 %v2809_v0  ;;  %v2812_v2 = vld [vmem:[%s4209_s1 + $0x174] ss:$8 sps:$4 sm:$0xff]   ;;  %v2814_v3 = vld [vmem:[%s4209_s1 + $0x170] ss:$8 sps:$4 sm:$0xff]   ;;  %v2817_v5 = vld [vmem:[%s4209_s1 + $0x60] ss:$8 sps:$4 sm:$0xff]  }
   0xd   : > { %2020 = vmatpush1.bf16.msra.mxu0 %v2811_v1  ;;  %2062 = vmatprep.subr.bf16.mxu1 %v2812_v2  ;;  %v2818_v6 = vld [vmem:[%s4209_s1 + $0x164] ss:$8 sps:$4 sm:$0xff]   ;;  %v2820_v7 = vld [vmem:[%s4209_s1 + $0x160] ss:$8 sps:$4 sm:$0xff]   ;;  %v2821_v8 = vld [vmem:[%s4209_s1 + $0x54] ss:$8 sps:$4 sm:$0xff]  }
   0xe   : > { %2063 = vmatpush1.bf16.msra.mxu1 %v2814_v3  ;;  %2021 = vmatprep.subr.bf16.mxu0 %v2815_v4  ;;  %v2823_v9 = vld [vmem:[%s4209_s1 + $0x50] ss:$8 sps:$4 sm:$0xff]   ;;  %v2824_v10 = vld [vmem:[%s4209_s1 + $0x154] ss:$8 sps:$4 sm:$0xff]   ;;  %v2827_v11 = vld [vmem:[%s4209_s1 + $0x44] ss:$8 sps:$4 sm:$0xff]  }
   0xf   : > { %2064 = vmatprep.subr.bf16.mxu1 %v2818_v6  ;;  %v2826_v12 = vld [vmem:[%s4209_s1 + $0x150] ss:$8 sps:$4 sm:$0xff]   ;;  %v2830_v13 = vld [vmem:[%s4209_s1 + $0x144] ss:$8 sps:$4 sm:$0xff]   ;;  %v2829_v14 = vld [vmem:[%s4209_s1 + $0x40] ss:$8 sps:$4 sm:$0xff]  }
  0x10   : > { %v2833_v15 = vld [vmem:[%s4209_s1 + $0x34] ss:$8 sps:$4 sm:$0xff]   ;;  %v2832_v16 = vld [vmem:[%s4209_s1 + $0x140] ss:$8 sps:$4 sm:$0xff]   ;;  %v2835_v18 = vld [vmem:[%s4209_s1 + $0x30] ss:$8 sps:$4 sm:$0xff]  }
  0x11   : > { %2022 = vmatpush1.bf16.msra.mxu0 %v2817_v5  ;;  %v2836_v17 = vld [vmem:[%s4209_s1 + $0x134] ss:$8 sps:$4 sm:$0xff]   ;;  %v2839_v19 = vld [vmem:[%s4209_s1 + $0x24] ss:$8 sps:$4 sm:$0xff]   ;;  %v2838_v20 = vld [vmem:[%s4209_s1 + $0x130] ss:$8 sps:$4 sm:$0xff]  }
  0x12   : > { %2023 = vmatprep.subr.bf16.mxu0 %v2821_v8  ;;  %2065 = vmatpush1.bf16.msra.mxu1 %v2820_v7  ;;  %v2842_v21 = vld [vmem:[%s4209_s1 + $0x124] ss:$8 sps:$4 sm:$0xff]   ;;  %v2841_v22 = vld [vmem:[%s4209_s1 + $0x20] ss:$8 sps:$4 sm:$0xff]   ;;  %v2845_v23 = vld [vmem:[%s4209_s1 + $0x14] ss:$8 sps:$4 sm:$0xff]  }
  0x13   : > { %2066 = vmatprep.subr.bf16.mxu1 %v2824_v10  ;;  %v2844_v24 = vld [vmem:[%s4209_s1 + $0x120] ss:$8 sps:$4 sm:$0xff]   ;;  %v2848_v25 = vld [vmem:[%s4209_s1 + $0x114] ss:$8 sps:$4 sm:$0xff]   ;;  %v2847_v26 = vld [vmem:[%s4209_s1 + $0x10] ss:$8 sps:$4 sm:$0xff]  }
  0x14   : > { %v2851_v27 = vld [vmem:[%s4209_s1 + $0x4] ss:$8 sps:$4 sm:$0xff]   ;;  %v2850_v28 = vld [vmem:[%s4209_s1 + $0x110] ss:$8 sps:$4 sm:$0xff]   ;;  %v2853_v30 = vld [vmem:[%s4209_s1] ss:$8 sps:$4 sm:$0xff]  }
  0x15   : > { %2024 = vmatpush1.bf16.msra.mxu0 %v2823_v9  ;;  %v2854_v29 = vld [vmem:[%s4209_s1 + $0x104] ss:$8 sps:$4 sm:$0xff]   ;;  %v2857_v31 = vld [vmem:[%s4209_s1 + $0xf4] ss:$8 sps:$4 sm:$0xff]   ;;  %v2856_v32 = vld [vmem:[%s4209_s1 + $0x100] ss:$8 sps:$4 sm:$0xff]  }
  0x16   : > { %2025 = vmatprep.subr.bf16.mxu0 %v2827_v11  ;;  %2067 = vmatpush1.bf16.msra.mxu1 %v2826_v12  ;;  %v2860_v33 = vld [vmem:[%s4209_s1 + $0x1f4] ss:$8 sps:$4 sm:$0xff]   ;;  %v2859_v34 = vld [vmem:[%s4209_s1 + $0xf0] ss:$8 sps:$4 sm:$0xff]   ;;  %v2863_v35 = vld [vmem:[%s4209_s1 + $0xe4] ss:$8 sps:$4 sm:$0xff]  }
  0x17   : > { %2068 = vmatprep.subr.bf16.mxu1 %v2830_v13  ;;  %s4213_s13 = smov (!%p161_p3, %s2479_s13), 3  ;;  %v2862_v36 = vld [vmem:[%s4209_s1 + $0x1f0] ss:$8 sps:$4 sm:$0xff]   ;;  %v2866_v37 = vld [vmem:[%s4209_s1 + $0x1e4] ss:$8 sps:$4 sm:$0xff]  }
  0x18   : > { %v2865_v38 = vld [vmem:[%s4209_s1 + $0xe0] ss:$8 sps:$4 sm:$0xff]   ;;  %v2869_v39 = vld [vmem:[%s4209_s1 + $0xd4] ss:$8 sps:$4 sm:$0xff]   ;;  %s2800_s19 = smul.u32 144, %s4213_s13  ;;  %s2797_s15 = sshll.u32 %s4213_s13, 4 }
  0x19   : > { %2026 = vmatpush1.bf16.msra.mxu0 %v2829_v14  ;;  %v2868_v40 = vld [vmem:[%s4209_s1 + $0x1e0] ss:$8 sps:$4 sm:$0xff]   ;;  %v2872_v41 = vld [vmem:[%s4209_s1 + $0x1d4] ss:$8 sps:$4 sm:$0xff]   ;;  %v2871_v42 = vld [vmem:[%s4209_s1 + $0xd0] ss:$8 sps:$4 sm:$0xff]   ;;  %s170_s18 = scalar_lea.vmem %s4211_s3, %s2797_s15 }
  0x1a   : > { %2027 = vmatprep.subr.bf16.mxu0 %v2833_v15  ;;  %2069 = vmatpush1.bf16.msra.mxu1 %v2832_v16  ;;  %v2875_v43 = vld [vmem:[%s4209_s1 + $0xc4] ss:$8 sps:$4 sm:$0xff]   ;;  %s3446_s30 = scalar_lea.vmem %s4208_s0, %s2800_s19  ;;  %v2874_v44 = vld [vmem:[%s4209_s1 + $0x1d0] ss:$8 sps:$4 sm:$0xff]   ;;  %v2877_v46 = vld [vmem:[%s4209_s1 + $0xc0] ss:$8 sps:$4 sm:$0xff]  }
  0x1b   : > { %2070 = vmatprep.subr.bf16.mxu1 %v2836_v17  ;;  %v2878_v45 = vld [vmem:[%s4209_s1 + $0x1c4] ss:$8 sps:$4 sm:$0xff]   ;;  %v2881_v48 = vld [vmem:[%s4209_s1 + $0xb4] ss:$8 sps:$4 sm:$0xff]   ;;  %v2880_v49 = vld [vmem:[%s4209_s1 + $0x1c0] ss:$8 sps:$4 sm:$0xff]  }
  0x1c   : > { %v2906_v47 = vld [vmem:[%s3446_s30 + $0x4] ss:$72 sps:$4 sm:$0xff]   ;;  %v2884_v50 = vld [vmem:[%s4209_s1 + $0x1b4] ss:$8 sps:$4 sm:$0xff]   ;;  %v2883_v52 = vld [vmem:[%s4209_s1 + $0xb0] ss:$8 sps:$4 sm:$0xff]  }
  0x1d   : > { %2028 = vmatpush1.bf16.msra.mxu0 %v2835_v18  ;;  %2051 = vmatprep.mubr.bf16.mxu0 %v2906_v47  ;;  %v2913_v51 = vld [vmem:[%s3446_s30 + $0xc] ss:$72 sps:$4 sm:$0xff]   ;;  %v2886_v54 = vld [vmem:[%s4209_s1 + $0x1b0] ss:$8 sps:$4 sm:$0xff]   ;;  %v2889_v56 = vld [vmem:[%s4209_s1 + $0xa0] ss:$8 sps:$4 sm:$0xff]  }
  0x1e   : > { %2029 = vmatprep.subr.bf16.mxu0 %v2839_v19  ;;  %2071 = vmatpush1.bf16.msra.mxu1 %v2838_v20  ;;  %v2887_v53 = vld [vmem:[%s4209_s1 + $0xa4] ss:$8 sps:$4 sm:$0xff]   ;;  %v2893_v57 = vld [vmem:[%s4209_s1 + $0x94] ss:$8 sps:$4 sm:$0xff]   ;;  %v2892_v58 = vld [vmem:[%s4209_s1 + $0x1a0] ss:$8 sps:$4 sm:$0xff]  }
  0x1f   : > { %2072 = vmatprep.subr.bf16.mxu1 %v2842_v21  ;;  %2094 = vmatprep.mubr.bf16.mxu1 %v2913_v51  ;;  %v2890_v55 = vld [vmem:[%s4209_s1 + $0x1a4] ss:$8 sps:$4 sm:$0xff]   ;;  %v2896_v59 = vld [vmem:[%s4209_s1 + $0x194] ss:$8 sps:$4 sm:$0xff]   ;;  %v2895_v60 = vld [vmem:[%s4209_s1 + $0x90] ss:$8 sps:$4 sm:$0xff]  }
  0x20   : > { %v2899_v61 = vld [vmem:[%s4209_s1 + $0x84] ss:$8 sps:$4 sm:$0xff]   ;;  %v2898_v62 = vld [vmem:[%s4209_s1 + $0x190] ss:$8 sps:$4 sm:$0xff]   ;;  %v2901_v0 = vld [vmem:[%s4209_s1 + $0x80] ss:$8 sps:$4 sm:$0xff]  }
  0x21   : > { %2030 = vmatpush1.bf16.msra.mxu0 %v2841_v22  ;;  %v2902_v63 = vld [vmem:[%s4209_s1 + $0x184] ss:$8 sps:$4 sm:$0xff]   ;;  %v2910_v1 = vld [vmem:[%s4209_s1 + $0x274] ss:$8 sps:$4 sm:$0xff]   ;;  %v2907_v2 = vld [vmem:[%s4209_s1 + $0x180] ss:$8 sps:$4 sm:$0xff]  }
  0x22   : > { %2031 = vmatprep.subr.bf16.mxu0 %v2845_v23  ;;  %2073 = vmatpush1.bf16.msra.mxu1 %v2844_v24  ;;  %v2904_v3 = vld [vmem:[%s3446_s30] ss:$72 sps:$4 sm:$0xff]   ;;  %v2916_v4 = vld [vmem:[%s4209_s1 + $0x374] ss:$8 sps:$4 sm:$0xff]   ;;  %v2908_v5 = vld [vmem:[%s4209_s1 + $0x270] ss:$8 sps:$4 sm:$0xff]  }
  0x23   : > { %2074 = vmatprep.subr.bf16.mxu1 %v2848_v25  ;;  %v2911_v6 = vld [vmem:[%s3446_s30 + $0x8] ss:$72 sps:$4 sm:$0xff]   ;;  %v2919_v7 = vld [vmem:[%s4209_s1 + $0x264] ss:$8 sps:$4 sm:$0xff]   ;;  %v2925_v11 = vld [vmem:[%s4209_s1 + $0x254] ss:$8 sps:$4 sm:$0xff]  }
  0x24   : > { %v2914_v8 = vld [vmem:[%s4209_s1 + $0x370] ss:$8 sps:$4 sm:$0xff]   ;;  %v2922_v9 = vld [vmem:[%s4209_s1 + $0x364] ss:$8 sps:$4 sm:$0xff]   ;;  %v2917_v10 = vld [vmem:[%s4209_s1 + $0x260] ss:$8 sps:$4 sm:$0xff]  }
  0x25   : > { %2032 = vmatpush1.bf16.msra.mxu0 %v2847_v26  ;;  %v2920_v12 = vld [vmem:[%s4209_s1 + $0x360] ss:$8 sps:$4 sm:$0xff]   ;;  %v2928_v13 = vld [vmem:[%s4209_s1 + $0x354] ss:$8 sps:$4 sm:$0xff]   ;;  %v2923_v14 = vld [vmem:[%s4209_s1 + $0x250] ss:$8 sps:$4 sm:$0xff]  }
  0x26   : > { %2033 = vmatprep.subr.bf16.mxu0 %v2851_v27  ;;  %2075 = vmatpush1.bf16.msra.mxu1 %v2850_v28  ;;  %v2931_v15 = vld [vmem:[%s4209_s1 + $0x244] ss:$8 sps:$4 sm:$0xff]   ;;  %v2926_v16 = vld [vmem:[%s4209_s1 + $0x350] ss:$8 sps:$4 sm:$0xff]   ;;  %v2929_v18 = vld [vmem:[%s4209_s1 + $0x240] ss:$8 sps:$4 sm:$0xff]  }
  0x27   : > { %2076 = vmatprep.subr.bf16.mxu1 %v2854_v29  ;;  %v2934_v17 = vld [vmem:[%s4209_s1 + $0x344] ss:$8 sps:$4 sm:$0xff]   ;;  %v2937_v19 = vld [vmem:[%s4209_s1 + $0x234] ss:$8 sps:$4 sm:$0xff]   ;;  %v2932_v20 = vld [vmem:[%s4209_s1 + $0x340] ss:$8 sps:$4 sm:$0xff]  }
  0x28   : > { %v2940_v21 = vld [vmem:[%s4209_s1 + $0x334] ss:$8 sps:$4 sm:$0xff]   ;;  %v2935_v22 = vld [vmem:[%s4209_s1 + $0x230] ss:$8 sps:$4 sm:$0xff]   ;;  %v2943_v23 = vld [vmem:[%s4209_s1 + $0x224] ss:$8 sps:$4 sm:$0xff]  }
  0x29   : > { %2034 = vmatpush1.bf16.msra.mxu0 %v2853_v30  ;;  %v2938_v24 = vld [vmem:[%s4209_s1 + $0x330] ss:$8 sps:$4 sm:$0xff]   ;;  %v2946_v25 = vld [vmem:[%s4209_s1 + $0x324] ss:$8 sps:$4 sm:$0xff]   ;;  %v2941_v26 = vld [vmem:[%s4209_s1 + $0x220] ss:$8 sps:$4 sm:$0xff]  }
  0x2a   : > { %2035 = vmatprep.subr.bf16.mxu0 %v2857_v31  ;;  %2077 = vmatpush1.bf16.msra.mxu1 %v2856_v32  ;;  %v2949_v27 = vld [vmem:[%s4209_s1 + $0x214] ss:$8 sps:$4 sm:$0xff]   ;;  %v2944_v28 = vld [vmem:[%s4209_s1 + $0x320] ss:$8 sps:$4 sm:$0xff]   ;;  %v2947_v30 = vld [vmem:[%s4209_s1 + $0x210] ss:$8 sps:$4 sm:$0xff]  }
  0x2b   : > { %2078 = vmatprep.subr.bf16.mxu1 %v2860_v33  ;;  %v2952_v29 = vld [vmem:[%s4209_s1 + $0x314] ss:$8 sps:$4 sm:$0xff]   ;;  %v2950_v31 = vld [vmem:[%s4209_s1 + $0x310] ss:$8 sps:$4 sm:$0xff]   ;;  %v2955_v32 = vld [vmem:[%s4209_s1 + $0x204] ss:$8 sps:$4 sm:$0xff]  }
  0x2c   : > { %v3009_v33 = vld [vmem:[%s3446_s30 + $0x14] ss:$72 sps:$4 sm:$0xff]   ;;  %v2982_v51 = vld [vmem:[%s4209_s1 + $0x3c4] ss:$8 sps:$4 sm:$0xff]  }
  0x2d   : > { %2036 = vmatpush2.bf16.msra.mxu0 %v2859_v34  ;;  %v2958_v34 = vld [vmem:[%s4209_s1 + $0x304] ss:$8 sps:$4 sm:$0xff]   ;;  %v2976_v47 = vld [vmem:[%s4209_s1 + $0x3d4] ss:$8 sps:$4 sm:$0xff]  }
  0x2e   : > { %2037 = vmatprep.subr.bf16.mxu0 %v2863_v35  ;;  %2079 = vmatpush2.bf16.msra.mxu1 %v2862_v36  ;;  %v2953_v35 = vld [vmem:[%s4209_s1 + $0x200] ss:$8 sps:$4 sm:$0xff]   ;;  %v3015_v36 = vld [vmem:[%s3446_s30 + $0x1c] ss:$72 sps:$4 sm:$0xff]  }
  0x2f   : > { %2080 = vmatprep.subr.bf16.mxu1 %v2866_v37  ;;  %v2961_v37 = vld [vmem:[%s4209_s1 + $0x2f4] ss:$8 sps:$4 sm:$0xff]  }
  0x31   : > { %2038 = vmatpush2.bf16.msra.mxu0 %v2865_v38  ;;  %v2956_v38 = vld [vmem:[%s4209_s1 + $0x300] ss:$8 sps:$4 sm:$0xff]  }
  0x32   : > { %2039 = vmatprep.subr.bf16.mxu0 %v2869_v39  ;;  %2081 = vmatpush2.bf16.msra.mxu1 %v2868_v40  ;;  %v2964_v39 = vld [vmem:[%s4209_s1 + $0x3f4] ss:$8 sps:$4 sm:$0xff]   ;;  %v2959_v40 = vld [vmem:[%s4209_s1 + $0x2f0] ss:$8 sps:$4 sm:$0xff]  }
  0x33   : > { %2082 = vmatprep.subr.bf16.mxu1 %v2872_v41  ;;  %v2967_v41 = vld [vmem:[%s4209_s1 + $0x2e4] ss:$8 sps:$4 sm:$0xff]  }
  0x35   : > { %2040 = vmatpush2.bf16.msra.mxu0 %v2871_v42  ;;  %v2962_v42 = vld [vmem:[%s4209_s1 + $0x3f0] ss:$8 sps:$4 sm:$0xff]  }
  0x36   : > { %2041 = vmatprep.subr.bf16.mxu0 %v2875_v43  ;;  %2083 = vmatpush2.bf16.msra.mxu1 %v2874_v44  ;;  %v2970_v43 = vld [vmem:[%s4209_s1 + $0x3e4] ss:$8 sps:$4 sm:$0xff]   ;;  %v2965_v44 = vld [vmem:[%s4209_s1 + $0x2e0] ss:$8 sps:$4 sm:$0xff]  }
  0x37   : > { %2084 = vmatprep.subr.bf16.mxu1 %v2878_v45  ;;  %v2973_v45 = vld [vmem:[%s4209_s1 + $0x2d4] ss:$8 sps:$4 sm:$0xff]  }
  0x39   : > { %2042 = vmatpush2.bf16.msra.mxu0 %v2877_v46  ;;  %v2968_v46 = vld [vmem:[%s4209_s1 + $0x3e0] ss:$8 sps:$4 sm:$0xff]  }
  0x3a   : > { %2043 = vmatprep.subr.bf16.mxu0 %v2881_v48  ;;  %2085 = vmatpush2.bf16.msra.mxu1 %v2880_v49  ;;  %v2971_v48 = vld [vmem:[%s4209_s1 + $0x2d0] ss:$8 sps:$4 sm:$0xff]   ;;  %v2979_v49 = vld [vmem:[%s4209_s1 + $0x2c4] ss:$8 sps:$4 sm:$0xff]  }
  0x3b   : > { %2086 = vmatprep.subr.bf16.mxu1 %v2884_v50  ;;  %v2974_v50 = vld [vmem:[%s4209_s1 + $0x3d0] ss:$8 sps:$4 sm:$0xff]  }
  0x3d   : > { %2044 = vmatpush2.bf16.msra.mxu0 %v2883_v52  ;;  %v2977_v52 = vld [vmem:[%s4209_s1 + $0x2c0] ss:$8 sps:$4 sm:$0xff]  }
  0x3e   : > { %2045 = vmatprep.subr.bf16.mxu0 %v2887_v53  ;;  %2087 = vmatpush2.bf16.msra.mxu1 %v2886_v54  ;;  %v2985_v53 = vld [vmem:[%s4209_s1 + $0x2b4] ss:$8 sps:$4 sm:$0xff]   ;;  %v2980_v54 = vld [vmem:[%s4209_s1 + $0x3c0] ss:$8 sps:$4 sm:$0xff]  }
  0x3f   : > { %2088 = vmatprep.subr.bf16.mxu1 %v2890_v55  ;;  %v2988_v55 = vld [vmem:[%s4209_s1 + $0x3b4] ss:$8 sps:$4 sm:$0xff]  }
  0x41   : > { %2046 = vmatpush2.bf16.msra.mxu0 %v2889_v56  ;;  %v2983_v56 = vld [vmem:[%s4209_s1 + $0x2b0] ss:$8 sps:$4 sm:$0xff]  }
  0x42   : > { %2047 = vmatprep.subr.bf16.mxu0 %v2893_v57  ;;  %2089 = vmatpush2.bf16.msra.mxu1 %v2892_v58  ;;  %v2991_v57 = vld [vmem:[%s4209_s1 + $0x2a4] ss:$8 sps:$4 sm:$0xff]   ;;  %v2986_v58 = vld [vmem:[%s4209_s1 + $0x3b0] ss:$8 sps:$4 sm:$0xff]  }
  0x43   : > { %2090 = vmatprep.subr.bf16.mxu1 %v2896_v59  ;;  %v2994_v59 = vld [vmem:[%s4209_s1 + $0x3a4] ss:$8 sps:$4 sm:$0xff]  }
  0x45   : > { %2048 = vmatpush2.bf16.msra.mxu0 %v2895_v60  ;;  %v2989_v60 = vld [vmem:[%s4209_s1 + $0x2a0] ss:$8 sps:$4 sm:$0xff]  }
  0x46   : > { %2049 = vmatprep.subr.bf16.mxu0 %v2899_v61  ;;  %2091 = vmatpush2.bf16.msra.mxu1 %v2898_v62  ;;  %v2997_v61 = vld [vmem:[%s4209_s1 + $0x294] ss:$8 sps:$4 sm:$0xff]   ;;  %v2992_v62 = vld [vmem:[%s4209_s1 + $0x3a0] ss:$8 sps:$4 sm:$0xff]  }
  0x47   : > { %2092 = vmatprep.subr.bf16.mxu1 %v2902_v63  ;;  %v3000_v63 = vld [vmem:[%s4209_s1 + $0x394] ss:$8 sps:$4 sm:$0xff]  }
  0x49   : > { %2050 = vmatpush2.bf16.msra.mxu0 %v2901_v0  ;;  %v2995_v0 = vld [vmem:[%s4209_s1 + $0x290] ss:$8 sps:$4 sm:$0xff]  }
  0x4a   : > { %2105 = vmatprep.subr.bf16.mxu0 %v2910_v1  ;;  %2093 = vmatpush2.bf16.msra.mxu1 %v2907_v2  ;;  %v3003_v1 = vld [vmem:[%s4209_s1 + $0x284] ss:$8 sps:$4 sm:$0xff]   ;;  %v2998_v2 = vld [vmem:[%s4209_s1 + $0x390] ss:$8 sps:$4 sm:$0xff]  }
  0x4b   : > { %2148 = vmatprep.subr.bf16.mxu1 %v2916_v4  ;;  %v3001_v4 = vld [vmem:[%s4209_s1 + $0x280] ss:$8 sps:$4 sm:$0xff]  }
  0x4c   : > { %2052 = vmatmul.mubr.bf16.vlgmr.msra.gmra.mxu0 %v2904_v3  ;;  %v3006_v3 = vld [vmem:[%s4209_s1 + $0x384] ss:$8 sps:$4 sm:$0xff]  }
  0x4d   : > { %2106 = vmatpush1.bf16.msra.mxu0 %v2908_v5  ;;  %2095 = vmatmul.mubr.bf16.vlgmr.msra.gmra.mxu1 %v2911_v6  ;;  %v3012_v5 = vld [vmem:[%s4209_s1 + $0x474] ss:$8 sps:$4 sm:$0xff]   ;;  %v3004_v6 = vld [vmem:[%s4209_s1 + $0x380] ss:$8 sps:$4 sm:$0xff]  }
  0x4e   : > { %2107 = vmatprep.subr.bf16.mxu0 %v2919_v7  ;;  %2149 = vmatpush1.bf16.msra.mxu1 %v2914_v8  ;;  %v3007_v7 = vld [vmem:[%s3446_s30 + $0x10] ss:$72 sps:$4 sm:$0xff]   ;;  %v3018_v8 = vld [vmem:[%s4209_s1 + $0x574] ss:$8 sps:$4 sm:$0xff]  }
  0x4f   : > { %2150 = vmatprep.subr.bf16.mxu1 %v2922_v9  ;;  %2137 = vmatprep.mubr.bf16.mxu0 %v3009_v33  ;;  %v3010_v9 = vld [vmem:[%s4209_s1 + $0x470] ss:$8 sps:$4 sm:$0xff]   ;;  %v3051_v33 = vld [vmem:[%s4209_s1 + $0x414] ss:$8 sps:$4 sm:$0xff]  }
  0x50   : > { %2180 = vmatprep.mubr.bf16.mxu1 %v3015_v36  ;;  %v3049_v36 = vld [vmem:[%s4209_s1 + $0x410] ss:$8 sps:$4 sm:$0xff]  }
  0x51   : > { %2108 = vmatpush1.bf16.msra.mxu0 %v2917_v10  ;;  %v3013_v10 = vld [vmem:[%s3446_s30 + $0x18] ss:$72 sps:$4 sm:$0xff]  }
  0x52   : > { %2109 = vmatprep.subr.bf16.mxu0 %v2925_v11  ;;  %2151 = vmatpush1.bf16.msra.mxu1 %v2920_v12  ;;  %v3021_v11 = vld [vmem:[%s4209_s1 + $0x464] ss:$8 sps:$4 sm:$0xff]   ;;  %v3016_v12 = vld [vmem:[%s4209_s1 + $0x570] ss:$8 sps:$4 sm:$0xff]  }
  0x53   : > { %2152 = vmatprep.subr.bf16.mxu1 %v2928_v13  ;;  %v3024_v13 = vld [vmem:[%s4209_s1 + $0x564] ss:$8 sps:$4 sm:$0xff]  }
  0x55   : > { %2110 = vmatpush1.bf16.msra.mxu0 %v2923_v14  ;;  %v3019_v14 = vld [vmem:[%s4209_s1 + $0x460] ss:$8 sps:$4 sm:$0xff]  }
  0x56   : > { %2111 = vmatprep.subr.bf16.mxu0 %v2931_v15  ;;  %2153 = vmatpush1.bf16.msra.mxu1 %v2926_v16  ;;  %v3027_v15 = vld [vmem:[%s4209_s1 + $0x454] ss:$8 sps:$4 sm:$0xff]   ;;  %v3022_v16 = vld [vmem:[%s4209_s1 + $0x560] ss:$8 sps:$4 sm:$0xff]  }
  0x57   : > { %2154 = vmatprep.subr.bf16.mxu1 %v2934_v17  ;;  %v3030_v17 = vld [vmem:[%s4209_s1 + $0x554] ss:$8 sps:$4 sm:$0xff]  }
  0x59   : > { %2112 = vmatpush1.bf16.msra.mxu0 %v2929_v18  ;;  %v3111_v18 = vld [vmem:[%s3446_s30 + $0x24] ss:$72 sps:$4 sm:$0xff]  }
  0x5a   : > { %2113 = vmatprep.subr.bf16.mxu0 %v2937_v19  ;;  %2155 = vmatpush1.bf16.msra.mxu1 %v2932_v20  ;;  %v3025_v19 = vld [vmem:[%s4209_s1 + $0x450] ss:$8 sps:$4 sm:$0xff]  }
  0x5b   : > { %2156 = vmatprep.subr.bf16.mxu1 %v2940_v21  ;;  %v3028_v20 = vld [vmem:[%s4209_s1 + $0x550] ss:$8 sps:$4 sm:$0xff]   ;;  %v3033_v21 = vld [vmem:[%s4209_s1 + $0x444] ss:$8 sps:$4 sm:$0xff]  }
  0x5d   : > { %2114 = vmatpush1.bf16.msra.mxu0 %v2935_v22  ;;  %v3117_v22 = vld [vmem:[%s3446_s30 + $0x2c] ss:$72 sps:$4 sm:$0xff]  }
  0x5e   : > { %2115 = vmatprep.subr.bf16.mxu0 %v2943_v23  ;;  %2157 = vmatpush1.bf16.msra.mxu1 %v2938_v24  ;;  %v3036_v23 = vld [vmem:[%s4209_s1 + $0x544] ss:$8 sps:$4 sm:$0xff]   ;;  %v3031_v24 = vld [vmem:[%s4209_s1 + $0x440] ss:$8 sps:$4 sm:$0xff]  }
  0x5f   : > { %2158 = vmatprep.subr.bf16.mxu1 %v2946_v25  ;;  %v3039_v25 = vld [vmem:[%s4209_s1 + $0x434] ss:$8 sps:$4 sm:$0xff]  }
  0x61   : > { %2116 = vmatpush1.bf16.msra.mxu0 %v2941_v26  ;;  %v3034_v26 = vld [vmem:[%s4209_s1 + $0x540] ss:$8 sps:$4 sm:$0xff]  }
  0x62   : > { %2117 = vmatprep.subr.bf16.mxu0 %v2949_v27  ;;  %2159 = vmatpush1.bf16.msra.mxu1 %v2944_v28  ;;  %v3042_v27 = vld [vmem:[%s4209_s1 + $0x534] ss:$8 sps:$4 sm:$0xff]   ;;  %v3037_v28 = vld [vmem:[%s4209_s1 + $0x430] ss:$8 sps:$4 sm:$0xff]  }
  0x63   : > { %2160 = vmatprep.subr.bf16.mxu1 %v2952_v29  ;;  %v3045_v29 = vld [vmem:[%s4209_s1 + $0x424] ss:$8 sps:$4 sm:$0xff]  }
  0x65   : > { %2118 = vmatpush1.bf16.msra.mxu0 %v2947_v30  ;;  %v3040_v30 = vld [vmem:[%s4209_s1 + $0x530] ss:$8 sps:$4 sm:$0xff]  }
  0x66   : > { %2119 = vmatprep.subr.bf16.mxu0 %v2955_v32  ;;  %2161 = vmatpush1.bf16.msra.mxu1 %v2950_v31  ;;  %v3048_v31 = vld [vmem:[%s4209_s1 + $0x524] ss:$8 sps:$4 sm:$0xff]   ;;  %v3043_v32 = vld [vmem:[%s4209_s1 + $0x420] ss:$8 sps:$4 sm:$0xff]  }
  0x67   : > { %2162 = vmatprep.subr.bf16.mxu1 %v2958_v34  ;;  %v3046_v34 = vld [vmem:[%s4209_s1 + $0x520] ss:$8 sps:$4 sm:$0xff]  }
  0x69   : > { %2120 = vmatpush1.bf16.msra.mxu0 %v2953_v35  ;;  %v3054_v35 = vld [vmem:[%s4209_s1 + $0x514] ss:$8 sps:$4 sm:$0xff]  }
  0x6a   : > { %2121 = vmatprep.subr.bf16.mxu0 %v2961_v37  ;;  %2163 = vmatpush1.bf16.msra.mxu1 %v2956_v38  ;;  %v3057_v37 = vld [vmem:[%s4209_s1 + $0x404] ss:$8 sps:$4 sm:$0xff]   ;;  %v3052_v38 = vld [vmem:[%s4209_s1 + $0x510] ss:$8 sps:$4 sm:$0xff]  }
  0x6b   : > { %2164 = vmatprep.subr.bf16.mxu1 %v2964_v39  ;;  %v3060_v39 = vld [vmem:[%s4209_s1 + $0x504] ss:$8 sps:$4 sm:$0xff]  }
  0x6d   : > { %2122 = vmatpush2.bf16.msra.mxu0 %v2959_v40  ;;  %v3055_v40 = vld [vmem:[%s4209_s1 + $0x400] ss:$8 sps:$4 sm:$0xff]  }
  0x6e   : > { %2123 = vmatprep.subr.bf16.mxu0 %v2967_v41  ;;  %2165 = vmatpush2.bf16.msra.mxu1 %v2962_v42  ;;  %v3063_v41 = vld [vmem:[%s4209_s1 + $0x4f4] ss:$8 sps:$4 sm:$0xff]   ;;  %v3058_v42 = vld [vmem:[%s4209_s1 + $0x500] ss:$8 sps:$4 sm:$0xff]  }
  0x6f   : > { %2166 = vmatprep.subr.bf16.mxu1 %v2970_v43  ;;  %v3066_v43 = vld [vmem:[%s4209_s1 + $0x5f4] ss:$8 sps:$4 sm:$0xff]  }
  0x71   : > { %2124 = vmatpush2.bf16.msra.mxu0 %v2965_v44  ;;  %v3061_v44 = vld [vmem:[%s4209_s1 + $0x4f0] ss:$8 sps:$4 sm:$0xff]  }
  0x72   : > { %2125 = vmatprep.subr.bf16.mxu0 %v2973_v45  ;;  %2167 = vmatpush2.bf16.msra.mxu1 %v2968_v46  ;;  %v3069_v45 = vld [vmem:[%s4209_s1 + $0x4e4] ss:$8 sps:$4 sm:$0xff]   ;;  %v3064_v46 = vld [vmem:[%s4209_s1 + $0x5f0] ss:$8 sps:$4 sm:$0xff]  }
  0x73   : > { %2168 = vmatprep.subr.bf16.mxu1 %v2976_v47  ;;  %v3072_v47 = vld [vmem:[%s4209_s1 + $0x5e4] ss:$8 sps:$4 sm:$0xff]  }
  0x75   : > { %2126 = vmatpush2.bf16.msra.mxu0 %v2971_v48  ;;  %v3067_v48 = vld [vmem:[%s4209_s1 + $0x4e0] ss:$8 sps:$4 sm:$0xff]  }
  0x76   : > { %2127 = vmatprep.subr.bf16.mxu0 %v2979_v49  ;;  %2169 = vmatpush2.bf16.msra.mxu1 %v2974_v50  ;;  %v3075_v49 = vld [vmem:[%s4209_s1 + $0x4d4] ss:$8 sps:$4 sm:$0xff]   ;;  %v3070_v50 = vld [vmem:[%s4209_s1 + $0x5e0] ss:$8 sps:$4 sm:$0xff]  }
  0x77   : > { %2170 = vmatprep.subr.bf16.mxu1 %v2982_v51  ;;  %v3078_v51 = vld [vmem:[%s4209_s1 + $0x5d4] ss:$8 sps:$4 sm:$0xff]  }
  0x79   : > { %2128 = vmatpush2.bf16.msra.mxu0 %v2977_v52  ;;  %v3073_v52 = vld [vmem:[%s4209_s1 + $0x4d0] ss:$8 sps:$4 sm:$0xff]  }
  0x7a   : > { %2129 = vmatprep.subr.bf16.mxu0 %v2985_v53  ;;  %2171 = vmatpush2.bf16.msra.mxu1 %v2980_v54  ;;  %v3081_v53 = vld [vmem:[%s4209_s1 + $0x4c4] ss:$8 sps:$4 sm:$0xff]   ;;  %v3076_v54 = vld [vmem:[%s4209_s1 + $0x5d0] ss:$8 sps:$4 sm:$0xff]  }
  0x7b   : > { %2172 = vmatprep.subr.bf16.mxu1 %v2988_v55  ;;  %v3084_v55 = vld [vmem:[%s4209_s1 + $0x5c4] ss:$8 sps:$4 sm:$0xff]  }
  0x7d   : > { %2130 = vmatpush2.bf16.msra.mxu0 %v2983_v56  ;;  %v3079_v56 = vld [vmem:[%s4209_s1 + $0x4c0] ss:$8 sps:$4 sm:$0xff]  }
  0x7e   : > { %2131 = vmatprep.subr.bf16.mxu0 %v2991_v57  ;;  %2173 = vmatpush2.bf16.msra.mxu1 %v2986_v58  ;;  %v3087_v57 = vld [vmem:[%s4209_s1 + $0x4b4] ss:$8 sps:$4 sm:$0xff]   ;;  %v3082_v58 = vld [vmem:[%s4209_s1 + $0x5c0] ss:$8 sps:$4 sm:$0xff]  }
  0x7f   : > { %2174 = vmatprep.subr.bf16.mxu1 %v2994_v59  ;;  %v3090_v59 = vld [vmem:[%s4209_s1 + $0x5b4] ss:$8 sps:$4 sm:$0xff]  }
  0x81   : > { %2132 = vmatpush2.bf16.msra.mxu0 %v2989_v60  ;;  %v3085_v60 = vld [vmem:[%s4209_s1 + $0x4b0] ss:$8 sps:$4 sm:$0xff]  }
  0x82   : > { %2133 = vmatprep.subr.bf16.mxu0 %v2997_v61  ;;  %2175 = vmatpush2.bf16.msra.mxu1 %v2992_v62  ;;  %v3093_v61 = vld [vmem:[%s4209_s1 + $0x4a4] ss:$8 sps:$4 sm:$0xff]   ;;  %v3088_v62 = vld [vmem:[%s4209_s1 + $0x5b0] ss:$8 sps:$4 sm:$0xff]  }
  0x83   : > { %2176 = vmatprep.subr.bf16.mxu1 %v3000_v63  ;;  %v3096_v63 = vld [vmem:[%s4209_s1 + $0x5a4] ss:$8 sps:$4 sm:$0xff]  }
  0x85   : > { %2134 = vmatpush2.bf16.msra.mxu0 %v2995_v0  ;;  %v3091_v0 = vld [vmem:[%s4209_s1 + $0x4a0] ss:$8 sps:$4 sm:$0xff]  }
  0x86   : > { %2135 = vmatprep.subr.bf16.mxu0 %v3003_v1  ;;  %2177 = vmatpush2.bf16.msra.mxu1 %v2998_v2  ;;  %v3099_v1 = vld [vmem:[%s4209_s1 + $0x494] ss:$8 sps:$4 sm:$0xff]   ;;  %v3094_v2 = vld [vmem:[%s4209_s1 + $0x5a0] ss:$8 sps:$4 sm:$0xff]  }
  0x87   : > { %2178 = vmatprep.subr.bf16.mxu1 %v3006_v3  ;;  %v3102_v3 = vld [vmem:[%s4209_s1 + $0x594] ss:$8 sps:$4 sm:$0xff]  }
  0x89   : > { %2136 = vmatpush2.bf16.msra.mxu0 %v3001_v4  ;;  %v3097_v4 = vld [vmem:[%s4209_s1 + $0x490] ss:$8 sps:$4 sm:$0xff]  }
  0x8a   : > { %2191 = vmatprep.subr.bf16.mxu0 %v3012_v5  ;;  %2179 = vmatpush2.bf16.msra.mxu1 %v3004_v6  ;;  %v3105_v5 = vld [vmem:[%s4209_s1 + $0x484] ss:$8 sps:$4 sm:$0xff]   ;;  %v3100_v6 = vld [vmem:[%s4209_s1 + $0x590] ss:$8 sps:$4 sm:$0xff]  }
  0x8b   : > { %2234 = vmatprep.subr.bf16.mxu1 %v3018_v8  ;;  %v3108_v8 = vld [vmem:[%s4209_s1 + $0x584] ss:$8 sps:$4 sm:$0xff]  }
  0x8c   : > { %2138 = vmatmul.mubr.bf16.vlgmr.msra.gmra.mxu0 %v3007_v7  ;;  %v3103_v7 = vld [vmem:[%s4209_s1 + $0x480] ss:$8 sps:$4 sm:$0xff]  }
  0x8d   : > { %2192 = vmatpush1.bf16.msra.mxu0 %v3010_v9  ;;  %2181 = vmatmul.mubr.bf16.vlgmr.msra.gmra.mxu1 %v3013_v10  ;;  %v3106_v9 = vld [vmem:[%s4209_s1 + $0x580] ss:$8 sps:$4 sm:$0xff]   ;;  %v3114_v10 = vld [vmem:[%s4209_s1 + $0x674] ss:$8 sps:$4 sm:$0xff]  }
  0x8e   : > { %2193 = vmatprep.subr.bf16.mxu0 %v3021_v11  ;;  %2235 = vmatpush1.bf16.msra.mxu1 %v3016_v12  ;;  %v3109_v11 = vld [vmem:[%s3446_s30 + $0x20] ss:$72 sps:$4 sm:$0xff]   ;;  %v3112_v12 = vld [vmem:[%s4209_s1 + $0x670] ss:$8 sps:$4 sm:$0xff]  }
  0x8f   : > { %2236 = vmatprep.subr.bf16.mxu1 %v3024_v13  ;;  %2223 = vmatprep.mubr.bf16.mxu0 %v3111_v18  ;;  %v3115_v13 = vld [vmem:[%s3446_s30 + $0x28] ss:$72 sps:$4 sm:$0xff]   ;;  %v3219_v18 = vld [vmem:[%s3446_s30 + $0x3c] ss:$72 sps:$4 sm:$0xff]  }
  0x90   : > { %2266 = vmatprep.mubr.bf16.mxu1 %v3117_v22  ;;  %v3124_v22 = vld [vmem:[%s4209_s1 + $0x760] ss:$8 sps:$4 sm:$0xff]  }
  0x91   : > { %2194 = vmatpush1.bf16.msra.mxu0 %v3019_v14  ;;  %v3120_v14 = vld [vmem:[%s4209_s1 + $0x774] ss:$8 sps:$4 sm:$0xff]  }
  0x92   : > { %2195 = vmatprep.subr.bf16.mxu0 %v3027_v15  ;;  %2237 = vmatpush1.bf16.msra.mxu1 %v3022_v16  ;;  %v3213_v15 = vld [vmem:[%s3446_s30 + $0x34] ss:$72 sps:$4 sm:$0xff]   ;;  %v3123_v16 = vld [vmem:[%s4209_s1 + $0x664] ss:$8 sps:$4 sm:$0xff]  }
  0x93   : > { %2238 = vmatprep.subr.bf16.mxu1 %v3030_v17  ;;  %v3118_v17 = vld [vmem:[%s4209_s1 + $0x770] ss:$8 sps:$4 sm:$0xff]  }
  0x95   : > { %2196 = vmatpush1.bf16.msra.mxu0 %v3025_v19  ;;  %v3126_v19 = vld [vmem:[%s4209_s1 + $0x764] ss:$8 sps:$4 sm:$0xff]  }
  0x96   : > { %2197 = vmatprep.subr.bf16.mxu0 %v3033_v21  ;;  %2239 = vmatpush1.bf16.msra.mxu1 %v3028_v20  ;;  %v3121_v20 = vld [vmem:[%s4209_s1 + $0x660] ss:$8 sps:$4 sm:$0xff]   ;;  %v3129_v21 = vld [vmem:[%s4209_s1 + $0x654] ss:$8 sps:$4 sm:$0xff]  }
  0x97   : > { %2240 = vmatprep.subr.bf16.mxu1 %v3036_v23  ;;  %v3132_v23 = vld [vmem:[%s4209_s1 + $0x754] ss:$8 sps:$4 sm:$0xff]  }
  0x99   : > { %2198 = vmatpush1.bf16.msra.mxu0 %v3031_v24  ;;  %v3127_v24 = vld [vmem:[%s4209_s1 + $0x650] ss:$8 sps:$4 sm:$0xff]  }
  0x9a   : > { %2199 = vmatprep.subr.bf16.mxu0 %v3039_v25  ;;  %2241 = vmatpush1.bf16.msra.mxu1 %v3034_v26  ;;  %v3135_v25 = vld [vmem:[%s4209_s1 + $0x644] ss:$8 sps:$4 sm:$0xff]   ;;  %v3130_v26 = vld [vmem:[%s4209_s1 + $0x750] ss:$8 sps:$4 sm:$0xff]  }
  0x9b   : > { %2242 = vmatprep.subr.bf16.mxu1 %v3042_v27  ;;  %v3138_v27 = vld [vmem:[%s4209_s1 + $0x744] ss:$8 sps:$4 sm:$0xff]  }
  0x9d   : > { %2200 = vmatpush1.bf16.msra.mxu0 %v3037_v28  ;;  %v3133_v28 = vld [vmem:[%s4209_s1 + $0x640] ss:$8 sps:$4 sm:$0xff]  }
  0x9e   : > { %2201 = vmatprep.subr.bf16.mxu0 %v3045_v29  ;;  %2243 = vmatpush1.bf16.msra.mxu1 %v3040_v30  ;;  %v3141_v29 = vld [vmem:[%s4209_s1 + $0x634] ss:$8 sps:$4 sm:$0xff]   ;;  %v3136_v30 = vld [vmem:[%s4209_s1 + $0x740] ss:$8 sps:$4 sm:$0xff]  }
  0x9f   : > { %2244 = vmatprep.subr.bf16.mxu1 %v3048_v31  ;;  %v3144_v31 = vld [vmem:[%s4209_s1 + $0x734] ss:$8 sps:$4 sm:$0xff]  }
  0xa1   : > { %2202 = vmatpush1.bf16.msra.mxu0 %v3043_v32  ;;  %v3139_v32 = vld [vmem:[%s4209_s1 + $0x630] ss:$8 sps:$4 sm:$0xff]  }
  0xa2   : > { %2203 = vmatprep.subr.bf16.mxu0 %v3051_v33  ;;  %2245 = vmatpush1.bf16.msra.mxu1 %v3046_v34  ;;  %v3147_v33 = vld [vmem:[%s4209_s1 + $0x624] ss:$8 sps:$4 sm:$0xff]   ;;  %v3142_v34 = vld [vmem:[%s4209_s1 + $0x730] ss:$8 sps:$4 sm:$0xff]  }
  0xa3   : > { %2246 = vmatprep.subr.bf16.mxu1 %v3054_v35  ;;  %v3150_v35 = vld [vmem:[%s4209_s1 + $0x724] ss:$8 sps:$4 sm:$0xff]  }
  0xa5   : > { %2204 = vmatpush1.bf16.msra.mxu0 %v3049_v36  ;;  %v3145_v36 = vld [vmem:[%s4209_s1 + $0x620] ss:$8 sps:$4 sm:$0xff]  }
  0xa6   : > { %2205 = vmatprep.subr.bf16.mxu0 %v3057_v37  ;;  %2247 = vmatpush1.bf16.msra.mxu1 %v3052_v38  ;;  %v3153_v37 = vld [vmem:[%s4209_s1 + $0x614] ss:$8 sps:$4 sm:$0xff]   ;;  %v3148_v38 = vld [vmem:[%s4209_s1 + $0x720] ss:$8 sps:$4 sm:$0xff]  }
  0xa7   : > { %2248 = vmatprep.subr.bf16.mxu1 %v3060_v39  ;;  %v3156_v39 = vld [vmem:[%s4209_s1 + $0x714] ss:$8 sps:$4 sm:$0xff]  }
  0xa9   : > { %2206 = vmatpush1.bf16.msra.mxu0 %v3055_v40  ;;  %v3151_v40 = vld [vmem:[%s4209_s1 + $0x610] ss:$8 sps:$4 sm:$0xff]  }
  0xaa   : > { %2207 = vmatprep.subr.bf16.mxu0 %v3063_v41  ;;  %2249 = vmatpush1.bf16.msra.mxu1 %v3058_v42  ;;  %v3159_v41 = vld [vmem:[%s4209_s1 + $0x604] ss:$8 sps:$4 sm:$0xff]   ;;  %v3154_v42 = vld [vmem:[%s4209_s1 + $0x710] ss:$8 sps:$4 sm:$0xff]  }
  0xab   : > { %2250 = vmatprep.subr.bf16.mxu1 %v3066_v43  ;;  %v3162_v43 = vld [vmem:[%s4209_s1 + $0x704] ss:$8 sps:$4 sm:$0xff]  }
  0xad   : > { %2208 = vmatpush2.bf16.msra.mxu0 %v3061_v44  ;;  %v3157_v44 = vld [vmem:[%s4209_s1 + $0x600] ss:$8 sps:$4 sm:$0xff]  }
  0xae   : > { %2209 = vmatprep.subr.bf16.mxu0 %v3069_v45  ;;  %2251 = vmatpush2.bf16.msra.mxu1 %v3064_v46  ;;  %v3165_v45 = vld [vmem:[%s4209_s1 + $0x6f4] ss:$8 sps:$4 sm:$0xff]   ;;  %v3160_v46 = vld [vmem:[%s4209_s1 + $0x700] ss:$8 sps:$4 sm:$0xff]  }
  0xaf   : > { %2252 = vmatprep.subr.bf16.mxu1 %v3072_v47  ;;  %v3168_v47 = vld [vmem:[%s4209_s1 + $0x7f4] ss:$8 sps:$4 sm:$0xff]  }
  0xb1   : > { %2210 = vmatpush2.bf16.msra.mxu0 %v3067_v48  ;;  %v3163_v48 = vld [vmem:[%s4209_s1 + $0x6f0] ss:$8 sps:$4 sm:$0xff]  }
  0xb2   : > { %2211 = vmatprep.subr.bf16.mxu0 %v3075_v49  ;;  %2253 = vmatpush2.bf16.msra.mxu1 %v3070_v50  ;;  %v3171_v49 = vld [vmem:[%s4209_s1 + $0x6e4] ss:$8 sps:$4 sm:$0xff]   ;;  %v3166_v50 = vld [vmem:[%s4209_s1 + $0x7f0] ss:$8 sps:$4 sm:$0xff]  }
  0xb3   : > { %2254 = vmatprep.subr.bf16.mxu1 %v3078_v51  ;;  %v3174_v51 = vld [vmem:[%s4209_s1 + $0x7e4] ss:$8 sps:$4 sm:$0xff]  }
  0xb5   : > { %2212 = vmatpush2.bf16.msra.mxu0 %v3073_v52  ;;  %v3169_v52 = vld [vmem:[%s4209_s1 + $0x6e0] ss:$8 sps:$4 sm:$0xff]  }
  0xb6   : > { %2213 = vmatprep.subr.bf16.mxu0 %v3081_v53  ;;  %2255 = vmatpush2.bf16.msra.mxu1 %v3076_v54  ;;  %v3177_v53 = vld [vmem:[%s4209_s1 + $0x6d4] ss:$8 sps:$4 sm:$0xff]   ;;  %v3172_v54 = vld [vmem:[%s4209_s1 + $0x7e0] ss:$8 sps:$4 sm:$0xff]  }
  0xb7   : > { %2256 = vmatprep.subr.bf16.mxu1 %v3084_v55  ;;  %v3180_v55 = vld [vmem:[%s4209_s1 + $0x7d4] ss:$8 sps:$4 sm:$0xff]  }
  0xb9   : > { %2214 = vmatpush2.bf16.msra.mxu0 %v3079_v56  ;;  %v3175_v56 = vld [vmem:[%s4209_s1 + $0x6d0] ss:$8 sps:$4 sm:$0xff]  }
  0xba   : > { %2215 = vmatprep.subr.bf16.mxu0 %v3087_v57  ;;  %2257 = vmatpush2.bf16.msra.mxu1 %v3082_v58  ;;  %v3183_v57 = vld [vmem:[%s4209_s1 + $0x6c4] ss:$8 sps:$4 sm:$0xff]   ;;  %v3178_v58 = vld [vmem:[%s4209_s1 + $0x7d0] ss:$8 sps:$4 sm:$0xff]  }
  0xbb   : > { %2258 = vmatprep.subr.bf16.mxu1 %v3090_v59  ;;  %v3186_v59 = vld [vmem:[%s4209_s1 + $0x7c4] ss:$8 sps:$4 sm:$0xff]  }
  0xbd   : > { %2216 = vmatpush2.bf16.msra.mxu0 %v3085_v60  ;;  %v3181_v60 = vld [vmem:[%s4209_s1 + $0x6c0] ss:$8 sps:$4 sm:$0xff]  }
  0xbe   : > { %2217 = vmatprep.subr.bf16.mxu0 %v3093_v61  ;;  %2259 = vmatpush2.bf16.msra.mxu1 %v3088_v62  ;;  %v3189_v61 = vld [vmem:[%s4209_s1 + $0x6b4] ss:$8 sps:$4 sm:$0xff]   ;;  %v3184_v62 = vld [vmem:[%s4209_s1 + $0x7c0] ss:$8 sps:$4 sm:$0xff]  }
  0xbf   : > { %2260 = vmatprep.subr.bf16.mxu1 %v3096_v63  ;;  %v3192_v63 = vld [vmem:[%s4209_s1 + $0x7b4] ss:$8 sps:$4 sm:$0xff]  }
  0xc1   : > { %2218 = vmatpush2.bf16.msra.mxu0 %v3091_v0  ;;  %v3187_v0 = vld [vmem:[%s4209_s1 + $0x6b0] ss:$8 sps:$4 sm:$0xff]  }
  0xc2   : > { %2219 = vmatprep.subr.bf16.mxu0 %v3099_v1  ;;  %2261 = vmatpush2.bf16.msra.mxu1 %v3094_v2  ;;  %v3195_v1 = vld [vmem:[%s4209_s1 + $0x6a4] ss:$8 sps:$4 sm:$0xff]   ;;  %v3190_v2 = vld [vmem:[%s4209_s1 + $0x7b0] ss:$8 sps:$4 sm:$0xff]  }
  0xc3   : > { %2262 = vmatprep.subr.bf16.mxu1 %v3102_v3  ;;  %v3198_v3 = vld [vmem:[%s4209_s1 + $0x7a4] ss:$8 sps:$4 sm:$0xff]  }
  0xc5   : > { %2220 = vmatpush2.bf16.msra.mxu0 %v3097_v4  ;;  %v3193_v4 = vld [vmem:[%s4209_s1 + $0x6a0] ss:$8 sps:$4 sm:$0xff]  }
  0xc6   : > { %2221 = vmatprep.subr.bf16.mxu0 %v3105_v5  ;;  %2263 = vmatpush2.bf16.msra.mxu1 %v3100_v6  ;;  %v3201_v5 = vld [vmem:[%s4209_s1 + $0x694] ss:$8 sps:$4 sm:$0xff]   ;;  %v3196_v6 = vld [vmem:[%s4209_s1 + $0x7a0] ss:$8 sps:$4 sm:$0xff]  }
  0xc7   : > { %2264 = vmatprep.subr.bf16.mxu1 %v3108_v8  ;;  %v3199_v8 = vld [vmem:[%s4209_s1 + $0x690] ss:$8 sps:$4 sm:$0xff]  }
  0xc9   : > { %2222 = vmatpush2.bf16.msra.mxu0 %v3103_v7  ;;  %v3204_v7 = vld [vmem:[%s4209_s1 + $0x794] ss:$8 sps:$4 sm:$0xff]  }
  0xca   : > { %2277 = vmatprep.subr.bf16.mxu0 %v3114_v10  ;;  %2265 = vmatpush2.bf16.msra.mxu1 %v3106_v9  ;;  %v3207_v9 = vld [vmem:[%s4209_s1 + $0x684] ss:$8 sps:$4 sm:$0xff]   ;;  %v3202_v10 = vld [vmem:[%s4209_s1 + $0x790] ss:$8 sps:$4 sm:$0xff]  }
  0xcb   : > { %2320 = vmatprep.subr.bf16.mxu1 %v3120_v14  ;;  %v3208_v14 = vld [vmem:[%s4209_s1 + $0x780] ss:$8 sps:$4 sm:$0xff]  }
  0xcc   : > { %2224 = vmatmul.mubr.bf16.vlgmr.msra.gmra.mxu0 %v3109_v11  ;;  %v3210_v11 = vld [vmem:[%s4209_s1 + $0x784] ss:$8 sps:$4 sm:$0xff]  }
  0xcd   : > { %2278 = vmatpush1.bf16.msra.mxu0 %v3112_v12  ;;  %2309 = vmatprep.mubr.bf16.mxu0 %v3213_v15  ;;  %v3205_v12 = vld [vmem:[%s4209_s1 + $0x680] ss:$8 sps:$4 sm:$0xff]   ;;  %v3211_v15 = vld [vmem:[%s3446_s30 + $0x30] ss:$72 sps:$4 sm:$0xff]  }
  0xce   : > { %2267 = vmatmul.mubr.bf16.vlgmr.msra.gmra.mxu1 %v3115_v13  ;;  %2279 = vmatprep.subr.bf16.mxu0 %v3123_v16  ;;  %v3216_v13 = vld [vmem:[%s4209_s1 + $0x874] ss:$8 sps:$4 sm:$0xff]   ;;  %v3214_v16 = vld [vmem:[%s4209_s1 + $0x870] ss:$8 sps:$4 sm:$0xff]  }
  0xcf   : > { %2321 = vmatpush1.bf16.msra.mxu1 %v3118_v17  ;;  %2352 = vmatprep.mubr.bf16.mxu1 %v3219_v18  ;;  %v3267_v17 = vld [vmem:[%s3446_s30 + $0x44] ss:$72 sps:$4 sm:$0xff]   ;;  %v3217_v18 = vld [vmem:[%s3446_s30 + $0x38] ss:$72 sps:$4 sm:$0xff]  }
  0xd0   : > { %2322 = vmatprep.subr.bf16.mxu1 %v3126_v19  ;;  %v3222_v19 = vld [vmem:[%s4209_s1 + $0x864] ss:$8 sps:$4 sm:$0xff]  }
  0xd1   : > { %2280 = vmatpush1.bf16.msra.mxu0 %v3121_v20  ;;  %v3220_v20 = vld [vmem:[%s4209_s1 + $0x860] ss:$8 sps:$4 sm:$0xff]  }
  0xd2   : > { %2281 = vmatprep.subr.bf16.mxu0 %v3129_v21  ;;  %v3225_v21 = vld [vmem:[%s4209_s1 + $0x854] ss:$8 sps:$4 sm:$0xff]  }
  0xd3   : > { %2323 = vmatpush1.bf16.msra.mxu1 %v3124_v22  ;;  %v3223_v22 = vld [vmem:[%s4209_s1 + $0x850] ss:$8 sps:$4 sm:$0xff]  }
  0xd4   : > { %2324 = vmatprep.subr.bf16.mxu1 %v3132_v23  ;;  %v3228_v23 = vld [vmem:[%s4209_s1 + $0x844] ss:$8 sps:$4 sm:$0xff]  }
  0xd5   : > { %2282 = vmatpush1.bf16.msra.mxu0 %v3127_v24  ;;  %v3226_v24 = vld [vmem:[%s4209_s1 + $0x840] ss:$8 sps:$4 sm:$0xff]  }
  0xd6   : > { %2283 = vmatprep.subr.bf16.mxu0 %v3135_v25  ;;  %v3231_v25 = vld [vmem:[%s4209_s1 + $0x834] ss:$8 sps:$4 sm:$0xff]  }
  0xd7   : > { %2325 = vmatpush1.bf16.msra.mxu1 %v3130_v26  ;;  %v3229_v26 = vld [vmem:[%s4209_s1 + $0x830] ss:$8 sps:$4 sm:$0xff]  }
  0xd8   : > { %2326 = vmatprep.subr.bf16.mxu1 %v3138_v27  ;;  %v3234_v27 = vld [vmem:[%s4209_s1 + $0x824] ss:$8 sps:$4 sm:$0xff]  }
  0xd9   : > { %2284 = vmatpush1.bf16.msra.mxu0 %v3133_v28  ;;  %v3232_v28 = vld [vmem:[%s4209_s1 + $0x820] ss:$8 sps:$4 sm:$0xff]  }
  0xda   : > { %2285 = vmatprep.subr.bf16.mxu0 %v3141_v29  ;;  %v3237_v29 = vld [vmem:[%s4209_s1 + $0x814] ss:$8 sps:$4 sm:$0xff]  }
  0xdb   : > { %2327 = vmatpush1.bf16.msra.mxu1 %v3136_v30  ;;  %v3235_v30 = vld [vmem:[%s4209_s1 + $0x810] ss:$8 sps:$4 sm:$0xff]  }
  0xdc   : > { %2328 = vmatprep.subr.bf16.mxu1 %v3144_v31  ;;  %v3240_v31 = vld [vmem:[%s4209_s1 + $0x804] ss:$8 sps:$4 sm:$0xff]  }
  0xdd   : > { %2286 = vmatpush1.bf16.msra.mxu0 %v3139_v32  ;;  %v3238_v32 = vld [vmem:[%s4209_s1 + $0x800] ss:$8 sps:$4 sm:$0xff]  }
  0xde   : > { %2287 = vmatprep.subr.bf16.mxu0 %v3147_v33  ;;  %v3243_v33 = vld [vmem:[%s4209_s1 + $0x8f4] ss:$8 sps:$4 sm:$0xff]  }
  0xdf   : > { %2329 = vmatpush1.bf16.msra.mxu1 %v3142_v34  ;;  %v3241_v34 = vld [vmem:[%s4209_s1 + $0x8f0] ss:$8 sps:$4 sm:$0xff]  }
  0xe0   : > { %2330 = vmatprep.subr.bf16.mxu1 %v3150_v35  ;;  %v3246_v35 = vld [vmem:[%s4209_s1 + $0x8e4] ss:$8 sps:$4 sm:$0xff]  }
  0xe1   : > { %2288 = vmatpush1.bf16.msra.mxu0 %v3145_v36  ;;  %v3244_v36 = vld [vmem:[%s4209_s1 + $0x8e0] ss:$8 sps:$4 sm:$0xff]  }
  0xe2   : > { %2289 = vmatprep.subr.bf16.mxu0 %v3153_v37  ;;  %v3249_v37 = vld [vmem:[%s4209_s1 + $0x8d4] ss:$8 sps:$4 sm:$0xff]  }
  0xe3   : > { %2331 = vmatpush1.bf16.msra.mxu1 %v3148_v38  ;;  %v3247_v38 = vld [vmem:[%s4209_s1 + $0x8d0] ss:$8 sps:$4 sm:$0xff]  }
  0xe4   : > { %2332 = vmatprep.subr.bf16.mxu1 %v3156_v39  ;;  %v3252_v39 = vld [vmem:[%s4209_s1 + $0x8c4] ss:$8 sps:$4 sm:$0xff]  }
  0xe5   : > { %2290 = vmatpush1.bf16.msra.mxu0 %v3151_v40  ;;  %v3250_v40 = vld [vmem:[%s4209_s1 + $0x8c0] ss:$8 sps:$4 sm:$0xff]  }
  0xe6   : > { %2291 = vmatprep.subr.bf16.mxu0 %v3159_v41  ;;  %v3255_v41 = vld [vmem:[%s4209_s1 + $0x8b4] ss:$8 sps:$4 sm:$0xff]  }
  0xe7   : > { %2333 = vmatpush1.bf16.msra.mxu1 %v3154_v42  ;;  %v3253_v42 = vld [vmem:[%s4209_s1 + $0x8b0] ss:$8 sps:$4 sm:$0xff]  }
  0xe8   : > { %2334 = vmatprep.subr.bf16.mxu1 %v3162_v43  ;;  %v3258_v43 = vld [vmem:[%s4209_s1 + $0x8a4] ss:$8 sps:$4 sm:$0xff]  }
  0xe9   : > { %2292 = vmatpush1.bf16.msra.mxu0 %v3157_v44  ;;  %v3256_v44 = vld [vmem:[%s4209_s1 + $0x8a0] ss:$8 sps:$4 sm:$0xff]  }
  0xea   : > { %2293 = vmatprep.subr.bf16.mxu0 %v3165_v45  ;;  %v3261_v45 = vld [vmem:[%s4209_s1 + $0x894] ss:$8 sps:$4 sm:$0xff]  }
  0xeb   : > { %2335 = vmatpush1.bf16.msra.mxu1 %v3160_v46  ;;  %v3259_v46 = vld [vmem:[%s4209_s1 + $0x890] ss:$8 sps:$4 sm:$0xff]  }
  0xec   : > { %2336 = vmatprep.subr.bf16.mxu1 %v3168_v47  ;;  %v3264_v47 = vld [vmem:[%s4209_s1 + $0x884] ss:$8 sps:$4 sm:$0xff]  }
  0xed   : > { %2294 = vmatpush2.bf16.msra.mxu0 %v3163_v48  ;;  %v3262_v48 = vld [vmem:[%s4209_s1 + $0x880] ss:$8 sps:$4 sm:$0xff]  }
  0xee   : > { %2295 = vmatprep.subr.bf16.mxu0 %v3171_v49  ;;  %v3265_v49 = vld [vmem:[%s3446_s30 + $0x40] ss:$72 sps:$4 sm:$0xff]  }
  0xef   : > { %2337 = vmatpush2.bf16.msra.mxu1 %v3166_v50 }
  0xf0   : > { %2338 = vmatprep.subr.bf16.mxu1 %v3174_v51 }
  0xf1   : > { %2296 = vmatpush2.bf16.msra.mxu0 %v3169_v52 }
  0xf2   : > { %2297 = vmatprep.subr.bf16.mxu0 %v3177_v53 }
  0xf3   : > { %2339 = vmatpush2.bf16.msra.mxu1 %v3172_v54 }
  0xf4   : > { %2340 = vmatprep.subr.bf16.mxu1 %v3180_v55 }
  0xf5   : > { %2298 = vmatpush2.bf16.msra.mxu0 %v3175_v56 }
  0xf6   : > { %2299 = vmatprep.subr.bf16.mxu0 %v3183_v57 }
  0xf7   : > { %2341 = vmatpush2.bf16.msra.mxu1 %v3178_v58 }
  0xf8   : > { %2342 = vmatprep.subr.bf16.mxu1 %v3186_v59  ;;  %v479_v59 = vlaneseq }
  0xf9   : > { %2300 = vmatpush2.bf16.msra.mxu0 %v3181_v60 }
  0xfa   : > { %2301 = vmatprep.subr.bf16.mxu0 %v3189_v61 }
  0xfb   : > { %2343 = vmatpush2.bf16.msra.mxu1 %v3184_v62  ;;  %v480_v62 = vshrl.u32 %v479_v59, 7 }
  0xfc   : > { %2344 = vmatprep.subr.bf16.mxu1 %v3192_v63 }
  0xfd   : > { %2302 = vmatpush2.bf16.msra.mxu0 %v3187_v0 }
  0xfe   : > { %2303 = vmatprep.subr.bf16.mxu0 %v3195_v1  ;;  %v481_v1 = vsub.s32 0, %v480_v62 }
  0xff   : > { %2345 = vmatpush2.bf16.msra.mxu1 %v3190_v2  ;;  %v477_v2 = vld [vmem:[%s4210_s2] sm:$0x3] }
 0x100   : > { %2346 = vmatprep.subr.bf16.mxu1 %v3198_v3 }
 0x101   : > { %2304 = vmatpush2.bf16.msra.mxu0 %v3193_v4 }
 0x102   : > { %2305 = vmatprep.subr.bf16.mxu0 %v3201_v5  ;;  %v485_v5 = vsub.s32 1, %v480_v62 }
 0x103   : > { %2347 = vmatpush2.bf16.msra.mxu1 %v3196_v6 }
 0x104   : > { %2348 = vmatprep.subr.bf16.mxu1 %v3204_v7  ;;  %v482_v7 = vrot.slane %v477_v2, %v481_v1 }
 0x105   : > { %2306 = vmatpush2.bf16.msra.mxu0 %v3199_v8 }
 0x106   : > { %2307 = vmatprep.subr.bf16.mxu0 %v3207_v9  ;;  %v486_v9 = vrot.slane %v477_v2, %v485_v5 }
 0x107   : > { %2349 = vmatpush2.bf16.msra.mxu1 %v3202_v10 }
 0x108   : > { %2350 = vmatprep.subr.bf16.mxu1 %v3210_v11 }
 0x109   : > { %2308 = vmatpush2.bf16.msra.mxu0 %v3205_v12 }
 0x10a   : > { %2363 = vmatprep.subr.bf16.mxu0 %v3216_v13 }
 0x10b   : > { %2351 = vmatpush2.bf16.msra.mxu1 %v3208_v14 }
 0x10c   : > { %2310 = vmatmul.mubr.bf16.vlgmr.msra.gmra.mxu0 %v3211_v15  ;;  %v2053_v50 = vpop.f32.mrf.mxu0 }
 0x10d   : > { %2364 = vmatpush1.bf16.msra.mxu0 %v3214_v16  ;;  %2395 = vmatprep.mubr.bf16.mxu0 %v3267_v17  ;;  %v2096_v52 = vpop.f32.mrf.mxu1  ;;  %v2054_v12 = vadd.f32 %v2053_v50, %v482_v7 }
 0x10e   : > { %2353 = vmatmul.mubr.bf16.vlgmr.msra.gmra.mxu1 %v3217_v18  ;;  %2365 = vmatprep.subr.bf16.mxu0 %v3222_v19  ;;  %v2055_v51 = vpop.f32.mrf.mxu0 }
 0x10f   : > { %v2098_v54 = vpop.f32.mrf.mxu1  ;;  %v2056_v13 = vadd.f32 %v2055_v51, %v486_v9  ;;  %v2097_v16 = vadd.f32 %v2096_v52, %v2054_v12 }
 0x110   : > { %v2057_v53 = vpop.f32.mrf.mxu0 }
 0x111   : > { %2366 = vmatpush1.bf16.msra.mxu0 %v3220_v20  ;;  %v2100_v56 = vpop.f32.mrf.mxu1  ;;  %v2058_v17 = vadd.f32 %v2057_v53, %v482_v7  ;;  %v2099_v18 = vadd.f32 %v2098_v54, %v2056_v13 }
 0x112   : > { %2367 = vmatprep.subr.bf16.mxu0 %v3225_v21  ;;  %v2059_v55 = vpop.f32.mrf.mxu0 }
 0x113   : > { %v2102_v58 = vpop.f32.mrf.mxu1  ;;  %v2060_v19 = vadd.f32 %v2059_v55, %v486_v9 }
 0x115   : > { %2368 = vmatpush1.bf16.msra.mxu0 %v3223_v22 }
 0x116   : > { %2369 = vmatprep.subr.bf16.mxu0 %v3228_v23  ;;  %v2101_v23 = vadd.f32 %v2100_v56, %v2058_v17 }
 0x119   : > { %2370 = vmatpush1.bf16.msra.mxu0 %v3226_v24 }
 0x11a   : > { %2371 = vmatprep.subr.bf16.mxu0 %v3231_v25 }
 0x11d   : > { %2372 = vmatpush1.bf16.msra.mxu0 %v3229_v26  ;;  %v2103_v26 = vadd.f32 %v2102_v58, %v2060_v19 }
 0x11e   : > { %2373 = vmatprep.subr.bf16.mxu0 %v3234_v27 }
 0x121   : > { %2374 = vmatpush1.bf16.msra.mxu0 %v3232_v28 }
 0x122   : > { %2375 = vmatprep.subr.bf16.mxu0 %v3237_v29 }
 0x125   : > { %2376 = vmatpush1.bf16.msra.mxu0 %v3235_v30 }
 0x126   : > { %2377 = vmatprep.subr.bf16.mxu0 %v3240_v31 }
 0x129   : > { %2378 = vmatpush1.bf16.msra.mxu0 %v3238_v32 }
 0x12a   : > { %2379 = vmatprep.subr.bf16.mxu0 %v3243_v33 }
 0x12d   : > { %2380 = vmatpush2.bf16.msra.mxu0 %v3241_v34 }
 0x12e   : > { %2381 = vmatprep.subr.bf16.mxu0 %v3246_v35 }
 0x131   : > { %2382 = vmatpush2.bf16.msra.mxu0 %v3244_v36 }
 0x132   : > { %2383 = vmatprep.subr.bf16.mxu0 %v3249_v37 }
 0x135   : > { %2384 = vmatpush2.bf16.msra.mxu0 %v3247_v38 }
 0x136   : > { %2385 = vmatprep.subr.bf16.mxu0 %v3252_v39 }
 0x139   : > { %2386 = vmatpush2.bf16.msra.mxu0 %v3250_v40 }
 0x13a   : > { %2387 = vmatprep.subr.bf16.mxu0 %v3255_v41 }
 0x13d   : > { %2388 = vmatpush2.bf16.msra.mxu0 %v3253_v42 }
 0x13e   : > { %2389 = vmatprep.subr.bf16.mxu0 %v3258_v43 }
 0x141   : > { %2390 = vmatpush2.bf16.msra.mxu0 %v3256_v44 }
 0x142   : > { %2391 = vmatprep.subr.bf16.mxu0 %v3261_v45 }
 0x145   : > { %2392 = vmatpush2.bf16.msra.mxu0 %v3259_v46 }
 0x146   : > { %2393 = vmatprep.subr.bf16.mxu0 %v3264_v47 }
 0x149   : > { %2394 = vmatpush2.bf16.msra.mxu0 %v3262_v48 }
 0x14c   : > { %2396 = vmatmul.mubr.bf16.vlgmr.msra.gmra.mxu0 %v3265_v49  ;;  %v2139_v57 = vpop.f32.mrf.mxu0 }
 0x14d   : > { %v2182_v61 = vpop.f32.mrf.mxu1  ;;  %v2140_v20 = vadd.f32 %v2139_v57, %v2097_v16 }
 0x14e   : > { %v2141_v60 = vpop.f32.mrf.mxu0 }
 0x14f   : > { %v2184_v0 = vpop.f32.mrf.mxu1  ;;  %v2142_v24 = vadd.f32 %v2141_v60, %v2099_v18  ;;  %v2183_v27 = vadd.f32 %v2182_v61, %v2140_v20 }
 0x150   : > { %v2143_v63 = vpop.f32.mrf.mxu0 }
 0x151   : > { %v2186_v4 = vpop.f32.mrf.mxu1  ;;  %v2144_v28 = vadd.f32 %v2143_v63, %v2101_v23  ;;  %v2185_v30 = vadd.f32 %v2184_v0, %v2142_v24 }
 0x152   : > { %v2145_v3 = vpop.f32.mrf.mxu0 }
 0x153   : > { %v2188_v8 = vpop.f32.mrf.mxu1  ;;  %v2146_v31 = vadd.f32 %v2145_v3, %v2103_v26  ;;  %v2187_v35 = vadd.f32 %v2186_v4, %v2144_v28 }
 0x155   : > { %v2189_v37 = vadd.f32 %v2188_v8, %v2146_v31 }
 0x18c   : > { %v2225_v6 = vpop.f32.mrf.mxu0 }
 0x18d   : > { %v2226_v32 = vadd.f32 %v2225_v6, %v2183_v27 }
 0x18e   : > { %v2227_v10 = vpop.f32.mrf.mxu0  ;;  %v2268_v11 = vpop.f32.mrf.mxu1 }
 0x18f   : > { %v2228_v36 = vadd.f32 %v2227_v10, %v2185_v30  ;;  %v2269_v38 = vadd.f32 %v2268_v11, %v2226_v32 }
 0x190   : > { %v2229_v14 = vpop.f32.mrf.mxu0  ;;  %v2270_v15 = vpop.f32.mrf.mxu1 }
 0x191   : > { %v2230_v39 = vadd.f32 %v2229_v14, %v2187_v35  ;;  %v2271_v42 = vadd.f32 %v2270_v15, %v2228_v36 }
 0x192   : > { %v2231_v21 = vpop.f32.mrf.mxu0  ;;  %v2272_v22 = vpop.f32.mrf.mxu1 }
 0x193   : > { %v2232_v43 = vadd.f32 %v2231_v21, %v2189_v37  ;;  %v2273_v45 = vadd.f32 %v2272_v22, %v2230_v39 }
 0x194   : > { %v2274_v29 = vpop.f32.mrf.mxu1 }
 0x195   : > { %v2275_v49 = vadd.f32 %v2274_v29, %v2232_v43 }
 0x1cc   : > { %v2311_v25 = vpop.f32.mrf.mxu0 }
 0x1cd   : > { %v2312_v44 = vadd.f32 %v2311_v25, %v2269_v38 }
 0x1ce   : > { %v2313_v33 = vpop.f32.mrf.mxu0  ;;  %v2354_v34 = vpop.f32.mrf.mxu1 }
 0x1cf   : > { %v2314_v46 = vadd.f32 %v2313_v33, %v2271_v42  ;;  %v2355_v50 = vadd.f32 %v2354_v34, %v2312_v44 }
 0x1d0   : > { %v2315_v40 = vpop.f32.mrf.mxu0  ;;  %v2356_v41 = vpop.f32.mrf.mxu1 }
 0x1d1   : > { %v2316_v51 = vadd.f32 %v2315_v40, %v2273_v45  ;;  %v2357_v53 = vadd.f32 %v2356_v41, %v2314_v46 }
 0x1d2   : > { %v2317_v47 = vpop.f32.mrf.mxu0  ;;  %v2358_v48 = vpop.f32.mrf.mxu1 }
 0x1d3   : > { %v2318_v54 = vadd.f32 %v2317_v47, %v2275_v49  ;;  %v2359_v58 = vadd.f32 %v2358_v48, %v2316_v51 }
 0x1d4   : > { %v2360_v56 = vpop.f32.mrf.mxu1 }
 0x1d5   : > { %v2361_v61 = vadd.f32 %v2360_v56, %v2318_v54 }
 0x20c   : > { %v2397_v52 = vpop.f32.mrf.mxu0 }
 0x20d   : > { %v2398_v55 = vadd.f32 %v2397_v52, %v2355_v50 }
 0x20e   : > { %v2399_v57 = vpop.f32.mrf.mxu0 }
 0x20f   : > { %v2400_v59 = vadd.f32 %v2399_v57, %v2357_v53  ;;  %v2406_v62 = vmax.f32 %v2398_v55, 0.0 }
 0x210   : > { %v2401_v60 = vpop.f32.mrf.mxu0 }
 0x211   : > { %v2407_v63 = vmax.f32 %v2400_v59, 0.0  ;;  %v2402_v0 = vadd.f32 %v2401_v60, %v2359_v58 }
 0x212   : > { %v2403_v1 = vpop.f32.mrf.mxu0 }
 0x213   : > { %v2798_v2 = vpack.c.bf16 %v2407_v63, %v2406_v62  ;;  %v2404_v3 = vadd.f32 %v2403_v1, %v2361_v61  ;;  %v2408_v4 = vmax.f32 %v2402_v0, 0.0 }
 0x215   : > { %2422 = vst [vmem:[%s170_s18] sm:$0xff] %v2798_v2  ;;  %v2409_v5 = vmax.f32 %v2404_v3, 0.0 }
 0x217   : > { %v2799_v6 = vpack.c.bf16 %v2409_v5, %v2408_v4 }
 0x219   : > { %2423 = vst [vmem:[%s170_s18 + $0x8] sm:$0xff] %v2799_v6 }
 0x21a PF: > { %s13_s12 = sadd.s32 1, %s3274_s12  }
 0x21b   : > { %p10_p4 = scmp.ge.s32.totalorder %s13_s12, 6  }
 0x21d   :  { %12 = sbr.rel (!%p10_p4) target bundleno = 1 (0x1), region = 62 }

// kernel: human_guided_loss.8
= control target key start
LH: loop header
LB: loop body
LE: loop exit
PB: predicated region body
PF: predicated region fallthrough
CT: control target
= control target key end

     0   :  { %vm115_vm0 = vcmask 1046528   ;;  %s716_s13 = smov 1   ;;  %vm304_vm1 = vcmask 1045504   ;;  %s717_s30 = smov 127   ;;  %s1205_s0 = inlined_call_operand.vmem [shape: f32[2,16,16], index: 0, kind: input, shape index: {}]   ;;  %s1206_s1 = inlined_call_operand.vmem [shape: f32[2,16,16], index: 1, kind: input, shape index: {}]   ;;  %s1207_s2 = inlined_call_operand.vmem [shape: f32[2,16,16], index: 2, kind: input, shape index: {}]   ;;  %s1208_s3 = inlined_call_operand.vmem [shape: f32[2,16,16], index: 3, kind: input, shape index: {}]   ;;  %s1209_s4 = inlined_call_operand.vmem [shape: f32[4,2,18,18], index: 4, kind: input, shape index: {}]   ;;  %s1210_s5 = inlined_call_operand.vmem [shape: f32[9], index: 5, kind: output, shape index: {}]  }
   0x1   :  { %v753_v0 = vld [vmem:[%s1205_s0 + $0x10] sm:$0xff]  ;;  %v761_v3 = vld [vmem:[%s1205_s0] sm:$0xff]  ;;  %v769_v6 = vld [vmem:[%s1205_s0 + $0x18] sm:$0xff] }
   0x2   :  { %v31_v1 = vld [vmem:[%s1207_s2 + $0x10] sm:$0xff]  ;;  %v29_v4 = vld [vmem:[%s1207_s2] sm:$0xff]  ;;  %v32_v7 = vld [vmem:[%s1207_s2 + $0x18] sm:$0xff] }
   0x3   :  { %v66_v2 = vsub.f32 1.0, %v31_v1  ;;  %v64_v5 = vsub.f32 1.0, %v29_v4  ;;  %v67_v9 = vsub.f32 1.0, %v32_v7  ;;  %v780_v10 = vld [vmem:[%s1205_s0 + $0x8] sm:$0xff]  ;;  %v186_v15 = vld [vmem:[%s1209_s4 + $0x10] sm:$0x3] }
   0x4   :  { %v30_v11 = vld [vmem:[%s1207_s2 + $0x8] sm:$0xff]  ;;  %v235_v18 = vrot.slane %v186_v15, 1  ;;  %v184_v19 = vld [vmem:[%s1209_s4] sm:$0xff]  ;;  %v191_v20 = vld [vmem:[%s1209_s4 + $0x38] sm:$0xff]  ;;  %v308_v23 = vrot.slane %v186_v15, 2 }
   0x5   :  { %v775_v8 = vmul.f32 %v66_v2, %v753_v0  ;;  %v786_v12 = vmul.f32 %v64_v5, %v761_v3  ;;  %v65_v13 = vsub.f32 1.0, %v30_v11  ;;  %v185_v14 = vld [vmem:[%s1209_s4 + $0x8] sm:$0xff]  ;;  %v796_v16 = vmul.f32 %v67_v9, %v769_v6  ;;  %v192_v24 = vld [vmem:[%s1209_s4 + $0x40] sm:$0x3]  ;;  %v190_v29 = vld [vmem:[%s1209_s4 + $0x30] sm:$0xff] }
   0x6   :  { %v233_v17 = vrot.slane %v185_v14, 1  ;;  %v306_v22 = vrot.slane %v185_v14, 2  ;;  %v232_v26 = vrot.slane %v184_v19, 1  ;;  %v305_v27 = vrot.slane %v184_v19, 2  ;;  %v197_v34 = vld [vmem:[%s1209_s4 + $0x68] sm:$0xff]  ;;  %v196_v44 = vld [vmem:[%s1209_s4 + $0x60] sm:$0xff] }
   0x7   :  { %95 = vrot.lane.b32.xlu1 %v775_v8, %s716_s13  ;;  %91 = vrot.lane.b32.xlu0 %v786_v12, %s716_s13  ;;  %v806_v21 = vmul.f32 %v65_v13, %v780_v10  ;;  %v243_v28 = vrot.slane %v191_v20, 1  ;;  %v245_v32 = vrot.slane %v192_v24, 1  ;;  %v316_v33 = vrot.slane %v191_v20, 2  ;;  %v198_v39 = vld [vmem:[%s1209_s4 + $0x70] sm:$0x3]  ;;  %v203_v49 = vld [vmem:[%s1209_s4 + $0x98] sm:$0xff] }
   0x8   :  { %v236_v25 = vsel %vm115_vm0, %v233_v17, %v235_v18  ;;  %v309_v31 = vsel %vm304_vm1, %v306_v22, %v308_v23  ;;  %v234_v35 = vsel %vm115_vm0, %v232_v26, %v233_v17  ;;  %v307_v36 = vsel %vm304_vm1, %v305_v27, %v306_v22  ;;  %v204_v54 = vld [vmem:[%s1209_s4 + $0xa0] sm:$0x3]  ;;  %v202_v63 = vld [vmem:[%s1209_s4 + $0x90] sm:$0xff] }
   0x9   :  { %v289_v30 = vmax.f32 %v185_v14, %v236_v25  ;;  %v318_v37 = vrot.slane %v192_v24, 2  ;;  %v242_v38 = vrot.slane %v190_v29, 1  ;;  %v288_v41 = vmax.f32 %v184_v19, %v234_v35 }
   0xa   :  { %v246_v42 = vsel %vm115_vm0, %v243_v28, %v245_v32  ;;  %v315_v43 = vrot.slane %v190_v29, 2  ;;  %v253_v48 = vrot.slane %v197_v34, 1  ;;  %v255_v53 = vrot.slane %v198_v39, 1 }
   0xb   :  { %97 = vrot.lane.b32.xlu1 %v796_v16, %s716_s13  ;;  %93 = vrot.lane.b32.xlu0 %v806_v21, %s716_s13  ;;  %v826_v40 = vmax.f32 %v289_v30, %v309_v31  ;;  %v293_v45 = vmax.f32 %v191_v20, %v246_v42  ;;  %v319_v46 = vsel %vm304_vm1, %v316_v33, %v318_v37  ;;  %v326_v56 = vrot.slane %v197_v34, 2 }
   0xc   :  { %v244_v47 = vsel %vm115_vm0, %v242_v38, %v243_v28  ;;  %v837_v50 = vmax.f32 %v288_v41, %v307_v36  ;;  %v317_v52 = vsel %vm304_vm1, %v315_v43, %v316_v33  ;;  %v328_v57 = vrot.slane %v198_v39, 2 }
   0xd   :  { %v292_v51 = vmax.f32 %v190_v29, %v244_v47  ;;  %v845_v55 = vmax.f32 %v293_v45, %v319_v46  ;;  %v252_v58 = vrot.slane %v196_v44, 1  ;;  %v256_v60 = vsel %vm115_vm0, %v253_v48, %v255_v53 }
   0xe   :  { %v325_v61 = vrot.slane %v196_v44, 2  ;;  %v263_v62 = vrot.slane %v203_v49, 1 }
   0xf   :  { %395 = vrot.lane.b32.xlu1 %v826_v40, %s717_s30  ;;  %393 = vrot.lane.b32.xlu0 %v837_v50, %s717_s30  ;;  %v849_v59 = vmax.f32 %v292_v51, %v317_v52 }
  0x10   :  { %10 = vsyncpa [#allocation3], 0  ;;  %v297_v1 = vmax.f32 %v197_v34, %v256_v60  ;;  %v329_v2 = vsel %vm304_vm1, %v326_v56, %v328_v57  ;;  %v254_v4 = vsel %vm115_vm0, %v252_v58, %v253_v48  ;;  %v265_v5 = vrot.slane %v204_v54, 1  ;;  %v193_v7 = vld [vmem:[%s1209_s4 + $0x48] sm:$0xff]  ;;  %v864_v15 = vld [vmem:[%s1209_s4 + $0x50] sm:$0xff]  ;;  %s718_s26 = smov 126  }
  0x11   :  { %v296_v9 = vmax.f32 %v196_v44, %v254_v4  ;;  %v327_v11 = vsel %vm304_vm1, %v325_v61, %v326_v56  ;;  %v336_v13 = vrot.slane %v203_v49, 2  ;;  %v338_v14 = vrot.slane %v204_v54, 2  ;;  %v187_v22 = vld [vmem:[%s1209_s4 + $0x18] sm:$0xff]  ;;  %v882_v27 = vld [vmem:[%s1209_s4 + $0x20] sm:$0xff]  ;;  %v205_v32 = vld [vmem:[%s1209_s4 + $0xa8] sm:$0xff]  ;;  %s671_s21 = sshll.u32 %s1210_s5, 4  ;;  %s672_s21 = int_to_ptr.vmem [resolvable:$true] %s671_s21 }
  0x12   :  { %v868_v17 = vmax.f32 %v297_v1, %v329_v2  ;;  %v266_v18 = vsel %vm115_vm0, %v263_v62, %v265_v5  ;;  %v262_v19 = vrot.slane %v202_v63, 1  ;;  %v335_v20 = vrot.slane %v202_v63, 2  ;;  %v896_v37 = vld [vmem:[%s1209_s4 + $0xb0] sm:$0xff]  ;;  %v199_v43 = vld [vmem:[%s1209_s4 + $0x78] sm:$0xff]  ;;  %v916_v48 = vld [vmem:[%s1209_s4 + $0x80] sm:$0xff]  ;;  %s702_s29 = scalar_lea.vmem %s672_s21, 16  ;;  %p707_p1 = scmp.lt.s32.totalorder %s672_s21, %s672_s21 }
  0x13   :  { %403 = vrot.lane.b32.xlu1 %v845_v55, %s717_s30  ;;  %401 = vrot.lane.b32.xlu0 %v849_v59, %s717_s30  ;;  %v876_v23 = vmax.f32 %v296_v9, %v327_v11  ;;  %v301_v24 = vmax.f32 %v203_v49, %v266_v18  ;;  %v339_v25 = vsel %vm304_vm1, %v336_v13, %v338_v14  ;;  %v247_v26 = vrot.slane %v193_v7, 1  ;;  %v195_v14 = vld [vmem:[%s1209_s4 + $0x58] sm:$0x3]  ;;  %v189_v18 = vld [vmem:[%s1209_s4 + $0x28] sm:$0x3]  ;;  %p703_p0 = scmp.ne.s32.totalorder %s672_s21, %s702_s29  ;;  %p708_p2 = scmp.lt.s32.totalorder %s702_s29, %s702_s29 }
  0x14   :  { %v264_v28 = vsel %vm115_vm0, %v262_v19, %v263_v62  ;;  %v337_v29 = vsel %vm304_vm1, %v335_v20, %v336_v13  ;;  %v248_v30 = vrot.slane %v864_v15, 1  ;;  %v320_v31 = vrot.slane %v193_v7, 2 }
  0x15   :  { %v890_v33 = vmax.f32 %v301_v24, %v339_v25  ;;  %v300_v34 = vmax.f32 %v202_v63, %v264_v28  ;;  %v321_v35 = vrot.slane %v864_v15, 2  ;;  %v237_v36 = vrot.slane %v187_v22, 1  ;;  %v201_v24 = vld [vmem:[%s1209_s4 + $0x88] sm:$0x3]  ;;  %v25_v25 = vld [vmem:[%s1206_s1] sm:$0xff]  ;;  %p709_p3 = por %p708_p2, %p707_p1 }
  0x16   :  { %v249_v38 = vsel %vm115_vm0, %v247_v26, %v248_v30  ;;  %v238_v39 = vrot.slane %v882_v27, 1  ;;  %v310_v41 = vrot.slane %v187_v22, 2  ;;  %v311_v42 = vrot.slane %v882_v27, 2  ;;  %v26_v26 = vld [vmem:[%s1206_s1 + $0x8] sm:$0xff] }
  0x17   :  { %411 = vrot.lane.b32.xlu1 %v868_v17, %s717_s30  ;;  %409 = vrot.lane.b32.xlu0 %v876_v23, %s717_s30  ;;  %v908_v44 = vmax.f32 %v300_v34, %v337_v29  ;;  %v294_v45 = vmax.f32 %v193_v7, %v249_v38  ;;  %v322_v46 = vsel %vm304_vm1, %v320_v31, %v321_v35  ;;  %v267_v47 = vrot.slane %v205_v32, 1  ;;  %v27_v38 = vld [vmem:[%s1206_s1 + $0x10] sm:$0xff]  ;;  %p710_p4 = pnand %p709_p3, %p703_p0 }
  0x18   :  { %v239_v49 = vsel %vm115_vm0, %v237_v36, %v238_v39  ;;  %v312_v51 = vsel %vm304_vm1, %v310_v41, %v311_v42  ;;  %v268_v52 = vrot.slane %v896_v37, 1  ;;  %v340_v53 = vrot.slane %v205_v32, 2 }
  0x19   :  { %v923_v54 = vmax.f32 %v294_v45, %v322_v46  ;;  %v290_v56 = vmax.f32 %v187_v22, %v239_v49  ;;  %v341_v57 = vrot.slane %v896_v37, 2  ;;  %v257_v58 = vrot.slane %v199_v43, 1  ;;  %v207_v22 = vld [vmem:[%s1209_s4 + $0xb8] sm:$0x3] }
  0x1a   :  { %v269_v60 = vsel %vm115_vm0, %v267_v47, %v268_v52  ;;  %v258_v61 = vrot.slane %v916_v48, 1  ;;  %v330_v62 = vrot.slane %v199_v43, 2  ;;  %v331_v63 = vrot.slane %v916_v48, 2 }
  0x1b   :  { %419 = vrot.lane.b32.xlu1 %v890_v33, %s717_s30  ;;  %417 = vrot.lane.b32.xlu0 %v908_v44, %s717_s30  ;;  %v933_v1 = vmax.f32 %v290_v56, %v312_v51  ;;  %v302_v2 = vmax.f32 %v205_v32, %v269_v60  ;;  %v342_v4 = vsel %vm304_vm1, %v340_v53, %v341_v57  ;;  %v250_v19 = vrot.slane %v195_v14, 1 }
  0x1c   :  { %v259_v5 = vsel %vm115_vm0, %v257_v58, %v258_v61  ;;  %v332_v7 = vsel %vm304_vm1, %v330_v62, %v331_v63  ;;  %v240_v20 = vrot.slane %v189_v18, 1  ;;  %v323_v29 = vrot.slane %v195_v14, 2 }
  0x1d   :  { %v298_v9 = vmax.f32 %v199_v43, %v259_v5  ;;  %v942_v11 = vmax.f32 %v302_v2, %v342_v4  ;;  %v251_v28 = vsel %vm115_vm0, %v248_v30, %v250_v19  ;;  %v270_v31 = vrot.slane %v207_v22, 1  ;;  %v28_v43 = vld [vmem:[%s1206_s1 + $0x18] sm:$0xff]  ;;  %v1043_v5 = vld [vmem:[%s1208_s3] sm:$0xff] }
  0x1e   :  { %v241_v32 = vsel %vm115_vm0, %v238_v39, %v240_v20  ;;  %v313_v34 = vrot.slane %v189_v18, 2  ;;  %v260_v36 = vrot.slane %v201_v24, 1  ;;  %v37_v41 = vsub.f32 %v761_v3, %v25_v25  ;;  %v1061_v18 = vld [vmem:[%s1208_s3 + $0x10] sm:$0xff] }
  0x1f   :  { %405 = vrot.lane.b32.xlu1 %v923_v54, %s717_s30  ;;  %397 = vrot.lane.b32.xlu0 %v933_v1, %s717_s30  ;;  %v946_v13 = vmax.f32 %v298_v9, %v332_v7  ;;  %v38_v45 = vsub.f32 %v780_v10, %v26_v26  ;;  %v295_v30 = vmax.f32 %v864_v15, %v251_v28  ;;  %v343_v47 = vrot.slane %v207_v22, 2  ;;  %v1048_v7 = vld [vmem:[%s1208_s3 + $0x8] sm:$0xff]  ;;  %v1070_v22 = vld [vmem:[%s1208_s3 + $0x18] sm:$0xff] }
  0x20   :  { %v324_v39 = vsel %vm304_vm1, %v321_v35, %v323_v29  ;;  %v291_v3 = vmax.f32 %v882_v27, %v241_v32  ;;  %v271_v46 = vsel %vm115_vm0, %v268_v52, %v270_v31  ;;  %v39_v49 = vsub.f32 %v753_v0, %v27_v38 }
  0x21   :  { %v314_v10 = vsel %vm304_vm1, %v311_v42, %v313_v34  ;;  %v261_v51 = vsel %vm115_vm0, %v258_v61, %v260_v36  ;;  %v333_v53 = vrot.slane %v201_v24, 2  ;;  %v40_v56 = vsub.f32 %v769_v6, %v28_v43 }
  0x22   :  { %v1004_v58 = vand.u32 2147483647, %v37_v41  ;;  %v1006_v15 = vand.u32 2147483647, %v38_v45  ;;  %v1010_v35 = vmax.f32 %v295_v30, %v324_v39  ;;  %v303_v0 = vmax.f32 %v896_v37, %v271_v46 }
  0x23   :  { %421 = vrot.lane.b32.xlu1 %v942_v11, %s717_s30  ;;  %413 = vrot.lane.b32.xlu0 %v946_v13, %s717_s30  ;;  %v1015_v27 = vmax.f32 %v291_v3, %v314_v10  ;;  %v344_v6 = vsel %vm304_vm1, %v341_v57, %v343_v47  ;;  %v299_v42 = vmax.f32 %v916_v48, %v261_v51  ;;  %vm45_vm2 = vcmask 130048  }
  0x24   :  { %v1021_v52 = vand.u32 2147483647, %v39_v49  ;;  %v334_v60 = vsel %vm304_vm1, %v331_v63, %v333_v53  ;;  %v1024_v61 = vand.u32 2147483647, %v40_v56  ;;  %v1028_v62 = vmax.f32 %v303_v0, %v344_v6 }
  0x25   :  { %v46_v2 = vsel %vm45_vm2, %v1004_v58, 0.0  ;;  %v47_v37 = vsel %vm45_vm2, %v1006_v15, 0.0  ;;  %v1036_v48 = vmax.f32 %v299_v42, %v334_v60  ;;  %v603_v19 = vmul.f32 %v1004_v58, %v1043_v5 }
  0x26   :  { %v48_v57 = vadd.f32 %v47_v37, %v46_v2  ;;  %v49_v63 = vsel %vm45_vm2, %v1021_v52, 0.0  ;;  %v51_v9 = vsel %vm45_vm2, %v1024_v61, 0.0  ;;  %v604_v20 = vmul.f32 %v1006_v15, %v1048_v7 }
  0x27   :  { %459 = vrot.lane.b32.xlu1 %v826_v40, %s718_s26  ;;  %457 = vrot.lane.b32.xlu0 %v837_v50, %s718_s26  ;;  %v605_v24 = vmul.f32 %v1021_v52, %v1061_v18  ;;  %v607_v25 = vsel %vm45_vm2, %v603_v19, 0.0  ;;  %v606_v28 = vmul.f32 %v1024_v61, %v1070_v22  ;;  %v77_v6 = vrot.slane %v786_v12, 7 }
  0x28   :  { %v50_v4 = vadd.f32 %v49_v63, %v48_v57  ;;  %v608_v26 = vsel %vm45_vm2, %v604_v20, 0.0  ;;  %v78_v42 = vrot.slane %v806_v21, 7  ;;  %vm76_vm3 = vcmask 1040384  }
  0x29   :  { %v609_v29 = vadd.f32 %v608_v26, %v607_v25  ;;  %v610_v31 = vsel %vm45_vm2, %v605_v24, 0.0  ;;  %v612_v32 = vsel %vm45_vm2, %v606_v28, 0.0  ;;  %v80_v63 = vrot.slane %v775_v8, 7 }
  0x2a   :  { %v1056_v14 = vadd.f32 %v51_v9, %v50_v4  ;;  %v79_v37 = vsel %vm76_vm3, %v77_v6, %v78_v42  ;;  %v81_v4 = vrot.slane %v796_v16, 7  ;;  %v87_v9 = vsub.f32 %v786_v12, %v77_v6 }
  0x2b   :  { %467 = vrot.lane.b32.xlu1 %v845_v55, %s718_s26  ;;  %465 = vrot.lane.b32.xlu0 %v849_v59, %s718_s26  ;;  %v611_v34 = vadd.f32 %v610_v31, %v609_v29  ;;  %v88_v19 = vsub.f32 %v806_v21, %v79_v37  ;;  %v89_v31 = vsub.f32 %v775_v8, %v80_v63  ;;  %vm127_vm4 = vcmask 129024  }
  0x2c   :  { %v82_v25 = vsel %vm76_vm3, %v80_v63, %v81_v4  ;;  %v107_v26 = vmul.f32 %v87_v9, %v87_v9  ;;  %vm165_vm5 = vcmask 121856  }
  0x2d   :  { %v1088_v36 = vadd.f32 %v612_v32, %v611_v34  ;;  %v108_v28 = vmul.f32 %v88_v19, %v88_v19  ;;  %v90_v32 = vsub.f32 %v796_v16, %v82_v25 }
  0x2f   :  { %475 = vrot.lane.b32.xlu1 %v868_v17, %s718_s26  ;;  %473 = vrot.lane.b32.xlu0 %v876_v23, %s718_s26 }
  0x33   :  { %483 = vrot.lane.b32.xlu1 %v890_v33, %s718_s26  ;;  %481 = vrot.lane.b32.xlu0 %v908_v44, %s718_s26 }
  0x37   :  { %407 = vrot.lane.b32.xlu1 %v1010_v35, %s717_s30  ;;  %399 = vrot.lane.b32.xlu0 %v1015_v27, %s717_s30 }
  0x3b   :  { %423 = vrot.lane.b32.xlu1 %v1028_v62, %s717_s30  ;;  %415 = vrot.lane.b32.xlu0 %v1036_v48, %s717_s30 }
  0x3f   :  { %469 = vrot.lane.b32.xlu1 %v923_v54, %s718_s26  ;;  %461 = vrot.lane.b32.xlu0 %v933_v1, %s718_s26 }
  0x43   :  { %485 = vrot.lane.b32.xlu1 %v942_v11, %s718_s26  ;;  %477 = vrot.lane.b32.xlu0 %v946_v13, %s718_s26 }
  0x47   :  { %471 = vrot.lane.b32.xlu1 %v1010_v35, %s718_s26  ;;  %463 = vrot.lane.b32.xlu0 %v1015_v27, %s718_s26 }
  0x4b   :  { %487 = vrot.lane.b32.xlu1 %v1028_v62, %s718_s26  ;;  %479 = vrot.lane.b32.xlu0 %v1036_v48, %s718_s26 }
  0x79   :  { %v96_v38 = vpop.permute.xlu1 %95  ;;  %v92_v41 = vpop.permute.xlu0 %91 }
  0x7a   :  { %v105_v43 = vsub.f32 %v775_v8, %v96_v38  ;;  %v103_v45 = vsub.f32 %v786_v12, %v92_v41  ;;  %v116_v38 = vrot.slane %v107_v26, 1  ;;  %v117_v41 = vrot.slane %v108_v28, 1 }
  0x7c   :  { %v145_v30 = vmul.f32 %v103_v45, %v103_v45  ;;  %v147_v46 = vmul.f32 %v105_v43, %v105_v43  ;;  %v110_v43 = vmul.f32 %v90_v32, %v90_v32 }
  0x7d   :  { %v98_v39 = vpop.permute.xlu1 %97  ;;  %v94_v3 = vpop.permute.xlu0 %93 }
  0x7e   :  { %v106_v47 = vsub.f32 %v796_v16, %v98_v39  ;;  %v104_v49 = vsub.f32 %v806_v21, %v94_v3  ;;  %153 = vrot.lane.b32.xlu0 %v145_v30, %s717_s30  ;;  %v109_v21 = vmul.f32 %v89_v31, %v89_v31  ;;  %v585_v30 = vsel %vm45_vm2, %v1043_v5, 0.0 }
  0x7f   :  { %v586_v39 = vsel %vm45_vm2, %v1048_v7, 0.0  ;;  %v118_v16 = vsel %vm115_vm0, %v116_v38, %v117_v41  ;;  %v588_v5 = vsel %vm45_vm2, %v1061_v18, 0.0 }
  0x80   :  { %v146_v10 = vmul.f32 %v104_v49, %v104_v49  ;;  %v148_v56 = vmul.f32 %v106_v47, %v106_v47  ;;  %v119_v47 = vrot.slane %v109_v21, 1  ;;  %v120_v49 = vrot.slane %v110_v43, 1 }
  0x81   :  { %v396_v51 = vpop.permute.xlu1 %395  ;;  %v394_v53 = vpop.permute.xlu0 %393  ;;  %v587_v6 = vadd.f32 %v586_v39, %v585_v30 }
  0x82   :  { %157 = vrot.lane.b32.xlu0 %v147_v46, %s717_s30  ;;  %155 = vrot.lane.b32.xlu1 %v146_v10, %s717_s30  ;;  %v442_v8 = vmax.f32 %v826_v40, %v396_v51  ;;  %v441_v3 = vmax.f32 %v837_v50, %v394_v53  ;;  %v126_v40 = vsel %vm45_vm2, %v118_v16, 0.0  ;;  %v128_v51 = vsel %vm127_vm4, %v117_v41, 0.0 }
  0x83   :  { %v121_v53 = vsel %vm115_vm0, %v119_v47, %v120_v49  ;;  %v589_v9 = vadd.f32 %v588_v5, %v587_v6  ;;  %v132_v30 = vsel %vm127_vm4, %v120_v49, 0.0 }
  0x84   :  { %v130_v19 = vsel %vm45_vm2, %v121_v53, 0.0 }
  0x85   :  { %v404_v0 = vpop.permute.xlu1 %403  ;;  %v402_v60 = vpop.permute.xlu0 %401 }
  0x86   :  { %159 = vrot.lane.b32.xlu1 %v148_v56, %s717_s30  ;;  %v446_v10 = vmax.f32 %v845_v55, %v404_v0  ;;  %v445_v42 = vmax.f32 %v849_v59, %v402_v60  ;;  %v129_v0 = vadd.f32 %v128_v51, %v126_v40  ;;  %v590_v59 = vsel %vm45_vm2, %v1070_v22, 0.0 }
  0x87   :  { %v591_v41 = vadd.f32 %v590_v59, %v589_v9 }
  0x89   :  { %v1108_v2 = vpop.permute.xlu1 %411  ;;  %v1110_v57 = vpop.permute.xlu0 %409 }
  0x8a   :  { %v450_v18 = vmax.f32 %v868_v17, %v1108_v2  ;;  %v449_v25 = vmax.f32 %v876_v23, %v1110_v57  ;;  %v131_v2 = vadd.f32 %v130_v19, %v129_v0 }
  0x8d   :  { %v1116_v20 = vpop.permute.xlu1 %419  ;;  %v1118_v24 = vpop.permute.xlu0 %417 }
  0x8e   :  { %v454_v31 = vmax.f32 %v890_v33, %v1116_v20  ;;  %v453_v22 = vmax.f32 %v908_v44, %v1118_v24 }
  0x91   :  { %v1120_v29 = vpop.permute.xlu1 %405  ;;  %v1124_v34 = vpop.permute.xlu0 %397 }
  0x92   :  { %v447_v51 = vmax.f32 %v923_v54, %v1120_v29  ;;  %v443_v53 = vmax.f32 %v933_v1, %v1124_v34 }
  0x95   :  { %v1126_v12 = vpop.permute.xlu1 %421  ;;  %v1128_v45 = vpop.permute.xlu0 %413 }
  0x96   :  { %v455_v54 = vmax.f32 %v942_v11, %v1126_v12  ;;  %v451_v59 = vmax.f32 %v946_v13, %v1128_v45 }
  0x99   :  { %v460_v46 = vpop.permute.xlu1 %459  ;;  %v458_v56 = vpop.permute.xlu0 %457 }
  0x9a   :  { %v506_v7 = vmax.f32 %v442_v8, %v460_v46  ;;  %v505_v37 = vmax.f32 %v441_v3, %v458_v56  ;;  %v133_v3 = vadd.f32 %v132_v30, %v131_v2 }
  0x9d   :  { %v468_v50 = vpop.permute.xlu1 %467  ;;  %v466_v4 = vpop.permute.xlu0 %465 }
  0x9e   :  { %v510_v63 = vmax.f32 %v446_v10, %v468_v50  ;;  %v509_v55 = vmax.f32 %v445_v42, %v466_v4 }
  0xa0   :  { %v522_v60 = vadd.f32 %v510_v63, %v506_v7  ;;  %v521_v26 = vadd.f32 %v509_v55, %v505_v37 }
  0xa1   :  { %v476_v28 = vpop.permute.xlu1 %475  ;;  %v474_v38 = vpop.permute.xlu0 %473  ;;  %53 = vadd.xlane.f32.xlu0 %v1056_v14 }
  0xa2   :  { %v526_v32 = vmax.f32 %v522_v60, 0.0  ;;  %v525_v17 = vmax.f32 %v521_v26, 0.0  ;;  %v514_v43 = vmax.f32 %v450_v18, %v476_v28  ;;  %v513_v57 = vmax.f32 %v449_v25, %v474_v38 }
  0xa4   :  { %v530_v21 = vmin.f32 %v526_v32, 1.0  ;;  %v529_v23 = vmin.f32 %v525_v17, 1.0 }
  0xa5   :  { %v484_v39 = vpop.permute.xlu1 %483  ;;  %v482_v20 = vpop.permute.xlu0 %481  ;;  %592 = vadd.xlane.f32.xlu0 %v591_v41 }
  0xa6   :  { %v564_v8 = vmul.f32 %v530_v21, %v1006_v15  ;;  %v518_v33 = vmax.f32 %v454_v31, %v484_v39  ;;  %v563_v14 = vmul.f32 %v529_v23, %v1004_v58  ;;  %v517_v16 = vmax.f32 %v453_v22, %v482_v20 }
  0xa7   :  { %v546_v28 = vsel %vm45_vm2, %v530_v21, 0.0  ;;  %v545_v11 = vsel %vm45_vm2, %v529_v23, 0.0 }
  0xa8   :  { %v534_v46 = vadd.f32 %v518_v33, %v514_v43  ;;  %v568_v44 = vsel %vm45_vm2, %v564_v8, 0.0  ;;  %v533_v24 = vadd.f32 %v517_v16, %v513_v57  ;;  %v567_v10 = vsel %vm45_vm2, %v563_v14, 0.0 }
  0xa9   :  { %v408_v47 = vpop.permute.xlu1 %407  ;;  %v400_v56 = vpop.permute.xlu0 %399  ;;  %v569_v6 = vadd.f32 %v568_v44, %v567_v10 }
  0xaa   :  { %v538_v49 = vmax.f32 %v534_v46, 0.0  ;;  %v537_v42 = vmax.f32 %v533_v24, 0.0  ;;  %134 = vadd.xlane.f32.xlu1 %v133_v3  ;;  %v444_v19 = vmax.f32 %v1015_v27, %v400_v56  ;;  %v547_v27 = vadd.f32 %v546_v28, %v545_v11 }
  0xac   :  { %v1161_v5 = vmin.f32 %v538_v49, 1.0  ;;  %v1163_v7 = vmin.f32 %v537_v42, 1.0 }
  0xad   :  { %v424_v40 = vpop.permute.xlu1 %423  ;;  %v416_v50 = vpop.permute.xlu0 %415 }
  0xae   :  { %v644_v37 = vmul.f32 %v1161_v5, %v1006_v15  ;;  %v643_v63 = vmul.f32 %v1163_v7, %v1004_v58  ;;  %614 = vadd.xlane.f32.xlu1 %v1088_v36  ;;  %v448_v58 = vmax.f32 %v1010_v35, %v408_v47  ;;  %v456_v13 = vmax.f32 %v1028_v62, %v424_v40 }
  0xaf   :  { %v452_v41 = vmax.f32 %v1036_v48, %v416_v50  ;;  %v625_v50 = vsel %vm45_vm2, %v1163_v7, 0.0 }
  0xb0   :  { %v648_v4 = vsel %vm45_vm2, %v644_v37, 0.0  ;;  %v647_v55 = vsel %vm45_vm2, %v643_v63, 0.0  ;;  %v626_v37 = vsel %vm45_vm2, %v1161_v5, 0.0 }
  0xb1   :  { %v470_v9 = vpop.permute.xlu1 %469  ;;  %v462_v0 = vpop.permute.xlu0 %461  ;;  %v649_v15 = vadd.f32 %v648_v4, %v647_v55 }
  0xb2   :  { %v511_v29 = vmax.f32 %v447_v51, %v470_v9  ;;  %v507_v1 = vmax.f32 %v443_v53, %v462_v0 }
  0xb4   :  { %v523_v34 = vadd.f32 %v511_v29, %v507_v1 }
  0xb5   :  { %v486_v18 = vpop.permute.xlu1 %485  ;;  %v478_v60 = vpop.permute.xlu0 %477 }
  0xb6   :  { %v519_v36 = vmax.f32 %v455_v54, %v486_v18  ;;  %v527_v25 = vmax.f32 %v523_v34, 0.0  ;;  %v515_v26 = vmax.f32 %v451_v59, %v478_v60  ;;  %v627_v54 = vadd.f32 %v626_v37, %v625_v50 }
  0xb8   :  { %v531_v12 = vmin.f32 %v527_v25, 1.0  ;;  %v535_v31 = vadd.f32 %v519_v36, %v515_v26 }
  0xb9   :  { %v472_v32 = vpop.permute.xlu1 %471  ;;  %v464_v38 = vpop.permute.xlu0 %463 }
  0xba   :  { %v512_v45 = vmax.f32 %v448_v58, %v472_v32  ;;  %v565_v35 = vmul.f32 %v531_v12, %v1021_v52  ;;  %v539_v22 = vmax.f32 %v535_v31, 0.0  ;;  %v508_v17 = vmax.f32 %v444_v19, %v464_v38 }
  0xbb   :  { %v548_v21 = vsel %vm45_vm2, %v531_v12, 0.0 }
  0xbc   :  { %v543_v2 = vmin.f32 %v539_v22, 1.0  ;;  %v524_v43 = vadd.f32 %v512_v45, %v508_v17  ;;  %v570_v23 = vsel %vm45_vm2, %v565_v35, 0.0  ;;  %v549_v48 = vadd.f32 %v548_v21, %v547_v27 }
  0xbd   :  { %v488_v30 = vpop.permute.xlu1 %487  ;;  %v480_v39 = vpop.permute.xlu0 %479  ;;  %v571_v8 = vadd.f32 %v570_v23, %v569_v6 }
  0xbe   :  { %v520_v57 = vmax.f32 %v456_v13, %v488_v30  ;;  %v645_v62 = vmul.f32 %v543_v2, %v1021_v52  ;;  %v528_v33 = vmax.f32 %v524_v43, 0.0  ;;  %v516_v20 = vmax.f32 %v452_v41, %v480_v39 }
  0xbf   :  { %v628_v29 = vsel %vm45_vm2, %v543_v2, 0.0 }
  0xc0   :  { %v532_v14 = vmin.f32 %v528_v33, 1.0  ;;  %v536_v16 = vadd.f32 %v520_v57, %v516_v20  ;;  %v650_v3 = vsel %vm45_vm2, %v645_v62, 0.0  ;;  %v629_v34 = vadd.f32 %v628_v29, %v627_v54 }
  0xc1   :  { %v651_v46 = vadd.f32 %v650_v3, %v649_v15 }
  0xc2   :  { %v540_v44 = vmax.f32 %v536_v16, 0.0  ;;  %v550_v24 = vsel %vm45_vm2, %v532_v14, 0.0  ;;  %v566_v47 = vmul.f32 %v532_v14, %v1024_v61 }
  0xc3   :  { %v551_v10 = vadd.f32 %v550_v24, %v549_v48 }
  0xc4   :  { %v544_v49 = vmin.f32 %v540_v44, 1.0  ;;  %v572_v56 = vsel %vm45_vm2, %v566_v47, 0.0 }
  0xc5   :  { %552 = vadd.xlane.f32.xlu0 %v551_v10  ;;  %v573_v6 = vadd.f32 %v572_v56, %v571_v8 }
  0xc6   :  { %v646_v52 = vmul.f32 %v544_v49, %v1024_v61  ;;  %v630_v18 = vsel %vm45_vm2, %v544_v49, 0.0 }
  0xc7   :  { %574 = vadd.xlane.f32.xlu1 %v573_v6  ;;  %v631_v5 = vadd.f32 %v630_v18, %v629_v34 }
  0xc8   :  { %v652_v42 = vsel %vm45_vm2, %v646_v52, 0.0 }
  0xc9   :  { %v653_v40 = vadd.f32 %v652_v42, %v651_v46 }
  0xcb   :  { %654 = vadd.xlane.f32.xlu1 %v653_v40 }
  0xf0   :  { %v154_v51 = vpop.permute.xlu0 %153 }
  0xf1   :  { %v166_v4 = vsel %vm165_vm5, %v154_v51, 0.0 }
  0xf4   :  { %v156_v53 = vpop.permute.xlu1 %155  ;;  %v158_v63 = vpop.permute.xlu0 %157 }
  0xf5   :  { %v167_v9 = vsel %vm165_vm5, %v156_v53, 0.0  ;;  %v169_v61 = vsel %vm165_vm5, %v158_v63, 0.0 }
  0xf6   :  { %v168_v55 = vadd.f32 %v167_v9, %v166_v4 }
  0xf8   :  { %v170_v0 = vadd.f32 %v169_v61, %v168_v55  ;;  %v160_v15 = vpop.permute.xlu1 %159 }
  0xf9   :  { %v171_v59 = vsel %vm165_vm5, %v160_v15, 0.0 }
  0xfa   :  { %v172_v1 = vadd.f32 %v171_v59, %v170_v0 }
  0xfc   :  { %173 = vadd.xlane.f32.xlu0 %v172_v1 }
 0x100   :  { %632 = vadd.xlane.f32.xlu0 %v631_v5 }
 0x12a   :  { %v54_v7 = vpop.xlane.xlu0 %53 }
 0x12b   :  { %v55_v58 = vrot.slane %v54_v7, 4 }
 0x12d   :  { %v56_v36 = vadd.f32 %v55_v58, %v54_v7 }
 0x12e   :  { %v593_v41 = vpop.xlane.xlu0 %592 }
 0x12f   :  { %v57_v60 = vrot.slane %v56_v36, 2  ;;  %v594_v2 = vrot.slane %v593_v41, 4 }
 0x131   :  { %v58_v19 = vadd.f32 %v57_v60, %v56_v36  ;;  %v595_v39 = vadd.f32 %v594_v2, %v593_v41 }
 0x133   :  { %v135_v25 = vpop.xlane.xlu1 %134  ;;  %v59_v26 = vrot.slane %v58_v19, 1  ;;  %v596_v16 = vrot.slane %v595_v39, 2 }
 0x134   :  { %v136_v28 = vrot.slane %v135_v25, 4 }
 0x135   :  { %v60_v11 = vadd.f32 %v59_v26, %v58_v19  ;;  %v597_v6 = vadd.f32 %v596_v16, %v595_v39 }
 0x136   :  { %v137_v12 = vadd.f32 %v136_v28, %v135_v25 }
 0x137   :  { %680 = vpush %v60_v11  ;;  %v615_v38 = vpop.xlane.xlu1 %614  ;;  %v598_v4 = vrot.slane %v597_v6, 1 }
 0x138   :  { %v138_v31 = vrot.slane %v137_v12, 2  ;;  %v616_v30 = vrot.slane %v615_v38, 4 }
 0x139   :  { %v599_v59 = vadd.f32 %v598_v4, %v597_v6 }
 0x13a   :  { %v139_v32 = vadd.f32 %v138_v31, %v137_v12  ;;  %v617_v8 = vadd.f32 %v616_v30, %v615_v38 }
 0x13c   :  { %v140_v13 = vrot.slane %v139_v32, 1  ;;  %v618_v3 = vrot.slane %v617_v8, 2 }
 0x13e   :  { %v141_v45 = vadd.f32 %v140_v13, %v139_v32  ;;  %v619_v40 = vadd.f32 %v618_v3, %v617_v8 }
 0x140   :  { %682 = vpush %v141_v45  ;;  %v620_v54 = vrot.slane %v619_v40, 1 }
 0x142   :  { %v621_v1 = vadd.f32 %v620_v54, %v619_v40 }
 0x14e   :  { %v553_v22 = vpop.xlane.xlu0 %552 }
 0x14f   :  { %v554_v17 = vrot.slane %v553_v22, 4 }
 0x150   :  { %v575_v35 = vpop.xlane.xlu1 %574 }
 0x151   :  { %v576_v27 = vrot.slane %v575_v35, 4  ;;  %v555_v21 = vadd.f32 %v554_v17, %v553_v22 }
 0x153   :  { %v577_v23 = vadd.f32 %v576_v27, %v575_v35  ;;  %v556_v62 = vrot.slane %v555_v21, 2 }
 0x154   :  { %v655_v43 = vpop.xlane.xlu1 %654 }
 0x155   :  { %v656_v57 = vrot.slane %v655_v43, 4  ;;  %v578_v20 = vrot.slane %v577_v23, 2  ;;  %v557_v24 = vadd.f32 %v556_v62, %v555_v21 }
 0x157   :  { %v657_v48 = vadd.f32 %v656_v57, %v655_v43  ;;  %v579_v56 = vadd.f32 %v578_v20, %v577_v23  ;;  %v558_v51 = vrot.slane %v557_v24, 1 }
 0x159   :  { %v658_v47 = vrot.slane %v657_v48, 2  ;;  %v580_v63 = vrot.slane %v579_v56, 1  ;;  %v559_v61 = vadd.f32 %v558_v51, %v557_v24 }
 0x15b   :  { %v659_v37 = vadd.f32 %v658_v47, %v657_v48  ;;  %v581_v29 = vadd.f32 %v580_v63, %v579_v56 }
 0x15d   :  { %v660_v15 = vrot.slane %v659_v37, 1 }
 0x15f   :  { %v661_v18 = vadd.f32 %v660_v15, %v659_v37 }
 0x168   :  { %s681_s3 = spop %680 }
 0x169   :  { %63 = sst [smem:[#allocation2]] %s681_s3 }
 0x171   :  { %s683_s30 = spop %682 }
 0x172   :  { %144 = sst [smem:[#allocation2 + $0x1]] %s683_s30 }
 0x185   :  { %v174_v33 = vpop.xlane.xlu0 %173 }
 0x186   :  { %v175_v14 = vrot.slane %v174_v33, 4 }
 0x188   :  { %v176_v46 = vadd.f32 %v175_v14, %v174_v33 }
 0x189   :  { %v633_v44 = vpop.xlane.xlu0 %632 }
 0x18a   :  { %v177_v10 = vrot.slane %v176_v46, 2  ;;  %v634_v49 = vrot.slane %v633_v44, 4 }
 0x18c   :  { %v635_v52 = vadd.f32 %v634_v49, %v633_v44  ;;  %v178_v42 = vadd.f32 %v177_v10, %v176_v46 }
 0x18e   :  { %v636_v50 = vrot.slane %v635_v52, 2  ;;  %v179_v53 = vrot.slane %v178_v42, 1 }
 0x190   :  { %v637_v9 = vadd.f32 %v636_v50, %v635_v52  ;;  %v180_v55 = vadd.f32 %v179_v53, %v178_v42 }
 0x192   :  { %684 = vpush %v180_v55  ;;  %v638_v0 = vrot.slane %v637_v9, 1 }
 0x193   :  { %686 = vpush %v559_v61 }
 0x194   :  { %688 = vpush %v581_v29  ;;  %v639_v34 = vadd.f32 %v638_v0, %v637_v9 }
 0x195   :  { %690 = vpush %v599_v59 }
 0x196   :  { %692 = vpush %v621_v1 }
 0x197   :  { %694 = vpush %v639_v34 }
 0x198   :  { %696 = vpush %v661_v18 }
 0x1c3   :  { %s685_s22 = spop %684 }
 0x1c4   :  { %183 = sst [smem:[#allocation2 + $0x2]] %s685_s22  ;;  %s687_s23 = spop %686 }
 0x1c5   :  { %562 = sst [smem:[#allocation2 + $0x3]] %s687_s23  ;;  %s689_s24 = spop %688 }
 0x1c6   :  { %584 = sst [smem:[#allocation2 + $0x4]] %s689_s24  ;;  %s691_s25 = spop %690 }
 0x1c7   :  { %602 = sst [smem:[#allocation2 + $0x5]] %s691_s25  ;;  %s693_s26 = spop %692 }
 0x1c8   :  { %624 = sst [smem:[#allocation2 + $0x6]] %s693_s26  ;;  %s695_s27 = spop %694 }
 0x1c9   :  { %642 = sst [smem:[#allocation2 + $0x7]] %s695_s27  ;;  %s697_s28 = spop %696 }
 0x1ca   :  { %664 = sst [smem:[#allocation2 + $0x8]] %s697_s28 }
 0x1cb   :  { %713 = shalt.err (!%p710_p4)
}
 0x1cc   :  { %s719_s5 = smov [#allocation2]  }
 0x1cd   :  { %674 = dma.smem_to_vmem %s719_s5, 16, %s672_s21, [#allocation3]  }
 0x1ce   :  { %714 = dma.done.wait [#allocation3], 16  }
 0x1cf   :  { %715 = vsyncadd [#allocation3], 4294967280 }
 0x1d0   :  { %678 = sfence }
 0x1d1   :  { %679 = vsyncpa [#allocation3], 1 }

// kernel: human_guided_loss.15
= control target key start
LH: loop header
LB: loop body
LE: loop exit
PB: predicated region body
PF: predicated region fallthrough
CT: control target
= control target key end

     0   :  { %s6563_s0 = inlined_call_operand.vmem [shape: bf16[32,2304], index: 0, kind: input, shape index: {}]   ;;  %s6564_s1 = inlined_call_operand.vmem [shape: bf16[32,2304], index: 1, kind: input, shape index: {}]   ;;  %s6565_s2 = inlined_call_operand.vmem [shape: bf16[2304,256], index: 2, kind: input, shape index: {}]   ;;  %s6566_s3 = inlined_call_operand.vmem [shape: f32[1,256], index: 3, kind: input, shape index: {}]   ;;  %s6567_s4 = inlined_call_operand.hbm [shape: f32[1], index: 4, kind: output, shape index: {}]  }
   0x1   :  { %v3570_v0 = vld [vmem:[%s6565_s2 + $0x74] ss:$8 sps:$4 sm:$0xff]   ;;  %v3574_v2 = vld [vmem:[%s6565_s2 + $0x70] ss:$8 sps:$4 sm:$0xff]   ;;  %v3576_v4 = vld [vmem:[%s6565_s2 + $0x64] ss:$8 sps:$4 sm:$0xff]  }
   0x2   :  { %v3572_v1 = vld [vmem:[%s6565_s2 + $0x174] ss:$8 sps:$4 sm:$0xff]   ;;  %1974 = vmatprep.subr.bf16.mxu0 %v3570_v0  ;;  %v3575_v3 = vld [vmem:[%s6565_s2 + $0x170] ss:$8 sps:$4 sm:$0xff]   ;;  %v3578_v5 = vld [vmem:[%s6565_s2 + $0x164] ss:$8 sps:$4 sm:$0xff]  }
   0x3   :  { %2027 = vmatprep.subr.bf16.mxu1 %v3572_v1  ;;  %1975 = vmatpush1.bf16.msra.mxu0 %v3574_v2  ;;  %v3580_v6 = vld [vmem:[%s6565_s2 + $0x60] ss:$8 sps:$4 sm:$0xff]   ;;  %v3582_v8 = vld [vmem:[%s6565_s2 + $0x54] ss:$8 sps:$4 sm:$0xff]   ;;  %v3586_v10 = vld [vmem:[%s6565_s2 + $0x50] ss:$8 sps:$4 sm:$0xff]  }
   0x4   :  { %2028 = vmatpush1.bf16.msra.mxu1 %v3575_v3  ;;  %1976 = vmatprep.subr.bf16.mxu0 %v3576_v4  ;;  %v3581_v7 = vld [vmem:[%s6565_s2 + $0x160] ss:$8 sps:$4 sm:$0xff]   ;;  %v3584_v9 = vld [vmem:[%s6565_s2 + $0x154] ss:$8 sps:$4 sm:$0xff]   ;;  %v3587_v11 = vld [vmem:[%s6565_s2 + $0x150] ss:$8 sps:$4 sm:$0xff]  }
   0x5   :  { %2029 = vmatprep.subr.bf16.mxu1 %v3578_v5  ;;  %v3588_v12 = vld [vmem:[%s6565_s2 + $0x44] ss:$8 sps:$4 sm:$0xff]   ;;  %v3592_v14 = vld [vmem:[%s6565_s2 + $0x40] ss:$8 sps:$4 sm:$0xff]   ;;  %v3594_v16 = vld [vmem:[%s6565_s2 + $0x34] ss:$8 sps:$4 sm:$0xff]  }
   0x6   :  { %v3590_v13 = vld [vmem:[%s6565_s2 + $0x144] ss:$8 sps:$4 sm:$0xff]   ;;  %v3593_v15 = vld [vmem:[%s6565_s2 + $0x140] ss:$8 sps:$4 sm:$0xff]   ;;  %v3596_v17 = vld [vmem:[%s6565_s2 + $0x134] ss:$8 sps:$4 sm:$0xff]  }
   0x7   :  { %1977 = vmatpush1.bf16.msra.mxu0 %v3580_v6  ;;  %v3598_v18 = vld [vmem:[%s6565_s2 + $0x30] ss:$8 sps:$4 sm:$0xff]   ;;  %v3600_v20 = vld [vmem:[%s6565_s2 + $0x24] ss:$8 sps:$4 sm:$0xff]   ;;  %v3604_v22 = vld [vmem:[%s6565_s2 + $0x20] ss:$8 sps:$4 sm:$0xff]  }
   0x8   :  { %2030 = vmatpush1.bf16.msra.mxu1 %v3581_v7  ;;  %1978 = vmatprep.subr.bf16.mxu0 %v3582_v8  ;;  %v3599_v19 = vld [vmem:[%s6565_s2 + $0x130] ss:$8 sps:$4 sm:$0xff]   ;;  %v3602_v21 = vld [vmem:[%s6565_s2 + $0x124] ss:$8 sps:$4 sm:$0xff]   ;;  %v3605_v23 = vld [vmem:[%s6565_s2 + $0x120] ss:$8 sps:$4 sm:$0xff]  }
   0x9   :  { %2031 = vmatprep.subr.bf16.mxu1 %v3584_v9  ;;  %v3606_v24 = vld [vmem:[%s6565_s2 + $0x14] ss:$8 sps:$4 sm:$0xff]   ;;  %v3610_v26 = vld [vmem:[%s6565_s2 + $0x10] ss:$8 sps:$4 sm:$0xff]   ;;  %v3612_v28 = vld [vmem:[%s6565_s2 + $0x4] ss:$8 sps:$4 sm:$0xff]  }
   0xa   :  { %v3608_v25 = vld [vmem:[%s6565_s2 + $0x114] ss:$8 sps:$4 sm:$0xff]   ;;  %v3611_v27 = vld [vmem:[%s6565_s2 + $0x110] ss:$8 sps:$4 sm:$0xff]   ;;  %v3614_v29 = vld [vmem:[%s6565_s2 + $0x104] ss:$8 sps:$4 sm:$0xff]  }
   0xb   :  { %1979 = vmatpush1.bf16.msra.mxu0 %v3586_v10  ;;  %v3616_v30 = vld [vmem:[%s6565_s2] ss:$8 sps:$4 sm:$0xff]   ;;  %v3618_v32 = vld [vmem:[%s6565_s2 + $0xf4] ss:$8 sps:$4 sm:$0xff]   ;;  %v3622_v34 = vld [vmem:[%s6565_s2 + $0xf0] ss:$8 sps:$4 sm:$0xff]  }
   0xc   :  { %2032 = vmatpush1.bf16.msra.mxu1 %v3587_v11  ;;  %1980 = vmatprep.subr.bf16.mxu0 %v3588_v12  ;;  %v3617_v31 = vld [vmem:[%s6565_s2 + $0x100] ss:$8 sps:$4 sm:$0xff]   ;;  %v3620_v33 = vld [vmem:[%s6565_s2 + $0x1f4] ss:$8 sps:$4 sm:$0xff]   ;;  %v3623_v35 = vld [vmem:[%s6565_s2 + $0x1f0] ss:$8 sps:$4 sm:$0xff]  }
   0xd   :  { %2033 = vmatprep.subr.bf16.mxu1 %v3590_v13  ;;  %v3624_v36 = vld [vmem:[%s6565_s2 + $0xe4] ss:$8 sps:$4 sm:$0xff]   ;;  %v3628_v38 = vld [vmem:[%s6565_s2 + $0xe0] ss:$8 sps:$4 sm:$0xff]   ;;  %v3630_v40 = vld [vmem:[%s6565_s2 + $0xd4] ss:$8 sps:$4 sm:$0xff]  }
   0xe   :  { %v3626_v37 = vld [vmem:[%s6565_s2 + $0x1e4] ss:$8 sps:$4 sm:$0xff]   ;;  %v3629_v39 = vld [vmem:[%s6565_s2 + $0x1e0] ss:$8 sps:$4 sm:$0xff]   ;;  %v3632_v41 = vld [vmem:[%s6565_s2 + $0x1d4] ss:$8 sps:$4 sm:$0xff]  }
   0xf   :  { %1981 = vmatpush1.bf16.msra.mxu0 %v3592_v14  ;;  %v3634_v42 = vld [vmem:[%s6565_s2 + $0xd0] ss:$8 sps:$4 sm:$0xff]   ;;  %v3636_v44 = vld [vmem:[%s6565_s2 + $0xc4] ss:$8 sps:$4 sm:$0xff]   ;;  %v3640_v46 = vld [vmem:[%s6565_s2 + $0xc0] ss:$8 sps:$4 sm:$0xff]  }
  0x10   :  { %2034 = vmatpush1.bf16.msra.mxu1 %v3593_v15  ;;  %1982 = vmatprep.subr.bf16.mxu0 %v3594_v16  ;;  %v3635_v43 = vld [vmem:[%s6565_s2 + $0x1d0] ss:$8 sps:$4 sm:$0xff]   ;;  %v3638_v45 = vld [vmem:[%s6565_s2 + $0x1c4] ss:$8 sps:$4 sm:$0xff]   ;;  %v3641_v47 = vld [vmem:[%s6565_s2 + $0x1c0] ss:$8 sps:$4 sm:$0xff]  }
  0x11   :  { %2035 = vmatprep.subr.bf16.mxu1 %v3596_v17  ;;  %v3642_v48 = vld [vmem:[%s6565_s2 + $0xb4] ss:$8 sps:$4 sm:$0xff]   ;;  %v3668_v49 = vld [vmem:[%s6563_s0 + $0x4] ss:$72 sps:$4 sm:$0xff]   ;;  %v3646_v52 = vld [vmem:[%s6565_s2 + $0xb0] ss:$8 sps:$4 sm:$0xff]  }
  0x12   :  { %v3644_v50 = vld [vmem:[%s6565_s2 + $0x1b4] ss:$8 sps:$4 sm:$0xff]   ;;  %2006 = vmatprep.mubr.bf16.mxu0 %v3668_v49  ;;  %v3647_v53 = vld [vmem:[%s6565_s2 + $0x1b0] ss:$8 sps:$4 sm:$0xff]   ;;  %v3648_v54 = vld [vmem:[%s6565_s2 + $0xa4] ss:$8 sps:$4 sm:$0xff]  }
  0x13   :  { %1983 = vmatpush1.bf16.msra.mxu0 %v3598_v18  ;;  %v3671_v51 = vld [vmem:[%s6563_s0 + $0xc] ss:$72 sps:$4 sm:$0xff]   ;;  %v3652_v56 = vld [vmem:[%s6565_s2 + $0xa0] ss:$8 sps:$4 sm:$0xff]   ;;  %v3658_v60 = vld [vmem:[%s6565_s2 + $0x90] ss:$8 sps:$4 sm:$0xff]  }
  0x14   :  { %2036 = vmatpush1.bf16.msra.mxu1 %v3599_v19  ;;  %1984 = vmatprep.subr.bf16.mxu0 %v3600_v20  ;;  %v3650_v55 = vld [vmem:[%s6565_s2 + $0x1a4] ss:$8 sps:$4 sm:$0xff]   ;;  %v3653_v57 = vld [vmem:[%s6565_s2 + $0x1a0] ss:$8 sps:$4 sm:$0xff]   ;;  %v3654_v58 = vld [vmem:[%s6565_s2 + $0x94] ss:$8 sps:$4 sm:$0xff]  }
  0x15   :  { %2037 = vmatprep.subr.bf16.mxu1 %v3602_v21  ;;  %2059 = vmatprep.mubr.bf16.mxu1 %v3671_v51  ;;  %v3656_v59 = vld [vmem:[%s6565_s2 + $0x194] ss:$8 sps:$4 sm:$0xff]   ;;  %v3659_v61 = vld [vmem:[%s6565_s2 + $0x190] ss:$8 sps:$4 sm:$0xff]   ;;  %v3660_v62 = vld [vmem:[%s6565_s2 + $0x84] ss:$8 sps:$4 sm:$0xff]  }
  0x16   :  { %v3662_v63 = vld [vmem:[%s6565_s2 + $0x184] ss:$8 sps:$4 sm:$0xff]   ;;  %v3664_v0 = vld [vmem:[%s6565_s2 + $0x80] ss:$8 sps:$4 sm:$0xff]   ;;  %v3674_v2 = vld [vmem:[%s6565_s2 + $0x274] ss:$8 sps:$4 sm:$0xff]  }
  0x17   :  { %1985 = vmatpush1.bf16.msra.mxu0 %v3604_v22  ;;  %v3665_v1 = vld [vmem:[%s6565_s2 + $0x180] ss:$8 sps:$4 sm:$0xff]   ;;  %v3677_v3 = vld [vmem:[%s6565_s2 + $0x374] ss:$8 sps:$4 sm:$0xff]   ;;  %v3672_v6 = vld [vmem:[%s6565_s2 + $0x270] ss:$8 sps:$4 sm:$0xff]  }
  0x18   :  { %2038 = vmatpush1.bf16.msra.mxu1 %v3605_v23  ;;  %1986 = vmatprep.subr.bf16.mxu0 %v3606_v24  ;;  %v3666_v4 = vld [vmem:[%s6563_s0] ss:$72 sps:$4 sm:$0xff]   ;;  %v3675_v7 = vld [vmem:[%s6565_s2 + $0x370] ss:$8 sps:$4 sm:$0xff]   ;;  %v3680_v8 = vld [vmem:[%s6565_s2 + $0x264] ss:$8 sps:$4 sm:$0xff]  }
  0x19   :  { %2039 = vmatprep.subr.bf16.mxu1 %v3608_v25  ;;  %v3669_v5 = vld [vmem:[%s6563_s0 + $0x8] ss:$72 sps:$4 sm:$0xff]   ;;  %v3683_v9 = vld [vmem:[%s6565_s2 + $0x364] ss:$8 sps:$4 sm:$0xff]   ;;  %v3686_v12 = vld [vmem:[%s6565_s2 + $0x254] ss:$8 sps:$4 sm:$0xff]  }
  0x1a   :  { %v3678_v10 = vld [vmem:[%s6565_s2 + $0x260] ss:$8 sps:$4 sm:$0xff]   ;;  %v3689_v13 = vld [vmem:[%s6565_s2 + $0x354] ss:$8 sps:$4 sm:$0xff]   ;;  %v3684_v14 = vld [vmem:[%s6565_s2 + $0x250] ss:$8 sps:$4 sm:$0xff]  }
  0x1b   :  { %1987 = vmatpush1.bf16.msra.mxu0 %v3610_v26  ;;  %v3681_v11 = vld [vmem:[%s6565_s2 + $0x360] ss:$8 sps:$4 sm:$0xff]   ;;  %v3687_v15 = vld [vmem:[%s6565_s2 + $0x350] ss:$8 sps:$4 sm:$0xff]   ;;  %v3692_v16 = vld [vmem:[%s6565_s2 + $0x244] ss:$8 sps:$4 sm:$0xff]  }
  0x1c   :  { %2040 = vmatpush1.bf16.msra.mxu1 %v3611_v27  ;;  %1988 = vmatprep.subr.bf16.mxu0 %v3612_v28  ;;  %v3695_v17 = vld [vmem:[%s6565_s2 + $0x344] ss:$8 sps:$4 sm:$0xff]   ;;  %v3690_v18 = vld [vmem:[%s6565_s2 + $0x240] ss:$8 sps:$4 sm:$0xff]   ;;  %v3698_v20 = vld [vmem:[%s6565_s2 + $0x234] ss:$8 sps:$4 sm:$0xff]  }
  0x1d   :  { %2041 = vmatprep.subr.bf16.mxu1 %v3614_v29  ;;  %v3693_v19 = vld [vmem:[%s6565_s2 + $0x340] ss:$8 sps:$4 sm:$0xff]   ;;  %v3701_v21 = vld [vmem:[%s6565_s2 + $0x334] ss:$8 sps:$4 sm:$0xff]   ;;  %v3696_v22 = vld [vmem:[%s6565_s2 + $0x230] ss:$8 sps:$4 sm:$0xff]  }
  0x1e   :  { %v3699_v23 = vld [vmem:[%s6565_s2 + $0x330] ss:$8 sps:$4 sm:$0xff]   ;;  %v3704_v24 = vld [vmem:[%s6565_s2 + $0x224] ss:$8 sps:$4 sm:$0xff]   ;;  %v3750_v26 = vld [vmem:[%s6563_s0 + $0x94] ss:$72 sps:$4 sm:$0xff]  }
  0x1f   :  { %1989 = vmatpush1.bf16.msra.mxu0 %v3616_v30  ;;  %v3707_v25 = vld [vmem:[%s6565_s2 + $0x324] ss:$8 sps:$4 sm:$0xff]   ;;  %v3752_v27 = vld [vmem:[%s6563_s0 + $0x90] ss:$72 sps:$4 sm:$0xff]   ;;  %v3702_v29 = vld [vmem:[%s6565_s2 + $0x220] ss:$8 sps:$4 sm:$0xff]  }
  0x20   :  { %2042 = vmatpush1.bf16.msra.mxu1 %v3617_v31  ;;  %1990 = vmatprep.subr.bf16.mxu0 %v3618_v32  ;;  %v3753_v28 = vld [vmem:[%s6563_s0 + $0x9c] ss:$72 sps:$4 sm:$0xff]   ;;  %v3705_v30 = vld [vmem:[%s6565_s2 + $0x320] ss:$8 sps:$4 sm:$0xff]  }
  0x21   :  { %2043 = vmatprep.subr.bf16.mxu1 %v3620_v33  ;;  %v3710_v31 = vld [vmem:[%s6565_s2 + $0x214] ss:$8 sps:$4 sm:$0xff]   ;;  %v3761_v33 = vld [vmem:[%s6563_s0 + $0x98] ss:$72 sps:$4 sm:$0xff]  }
  0x22   :  { %v3713_v32 = vld [vmem:[%s6565_s2 + $0x314] ss:$8 sps:$4 sm:$0xff]   ;;  %v3729_v49 = vld [vmem:[%s6565_s2 + $0x3e0] ss:$8 sps:$4 sm:$0xff]  }
  0x23   :  { %1991 = vmatpush2.bf16.msra.mxu0 %v3622_v34  ;;  %v3708_v34 = vld [vmem:[%s6565_s2 + $0x210] ss:$8 sps:$4 sm:$0xff]   ;;  %v3737_v51 = vld [vmem:[%s6565_s2 + $0x3d4] ss:$8 sps:$4 sm:$0xff]  }
  0x24   :  { %2044 = vmatpush2.bf16.msra.mxu1 %v3623_v35  ;;  %1992 = vmatprep.subr.bf16.mxu0 %v3624_v36  ;;  %v3711_v35 = vld [vmem:[%s6565_s2 + $0x310] ss:$8 sps:$4 sm:$0xff]   ;;  %v3716_v36 = vld [vmem:[%s6565_s2 + $0x204] ss:$8 sps:$4 sm:$0xff]  }
  0x25   :  { %2045 = vmatprep.subr.bf16.mxu1 %v3626_v37  ;;  %v3719_v37 = vld [vmem:[%s6565_s2 + $0x304] ss:$8 sps:$4 sm:$0xff]  }
  0x27   :  { %1993 = vmatpush2.bf16.msra.mxu0 %v3628_v38  ;;  %v3714_v38 = vld [vmem:[%s6565_s2 + $0x200] ss:$8 sps:$4 sm:$0xff]  }
  0x28   :  { %2046 = vmatpush2.bf16.msra.mxu1 %v3629_v39  ;;  %1994 = vmatprep.subr.bf16.mxu0 %v3630_v40  ;;  %v3717_v39 = vld [vmem:[%s6565_s2 + $0x300] ss:$8 sps:$4 sm:$0xff]   ;;  %v3722_v40 = vld [vmem:[%s6565_s2 + $0x2f4] ss:$8 sps:$4 sm:$0xff]  }
  0x29   :  { %2047 = vmatprep.subr.bf16.mxu1 %v3632_v41  ;;  %v3776_v41 = vld [vmem:[%s6563_s0 + $0x14] ss:$72 sps:$4 sm:$0xff]  }
  0x2b   :  { %1995 = vmatpush2.bf16.msra.mxu0 %v3634_v42  ;;  %v3725_v42 = vld [vmem:[%s6565_s2 + $0x3f4] ss:$8 sps:$4 sm:$0xff]  }
  0x2c   :  { %2048 = vmatpush2.bf16.msra.mxu1 %v3635_v43  ;;  %1996 = vmatprep.subr.bf16.mxu0 %v3636_v44  ;;  %v3779_v43 = vld [vmem:[%s6563_s0 + $0x1c] ss:$72 sps:$4 sm:$0xff]   ;;  %v3720_v44 = vld [vmem:[%s6565_s2 + $0x2f0] ss:$8 sps:$4 sm:$0xff]  }
  0x2d   :  { %2049 = vmatprep.subr.bf16.mxu1 %v3638_v45  ;;  %v3723_v45 = vld [vmem:[%s6565_s2 + $0x3f0] ss:$8 sps:$4 sm:$0xff]  }
  0x2f   :  { %1997 = vmatpush2.bf16.msra.mxu0 %v3640_v46  ;;  %v3728_v46 = vld [vmem:[%s6565_s2 + $0x2e4] ss:$8 sps:$4 sm:$0xff]  }
  0x30   :  { %2050 = vmatpush2.bf16.msra.mxu1 %v3641_v47  ;;  %1998 = vmatprep.subr.bf16.mxu0 %v3642_v48  ;;  %v3731_v47 = vld [vmem:[%s6565_s2 + $0x3e4] ss:$8 sps:$4 sm:$0xff]   ;;  %v3726_v48 = vld [vmem:[%s6565_s2 + $0x2e0] ss:$8 sps:$4 sm:$0xff]  }
  0x31   :  { %2051 = vmatprep.subr.bf16.mxu1 %v3644_v50  ;;  %v3734_v50 = vld [vmem:[%s6565_s2 + $0x2d4] ss:$8 sps:$4 sm:$0xff]  }
  0x33   :  { %1999 = vmatpush2.bf16.msra.mxu0 %v3646_v52  ;;  %v3732_v52 = vld [vmem:[%s6565_s2 + $0x2d0] ss:$8 sps:$4 sm:$0xff]  }
  0x34   :  { %2052 = vmatpush2.bf16.msra.mxu1 %v3647_v53  ;;  %2000 = vmatprep.subr.bf16.mxu0 %v3648_v54  ;;  %v3735_v53 = vld [vmem:[%s6565_s2 + $0x3d0] ss:$8 sps:$4 sm:$0xff]   ;;  %v3740_v54 = vld [vmem:[%s6565_s2 + $0x2c4] ss:$8 sps:$4 sm:$0xff]  }
  0x35   :  { %2053 = vmatprep.subr.bf16.mxu1 %v3650_v55  ;;  %v3743_v55 = vld [vmem:[%s6565_s2 + $0x3c4] ss:$8 sps:$4 sm:$0xff]  }
  0x37   :  { %2001 = vmatpush2.bf16.msra.mxu0 %v3652_v56  ;;  %v3738_v56 = vld [vmem:[%s6565_s2 + $0x2c0] ss:$8 sps:$4 sm:$0xff]  }
  0x38   :  { %2054 = vmatpush2.bf16.msra.mxu1 %v3653_v57  ;;  %2002 = vmatprep.subr.bf16.mxu0 %v3654_v58  ;;  %v3741_v57 = vld [vmem:[%s6565_s2 + $0x3c0] ss:$8 sps:$4 sm:$0xff]   ;;  %v3746_v58 = vld [vmem:[%s6565_s2 + $0x2b4] ss:$8 sps:$4 sm:$0xff]  }
  0x39   :  { %2055 = vmatprep.subr.bf16.mxu1 %v3656_v59  ;;  %v3749_v59 = vld [vmem:[%s6565_s2 + $0x3b4] ss:$8 sps:$4 sm:$0xff]  }
  0x3b   :  { %2003 = vmatpush2.bf16.msra.mxu0 %v3658_v60  ;;  %v3744_v60 = vld [vmem:[%s6565_s2 + $0x2b0] ss:$8 sps:$4 sm:$0xff]  }
  0x3c   :  { %2056 = vmatpush2.bf16.msra.mxu1 %v3659_v61  ;;  %2004 = vmatprep.subr.bf16.mxu0 %v3660_v62  ;;  %v3747_v61 = vld [vmem:[%s6565_s2 + $0x3b0] ss:$8 sps:$4 sm:$0xff]   ;;  %v3757_v62 = vld [vmem:[%s6565_s2 + $0x2a4] ss:$8 sps:$4 sm:$0xff]  }
  0x3d   :  { %2057 = vmatprep.subr.bf16.mxu1 %v3662_v63  ;;  %v3760_v63 = vld [vmem:[%s6565_s2 + $0x3a4] ss:$8 sps:$4 sm:$0xff]  }
  0x3f   :  { %2005 = vmatpush2.bf16.msra.mxu0 %v3664_v0  ;;  %v3755_v0 = vld [vmem:[%s6565_s2 + $0x2a0] ss:$8 sps:$4 sm:$0xff]  }
  0x40   :  { %2058 = vmatpush2.bf16.msra.mxu1 %v3665_v1  ;;  %2080 = vmatprep.subr.bf16.mxu0 %v3674_v2  ;;  %v3758_v1 = vld [vmem:[%s6565_s2 + $0x3a0] ss:$8 sps:$4 sm:$0xff]   ;;  %v3764_v2 = vld [vmem:[%s6565_s2 + $0x294] ss:$8 sps:$4 sm:$0xff]  }
  0x41   :  { %2133 = vmatprep.subr.bf16.mxu1 %v3677_v3  ;;  %v3767_v3 = vld [vmem:[%s6565_s2 + $0x394] ss:$8 sps:$4 sm:$0xff]  }
  0x42   :  { %2007 = vmatmul.mubr.bf16.vlgmr.msra.gmra.mxu0 %v3666_v4  ;;  %v3762_v4 = vld [vmem:[%s6565_s2 + $0x290] ss:$8 sps:$4 sm:$0xff]  }
  0x43   :  { %2060 = vmatmul.mubr.bf16.vlgmr.msra.gmra.mxu1 %v3669_v5  ;;  %2081 = vmatpush1.bf16.msra.mxu0 %v3672_v6  ;;  %v3765_v5 = vld [vmem:[%s6565_s2 + $0x390] ss:$8 sps:$4 sm:$0xff]   ;;  %v3770_v6 = vld [vmem:[%s6565_s2 + $0x284] ss:$8 sps:$4 sm:$0xff]  }
  0x44   :  { %2134 = vmatpush1.bf16.msra.mxu1 %v3675_v7  ;;  %2082 = vmatprep.subr.bf16.mxu0 %v3680_v8  ;;  %v3773_v7 = vld [vmem:[%s6565_s2 + $0x384] ss:$8 sps:$4 sm:$0xff]   ;;  %v3768_v8 = vld [vmem:[%s6565_s2 + $0x280] ss:$8 sps:$4 sm:$0xff]  }
  0x45   :  { %2135 = vmatprep.subr.bf16.mxu1 %v3683_v9  ;;  %2016 = vmatprep.mubr.bf16.mxu0 %v3750_v26  ;;  %v3771_v9 = vld [vmem:[%s6565_s2 + $0x380] ss:$8 sps:$4 sm:$0xff]   ;;  %v3798_v26 = vld [vmem:[%s6565_s2 + $0x550] ss:$8 sps:$4 sm:$0xff]  }
  0x46   :  { %2069 = vmatprep.mubr.bf16.mxu1 %v3753_v28  ;;  %v3806_v28 = vld [vmem:[%s6565_s2 + $0x444] ss:$8 sps:$4 sm:$0xff]  }
  0x47   :  { %2083 = vmatpush1.bf16.msra.mxu0 %v3678_v10  ;;  %v3782_v10 = vld [vmem:[%s6565_s2 + $0x474] ss:$8 sps:$4 sm:$0xff]  }
  0x48   :  { %2136 = vmatpush1.bf16.msra.mxu1 %v3681_v11  ;;  %2084 = vmatprep.subr.bf16.mxu0 %v3686_v12  ;;  %v3785_v11 = vld [vmem:[%s6565_s2 + $0x574] ss:$8 sps:$4 sm:$0xff]   ;;  %v3774_v12 = vld [vmem:[%s6563_s0 + $0x10] ss:$72 sps:$4 sm:$0xff]  }
  0x49   :  { %2137 = vmatprep.subr.bf16.mxu1 %v3689_v13  ;;  %v3777_v13 = vld [vmem:[%s6563_s0 + $0x18] ss:$72 sps:$4 sm:$0xff]  }
  0x4a   :  { %2017 = vmatmul.mubr.bf16.gmra.mxu0 %v3752_v27  ;;  %v3803_v27 = vld [vmem:[%s6563_s0 + $0xa8] ss:$72 sps:$4 sm:$0xff]  }
  0x4b   :  { %2085 = vmatpush1.bf16.msra.mxu0 %v3684_v14  ;;  %2070 = vmatmul.mubr.bf16.gmra.mxu1 %v3761_v33  ;;  %v3780_v14 = vld [vmem:[%s6565_s2 + $0x470] ss:$8 sps:$4 sm:$0xff]   ;;  %v3884_v33 = vld [vmem:[%s6563_s0 + $0x24] ss:$72 sps:$4 sm:$0xff]  }
  0x4c   :  { %2138 = vmatpush1.bf16.msra.mxu1 %v3687_v15  ;;  %2086 = vmatprep.subr.bf16.mxu0 %v3692_v16  ;;  %v3783_v15 = vld [vmem:[%s6565_s2 + $0x570] ss:$8 sps:$4 sm:$0xff]   ;;  %v3788_v16 = vld [vmem:[%s6565_s2 + $0x464] ss:$8 sps:$4 sm:$0xff]  }
  0x4d   :  { %2139 = vmatprep.subr.bf16.mxu1 %v3695_v17  ;;  %2112 = vmatprep.mubr.bf16.mxu0 %v3776_v41  ;;  %v3791_v17 = vld [vmem:[%s6565_s2 + $0x564] ss:$8 sps:$4 sm:$0xff]   ;;  %v3819_v41 = vld [vmem:[%s6565_s2 + $0x520] ss:$8 sps:$4 sm:$0xff]  }
  0x4e   :  { %2165 = vmatprep.mubr.bf16.mxu1 %v3779_v43  ;;  %v3827_v43 = vld [vmem:[%s6565_s2 + $0x514] ss:$8 sps:$4 sm:$0xff]  }
  0x4f   :  { %2087 = vmatpush1.bf16.msra.mxu0 %v3690_v18  ;;  %v3792_v18 = vld [vmem:[%s6563_s0 + $0xa4] ss:$72 sps:$4 sm:$0xff]  }
  0x50   :  { %2140 = vmatpush1.bf16.msra.mxu1 %v3693_v19  ;;  %2088 = vmatprep.subr.bf16.mxu0 %v3698_v20  ;;  %v3801_v19 = vld [vmem:[%s6563_s0 + $0xac] ss:$72 sps:$4 sm:$0xff]   ;;  %v3786_v20 = vld [vmem:[%s6565_s2 + $0x460] ss:$8 sps:$4 sm:$0xff]  }
  0x51   :  { %2141 = vmatprep.subr.bf16.mxu1 %v3701_v21  ;;  %v3789_v21 = vld [vmem:[%s6565_s2 + $0x560] ss:$8 sps:$4 sm:$0xff]  }
  0x53   :  { %2089 = vmatpush1.bf16.msra.mxu0 %v3696_v22  ;;  %v3797_v22 = vld [vmem:[%s6565_s2 + $0x454] ss:$8 sps:$4 sm:$0xff]  }
  0x54   :  { %2142 = vmatpush1.bf16.msra.mxu1 %v3699_v23  ;;  %2090 = vmatprep.subr.bf16.mxu0 %v3704_v24  ;;  %v3800_v23 = vld [vmem:[%s6565_s2 + $0x554] ss:$8 sps:$4 sm:$0xff]   ;;  %v3794_v24 = vld [vmem:[%s6563_s0 + $0xa0] ss:$72 sps:$4 sm:$0xff]  }
  0x55   :  { %2143 = vmatprep.subr.bf16.mxu1 %v3707_v25  ;;  %v3795_v25 = vld [vmem:[%s6565_s2 + $0x450] ss:$8 sps:$4 sm:$0xff]  }
  0x57   :  { %2091 = vmatpush1.bf16.msra.mxu0 %v3702_v29  ;;  %v3809_v29 = vld [vmem:[%s6565_s2 + $0x544] ss:$8 sps:$4 sm:$0xff]  }
  0x58   :  { %2144 = vmatpush1.bf16.msra.mxu1 %v3705_v30  ;;  %2092 = vmatprep.subr.bf16.mxu0 %v3710_v31  ;;  %v3804_v30 = vld [vmem:[%s6565_s2 + $0x440] ss:$8 sps:$4 sm:$0xff]  }
  0x59   :  { %2145 = vmatprep.subr.bf16.mxu1 %v3713_v32  ;;  %v3807_v31 = vld [vmem:[%s6565_s2 + $0x540] ss:$8 sps:$4 sm:$0xff]   ;;  %v3812_v32 = vld [vmem:[%s6565_s2 + $0x434] ss:$8 sps:$4 sm:$0xff]  }
  0x5b   :  { %2093 = vmatpush1.bf16.msra.mxu0 %v3708_v34  ;;  %v3815_v34 = vld [vmem:[%s6565_s2 + $0x534] ss:$8 sps:$4 sm:$0xff]  }
  0x5c   :  { %2146 = vmatpush1.bf16.msra.mxu1 %v3711_v35  ;;  %2094 = vmatprep.subr.bf16.mxu0 %v3716_v36  ;;  %v3887_v35 = vld [vmem:[%s6563_s0 + $0x2c] ss:$72 sps:$4 sm:$0xff]   ;;  %v3810_v36 = vld [vmem:[%s6565_s2 + $0x430] ss:$8 sps:$4 sm:$0xff]  }
  0x5d   :  { %2147 = vmatprep.subr.bf16.mxu1 %v3719_v37  ;;  %v3813_v37 = vld [vmem:[%s6565_s2 + $0x530] ss:$8 sps:$4 sm:$0xff]  }
  0x5f   :  { %2095 = vmatpush1.bf16.msra.mxu0 %v3714_v38  ;;  %v3818_v38 = vld [vmem:[%s6565_s2 + $0x424] ss:$8 sps:$4 sm:$0xff]  }
  0x60   :  { %2148 = vmatpush1.bf16.msra.mxu1 %v3717_v39  ;;  %2096 = vmatprep.subr.bf16.mxu0 %v3722_v40  ;;  %v3821_v39 = vld [vmem:[%s6565_s2 + $0x524] ss:$8 sps:$4 sm:$0xff]   ;;  %v3816_v40 = vld [vmem:[%s6565_s2 + $0x420] ss:$8 sps:$4 sm:$0xff]  }
  0x61   :  { %2149 = vmatprep.subr.bf16.mxu1 %v3725_v42  ;;  %v3824_v42 = vld [vmem:[%s6565_s2 + $0x414] ss:$8 sps:$4 sm:$0xff]  }
  0x63   :  { %2097 = vmatpush2.bf16.msra.mxu0 %v3720_v44  ;;  %v3822_v44 = vld [vmem:[%s6565_s2 + $0x410] ss:$8 sps:$4 sm:$0xff]  }
  0x64   :  { %2150 = vmatpush2.bf16.msra.mxu1 %v3723_v45  ;;  %2098 = vmatprep.subr.bf16.mxu0 %v3728_v46  ;;  %v3825_v45 = vld [vmem:[%s6565_s2 + $0x510] ss:$8 sps:$4 sm:$0xff]   ;;  %v3830_v46 = vld [vmem:[%s6565_s2 + $0x404] ss:$8 sps:$4 sm:$0xff]  }
  0x65   :  { %2151 = vmatprep.subr.bf16.mxu1 %v3731_v47  ;;  %v3833_v47 = vld [vmem:[%s6565_s2 + $0x504] ss:$8 sps:$4 sm:$0xff]  }
  0x67   :  { %2099 = vmatpush2.bf16.msra.mxu0 %v3726_v48  ;;  %v3828_v48 = vld [vmem:[%s6565_s2 + $0x400] ss:$8 sps:$4 sm:$0xff]  }
  0x68   :  { %2152 = vmatpush2.bf16.msra.mxu1 %v3729_v49  ;;  %2100 = vmatprep.subr.bf16.mxu0 %v3734_v50  ;;  %v3831_v49 = vld [vmem:[%s6565_s2 + $0x500] ss:$8 sps:$4 sm:$0xff]   ;;  %v3836_v50 = vld [vmem:[%s6565_s2 + $0x4f4] ss:$8 sps:$4 sm:$0xff]  }
  0x69   :  { %2153 = vmatprep.subr.bf16.mxu1 %v3737_v51  ;;  %v3839_v51 = vld [vmem:[%s6565_s2 + $0x5f4] ss:$8 sps:$4 sm:$0xff]  }
  0x6b   :  { %2101 = vmatpush2.bf16.msra.mxu0 %v3732_v52  ;;  %v3834_v52 = vld [vmem:[%s6565_s2 + $0x4f0] ss:$8 sps:$4 sm:$0xff]  }
  0x6c   :  { %2154 = vmatpush2.bf16.msra.mxu1 %v3735_v53  ;;  %2102 = vmatprep.subr.bf16.mxu0 %v3740_v54  ;;  %v3837_v53 = vld [vmem:[%s6565_s2 + $0x5f0] ss:$8 sps:$4 sm:$0xff]   ;;  %v3842_v54 = vld [vmem:[%s6565_s2 + $0x4e4] ss:$8 sps:$4 sm:$0xff]  }
  0x6d   :  { %2155 = vmatprep.subr.bf16.mxu1 %v3743_v55  ;;  %v3845_v55 = vld [vmem:[%s6565_s2 + $0x5e4] ss:$8 sps:$4 sm:$0xff]  }
  0x6f   :  { %2103 = vmatpush2.bf16.msra.mxu0 %v3738_v56  ;;  %v3840_v56 = vld [vmem:[%s6565_s2 + $0x4e0] ss:$8 sps:$4 sm:$0xff]  }
  0x70   :  { %2156 = vmatpush2.bf16.msra.mxu1 %v3741_v57  ;;  %2104 = vmatprep.subr.bf16.mxu0 %v3746_v58  ;;  %v3843_v57 = vld [vmem:[%s6565_s2 + $0x5e0] ss:$8 sps:$4 sm:$0xff]   ;;  %v3848_v58 = vld [vmem:[%s6565_s2 + $0x4d4] ss:$8 sps:$4 sm:$0xff]  }
  0x71   :  { %2157 = vmatprep.subr.bf16.mxu1 %v3749_v59  ;;  %v3851_v59 = vld [vmem:[%s6565_s2 + $0x5d4] ss:$8 sps:$4 sm:$0xff]  }
  0x73   :  { %2105 = vmatpush2.bf16.msra.mxu0 %v3744_v60  ;;  %v3846_v60 = vld [vmem:[%s6565_s2 + $0x4d0] ss:$8 sps:$4 sm:$0xff]  }
  0x74   :  { %2158 = vmatpush2.bf16.msra.mxu1 %v3747_v61  ;;  %2106 = vmatprep.subr.bf16.mxu0 %v3757_v62  ;;  %v3849_v61 = vld [vmem:[%s6565_s2 + $0x5d0] ss:$8 sps:$4 sm:$0xff]   ;;  %v3854_v62 = vld [vmem:[%s6565_s2 + $0x4c4] ss:$8 sps:$4 sm:$0xff]  }
  0x75   :  { %2159 = vmatprep.subr.bf16.mxu1 %v3760_v63  ;;  %v3857_v63 = vld [vmem:[%s6565_s2 + $0x5c4] ss:$8 sps:$4 sm:$0xff]  }
  0x77   :  { %2107 = vmatpush2.bf16.msra.mxu0 %v3755_v0  ;;  %v3852_v0 = vld [vmem:[%s6565_s2 + $0x4c0] ss:$8 sps:$4 sm:$0xff]  }
  0x78   :  { %2160 = vmatpush2.bf16.msra.mxu1 %v3758_v1  ;;  %2108 = vmatprep.subr.bf16.mxu0 %v3764_v2  ;;  %v3855_v1 = vld [vmem:[%s6565_s2 + $0x5c0] ss:$8 sps:$4 sm:$0xff]   ;;  %v3860_v2 = vld [vmem:[%s6565_s2 + $0x4b4] ss:$8 sps:$4 sm:$0xff]  }
  0x79   :  { %2161 = vmatprep.subr.bf16.mxu1 %v3767_v3  ;;  %v3863_v3 = vld [vmem:[%s6565_s2 + $0x5b4] ss:$8 sps:$4 sm:$0xff]  }
  0x7b   :  { %2109 = vmatpush2.bf16.msra.mxu0 %v3762_v4  ;;  %v3858_v4 = vld [vmem:[%s6565_s2 + $0x4b0] ss:$8 sps:$4 sm:$0xff]  }
  0x7c   :  { %2162 = vmatpush2.bf16.msra.mxu1 %v3765_v5  ;;  %2110 = vmatprep.subr.bf16.mxu0 %v3770_v6  ;;  %v3861_v5 = vld [vmem:[%s6565_s2 + $0x5b0] ss:$8 sps:$4 sm:$0xff]   ;;  %v3866_v6 = vld [vmem:[%s6565_s2 + $0x4a4] ss:$8 sps:$4 sm:$0xff]  }
  0x7d   :  { %2163 = vmatprep.subr.bf16.mxu1 %v3773_v7  ;;  %v3869_v7 = vld [vmem:[%s6565_s2 + $0x5a4] ss:$8 sps:$4 sm:$0xff]  }
  0x7f   :  { %2111 = vmatpush2.bf16.msra.mxu0 %v3768_v8  ;;  %v3864_v8 = vld [vmem:[%s6565_s2 + $0x4a0] ss:$8 sps:$4 sm:$0xff]  }
  0x80   :  { %2164 = vmatpush2.bf16.msra.mxu1 %v3771_v9  ;;  %2186 = vmatprep.subr.bf16.mxu0 %v3782_v10  ;;  %v3867_v9 = vld [vmem:[%s6565_s2 + $0x5a0] ss:$8 sps:$4 sm:$0xff]   ;;  %v3872_v10 = vld [vmem:[%s6565_s2 + $0x494] ss:$8 sps:$4 sm:$0xff]  }
  0x81   :  { %2239 = vmatprep.subr.bf16.mxu1 %v3785_v11  ;;  %v3875_v11 = vld [vmem:[%s6565_s2 + $0x594] ss:$8 sps:$4 sm:$0xff]  }
  0x82   :  { %2113 = vmatmul.mubr.bf16.vlgmr.msra.gmra.mxu0 %v3774_v12  ;;  %v3870_v12 = vld [vmem:[%s6565_s2 + $0x490] ss:$8 sps:$4 sm:$0xff]  }
  0x83   :  { %2166 = vmatmul.mubr.bf16.vlgmr.msra.gmra.mxu1 %v3777_v13  ;;  %2187 = vmatpush1.bf16.msra.mxu0 %v3780_v14  ;;  %v3873_v13 = vld [vmem:[%s6565_s2 + $0x590] ss:$8 sps:$4 sm:$0xff]   ;;  %v3878_v14 = vld [vmem:[%s6565_s2 + $0x484] ss:$8 sps:$4 sm:$0xff]  }
  0x84   :  { %2240 = vmatpush1.bf16.msra.mxu1 %v3783_v15  ;;  %2188 = vmatprep.subr.bf16.mxu0 %v3788_v16  ;;  %v3881_v15 = vld [vmem:[%s6565_s2 + $0x584] ss:$8 sps:$4 sm:$0xff]   ;;  %v3876_v16 = vld [vmem:[%s6565_s2 + $0x480] ss:$8 sps:$4 sm:$0xff]  }
  0x85   :  { %2241 = vmatprep.subr.bf16.mxu1 %v3791_v17  ;;  %2122 = vmatprep.mubr.bf16.mxu0 %v3792_v18  ;;  %v3879_v17 = vld [vmem:[%s6565_s2 + $0x580] ss:$8 sps:$4 sm:$0xff]   ;;  %v3890_v18 = vld [vmem:[%s6565_s2 + $0x674] ss:$8 sps:$4 sm:$0xff]  }
  0x86   :  { %2175 = vmatprep.mubr.bf16.mxu1 %v3801_v19  ;;  %v3893_v19 = vld [vmem:[%s6565_s2 + $0x774] ss:$8 sps:$4 sm:$0xff]  }
  0x87   :  { %2189 = vmatpush1.bf16.msra.mxu0 %v3786_v20  ;;  %v3882_v20 = vld [vmem:[%s6563_s0 + $0x20] ss:$72 sps:$4 sm:$0xff]  }
  0x88   :  { %2242 = vmatpush1.bf16.msra.mxu1 %v3789_v21  ;;  %2190 = vmatprep.subr.bf16.mxu0 %v3797_v22  ;;  %v3885_v21 = vld [vmem:[%s6563_s0 + $0x28] ss:$72 sps:$4 sm:$0xff]  }
  0x89   :  { %2243 = vmatprep.subr.bf16.mxu1 %v3800_v23  ;;  %v3888_v22 = vld [vmem:[%s6565_s2 + $0x670] ss:$8 sps:$4 sm:$0xff]  }
  0x8a   :  { %2123 = vmatmul.mubr.bf16.gmra.mxu0 %v3794_v24  ;;  %v3891_v23 = vld [vmem:[%s6565_s2 + $0x770] ss:$8 sps:$4 sm:$0xff]   ;;  %v3896_v24 = vld [vmem:[%s6565_s2 + $0x664] ss:$8 sps:$4 sm:$0xff]  }
  0x8b   :  { %2176 = vmatmul.mubr.bf16.gmra.mxu1 %v3803_v27  ;;  %2191 = vmatpush1.bf16.msra.mxu0 %v3795_v25  ;;  %v3899_v25 = vld [vmem:[%s6565_s2 + $0x764] ss:$8 sps:$4 sm:$0xff]  }
  0x8c   :  { %2244 = vmatpush1.bf16.msra.mxu1 %v3798_v26  ;;  %2192 = vmatprep.subr.bf16.mxu0 %v3806_v28  ;;  %v3900_v26 = vld [vmem:[%s6563_s0 + $0xb4] ss:$72 sps:$4 sm:$0xff]   ;;  %v3894_v28 = vld [vmem:[%s6565_s2 + $0x660] ss:$8 sps:$4 sm:$0xff]  }
  0x8d   :  { %2245 = vmatprep.subr.bf16.mxu1 %v3809_v29  ;;  %2218 = vmatprep.mubr.bf16.mxu0 %v3884_v33  ;;  %v3909_v27 = vld [vmem:[%s6563_s0 + $0xbc] ss:$72 sps:$4 sm:$0xff]   ;;  %v3897_v29 = vld [vmem:[%s6565_s2 + $0x760] ss:$8 sps:$4 sm:$0xff]   ;;  %v3903_v33 = vld [vmem:[%s6565_s2 + $0x650] ss:$8 sps:$4 sm:$0xff]  }
  0x8e   :  { %2271 = vmatprep.mubr.bf16.mxu1 %v3887_v35  ;;  %v3906_v35 = vld [vmem:[%s6565_s2 + $0x750] ss:$8 sps:$4 sm:$0xff]  }
  0x8f   :  { %2193 = vmatpush1.bf16.msra.mxu0 %v3804_v30  ;;  %v3905_v30 = vld [vmem:[%s6565_s2 + $0x654] ss:$8 sps:$4 sm:$0xff]  }
  0x90   :  { %2246 = vmatpush1.bf16.msra.mxu1 %v3807_v31  ;;  %2194 = vmatprep.subr.bf16.mxu0 %v3812_v32  ;;  %v3908_v31 = vld [vmem:[%s6565_s2 + $0x754] ss:$8 sps:$4 sm:$0xff]   ;;  %v3902_v32 = vld [vmem:[%s6563_s0 + $0xb0] ss:$72 sps:$4 sm:$0xff]  }
  0x91   :  { %2247 = vmatprep.subr.bf16.mxu1 %v3815_v34  ;;  %v3911_v34 = vld [vmem:[%s6563_s0 + $0xb8] ss:$72 sps:$4 sm:$0xff]  }
  0x93   :  { %2195 = vmatpush1.bf16.msra.mxu0 %v3810_v36  ;;  %v3914_v36 = vld [vmem:[%s6565_s2 + $0x644] ss:$8 sps:$4 sm:$0xff]  }
  0x94   :  { %2248 = vmatpush1.bf16.msra.mxu1 %v3813_v37  ;;  %2196 = vmatprep.subr.bf16.mxu0 %v3818_v38  ;;  %v3917_v37 = vld [vmem:[%s6565_s2 + $0x744] ss:$8 sps:$4 sm:$0xff]   ;;  %v3992_v38 = vld [vmem:[%s6563_s0 + $0x34] ss:$72 sps:$4 sm:$0xff]  }
  0x95   :  { %2249 = vmatprep.subr.bf16.mxu1 %v3821_v39  ;;  %v3995_v39 = vld [vmem:[%s6563_s0 + $0x3c] ss:$72 sps:$4 sm:$0xff]  }
  0x97   :  { %2197 = vmatpush1.bf16.msra.mxu0 %v3816_v40  ;;  %v3912_v40 = vld [vmem:[%s6565_s2 + $0x640] ss:$8 sps:$4 sm:$0xff]  }
  0x98   :  { %2250 = vmatpush1.bf16.msra.mxu1 %v3819_v41  ;;  %2198 = vmatprep.subr.bf16.mxu0 %v3824_v42  ;;  %v3915_v41 = vld [vmem:[%s6565_s2 + $0x740] ss:$8 sps:$4 sm:$0xff]   ;;  %v3920_v42 = vld [vmem:[%s6565_s2 + $0x634] ss:$8 sps:$4 sm:$0xff]  }
  0x99   :  { %2251 = vmatprep.subr.bf16.mxu1 %v3827_v43  ;;  %v3923_v43 = vld [vmem:[%s6565_s2 + $0x734] ss:$8 sps:$4 sm:$0xff]  }
  0x9b   :  { %2199 = vmatpush1.bf16.msra.mxu0 %v3822_v44  ;;  %v3918_v44 = vld [vmem:[%s6565_s2 + $0x630] ss:$8 sps:$4 sm:$0xff]  }
  0x9c   :  { %2252 = vmatpush1.bf16.msra.mxu1 %v3825_v45  ;;  %2200 = vmatprep.subr.bf16.mxu0 %v3830_v46  ;;  %v3921_v45 = vld [vmem:[%s6565_s2 + $0x730] ss:$8 sps:$4 sm:$0xff]   ;;  %v3926_v46 = vld [vmem:[%s6565_s2 + $0x624] ss:$8 sps:$4 sm:$0xff]  }
  0x9d   :  { %2253 = vmatprep.subr.bf16.mxu1 %v3833_v47  ;;  %v3929_v47 = vld [vmem:[%s6565_s2 + $0x724] ss:$8 sps:$4 sm:$0xff]  }
  0x9f   :  { %2201 = vmatpush1.bf16.msra.mxu0 %v3828_v48  ;;  %v3924_v48 = vld [vmem:[%s6565_s2 + $0x620] ss:$8 sps:$4 sm:$0xff]  }
  0xa0   :  { %2254 = vmatpush1.bf16.msra.mxu1 %v3831_v49  ;;  %2202 = vmatprep.subr.bf16.mxu0 %v3836_v50  ;;  %v3927_v49 = vld [vmem:[%s6565_s2 + $0x720] ss:$8 sps:$4 sm:$0xff]   ;;  %v3932_v50 = vld [vmem:[%s6565_s2 + $0x614] ss:$8 sps:$4 sm:$0xff]  }
  0xa1   :  { %2255 = vmatprep.subr.bf16.mxu1 %v3839_v51  ;;  %v3935_v51 = vld [vmem:[%s6565_s2 + $0x714] ss:$8 sps:$4 sm:$0xff]  }
  0xa3   :  { %2203 = vmatpush2.bf16.msra.mxu0 %v3834_v52  ;;  %v3930_v52 = vld [vmem:[%s6565_s2 + $0x610] ss:$8 sps:$4 sm:$0xff]  }
  0xa4   :  { %2256 = vmatpush2.bf16.msra.mxu1 %v3837_v53  ;;  %2204 = vmatprep.subr.bf16.mxu0 %v3842_v54  ;;  %v3933_v53 = vld [vmem:[%s6565_s2 + $0x710] ss:$8 sps:$4 sm:$0xff]   ;;  %v3938_v54 = vld [vmem:[%s6565_s2 + $0x604] ss:$8 sps:$4 sm:$0xff]  }
  0xa5   :  { %2257 = vmatprep.subr.bf16.mxu1 %v3845_v55  ;;  %v3941_v55 = vld [vmem:[%s6565_s2 + $0x704] ss:$8 sps:$4 sm:$0xff]  }
  0xa7   :  { %2205 = vmatpush2.bf16.msra.mxu0 %v3840_v56  ;;  %v3936_v56 = vld [vmem:[%s6565_s2 + $0x600] ss:$8 sps:$4 sm:$0xff]  }
  0xa8   :  { %2258 = vmatpush2.bf16.msra.mxu1 %v3843_v57  ;;  %2206 = vmatprep.subr.bf16.mxu0 %v3848_v58  ;;  %v3939_v57 = vld [vmem:[%s6565_s2 + $0x700] ss:$8 sps:$4 sm:$0xff]   ;;  %v3944_v58 = vld [vmem:[%s6565_s2 + $0x6f4] ss:$8 sps:$4 sm:$0xff]  }
  0xa9   :  { %2259 = vmatprep.subr.bf16.mxu1 %v3851_v59  ;;  %v3947_v59 = vld [vmem:[%s6565_s2 + $0x7f4] ss:$8 sps:$4 sm:$0xff]  }
  0xab   :  { %2207 = vmatpush2.bf16.msra.mxu0 %v3846_v60  ;;  %v3942_v60 = vld [vmem:[%s6565_s2 + $0x6f0] ss:$8 sps:$4 sm:$0xff]  }
  0xac   :  { %2260 = vmatpush2.bf16.msra.mxu1 %v3849_v61  ;;  %2208 = vmatprep.subr.bf16.mxu0 %v3854_v62  ;;  %v3945_v61 = vld [vmem:[%s6565_s2 + $0x7f0] ss:$8 sps:$4 sm:$0xff]   ;;  %v3950_v62 = vld [vmem:[%s6565_s2 + $0x6e4] ss:$8 sps:$4 sm:$0xff]  }
  0xad   :  { %2261 = vmatprep.subr.bf16.mxu1 %v3857_v63  ;;  %v3953_v63 = vld [vmem:[%s6565_s2 + $0x7e4] ss:$8 sps:$4 sm:$0xff]  }
  0xaf   :  { %2209 = vmatpush2.bf16.msra.mxu0 %v3852_v0  ;;  %v3948_v0 = vld [vmem:[%s6565_s2 + $0x6e0] ss:$8 sps:$4 sm:$0xff]  }
  0xb0   :  { %2262 = vmatpush2.bf16.msra.mxu1 %v3855_v1  ;;  %2210 = vmatprep.subr.bf16.mxu0 %v3860_v2  ;;  %v3951_v1 = vld [vmem:[%s6565_s2 + $0x7e0] ss:$8 sps:$4 sm:$0xff]   ;;  %v3956_v2 = vld [vmem:[%s6565_s2 + $0x6d4] ss:$8 sps:$4 sm:$0xff]  }
  0xb1   :  { %2263 = vmatprep.subr.bf16.mxu1 %v3863_v3  ;;  %v3959_v3 = vld [vmem:[%s6565_s2 + $0x7d4] ss:$8 sps:$4 sm:$0xff]  }
  0xb3   :  { %2211 = vmatpush2.bf16.msra.mxu0 %v3858_v4 }
  0xb4   :  { %2264 = vmatpush2.bf16.msra.mxu1 %v3861_v5  ;;  %2212 = vmatprep.subr.bf16.mxu0 %v3866_v6 }
  0xb5   :  { %2265 = vmatprep.subr.bf16.mxu1 %v3869_v7 }
  0xb7   :  { %2213 = vmatpush2.bf16.msra.mxu0 %v3864_v8 }
  0xb8   :  { %2266 = vmatpush2.bf16.msra.mxu1 %v3867_v9  ;;  %2214 = vmatprep.subr.bf16.mxu0 %v3872_v10 }
  0xb9   :  { %2267 = vmatprep.subr.bf16.mxu1 %v3875_v11 }
  0xbb   :  { %2215 = vmatpush2.bf16.msra.mxu0 %v3870_v12 }
  0xbc   :  { %2268 = vmatpush2.bf16.msra.mxu1 %v3873_v13  ;;  %2216 = vmatprep.subr.bf16.mxu0 %v3878_v14 }
  0xbd   :  { %2269 = vmatprep.subr.bf16.mxu1 %v3881_v15 }
  0xbf   :  { %2217 = vmatpush2.bf16.msra.mxu0 %v3876_v16 }
  0xc0   :  { %2270 = vmatpush2.bf16.msra.mxu1 %v3879_v17  ;;  %2292 = vmatprep.subr.bf16.mxu0 %v3890_v18 }
  0xc1   :  { %2345 = vmatprep.subr.bf16.mxu1 %v3893_v19 }
  0xc2   :  { %2219 = vmatmul.mubr.bf16.vlgmr.msra.gmra.mxu0 %v3882_v20 }
  0xc3   :  { %2272 = vmatmul.mubr.bf16.vlgmr.msra.gmra.mxu1 %v3885_v21  ;;  %2293 = vmatpush1.bf16.msra.mxu0 %v3888_v22 }
  0xc4   :  { %2346 = vmatpush1.bf16.msra.mxu1 %v3891_v23  ;;  %2294 = vmatprep.subr.bf16.mxu0 %v3896_v24 }
  0xc5   :  { %2347 = vmatprep.subr.bf16.mxu1 %v3899_v25  ;;  %2228 = vmatprep.mubr.bf16.mxu0 %v3900_v26 }
  0xc6   :  { %2281 = vmatprep.mubr.bf16.mxu1 %v3909_v27 }
  0xc7   :  { %2295 = vmatpush1.bf16.msra.mxu0 %v3894_v28 }
  0xc8   :  { %2348 = vmatpush1.bf16.msra.mxu1 %v3897_v29  ;;  %2296 = vmatprep.subr.bf16.mxu0 %v3905_v30 }
  0xc9   :  { %2349 = vmatprep.subr.bf16.mxu1 %v3908_v31 }
  0xca   :  { %2229 = vmatmul.mubr.bf16.gmra.mxu0 %v3902_v32 }
  0xcb   :  { %2282 = vmatmul.mubr.bf16.gmra.mxu1 %v3911_v34  ;;  %2297 = vmatpush1.bf16.msra.mxu0 %v3903_v33 }
  0xcc   :  { %2350 = vmatpush1.bf16.msra.mxu1 %v3906_v35  ;;  %2298 = vmatprep.subr.bf16.mxu0 %v3914_v36 }
  0xcd   :  { %2351 = vmatprep.subr.bf16.mxu1 %v3917_v37  ;;  %2324 = vmatprep.mubr.bf16.mxu0 %v3992_v38 }
  0xce   :  { %2377 = vmatprep.mubr.bf16.mxu1 %v3995_v39 }
  0xcf   :  { %2299 = vmatpush1.bf16.msra.mxu0 %v3912_v40 }
  0xd0   :  { %2352 = vmatpush1.bf16.msra.mxu1 %v3915_v41  ;;  %2300 = vmatprep.subr.bf16.mxu0 %v3920_v42 }
  0xd1   :  { %2353 = vmatprep.subr.bf16.mxu1 %v3923_v43 }
  0xd3   :  { %2301 = vmatpush1.bf16.msra.mxu0 %v3918_v44 }
  0xd4   :  { %2354 = vmatpush1.bf16.msra.mxu1 %v3921_v45  ;;  %2302 = vmatprep.subr.bf16.mxu0 %v3926_v46 }
  0xd5   :  { %2355 = vmatprep.subr.bf16.mxu1 %v3929_v47 }
  0xd7   :  { %2303 = vmatpush1.bf16.msra.mxu0 %v3924_v48 }
  0xd8   :  { %2356 = vmatpush1.bf16.msra.mxu1 %v3927_v49  ;;  %2304 = vmatprep.subr.bf16.mxu0 %v3932_v50 }
  0xd9   :  { %2357 = vmatprep.subr.bf16.mxu1 %v3935_v51 }
  0xdb   :  { %2305 = vmatpush1.bf16.msra.mxu0 %v3930_v52 }
  0xdc   :  { %2358 = vmatpush1.bf16.msra.mxu1 %v3933_v53  ;;  %2306 = vmatprep.subr.bf16.mxu0 %v3938_v54 }
  0xdd   :  { %2359 = vmatprep.subr.bf16.mxu1 %v3941_v55 }
  0xdf   :  { %2307 = vmatpush1.bf16.msra.mxu0 %v3936_v56 }
  0xe0   :  { %2360 = vmatpush1.bf16.msra.mxu1 %v3939_v57  ;;  %2308 = vmatprep.subr.bf16.mxu0 %v3944_v58 }
  0xe1   :  { %2361 = vmatprep.subr.bf16.mxu1 %v3947_v59 }
  0xe3   :  { %2309 = vmatpush2.bf16.msra.mxu0 %v3942_v60 }
  0xe4   :  { %2362 = vmatpush2.bf16.msra.mxu1 %v3945_v61  ;;  %2310 = vmatprep.subr.bf16.mxu0 %v3950_v62 }
  0xe5   :  { %2363 = vmatprep.subr.bf16.mxu1 %v3953_v63 }
  0xe6   :  { %9 = vsyncpa [#allocation3], 0  ;;  %v3954_v4 = vld [vmem:[%s6565_s2 + $0x6d0] ss:$8 sps:$4 sm:$0xff]   ;;  %v5181_v6 = vld [vmem:[%s6565_s2 + $0x6c4] ss:$8 sps:$4 sm:$0xff]   ;;  %v344_v18 = vlaneseq }
  0xe7   :  { %2311 = vmatpush2.bf16.msra.mxu0 %v3948_v0  ;;  %v3957_v5 = vld [vmem:[%s6565_s2 + $0x7d0] ss:$8 sps:$4 sm:$0xff]   ;;  %v3965_v7 = vld [vmem:[%s6565_s2 + $0x7c4] ss:$8 sps:$4 sm:$0xff]   ;;  %v5189_v8 = vld [vmem:[%s6565_s2 + $0x6c0] ss:$8 sps:$4 sm:$0xff]  }
  0xe8   :  { %2364 = vmatpush2.bf16.msra.mxu1 %v3951_v1  ;;  %2312 = vmatprep.subr.bf16.mxu0 %v3956_v2  ;;  %v3963_v9 = vld [vmem:[%s6565_s2 + $0x7c0] ss:$8 sps:$4 sm:$0xff]   ;;  %v5198_v10 = vld [vmem:[%s6565_s2 + $0x6b4] ss:$8 sps:$4 sm:$0xff]   ;;  %v5207_v12 = vld [vmem:[%s6565_s2 + $0x6b0] ss:$8 sps:$4 sm:$0xff]  }
  0xe9   :  { %2365 = vmatprep.subr.bf16.mxu1 %v3959_v3  ;;  %v3971_v11 = vld [vmem:[%s6565_s2 + $0x7b4] ss:$8 sps:$4 sm:$0xff]   ;;  %v3969_v13 = vld [vmem:[%s6565_s2 + $0x7b0] ss:$8 sps:$4 sm:$0xff]   ;;  %v5216_v14 = vld [vmem:[%s6565_s2 + $0x6a4] ss:$8 sps:$4 sm:$0xff]  }
  0xea   :  { %v3977_v15 = vld [vmem:[%s6565_s2 + $0x7a4] ss:$8 sps:$4 sm:$0xff]   ;;  %v5225_v16 = vld [vmem:[%s6565_s2 + $0x6a0] ss:$8 sps:$4 sm:$0xff]   ;;  %v5234_v19 = vld [vmem:[%s6565_s2 + $0x694] ss:$8 sps:$4 sm:$0xff]  }
  0xeb   :  { %2313 = vmatpush2.bf16.msra.mxu0 %v3954_v4  ;;  %v3975_v17 = vld [vmem:[%s6565_s2 + $0x7a0] ss:$8 sps:$4 sm:$0xff]   ;;  %v3983_v20 = vld [vmem:[%s6565_s2 + $0x794] ss:$8 sps:$4 sm:$0xff]   ;;  %v5243_v21 = vld [vmem:[%s6565_s2 + $0x690] ss:$8 sps:$4 sm:$0xff]  }
  0xec   :  { %2366 = vmatpush2.bf16.msra.mxu1 %v3957_v5  ;;  %2314 = vmatprep.subr.bf16.mxu0 %v5181_v6  ;;  %v3981_v22 = vld [vmem:[%s6565_s2 + $0x790] ss:$8 sps:$4 sm:$0xff]   ;;  %v345_v23 = vshrl.u32 %v344_v18, 7  ;;  %v5252_v24 = vld [vmem:[%s6565_s2 + $0x684] ss:$8 sps:$4 sm:$0xff]   ;;  %s4366_s17 = smov [#allocation2]  }
  0xed   :  { %2367 = vmatprep.subr.bf16.mxu1 %v3965_v7  ;;  %v3989_v25 = vld [vmem:[%s6565_s2 + $0x784] ss:$8 sps:$4 sm:$0xff]   ;;  %v5261_v26 = vld [vmem:[%s6565_s2 + $0x680] ss:$8 sps:$4 sm:$0xff]   ;;  %v5273_v30 = vld [vmem:[%s6565_s2 + $0x874] ss:$8 sps:$4 sm:$0xff]  }
  0xee   :  { %v3987_v27 = vld [vmem:[%s6565_s2 + $0x780] ss:$8 sps:$4 sm:$0xff]   ;;  %v346_v28 = vsub.s32 0, %v345_v23  ;;  %v350_v31 = vsub.s32 1, %v345_v23  ;;  %v3990_v32 = vld [vmem:[%s6563_s0 + $0x30] ss:$72 sps:$4 sm:$0xff]  }
  0xef   :  { %2315 = vmatpush2.bf16.msra.mxu0 %v5189_v8  ;;  %v306_v29 = vld [vmem:[%s6566_s3] sm:$0x3]  ;;  %v5287_v35 = vld [vmem:[%s6565_s2 + $0x870] ss:$8 sps:$4 sm:$0xff]   ;;  %v4110_v36 = vld [vmem:[%s6565_s2 + $0x74] ss:$8 sps:$4 sm:$0xff]  }
  0xf0   :  { %2368 = vmatpush2.bf16.msra.mxu1 %v3963_v9  ;;  %2316 = vmatprep.subr.bf16.mxu0 %v5198_v10  ;;  %v3993_v33 = vld [vmem:[%s6563_s0 + $0x38] ss:$72 sps:$4 sm:$0xff]   ;;  %v5282_v34 = vrot.slane %v306_v29, %v346_v28  ;;  %v5296_v37 = vld [vmem:[%s6565_s2 + $0x864] ss:$8 sps:$4 sm:$0xff]   ;;  %v5298_v38 = vrot.slane %v306_v29, %v350_v31  ;;  %v5323_v49 = vld [vmem:[%s6565_s2 + $0x854] ss:$8 sps:$4 sm:$0xff]  }
  0xf1   :  { %2369 = vmatprep.subr.bf16.mxu1 %v3971_v11  ;;  %v4002_v39 = vld [vmem:[%s6563_s0 + $0xc4] ss:$72 sps:$4 sm:$0xff]   ;;  %v4111_v44 = vld [vmem:[%s6565_s2 + $0x70] ss:$8 sps:$4 sm:$0xff]   ;;  %v5314_v45 = vld [vmem:[%s6565_s2 + $0x860] ss:$8 sps:$4 sm:$0xff]  }
  0xf2   :  { %6570 = vst [vmem:[#allocation5_spill] sm:$0xff] %v5298_v38  ;;  %v4008_v40 = vld [vmem:[%s6563_s0 + $0xcc] ss:$72 sps:$4 sm:$0xff]   ;;  %v4004_v54 = vld [vmem:[%s6563_s0 + $0xc0] ss:$72 sps:$4 sm:$0xff]  }
  0xf3   :  { %2317 = vmatpush2.bf16.msra.mxu0 %v5207_v12  ;;  %v4112_v48 = vld [vmem:[%s6565_s2 + $0x64] ss:$8 sps:$4 sm:$0xff]   ;;  %v4010_v55 = vld [vmem:[%s6563_s0 + $0xc8] ss:$72 sps:$4 sm:$0xff]   ;;  %v4114_v61 = vld [vmem:[%s6565_s2 + $0x54] ss:$8 sps:$4 sm:$0xff]  }
  0xf4   :  { %2370 = vmatpush2.bf16.msra.mxu1 %v3969_v13  ;;  %2318 = vmatprep.subr.bf16.mxu0 %v5216_v14  ;;  %v4113_v58 = vld [vmem:[%s6565_s2 + $0x60] ss:$8 sps:$4 sm:$0xff]   ;;  %v5344_v59 = vld [vmem:[%s6565_s2 + $0x850] ss:$8 sps:$4 sm:$0xff]   ;;  %v5353_v62 = vld [vmem:[%s6565_s2 + $0x844] ss:$8 sps:$4 sm:$0xff]  }
  0xf5   :  { %2371 = vmatprep.subr.bf16.mxu1 %v3977_v15  ;;  %v4052_v1 = vld [vmem:[%s6563_s0 + $0x44] ss:$72 sps:$4 sm:$0xff]   ;;  %v4115_v5 = vld [vmem:[%s6565_s2 + $0x50] ss:$8 sps:$4 sm:$0xff]   ;;  %v5373_v7 = vld [vmem:[%s6565_s2 + $0x840] ss:$8 sps:$4 sm:$0xff]  }
  0xf6   :  { %v4055_v2 = vld [vmem:[%s6564_s1 + $0x4] ss:$72 sps:$4 sm:$0xff]   ;;  %v5382_v11 = vld [vmem:[%s6565_s2 + $0x834] ss:$8 sps:$4 sm:$0xff]   ;;  %v4117_v13 = vld [vmem:[%s6565_s2 + $0x40] ss:$8 sps:$4 sm:$0xff]  }
  0xf7   :  { %2319 = vmatpush2.bf16.msra.mxu0 %v5225_v16  ;;  %v4116_v9 = vld [vmem:[%s6565_s2 + $0x44] ss:$8 sps:$4 sm:$0xff]   ;;  %v5391_v15 = vld [vmem:[%s6565_s2 + $0x830] ss:$8 sps:$4 sm:$0xff]   ;;  %v5409_v23 = vld [vmem:[%s6565_s2 + $0x820] ss:$8 sps:$4 sm:$0xff]  }
  0xf8   :  { %2372 = vmatpush2.bf16.msra.mxu1 %v3975_v17  ;;  %2320 = vmatprep.subr.bf16.mxu0 %v5234_v19  ;;  %v4118_v17 = vld [vmem:[%s6565_s2 + $0x34] ss:$8 sps:$4 sm:$0xff]   ;;  %v5400_v18 = vld [vmem:[%s6565_s2 + $0x824] ss:$8 sps:$4 sm:$0xff]  }
  0xf9   :  { %2373 = vmatprep.subr.bf16.mxu1 %v3983_v20  ;;  %v5419_v28 = vld [vmem:[%s6565_s2 + $0x814] ss:$8 sps:$4 sm:$0xff]  }
  0xfb   :  { %2321 = vmatpush2.bf16.msra.mxu0 %v5243_v21 }
  0xfc   :  { %2374 = vmatpush2.bf16.msra.mxu1 %v3981_v22  ;;  %2322 = vmatprep.subr.bf16.mxu0 %v5252_v24  ;;  %v4119_v22 = vld [vmem:[%s6565_s2 + $0x30] ss:$8 sps:$4 sm:$0xff]  }
  0xfd   :  { %2375 = vmatprep.subr.bf16.mxu1 %v3989_v25 }
  0xff   :  { %2323 = vmatpush2.bf16.msra.mxu0 %v5261_v26 }
 0x100   :  { %2376 = vmatpush2.bf16.msra.mxu1 %v3987_v27  ;;  %2398 = vmatprep.subr.bf16.mxu0 %v5273_v30  ;;  %v4120_v27 = vld [vmem:[%s6565_s2 + $0x24] ss:$8 sps:$4 sm:$0xff]  }
 0x101   :  { %2675 = vmatprep.subr.bf16.mxu1 %v4110_v36  ;;  %v4121_v36 = vld [vmem:[%s6565_s2 + $0x20] ss:$8 sps:$4 sm:$0xff]  }
 0x102   :  { %v2008_v41 = vpop.f32.mrf.mxu0  ;;  %2325 = vmatmul.mubr.bf16.vlgmr.msra.gmra.mxu0 %v3990_v32 }
 0x103   :  { %v2061_v42 = vpop.f32.mrf.mxu1  ;;  %2378 = vmatmul.mubr.bf16.vlgmr.msra.gmra.mxu1 %v3993_v33  ;;  %v2009_v43 = vadd.f32 %v2008_v41, %v5282_v34  ;;  %2399 = vmatpush1.bf16.msra.mxu0 %v5287_v35 }
 0x104   :  { %2676 = vmatpush1.bf16.msra.mxu1 %v4111_v44  ;;  %v2010_v46 = vpop.f32.mrf.mxu0  ;;  %2400 = vmatprep.subr.bf16.mxu0 %v5296_v37 }
 0x105   :  { %v2063_v47 = vpop.f32.mrf.mxu1  ;;  %2677 = vmatprep.subr.bf16.mxu1 %v4112_v48  ;;  %v5325_v50 = vadd.f32 %v2061_v42, %v2009_v43  ;;  %v2011_v51 = vadd.f32 %v2010_v46, %v5298_v38  ;;  %2334 = vmatprep.mubr.bf16.mxu0 %v4002_v39  ;;  %v5429_v39 = vld [vmem:[%s6565_s2 + $0x810] ss:$8 sps:$4 sm:$0xff]   ;;  %v4122_v42 = vld [vmem:[%s6565_s2 + $0x14] ss:$8 sps:$4 sm:$0xff]   ;;  %v5441_v43 = vld [vmem:[%s6565_s2 + $0x804] ss:$8 sps:$4 sm:$0xff]  }
 0x106   :  { %2387 = vmatprep.mubr.bf16.mxu1 %v4008_v40  ;;  %v2012_v52 = vpop.f32.mrf.mxu0 }
 0x107   :  { %v2065_v53 = vpop.f32.mrf.mxu1  ;;  %v5334_v56 = vadd.f32 %v2063_v47, %v2011_v51  ;;  %v2013_v57 = vadd.f32 %v2012_v52, %v5282_v34  ;;  %2401 = vmatpush1.bf16.msra.mxu0 %v5314_v45  ;;  %v4123_v52 = vld [vmem:[%s6565_s2 + $0x10] ss:$8 sps:$4 sm:$0xff]  }
 0x108   :  { %2678 = vmatpush1.bf16.msra.mxu1 %v4113_v58  ;;  %v2014_v60 = vpop.f32.mrf.mxu0  ;;  %2402 = vmatprep.subr.bf16.mxu0 %v5323_v49 }
 0x109   :  { %2679 = vmatprep.subr.bf16.mxu1 %v4114_v61  ;;  %v5355_v63 = vadd.f32 %v2065_v53, %v2013_v57  ;;  %v2015_v0 = vadd.f32 %v2014_v60, %v5298_v38  ;;  %v2067_v3 = vpop.f32.mrf.mxu1  ;;  %v5453_v53 = vld [vmem:[%s6565_s2 + $0x800] ss:$8 sps:$4 sm:$0xff]   ;;  %v5464_v57 = vld [vmem:[%s6565_s2 + $0x8f4] ss:$8 sps:$4 sm:$0xff]  }
 0x10a   :  { %2335 = vmatmul.mubr.bf16.gmra.mxu0 %v4004_v54  ;;  %v2018_v20 = vpop.f32.mrf.mxu0  ;;  %v4125_v61 = vld [vmem:[%s6565_s2] ss:$8 sps:$4 sm:$0xff]  }
 0x10b   :  { %2388 = vmatmul.mubr.bf16.gmra.mxu1 %v4010_v55  ;;  %v5364_v4 = vadd.f32 %v2067_v3, %v2015_v0  ;;  %2403 = vmatpush1.bf16.msra.mxu0 %v5344_v59  ;;  %v2019_v25 = vadd.f32 %v2018_v20, %v5282_v34  ;;  %v2071_v32 = vpop.f32.mrf.mxu1  ;;  %v4124_v55 = vld [vmem:[%s6565_s2 + $0x4] ss:$8 sps:$4 sm:$0xff]   ;;  %v5475_v0 = vld [vmem:[%s6565_s2 + $0x8f0] ss:$8 sps:$4 sm:$0xff]  }
 0x10c   :  { %2680 = vmatpush1.bf16.msra.mxu1 %v4115_v5  ;;  %2404 = vmatprep.subr.bf16.mxu0 %v5353_v62  ;;  %v2020_v29 = vpop.f32.mrf.mxu0  ;;  %v4127_v3 = vld [vmem:[%s6565_s2 + $0xf0] ss:$8 sps:$4 sm:$0xff]   ;;  %v5493_v5 = vld [vmem:[%s6565_s2 + $0x8e0] ss:$8 sps:$4 sm:$0xff]  }
 0x10d   :  { %2681 = vmatprep.subr.bf16.mxu1 %v4116_v9  ;;  %2430 = vmatprep.mubr.bf16.mxu0 %v4052_v1  ;;  %v2021_v31 = vadd.f32 %v2020_v29, %v5298_v38  ;;  %v5431_v40 = vadd.f32 %v2071_v32, %v2019_v25  ;;  %v2073_v44 = vpop.f32.mrf.mxu1  ;;  %v4126_v1 = vld [vmem:[%s6565_s2 + $0xf4] ss:$8 sps:$4 sm:$0xff]   ;;  %v4128_v9 = vld [vmem:[%s6565_s2 + $0xe4] ss:$8 sps:$4 sm:$0xff]   ;;  %v5511_v20 = vld [vmem:[%s6565_s2 + $0x8d0] ss:$8 sps:$4 sm:$0xff]  }
 0x10e   :  { %2707 = vmatprep.mubr.bf16.mxu1 %v4055_v2  ;;  %v2022_v33 = vpop.f32.mrf.mxu0  ;;  %v5484_v2 = vld [vmem:[%s6565_s2 + $0x8e4] ss:$8 sps:$4 sm:$0xff]   ;;  %v5529_v29 = vld [vmem:[%s6565_s2 + $0x8c0] ss:$8 sps:$4 sm:$0xff]   ;;  %v5538_v32 = vld [vmem:[%s6565_s2 + $0x8b4] ss:$8 sps:$4 sm:$0xff]  }
 0x10f   :  { %2405 = vmatpush1.bf16.msra.mxu0 %v5373_v7  ;;  %v2023_v41 = vadd.f32 %v2022_v33, %v5282_v34  ;;  %v5443_v47 = vadd.f32 %v2073_v44, %v2021_v31  ;;  %v2075_v51 = vpop.f32.mrf.mxu1  ;;  %v5520_v25 = vld [vmem:[%s6565_s2 + $0x8c4] ss:$8 sps:$4 sm:$0xff]   ;;  %v4133_v33 = vld [vmem:[%s6565_s2 + $0xc0] ss:$8 sps:$4 sm:$0xff]   ;;  %v4135_v44 = vld [vmem:[%s6565_s2 + $0xb0] ss:$8 sps:$4 sm:$0xff]  }
 0x110   :  { %2682 = vmatpush1.bf16.msra.mxu1 %v4117_v13  ;;  %2406 = vmatprep.subr.bf16.mxu0 %v5382_v11  ;;  %v2024_v46 = vpop.f32.mrf.mxu0  ;;  %v5502_v13 = vld [vmem:[%s6565_s2 + $0x8d4] ss:$8 sps:$4 sm:$0xff]   ;;  %v4132_v31 = vld [vmem:[%s6565_s2 + $0xc4] ss:$8 sps:$4 sm:$0xff]  }
 0x111   :  { %2683 = vmatprep.subr.bf16.mxu1 %v4118_v17  ;;  %v2025_v48 = vadd.f32 %v2024_v46, %v5298_v38  ;;  %v5455_v54 = vadd.f32 %v2075_v51, %v2023_v41  ;;  %v2077_v58 = vpop.f32.mrf.mxu1  ;;  %v4129_v17 = vld [vmem:[%s6565_s2 + $0xe0] ss:$8 sps:$4 sm:$0xff]   ;;  %v4134_v41 = vld [vmem:[%s6565_s2 + $0xb4] ss:$8 sps:$4 sm:$0xff]  }
 0x112   :  { %v5565_v46 = vld [vmem:[%s6565_s2 + $0x8a0] ss:$8 sps:$4 sm:$0xff]   ;;  %v5574_v51 = vld [vmem:[%s6565_s2 + $0x894] ss:$8 sps:$4 sm:$0xff]  }
 0x113   :  { %2407 = vmatpush1.bf16.msra.mxu0 %v5391_v15  ;;  %v5466_v60 = vadd.f32 %v2077_v58, %v2025_v48  ;;  %v4136_v48 = vld [vmem:[%s6565_s2 + $0xa4] ss:$8 sps:$4 sm:$0xff]   ;;  %v4138_v58 = vld [vmem:[%s6565_s2 + $0x94] ss:$8 sps:$4 sm:$0xff]  }
 0x114   :  { %2684 = vmatpush1.bf16.msra.mxu1 %v4119_v22  ;;  %2408 = vmatprep.subr.bf16.mxu0 %v5400_v18  ;;  %v4130_v22 = vld [vmem:[%s6565_s2 + $0xd4] ss:$8 sps:$4 sm:$0xff]  }
 0x115   :  { %2685 = vmatprep.subr.bf16.mxu1 %v4120_v27  ;;  %v4131_v27 = vld [vmem:[%s6565_s2 + $0xd0] ss:$8 sps:$4 sm:$0xff]  }
 0x117   :  { %2409 = vmatpush1.bf16.msra.mxu0 %v5409_v23 }
 0x118   :  { %2686 = vmatpush1.bf16.msra.mxu1 %v4121_v36  ;;  %2410 = vmatprep.subr.bf16.mxu0 %v5419_v28  ;;  %v5547_v36 = vld [vmem:[%s6565_s2 + $0x8b0] ss:$8 sps:$4 sm:$0xff]  }
 0x119   :  { %2687 = vmatprep.subr.bf16.mxu1 %v4122_v42  ;;  %v5556_v42 = vld [vmem:[%s6565_s2 + $0x8a4] ss:$8 sps:$4 sm:$0xff]  }
 0x11b   :  { %2411 = vmatpush1.bf16.msra.mxu0 %v5429_v39 }
 0x11c   :  { %2688 = vmatpush1.bf16.msra.mxu1 %v4123_v52  ;;  %2412 = vmatprep.subr.bf16.mxu0 %v5441_v43  ;;  %v4137_v52 = vld [vmem:[%s6565_s2 + $0xa0] ss:$8 sps:$4 sm:$0xff]  }
 0x11d   :  { %2689 = vmatprep.subr.bf16.mxu1 %v4124_v55  ;;  %v5583_v55 = vld [vmem:[%s6565_s2 + $0x890] ss:$8 sps:$4 sm:$0xff]  }
 0x11f   :  { %2413 = vmatpush1.bf16.msra.mxu0 %v5453_v53 }
 0x120   :  { %2690 = vmatpush1.bf16.msra.mxu1 %v4125_v61  ;;  %2414 = vmatprep.subr.bf16.mxu0 %v5464_v57  ;;  %v5592_v61 = vld [vmem:[%s6565_s2 + $0x884] ss:$8 sps:$4 sm:$0xff]  }
 0x121   :  { %2691 = vmatprep.subr.bf16.mxu1 %v4126_v1  ;;  %v4139_v1 = vld [vmem:[%s6565_s2 + $0x90] ss:$8 sps:$4 sm:$0xff]  }
 0x123   :  { %2415 = vmatpush2.bf16.msra.mxu0 %v5475_v0 }
 0x124   :  { %2692 = vmatpush2.bf16.msra.mxu1 %v4127_v3  ;;  %2416 = vmatprep.subr.bf16.mxu0 %v5484_v2  ;;  %v5601_v3 = vld [vmem:[%s6565_s2 + $0x880] ss:$8 sps:$4 sm:$0xff]  }
 0x125   :  { %2693 = vmatprep.subr.bf16.mxu1 %v4128_v9  ;;  %v4140_v9 = vld [vmem:[%s6565_s2 + $0x84] ss:$8 sps:$4 sm:$0xff]  }
 0x127   :  { %2417 = vmatpush2.bf16.msra.mxu0 %v5493_v5 }
 0x128   :  { %2694 = vmatpush2.bf16.msra.mxu1 %v4129_v17  ;;  %2418 = vmatprep.subr.bf16.mxu0 %v5502_v13  ;;  %v4050_v17 = vld [vmem:[%s6563_s0 + $0x40] ss:$72 sps:$4 sm:$0xff]  }
 0x129   :  { %2695 = vmatprep.subr.bf16.mxu1 %v4130_v22  ;;  %v4053_v22 = vld [vmem:[%s6564_s1] ss:$72 sps:$4 sm:$0xff]  }
 0x12b   :  { %2419 = vmatpush2.bf16.msra.mxu0 %v5511_v20 }
 0x12c   :  { %2696 = vmatpush2.bf16.msra.mxu1 %v4131_v27  ;;  %2420 = vmatprep.subr.bf16.mxu0 %v5520_v25  ;;  %v4141_v27 = vld [vmem:[%s6565_s2 + $0x80] ss:$8 sps:$4 sm:$0xff]  }
 0x12d   :  { %2697 = vmatprep.subr.bf16.mxu1 %v4132_v31  ;;  %v4142_v31 = vld [vmem:[%s6565_s2 + $0x174] ss:$8 sps:$4 sm:$0xff]  }
 0x12f   :  { %2421 = vmatpush2.bf16.msra.mxu0 %v5529_v29 }
 0x130   :  { %2698 = vmatpush2.bf16.msra.mxu1 %v4133_v33  ;;  %2422 = vmatprep.subr.bf16.mxu0 %v5538_v32  ;;  %v4143_v33 = vld [vmem:[%s6565_s2 + $0x274] ss:$8 sps:$4 sm:$0xff]  }
 0x131   :  { %2699 = vmatprep.subr.bf16.mxu1 %v4134_v41  ;;  %v4056_v41 = vld [vmem:[%s6563_s0 + $0xd4] ss:$72 sps:$4 sm:$0xff]  }
 0x133   :  { %2423 = vmatpush2.bf16.msra.mxu0 %v5547_v36 }
 0x134   :  { %2700 = vmatpush2.bf16.msra.mxu1 %v4135_v44  ;;  %2424 = vmatprep.subr.bf16.mxu0 %v5556_v42  ;;  %v4059_v44 = vld [vmem:[%s6564_s1 + $0x94] ss:$72 sps:$4 sm:$0xff]  }
 0x135   :  { %2701 = vmatprep.subr.bf16.mxu1 %v4136_v48 }
 0x137   :  { %2425 = vmatpush2.bf16.msra.mxu0 %v5565_v46 }
 0x138   :  { %2702 = vmatpush2.bf16.msra.mxu1 %v4137_v52  ;;  %2426 = vmatprep.subr.bf16.mxu0 %v5574_v51 }
 0x139   :  { %2703 = vmatprep.subr.bf16.mxu1 %v4138_v58 }
 0x13b   :  { %2427 = vmatpush2.bf16.msra.mxu0 %v5583_v55 }
 0x13c   :  { %2704 = vmatpush2.bf16.msra.mxu1 %v4139_v1  ;;  %2428 = vmatprep.subr.bf16.mxu0 %v5592_v61  ;;  %v4144_v1 = vld [vmem:[%s6565_s2 + $0x170] ss:$8 sps:$4 sm:$0xff]  }
 0x13d   :  { %2705 = vmatprep.subr.bf16.mxu1 %v4140_v9  ;;  %v4145_v9 = vld [vmem:[%s6565_s2 + $0x270] ss:$8 sps:$4 sm:$0xff]  }
 0x13f   :  { %2429 = vmatpush2.bf16.msra.mxu0 %v5601_v3 }
 0x140   :  { %2706 = vmatpush2.bf16.msra.mxu1 %v4141_v27  ;;  %2728 = vmatprep.subr.bf16.mxu0 %v4142_v31 }
 0x141   :  { %2781 = vmatprep.subr.bf16.mxu1 %v4143_v33  ;;  %v4146_v33 = vld [vmem:[%s6565_s2 + $0x164] ss:$8 sps:$4 sm:$0xff]  }
 0x142   :  { %v2114_v48 = vpop.f32.mrf.mxu0  ;;  %2431 = vmatmul.mubr.bf16.vlgmr.msra.gmra.mxu0 %v4050_v17 }
 0x143   :  { %v2167_v52 = vpop.f32.mrf.mxu1  ;;  %2708 = vmatmul.mubr.bf16.vlgmr.msra.gmra.mxu1 %v4053_v22  ;;  %v2115_v58 = vadd.f32 %v2114_v48, %v5325_v50  ;;  %2729 = vmatpush1.bf16.msra.mxu0 %v4144_v1  ;;  %v4147_v50 = vld [vmem:[%s6565_s2 + $0x264] ss:$8 sps:$4 sm:$0xff]  }
 0x144   :  { %2782 = vmatpush1.bf16.msra.mxu1 %v4145_v9  ;;  %v2116_v27 = vpop.f32.mrf.mxu0  ;;  %2730 = vmatprep.subr.bf16.mxu0 %v4146_v33  ;;  %v4058_v9 = vld [vmem:[%s6563_s0 + $0xd0] ss:$72 sps:$4 sm:$0xff]  }
 0x145   :  { %v2169_v31 = vpop.f32.mrf.mxu1  ;;  %2783 = vmatprep.subr.bf16.mxu1 %v4147_v50  ;;  %v5642_v17 = vadd.f32 %v2167_v52, %v2115_v58  ;;  %v2117_v22 = vadd.f32 %v2116_v27, %v5334_v56  ;;  %2440 = vmatprep.mubr.bf16.mxu0 %v4056_v41  ;;  %v4061_v33 = vld [vmem:[%s6564_s1 + $0x90] ss:$72 sps:$4 sm:$0xff]   ;;  %v4148_v56 = vld [vmem:[%s6565_s2 + $0x160] ss:$8 sps:$4 sm:$0xff]   ;;  %v4150_v58 = vld [vmem:[%s6565_s2 + $0x154] ss:$8 sps:$4 sm:$0xff]  }
 0x146   :  { %2717 = vmatprep.mubr.bf16.mxu1 %v4059_v44  ;;  %v2118_v48 = vpop.f32.mrf.mxu0  ;;  %v4149_v41 = vld [vmem:[%s6565_s2 + $0x260] ss:$8 sps:$4 sm:$0xff]  }
 0x147   :  { %v2171_v1 = vpop.f32.mrf.mxu1  ;;  %v5651_v38 = vadd.f32 %v2169_v31, %v2117_v22  ;;  %v2119_v50 = vadd.f32 %v2118_v48, %v5355_v63  ;;  %2731 = vmatpush1.bf16.msra.mxu0 %v4148_v56  ;;  %v4151_v63 = vld [vmem:[%s6565_s2 + $0x254] ss:$8 sps:$4 sm:$0xff]  }
 0x148   :  { %2784 = vmatpush1.bf16.msra.mxu1 %v4149_v41  ;;  %v2120_v44 = vpop.f32.mrf.mxu0  ;;  %2732 = vmatprep.subr.bf16.mxu0 %v4150_v58  ;;  %v4064_v22 = vld [vmem:[%s6564_s1 + $0xc] ss:$72 sps:$4 sm:$0xff]  }
 0x149   :  { %v2173_v52 = vpop.f32.mrf.mxu1  ;;  %2785 = vmatprep.subr.bf16.mxu1 %v4151_v63  ;;  %v5666_v27 = vadd.f32 %v2171_v1, %v2119_v50  ;;  %v2121_v31 = vadd.f32 %v2120_v44, %v5364_v4  ;;  %v4067_v48 = vld [vmem:[%s6564_s1 + $0x14] ss:$72 sps:$4 sm:$0xff]   ;;  %v4152_v4 = vld [vmem:[%s6565_s2 + $0x150] ss:$8 sps:$4 sm:$0xff]  }
 0x14a   :  { %v2124_v56 = vpop.f32.mrf.mxu0  ;;  %2441 = vmatmul.mubr.bf16.gmra.mxu0 %v4058_v9  ;;  %v4153_v1 = vld [vmem:[%s6565_s2 + $0x250] ss:$8 sps:$4 sm:$0xff]   ;;  %v4154_v9 = vld [vmem:[%s6565_s2 + $0x144] ss:$8 sps:$4 sm:$0xff]  }
 0x14b   :  { %v2177_v41 = vpop.f32.mrf.mxu1  ;;  %2718 = vmatmul.mubr.bf16.gmra.mxu1 %v4061_v33  ;;  %v5675_v58 = vadd.f32 %v2173_v52, %v2121_v31  ;;  %v2125_v63 = vadd.f32 %v2124_v56, %v5431_v40  ;;  %2733 = vmatpush1.bf16.msra.mxu0 %v4152_v4  ;;  %v4155_v40 = vld [vmem:[%s6565_s2 + $0x244] ss:$8 sps:$4 sm:$0xff]  }
 0x14c   :  { %2786 = vmatpush1.bf16.msra.mxu1 %v4153_v1  ;;  %v2126_v50 = vpop.f32.mrf.mxu0  ;;  %2734 = vmatprep.subr.bf16.mxu0 %v4154_v9  ;;  %v4156_v9 = vld [vmem:[%s6565_s2 + $0x140] ss:$8 sps:$4 sm:$0xff]  }
 0x14d   :  { %v2179_v44 = vpop.f32.mrf.mxu1  ;;  %2787 = vmatprep.subr.bf16.mxu1 %v4155_v40  ;;  %v2127_v33 = vadd.f32 %v2126_v50, %v5443_v47  ;;  %v5691_v52 = vadd.f32 %v2177_v41, %v2125_v63  ;;  %2760 = vmatprep.mubr.bf16.mxu0 %v4064_v22  ;;  %v4157_v40 = vld [vmem:[%s6565_s2 + $0x240] ss:$8 sps:$4 sm:$0xff]   ;;  %v4158_v22 = vld [vmem:[%s6565_s2 + $0x134] ss:$8 sps:$4 sm:$0xff]  }
 0x14e   :  { %2813 = vmatprep.mubr.bf16.mxu1 %v4067_v48  ;;  %v2128_v31 = vpop.f32.mrf.mxu0 }
 0x14f   :  { %v2181_v56 = vpop.f32.mrf.mxu1  ;;  %v2129_v4 = vadd.f32 %v2128_v31, %v5455_v54  ;;  %v5694_v1 = vadd.f32 %v2179_v44, %v2127_v33  ;;  %2735 = vmatpush1.bf16.msra.mxu0 %v4156_v9  ;;  %v4159_v54 = vld [vmem:[%s6565_s2 + $0x234] ss:$8 sps:$4 sm:$0xff]   ;;  %v4160_v44 = vld [vmem:[%s6565_s2 + $0x130] ss:$8 sps:$4 sm:$0xff]   ;;  %v4162_v31 = vld [vmem:[%s6565_s2 + $0x124] ss:$8 sps:$4 sm:$0xff]  }
 0x150   :  { %2788 = vmatpush1.bf16.msra.mxu1 %v4157_v40  ;;  %v2130_v47 = vpop.f32.mrf.mxu0  ;;  %2736 = vmatprep.subr.bf16.mxu0 %v4158_v22  ;;  %v4161_v33 = vld [vmem:[%s6565_s2 + $0x230] ss:$8 sps:$4 sm:$0xff]   ;;  %v4166_v9 = vld [vmem:[%s6565_s2 + $0x114] ss:$8 sps:$4 sm:$0xff]   ;;  %v4170_v22 = vld [vmem:[%s6565_s2 + $0x104] ss:$8 sps:$4 sm:$0xff]  }
 0x151   :  { %v2183_v41 = vpop.f32.mrf.mxu1  ;;  %2789 = vmatprep.subr.bf16.mxu1 %v4159_v54  ;;  %v2131_v48 = vadd.f32 %v2130_v47, %v5466_v60  ;;  %v5709_v63 = vadd.f32 %v2181_v56, %v2129_v4  ;;  %v4163_v60 = vld [vmem:[%s6565_s2 + $0x224] ss:$8 sps:$4 sm:$0xff]   ;;  %v4164_v56 = vld [vmem:[%s6565_s2 + $0x120] ss:$8 sps:$4 sm:$0xff]   ;;  %v4167_v40 = vld [vmem:[%s6565_s2 + $0x214] ss:$8 sps:$4 sm:$0xff]  }
 0x152   :  { %v4165_v4 = vld [vmem:[%s6565_s2 + $0x220] ss:$8 sps:$4 sm:$0xff]   ;;  %v4168_v47 = vld [vmem:[%s6565_s2 + $0x110] ss:$8 sps:$4 sm:$0xff]   ;;  %v4171_v54 = vld [vmem:[%s6565_s2 + $0x204] ss:$8 sps:$4 sm:$0xff]  }
 0x153   :  { %v5711_v50 = vadd.f32 %v2183_v41, %v2131_v48  ;;  %2737 = vmatpush1.bf16.msra.mxu0 %v4160_v44  ;;  %v4169_v41 = vld [vmem:[%s6565_s2 + $0x210] ss:$8 sps:$4 sm:$0xff]   ;;  %v4172_v48 = vld [vmem:[%s6565_s2 + $0x100] ss:$8 sps:$4 sm:$0xff]  }
 0x154   :  { %2790 = vmatpush1.bf16.msra.mxu1 %v4161_v33  ;;  %2738 = vmatprep.subr.bf16.mxu0 %v4162_v31  ;;  %v4173_v44 = vld [vmem:[%s6565_s2 + $0x200] ss:$8 sps:$4 sm:$0xff]   ;;  %v4174_v33 = vld [vmem:[%s6565_s2 + $0x1f4] ss:$8 sps:$4 sm:$0xff]  }
 0x155   :  { %2791 = vmatprep.subr.bf16.mxu1 %v4163_v60  ;;  %v4175_v31 = vld [vmem:[%s6565_s2 + $0x2f4] ss:$8 sps:$4 sm:$0xff]   ;;  %v4176_v60 = vld [vmem:[%s6565_s2 + $0x1f0] ss:$8 sps:$4 sm:$0xff]  }
 0x157   :  { %2739 = vmatpush1.bf16.msra.mxu0 %v4164_v56  ;;  %v4177_v56 = vld [vmem:[%s6565_s2 + $0x2f0] ss:$8 sps:$4 sm:$0xff]  }
 0x158   :  { %2792 = vmatpush1.bf16.msra.mxu1 %v4165_v4  ;;  %2740 = vmatprep.subr.bf16.mxu0 %v4166_v9  ;;  %v4178_v4 = vld [vmem:[%s6565_s2 + $0x1e4] ss:$8 sps:$4 sm:$0xff]  }
 0x159   :  { %2793 = vmatprep.subr.bf16.mxu1 %v4167_v40  ;;  %v4179_v9 = vld [vmem:[%s6565_s2 + $0x2e4] ss:$8 sps:$4 sm:$0xff]   ;;  %v4180_v40 = vld [vmem:[%s6565_s2 + $0x1e0] ss:$8 sps:$4 sm:$0xff]  }
 0x15b   :  { %2741 = vmatpush1.bf16.msra.mxu0 %v4168_v47  ;;  %v4181_v47 = vld [vmem:[%s6565_s2 + $0x2e0] ss:$8 sps:$4 sm:$0xff]  }
 0x15c   :  { %2794 = vmatpush1.bf16.msra.mxu1 %v4169_v41  ;;  %2742 = vmatprep.subr.bf16.mxu0 %v4170_v22  ;;  %v4182_v41 = vld [vmem:[%s6565_s2 + $0x1d4] ss:$8 sps:$4 sm:$0xff]  }
 0x15d   :  { %2795 = vmatprep.subr.bf16.mxu1 %v4171_v54  ;;  %v4183_v22 = vld [vmem:[%s6565_s2 + $0x2d4] ss:$8 sps:$4 sm:$0xff]   ;;  %v4184_v54 = vld [vmem:[%s6565_s2 + $0x1d0] ss:$8 sps:$4 sm:$0xff]  }
 0x15f   :  { %2743 = vmatpush1.bf16.msra.mxu0 %v4172_v48  ;;  %v4185_v48 = vld [vmem:[%s6565_s2 + $0x2d0] ss:$8 sps:$4 sm:$0xff]  }
 0x160   :  { %2796 = vmatpush1.bf16.msra.mxu1 %v4173_v44  ;;  %2744 = vmatprep.subr.bf16.mxu0 %v4174_v33  ;;  %v4186_v44 = vld [vmem:[%s6565_s2 + $0x1c4] ss:$8 sps:$4 sm:$0xff]  }
 0x161   :  { %2797 = vmatprep.subr.bf16.mxu1 %v4175_v31  ;;  %v4187_v33 = vld [vmem:[%s6565_s2 + $0x2c4] ss:$8 sps:$4 sm:$0xff]   ;;  %v4188_v31 = vld [vmem:[%s6565_s2 + $0x1c0] ss:$8 sps:$4 sm:$0xff]  }
 0x163   :  { %2745 = vmatpush2.bf16.msra.mxu0 %v4176_v60  ;;  %v4189_v60 = vld [vmem:[%s6565_s2 + $0x2c0] ss:$8 sps:$4 sm:$0xff]  }
 0x164   :  { %2798 = vmatpush2.bf16.msra.mxu1 %v4177_v56  ;;  %2746 = vmatprep.subr.bf16.mxu0 %v4178_v4  ;;  %v4190_v56 = vld [vmem:[%s6565_s2 + $0x1b4] ss:$8 sps:$4 sm:$0xff]  }
 0x165   :  { %2799 = vmatprep.subr.bf16.mxu1 %v4179_v9  ;;  %v4191_v4 = vld [vmem:[%s6565_s2 + $0x2b4] ss:$8 sps:$4 sm:$0xff]   ;;  %v4192_v9 = vld [vmem:[%s6565_s2 + $0x1b0] ss:$8 sps:$4 sm:$0xff]  }
 0x167   :  { %2747 = vmatpush2.bf16.msra.mxu0 %v4180_v40  ;;  %v4193_v40 = vld [vmem:[%s6565_s2 + $0x2b0] ss:$8 sps:$4 sm:$0xff]  }
 0x168   :  { %2800 = vmatpush2.bf16.msra.mxu1 %v4181_v47  ;;  %2748 = vmatprep.subr.bf16.mxu0 %v4182_v41  ;;  %v4194_v47 = vld [vmem:[%s6565_s2 + $0x1a4] ss:$8 sps:$4 sm:$0xff]  }
 0x169   :  { %2801 = vmatprep.subr.bf16.mxu1 %v4183_v22  ;;  %v4195_v41 = vld [vmem:[%s6565_s2 + $0x2a4] ss:$8 sps:$4 sm:$0xff]   ;;  %v4196_v22 = vld [vmem:[%s6565_s2 + $0x1a0] ss:$8 sps:$4 sm:$0xff]  }
 0x16b   :  { %2749 = vmatpush2.bf16.msra.mxu0 %v4184_v54  ;;  %v4197_v54 = vld [vmem:[%s6565_s2 + $0x2a0] ss:$8 sps:$4 sm:$0xff]  }
 0x16c   :  { %2802 = vmatpush2.bf16.msra.mxu1 %v4185_v48  ;;  %2750 = vmatprep.subr.bf16.mxu0 %v4186_v44  ;;  %v4198_v48 = vld [vmem:[%s6565_s2 + $0x194] ss:$8 sps:$4 sm:$0xff]  }
 0x16d   :  { %2803 = vmatprep.subr.bf16.mxu1 %v4187_v33  ;;  %v4199_v44 = vld [vmem:[%s6565_s2 + $0x294] ss:$8 sps:$4 sm:$0xff]   ;;  %v4200_v33 = vld [vmem:[%s6565_s2 + $0x190] ss:$8 sps:$4 sm:$0xff]  }
 0x16f   :  { %2751 = vmatpush2.bf16.msra.mxu0 %v4188_v31  ;;  %v4201_v31 = vld [vmem:[%s6565_s2 + $0x290] ss:$8 sps:$4 sm:$0xff]  }
 0x170   :  { %2804 = vmatpush2.bf16.msra.mxu1 %v4189_v60  ;;  %2752 = vmatprep.subr.bf16.mxu0 %v4190_v56  ;;  %v4202_v60 = vld [vmem:[%s6565_s2 + $0x184] ss:$8 sps:$4 sm:$0xff]  }
 0x171   :  { %2805 = vmatprep.subr.bf16.mxu1 %v4191_v4  ;;  %v4203_v56 = vld [vmem:[%s6565_s2 + $0x284] ss:$8 sps:$4 sm:$0xff]   ;;  %v4062_v4 = vld [vmem:[%s6564_s1 + $0x8] ss:$72 sps:$4 sm:$0xff]  }
 0x173   :  { %2753 = vmatpush2.bf16.msra.mxu0 %v4192_v9  ;;  %v4065_v9 = vld [vmem:[%s6564_s1 + $0x10] ss:$72 sps:$4 sm:$0xff]  }
 0x174   :  { %2806 = vmatpush2.bf16.msra.mxu1 %v4193_v40  ;;  %2754 = vmatprep.subr.bf16.mxu0 %v4194_v47  ;;  %v4204_v40 = vld [vmem:[%s6565_s2 + $0x180] ss:$8 sps:$4 sm:$0xff]  }
 0x175   :  { %2807 = vmatprep.subr.bf16.mxu1 %v4195_v41  ;;  %v4205_v47 = vld [vmem:[%s6565_s2 + $0x280] ss:$8 sps:$4 sm:$0xff]   ;;  %v4206_v41 = vld [vmem:[%s6565_s2 + $0x374] ss:$8 sps:$4 sm:$0xff]  }
 0x177   :  { %2755 = vmatpush2.bf16.msra.mxu0 %v4196_v22  ;;  %v4207_v22 = vld [vmem:[%s6565_s2 + $0x474] ss:$8 sps:$4 sm:$0xff]  }
 0x178   :  { %2808 = vmatpush2.bf16.msra.mxu1 %v4197_v54  ;;  %2756 = vmatprep.subr.bf16.mxu0 %v4198_v48  ;;  %v4068_v54 = vld [vmem:[%s6564_s1 + $0x9c] ss:$72 sps:$4 sm:$0xff]  }
 0x179   :  { %2809 = vmatprep.subr.bf16.mxu1 %v4199_v44  ;;  %v4071_v48 = vld [vmem:[%s6564_s1 + $0xa4] ss:$72 sps:$4 sm:$0xff]  }
 0x17b   :  { %2757 = vmatpush2.bf16.msra.mxu0 %v4200_v33 }
 0x17c   :  { %2810 = vmatpush2.bf16.msra.mxu1 %v4201_v31  ;;  %2758 = vmatprep.subr.bf16.mxu0 %v4202_v60  ;;  %v4208_v60 = vld [vmem:[%s6565_s2 + $0x370] ss:$8 sps:$4 sm:$0xff]  }
 0x17d   :  { %2811 = vmatprep.subr.bf16.mxu1 %v4203_v56  ;;  %v4209_v56 = vld [vmem:[%s6565_s2 + $0x470] ss:$8 sps:$4 sm:$0xff]  }
 0x17f   :  { %2759 = vmatpush2.bf16.msra.mxu0 %v4204_v40 }
 0x180   :  { %2812 = vmatpush2.bf16.msra.mxu1 %v4205_v47  ;;  %2834 = vmatprep.subr.bf16.mxu0 %v4206_v41  ;;  %v4210_v41 = vld [vmem:[%s6565_s2 + $0x364] ss:$8 sps:$4 sm:$0xff]  }
 0x181   :  { %2887 = vmatprep.subr.bf16.mxu1 %v4207_v22 }
 0x182   :  { %v2220_v44 = vpop.f32.mrf.mxu0  ;;  %2761 = vmatmul.mubr.bf16.vlgmr.msra.gmra.mxu0 %v4062_v4 }
 0x183   :  { %v2273_v33 = vpop.f32.mrf.mxu1  ;;  %2814 = vmatmul.mubr.bf16.vlgmr.msra.gmra.mxu1 %v4065_v9  ;;  %v2221_v31 = vadd.f32 %v2220_v44, %v5642_v17  ;;  %2835 = vmatpush1.bf16.msra.mxu0 %v4208_v60  ;;  %v4211_v17 = vld [vmem:[%s6565_s2 + $0x464] ss:$8 sps:$4 sm:$0xff]   ;;  %v4070_v60 = vld [vmem:[%s6564_s1 + $0x98] ss:$72 sps:$4 sm:$0xff]  }
 0x184   :  { %2888 = vmatpush1.bf16.msra.mxu1 %v4209_v56  ;;  %v2222_v40 = vpop.f32.mrf.mxu0  ;;  %2836 = vmatprep.subr.bf16.mxu0 %v4210_v41  ;;  %v4073_v56 = vld [vmem:[%s6564_s1 + $0xa0] ss:$72 sps:$4 sm:$0xff]  }
 0x185   :  { %v2275_v47 = vpop.f32.mrf.mxu1  ;;  %2889 = vmatprep.subr.bf16.mxu1 %v4211_v17  ;;  %v5882_v4 = vadd.f32 %v2273_v33, %v2221_v31  ;;  %v2223_v9 = vadd.f32 %v2222_v40, %v5651_v38  ;;  %2770 = vmatprep.mubr.bf16.mxu0 %v4068_v54  ;;  %v4212_v38 = vld [vmem:[%s6565_s2 + $0x360] ss:$8 sps:$4 sm:$0xff]   ;;  %v4214_v31 = vld [vmem:[%s6565_s2 + $0x354] ss:$8 sps:$4 sm:$0xff]  }
 0x186   :  { %2823 = vmatprep.mubr.bf16.mxu1 %v4071_v48  ;;  %v2224_v22 = vpop.f32.mrf.mxu0  ;;  %v4213_v54 = vld [vmem:[%s6565_s2 + $0x460] ss:$8 sps:$4 sm:$0xff]  }
 0x187   :  { %v2277_v44 = vpop.f32.mrf.mxu1  ;;  %v5891_v41 = vadd.f32 %v2275_v47, %v2223_v9  ;;  %v2225_v17 = vadd.f32 %v2224_v22, %v5666_v27  ;;  %2837 = vmatpush1.bf16.msra.mxu0 %v4212_v38  ;;  %v4215_v27 = vld [vmem:[%s6565_s2 + $0x454] ss:$8 sps:$4 sm:$0xff]   ;;  %v4079_v22 = vld [vmem:[%s6564_s1 + $0x24] ss:$72 sps:$4 sm:$0xff]  }
 0x188   :  { %2890 = vmatpush1.bf16.msra.mxu1 %v4213_v54  ;;  %v2226_v48 = vpop.f32.mrf.mxu0  ;;  %2838 = vmatprep.subr.bf16.mxu0 %v4214_v31  ;;  %v4076_v9 = vld [vmem:[%s6564_s1 + $0x1c] ss:$72 sps:$4 sm:$0xff]  }
 0x189   :  { %v2279_v33 = vpop.f32.mrf.mxu1  ;;  %2891 = vmatprep.subr.bf16.mxu1 %v4215_v27  ;;  %v5906_v40 = vadd.f32 %v2277_v44, %v2225_v17  ;;  %v2227_v47 = vadd.f32 %v2226_v48, %v5675_v58  ;;  %v4216_v58 = vld [vmem:[%s6565_s2 + $0x350] ss:$8 sps:$4 sm:$0xff]  }
 0x18a   :  { %v2230_v38 = vpop.f32.mrf.mxu0  ;;  %2771 = vmatmul.mubr.bf16.gmra.mxu0 %v4070_v60  ;;  %v4217_v44 = vld [vmem:[%s6565_s2 + $0x450] ss:$8 sps:$4 sm:$0xff]   ;;  %v4218_v60 = vld [vmem:[%s6565_s2 + $0x344] ss:$8 sps:$4 sm:$0xff]  }
 0x18b   :  { %v2283_v54 = vpop.f32.mrf.mxu1  ;;  %2824 = vmatmul.mubr.bf16.gmra.mxu1 %v4073_v56  ;;  %v5915_v31 = vadd.f32 %v2279_v33, %v2227_v47  ;;  %v2231_v27 = vadd.f32 %v2230_v38, %v5691_v52  ;;  %2839 = vmatpush1.bf16.msra.mxu0 %v4216_v58  ;;  %v4219_v52 = vld [vmem:[%s6565_s2 + $0x444] ss:$8 sps:$4 sm:$0xff]  }
 0x18c   :  { %2892 = vmatpush1.bf16.msra.mxu1 %v4217_v44  ;;  %v2232_v17 = vpop.f32.mrf.mxu0  ;;  %2840 = vmatprep.subr.bf16.mxu0 %v4218_v60  ;;  %v4220_v60 = vld [vmem:[%s6565_s2 + $0x340] ss:$8 sps:$4 sm:$0xff]  }
 0x18d   :  { %v2285_v48 = vpop.f32.mrf.mxu1  ;;  %2893 = vmatprep.subr.bf16.mxu1 %v4219_v52  ;;  %v2233_v56 = vadd.f32 %v2232_v17, %v5694_v1  ;;  %v5931_v33 = vadd.f32 %v2283_v54, %v2231_v27  ;;  %2866 = vmatprep.mubr.bf16.mxu0 %v4076_v9  ;;  %v4221_v52 = vld [vmem:[%s6565_s2 + $0x440] ss:$8 sps:$4 sm:$0xff]   ;;  %v4222_v9 = vld [vmem:[%s6565_s2 + $0x334] ss:$8 sps:$4 sm:$0xff]  }
 0x18e   :  { %2919 = vmatprep.mubr.bf16.mxu1 %v4079_v22  ;;  %v2234_v47 = vpop.f32.mrf.mxu0 }
 0x18f   :  { %v2287_v38 = vpop.f32.mrf.mxu1  ;;  %v2235_v58 = vadd.f32 %v2234_v47, %v5709_v63  ;;  %v5934_v44 = vadd.f32 %v2285_v48, %v2233_v56  ;;  %2841 = vmatpush1.bf16.msra.mxu0 %v4220_v60  ;;  %v4223_v63 = vld [vmem:[%s6565_s2 + $0x434] ss:$8 sps:$4 sm:$0xff]   ;;  %v4224_v48 = vld [vmem:[%s6565_s2 + $0x330] ss:$8 sps:$4 sm:$0xff]   ;;  %v4226_v47 = vld [vmem:[%s6565_s2 + $0x324] ss:$8 sps:$4 sm:$0xff]  }
 0x190   :  { %2894 = vmatpush1.bf16.msra.mxu1 %v4221_v52  ;;  %v2236_v1 = vpop.f32.mrf.mxu0  ;;  %2842 = vmatprep.subr.bf16.mxu0 %v4222_v9  ;;  %v4225_v56 = vld [vmem:[%s6565_s2 + $0x430] ss:$8 sps:$4 sm:$0xff]   ;;  %v4230_v60 = vld [vmem:[%s6565_s2 + $0x314] ss:$8 sps:$4 sm:$0xff]   ;;  %v4234_v9 = vld [vmem:[%s6565_s2 + $0x304] ss:$8 sps:$4 sm:$0xff]  }
 0x191   :  { %v2289_v54 = vpop.f32.mrf.mxu1  ;;  %2895 = vmatprep.subr.bf16.mxu1 %v4223_v63  ;;  %v2237_v22 = vadd.f32 %v2236_v1, %v5711_v50  ;;  %v5949_v27 = vadd.f32 %v2287_v38, %v2235_v58  ;;  %v4227_v50 = vld [vmem:[%s6565_s2 + $0x424] ss:$8 sps:$4 sm:$0xff]   ;;  %v4228_v38 = vld [vmem:[%s6565_s2 + $0x320] ss:$8 sps:$4 sm:$0xff]   ;;  %v4231_v52 = vld [vmem:[%s6565_s2 + $0x414] ss:$8 sps:$4 sm:$0xff]  }
 0x192   :  { %v4229_v58 = vld [vmem:[%s6565_s2 + $0x420] ss:$8 sps:$4 sm:$0xff]   ;;  %v4232_v1 = vld [vmem:[%s6565_s2 + $0x310] ss:$8 sps:$4 sm:$0xff]   ;;  %v4235_v63 = vld [vmem:[%s6565_s2 + $0x404] ss:$8 sps:$4 sm:$0xff]  }
 0x193   :  { %v5951_v17 = vadd.f32 %v2289_v54, %v2237_v22  ;;  %2843 = vmatpush1.bf16.msra.mxu0 %v4224_v48  ;;  %v4233_v54 = vld [vmem:[%s6565_s2 + $0x410] ss:$8 sps:$4 sm:$0xff]   ;;  %v4236_v22 = vld [vmem:[%s6565_s2 + $0x300] ss:$8 sps:$4 sm:$0xff]  }
 0x194   :  { %2896 = vmatpush1.bf16.msra.mxu1 %v4225_v56  ;;  %2844 = vmatprep.subr.bf16.mxu0 %v4226_v47  ;;  %v4237_v48 = vld [vmem:[%s6565_s2 + $0x400] ss:$8 sps:$4 sm:$0xff]   ;;  %v4238_v56 = vld [vmem:[%s6565_s2 + $0x3f4] ss:$8 sps:$4 sm:$0xff]  }
 0x195   :  { %2897 = vmatprep.subr.bf16.mxu1 %v4227_v50  ;;  %v4239_v47 = vld [vmem:[%s6565_s2 + $0x4f4] ss:$8 sps:$4 sm:$0xff]   ;;  %v4240_v50 = vld [vmem:[%s6565_s2 + $0x3f0] ss:$8 sps:$4 sm:$0xff]  }
 0x197   :  { %2845 = vmatpush1.bf16.msra.mxu0 %v4228_v38  ;;  %v4241_v38 = vld [vmem:[%s6565_s2 + $0x4f0] ss:$8 sps:$4 sm:$0xff]  }
 0x198   :  { %2898 = vmatpush1.bf16.msra.mxu1 %v4229_v58  ;;  %2846 = vmatprep.subr.bf16.mxu0 %v4230_v60  ;;  %v4242_v58 = vld [vmem:[%s6565_s2 + $0x3e4] ss:$8 sps:$4 sm:$0xff]  }
 0x199   :  { %2899 = vmatprep.subr.bf16.mxu1 %v4231_v52  ;;  %v4243_v60 = vld [vmem:[%s6565_s2 + $0x4e4] ss:$8 sps:$4 sm:$0xff]   ;;  %v4244_v52 = vld [vmem:[%s6565_s2 + $0x3e0] ss:$8 sps:$4 sm:$0xff]  }
 0x19b   :  { %2847 = vmatpush1.bf16.msra.mxu0 %v4232_v1  ;;  %v4245_v1 = vld [vmem:[%s6565_s2 + $0x4e0] ss:$8 sps:$4 sm:$0xff]  }
 0x19c   :  { %2900 = vmatpush1.bf16.msra.mxu1 %v4233_v54  ;;  %2848 = vmatprep.subr.bf16.mxu0 %v4234_v9  ;;  %v4246_v54 = vld [vmem:[%s6565_s2 + $0x3d4] ss:$8 sps:$4 sm:$0xff]  }
 0x19d   :  { %2901 = vmatprep.subr.bf16.mxu1 %v4235_v63  ;;  %v4247_v9 = vld [vmem:[%s6565_s2 + $0x4d4] ss:$8 sps:$4 sm:$0xff]   ;;  %v4248_v63 = vld [vmem:[%s6565_s2 + $0x3d0] ss:$8 sps:$4 sm:$0xff]  }
 0x19f   :  { %2849 = vmatpush1.bf16.msra.mxu0 %v4236_v22  ;;  %v4249_v22 = vld [vmem:[%s6565_s2 + $0x4d0] ss:$8 sps:$4 sm:$0xff]  }
 0x1a0   :  { %2902 = vmatpush1.bf16.msra.mxu1 %v4237_v48  ;;  %2850 = vmatprep.subr.bf16.mxu0 %v4238_v56  ;;  %v4250_v48 = vld [vmem:[%s6565_s2 + $0x3c4] ss:$8 sps:$4 sm:$0xff]  }
 0x1a1   :  { %2903 = vmatprep.subr.bf16.mxu1 %v4239_v47  ;;  %v4251_v56 = vld [vmem:[%s6565_s2 + $0x4c4] ss:$8 sps:$4 sm:$0xff]   ;;  %v4252_v47 = vld [vmem:[%s6565_s2 + $0x3c0] ss:$8 sps:$4 sm:$0xff]  }
 0x1a3   :  { %2851 = vmatpush2.bf16.msra.mxu0 %v4240_v50  ;;  %v4253_v50 = vld [vmem:[%s6565_s2 + $0x4c0] ss:$8 sps:$4 sm:$0xff]  }
 0x1a4   :  { %2904 = vmatpush2.bf16.msra.mxu1 %v4241_v38  ;;  %2852 = vmatprep.subr.bf16.mxu0 %v4242_v58  ;;  %v4254_v38 = vld [vmem:[%s6565_s2 + $0x3b4] ss:$8 sps:$4 sm:$0xff]  }
 0x1a5   :  { %2905 = vmatprep.subr.bf16.mxu1 %v4243_v60  ;;  %v4255_v58 = vld [vmem:[%s6565_s2 + $0x4b4] ss:$8 sps:$4 sm:$0xff]   ;;  %v4256_v60 = vld [vmem:[%s6565_s2 + $0x3b0] ss:$8 sps:$4 sm:$0xff]  }
 0x1a7   :  { %2853 = vmatpush2.bf16.msra.mxu0 %v4244_v52  ;;  %v4257_v52 = vld [vmem:[%s6565_s2 + $0x4b0] ss:$8 sps:$4 sm:$0xff]  }
 0x1a8   :  { %2906 = vmatpush2.bf16.msra.mxu1 %v4245_v1  ;;  %2854 = vmatprep.subr.bf16.mxu0 %v4246_v54  ;;  %v4258_v1 = vld [vmem:[%s6565_s2 + $0x3a4] ss:$8 sps:$4 sm:$0xff]  }
 0x1a9   :  { %2907 = vmatprep.subr.bf16.mxu1 %v4247_v9  ;;  %v4259_v54 = vld [vmem:[%s6565_s2 + $0x4a4] ss:$8 sps:$4 sm:$0xff]   ;;  %v4260_v9 = vld [vmem:[%s6565_s2 + $0x3a0] ss:$8 sps:$4 sm:$0xff]  }
 0x1ab   :  { %2855 = vmatpush2.bf16.msra.mxu0 %v4248_v63  ;;  %v4261_v63 = vld [vmem:[%s6565_s2 + $0x4a0] ss:$8 sps:$4 sm:$0xff]  }
 0x1ac   :  { %2908 = vmatpush2.bf16.msra.mxu1 %v4249_v22  ;;  %2856 = vmatprep.subr.bf16.mxu0 %v4250_v48  ;;  %v4262_v22 = vld [vmem:[%s6565_s2 + $0x394] ss:$8 sps:$4 sm:$0xff]  }
 0x1ad   :  { %2909 = vmatprep.subr.bf16.mxu1 %v4251_v56  ;;  %v4263_v48 = vld [vmem:[%s6565_s2 + $0x494] ss:$8 sps:$4 sm:$0xff]   ;;  %v4264_v56 = vld [vmem:[%s6565_s2 + $0x390] ss:$8 sps:$4 sm:$0xff]  }
 0x1af   :  { %2857 = vmatpush2.bf16.msra.mxu0 %v4252_v47  ;;  %v4265_v47 = vld [vmem:[%s6565_s2 + $0x490] ss:$8 sps:$4 sm:$0xff]  }
 0x1b0   :  { %2910 = vmatpush2.bf16.msra.mxu1 %v4253_v50  ;;  %2858 = vmatprep.subr.bf16.mxu0 %v4254_v38  ;;  %v4266_v50 = vld [vmem:[%s6565_s2 + $0x384] ss:$8 sps:$4 sm:$0xff]  }
 0x1b1   :  { %2911 = vmatprep.subr.bf16.mxu1 %v4255_v58  ;;  %v4267_v38 = vld [vmem:[%s6565_s2 + $0x484] ss:$8 sps:$4 sm:$0xff]   ;;  %v4074_v58 = vld [vmem:[%s6564_s1 + $0x18] ss:$72 sps:$4 sm:$0xff]  }
 0x1b3   :  { %2859 = vmatpush2.bf16.msra.mxu0 %v4256_v60  ;;  %v4077_v60 = vld [vmem:[%s6564_s1 + $0x20] ss:$72 sps:$4 sm:$0xff]  }
 0x1b4   :  { %2912 = vmatpush2.bf16.msra.mxu1 %v4257_v52  ;;  %2860 = vmatprep.subr.bf16.mxu0 %v4258_v1  ;;  %v4268_v52 = vld [vmem:[%s6565_s2 + $0x380] ss:$8 sps:$4 sm:$0xff]  }
 0x1b5   :  { %2913 = vmatprep.subr.bf16.mxu1 %v4259_v54  ;;  %v4269_v1 = vld [vmem:[%s6565_s2 + $0x480] ss:$8 sps:$4 sm:$0xff]   ;;  %v4270_v54 = vld [vmem:[%s6565_s2 + $0x574] ss:$8 sps:$4 sm:$0xff]  }
 0x1b7   :  { %2861 = vmatpush2.bf16.msra.mxu0 %v4260_v9  ;;  %v4271_v9 = vld [vmem:[%s6565_s2 + $0x674] ss:$8 sps:$4 sm:$0xff]  }
 0x1b8   :  { %2914 = vmatpush2.bf16.msra.mxu1 %v4261_v63  ;;  %2862 = vmatprep.subr.bf16.mxu0 %v4262_v22  ;;  %v4080_v63 = vld [vmem:[%s6564_s1 + $0xac] ss:$72 sps:$4 sm:$0xff]  }
 0x1b9   :  { %2915 = vmatprep.subr.bf16.mxu1 %v4263_v48  ;;  %v4083_v22 = vld [vmem:[%s6564_s1 + $0xb4] ss:$72 sps:$4 sm:$0xff]  }
 0x1bb   :  { %2863 = vmatpush2.bf16.msra.mxu0 %v4264_v56 }
 0x1bc   :  { %2916 = vmatpush2.bf16.msra.mxu1 %v4265_v47  ;;  %2864 = vmatprep.subr.bf16.mxu0 %v4266_v50  ;;  %v4272_v50 = vld [vmem:[%s6565_s2 + $0x570] ss:$8 sps:$4 sm:$0xff]  }
 0x1bd   :  { %2917 = vmatprep.subr.bf16.mxu1 %v4267_v38  ;;  %v4273_v38 = vld [vmem:[%s6565_s2 + $0x670] ss:$8 sps:$4 sm:$0xff]  }
 0x1bf   :  { %2865 = vmatpush2.bf16.msra.mxu0 %v4268_v52 }
 0x1c0   :  { %2918 = vmatpush2.bf16.msra.mxu1 %v4269_v1  ;;  %2940 = vmatprep.subr.bf16.mxu0 %v4270_v54  ;;  %v4274_v54 = vld [vmem:[%s6565_s2 + $0x564] ss:$8 sps:$4 sm:$0xff]  }
 0x1c1   :  { %2993 = vmatprep.subr.bf16.mxu1 %v4271_v9 }
 0x1c2   :  { %v2326_v48 = vpop.f32.mrf.mxu0  ;;  %2867 = vmatmul.mubr.bf16.vlgmr.msra.gmra.mxu0 %v4074_v58 }
 0x1c3   :  { %v2379_v56 = vpop.f32.mrf.mxu1  ;;  %2920 = vmatmul.mubr.bf16.vlgmr.msra.gmra.mxu1 %v4077_v60  ;;  %v2327_v47 = vadd.f32 %v2326_v48, %v5882_v4  ;;  %2941 = vmatpush1.bf16.msra.mxu0 %v4272_v50  ;;  %v4275_v4 = vld [vmem:[%s6565_s2 + $0x664] ss:$8 sps:$4 sm:$0xff]   ;;  %v4082_v50 = vld [vmem:[%s6564_s1 + $0xa8] ss:$72 sps:$4 sm:$0xff]  }
 0x1c4   :  { %2994 = vmatpush1.bf16.msra.mxu1 %v4273_v38  ;;  %v2328_v52 = vpop.f32.mrf.mxu0  ;;  %2942 = vmatprep.subr.bf16.mxu0 %v4274_v54  ;;  %v4085_v38 = vld [vmem:[%s6564_s1 + $0xb0] ss:$72 sps:$4 sm:$0xff]  }
 0x1c5   :  { %v2381_v1 = vpop.f32.mrf.mxu1  ;;  %2995 = vmatprep.subr.bf16.mxu1 %v4275_v4  ;;  %v6122_v58 = vadd.f32 %v2379_v56, %v2327_v47  ;;  %v2329_v60 = vadd.f32 %v2328_v52, %v5891_v41  ;;  %2876 = vmatprep.mubr.bf16.mxu0 %v4080_v63  ;;  %v4276_v41 = vld [vmem:[%s6565_s2 + $0x560] ss:$8 sps:$4 sm:$0xff]   ;;  %v4278_v47 = vld [vmem:[%s6565_s2 + $0x554] ss:$8 sps:$4 sm:$0xff]  }
 0x1c6   :  { %2929 = vmatprep.mubr.bf16.mxu1 %v4083_v22  ;;  %v2330_v9 = vpop.f32.mrf.mxu0  ;;  %v4277_v63 = vld [vmem:[%s6565_s2 + $0x660] ss:$8 sps:$4 sm:$0xff]  }
 0x1c7   :  { %v2383_v48 = vpop.f32.mrf.mxu1  ;;  %v6131_v54 = vadd.f32 %v2381_v1, %v2329_v60  ;;  %v2331_v4 = vadd.f32 %v2330_v9, %v5906_v40  ;;  %2943 = vmatpush1.bf16.msra.mxu0 %v4276_v41  ;;  %v4279_v40 = vld [vmem:[%s6565_s2 + $0x654] ss:$8 sps:$4 sm:$0xff]  }
 0x1c8   :  { %2996 = vmatpush1.bf16.msra.mxu1 %v4277_v63  ;;  %v2332_v22 = vpop.f32.mrf.mxu0  ;;  %2944 = vmatprep.subr.bf16.mxu0 %v4278_v47  ;;  %v4088_v60 = vld [vmem:[%s6564_s1 + $0x2c] ss:$72 sps:$4 sm:$0xff]  }
 0x1c9   :  { %v2385_v56 = vpop.f32.mrf.mxu1  ;;  %2997 = vmatprep.subr.bf16.mxu1 %v4279_v40  ;;  %v6146_v52 = vadd.f32 %v2383_v48, %v2331_v4  ;;  %v2333_v1 = vadd.f32 %v2332_v22, %v5915_v31  ;;  %v4091_v9 = vld [vmem:[%s6564_s1 + $0x34] ss:$72 sps:$4 sm:$0xff]   ;;  %v4280_v31 = vld [vmem:[%s6565_s2 + $0x550] ss:$8 sps:$4 sm:$0xff]  }
 0x1ca   :  { %v2336_v41 = vpop.f32.mrf.mxu0  ;;  %2877 = vmatmul.mubr.bf16.gmra.mxu0 %v4082_v50  ;;  %v4281_v48 = vld [vmem:[%s6565_s2 + $0x650] ss:$8 sps:$4 sm:$0xff]   ;;  %v4282_v50 = vld [vmem:[%s6565_s2 + $0x544] ss:$8 sps:$4 sm:$0xff]  }
 0x1cb   :  { %v2389_v63 = vpop.f32.mrf.mxu1  ;;  %2930 = vmatmul.mubr.bf16.gmra.mxu1 %v4085_v38  ;;  %v6155_v47 = vadd.f32 %v2385_v56, %v2333_v1  ;;  %v2337_v40 = vadd.f32 %v2336_v41, %v5931_v33  ;;  %2945 = vmatpush1.bf16.msra.mxu0 %v4280_v31  ;;  %v4283_v33 = vld [vmem:[%s6565_s2 + $0x644] ss:$8 sps:$4 sm:$0xff]  }
 0x1cc   :  { %2998 = vmatpush1.bf16.msra.mxu1 %v4281_v48  ;;  %v2338_v4 = vpop.f32.mrf.mxu0  ;;  %2946 = vmatprep.subr.bf16.mxu0 %v4282_v50  ;;  %v4284_v50 = vld [vmem:[%s6565_s2 + $0x540] ss:$8 sps:$4 sm:$0xff]  }
 0x1cd   :  { %v2391_v22 = vpop.f32.mrf.mxu1  ;;  %2999 = vmatprep.subr.bf16.mxu1 %v4283_v33  ;;  %v2339_v38 = vadd.f32 %v2338_v4, %v5934_v44  ;;  %v6171_v56 = vadd.f32 %v2389_v63, %v2337_v40  ;;  %2972 = vmatprep.mubr.bf16.mxu0 %v4088_v60  ;;  %v4285_v33 = vld [vmem:[%s6565_s2 + $0x640] ss:$8 sps:$4 sm:$0xff]   ;;  %v4286_v60 = vld [vmem:[%s6565_s2 + $0x534] ss:$8 sps:$4 sm:$0xff]  }
 0x1ce   :  { %3025 = vmatprep.mubr.bf16.mxu1 %v4091_v9  ;;  %v2340_v1 = vpop.f32.mrf.mxu0 }
 0x1cf   :  { %v2393_v41 = vpop.f32.mrf.mxu1  ;;  %v2341_v31 = vadd.f32 %v2340_v1, %v5949_v27  ;;  %v6174_v48 = vadd.f32 %v2391_v22, %v2339_v38  ;;  %2947 = vmatpush1.bf16.msra.mxu0 %v4284_v50  ;;  %v4287_v27 = vld [vmem:[%s6565_s2 + $0x634] ss:$8 sps:$4 sm:$0xff]   ;;  %v4288_v22 = vld [vmem:[%s6565_s2 + $0x530] ss:$8 sps:$4 sm:$0xff]   ;;  %v4290_v1 = vld [vmem:[%s6565_s2 + $0x524] ss:$8 sps:$4 sm:$0xff]  }
 0x1d0   :  { %3000 = vmatpush1.bf16.msra.mxu1 %v4285_v33  ;;  %v2342_v44 = vpop.f32.mrf.mxu0  ;;  %2948 = vmatprep.subr.bf16.mxu0 %v4286_v60  ;;  %v4289_v38 = vld [vmem:[%s6565_s2 + $0x630] ss:$8 sps:$4 sm:$0xff]   ;;  %v4294_v50 = vld [vmem:[%s6565_s2 + $0x514] ss:$8 sps:$4 sm:$0xff]   ;;  %v4298_v60 = vld [vmem:[%s6565_s2 + $0x504] ss:$8 sps:$4 sm:$0xff]  }
 0x1d1   :  { %v2395_v63 = vpop.f32.mrf.mxu1  ;;  %3001 = vmatprep.subr.bf16.mxu1 %v4287_v27  ;;  %v2343_v9 = vadd.f32 %v2342_v44, %v5951_v17  ;;  %v6189_v40 = vadd.f32 %v2393_v41, %v2341_v31  ;;  %v4291_v17 = vld [vmem:[%s6565_s2 + $0x624] ss:$8 sps:$4 sm:$0xff]   ;;  %v4292_v41 = vld [vmem:[%s6565_s2 + $0x520] ss:$8 sps:$4 sm:$0xff]   ;;  %v4295_v33 = vld [vmem:[%s6565_s2 + $0x614] ss:$8 sps:$4 sm:$0xff]  }
 0x1d2   :  { %v4293_v31 = vld [vmem:[%s6565_s2 + $0x620] ss:$8 sps:$4 sm:$0xff]   ;;  %v4296_v44 = vld [vmem:[%s6565_s2 + $0x510] ss:$8 sps:$4 sm:$0xff]   ;;  %v4299_v27 = vld [vmem:[%s6565_s2 + $0x604] ss:$8 sps:$4 sm:$0xff]  }
 0x1d3   :  { %v6191_v4 = vadd.f32 %v2395_v63, %v2343_v9  ;;  %2949 = vmatpush1.bf16.msra.mxu0 %v4288_v22  ;;  %v4297_v63 = vld [vmem:[%s6565_s2 + $0x610] ss:$8 sps:$4 sm:$0xff]   ;;  %v4300_v9 = vld [vmem:[%s6565_s2 + $0x500] ss:$8 sps:$4 sm:$0xff]  }
 0x1d4   :  { %3002 = vmatpush1.bf16.msra.mxu1 %v4289_v38  ;;  %2950 = vmatprep.subr.bf16.mxu0 %v4290_v1  ;;  %v4301_v22 = vld [vmem:[%s6565_s2 + $0x600] ss:$8 sps:$4 sm:$0xff]   ;;  %v4302_v38 = vld [vmem:[%s6565_s2 + $0x5f4] ss:$8 sps:$4 sm:$0xff]  }
 0x1d5   :  { %3003 = vmatprep.subr.bf16.mxu1 %v4291_v17  ;;  %v4303_v1 = vld [vmem:[%s6565_s2 + $0x6f4] ss:$8 sps:$4 sm:$0xff]   ;;  %v4304_v17 = vld [vmem:[%s6565_s2 + $0x5f0] ss:$8 sps:$4 sm:$0xff]  }
 0x1d7   :  { %2951 = vmatpush1.bf16.msra.mxu0 %v4292_v41  ;;  %v4305_v41 = vld [vmem:[%s6565_s2 + $0x6f0] ss:$8 sps:$4 sm:$0xff]  }
 0x1d8   :  { %3004 = vmatpush1.bf16.msra.mxu1 %v4293_v31  ;;  %2952 = vmatprep.subr.bf16.mxu0 %v4294_v50  ;;  %v4306_v31 = vld [vmem:[%s6565_s2 + $0x5e4] ss:$8 sps:$4 sm:$0xff]  }
 0x1d9   :  { %3005 = vmatprep.subr.bf16.mxu1 %v4295_v33  ;;  %v4307_v50 = vld [vmem:[%s6565_s2 + $0x6e4] ss:$8 sps:$4 sm:$0xff]   ;;  %v4308_v33 = vld [vmem:[%s6565_s2 + $0x5e0] ss:$8 sps:$4 sm:$0xff]  }
 0x1db   :  { %2953 = vmatpush1.bf16.msra.mxu0 %v4296_v44  ;;  %v4309_v44 = vld [vmem:[%s6565_s2 + $0x6e0] ss:$8 sps:$4 sm:$0xff]  }
 0x1dc   :  { %3006 = vmatpush1.bf16.msra.mxu1 %v4297_v63  ;;  %2954 = vmatprep.subr.bf16.mxu0 %v4298_v60  ;;  %v4310_v63 = vld [vmem:[%s6565_s2 + $0x5d4] ss:$8 sps:$4 sm:$0xff]  }
 0x1dd   :  { %3007 = vmatprep.subr.bf16.mxu1 %v4299_v27  ;;  %v4311_v60 = vld [vmem:[%s6565_s2 + $0x6d4] ss:$8 sps:$4 sm:$0xff]   ;;  %v4312_v27 = vld [vmem:[%s6565_s2 + $0x5d0] ss:$8 sps:$4 sm:$0xff]  }
 0x1df   :  { %2955 = vmatpush1.bf16.msra.mxu0 %v4300_v9  ;;  %v4313_v9 = vld [vmem:[%s6565_s2 + $0x6d0] ss:$8 sps:$4 sm:$0xff]  }
 0x1e0   :  { %3008 = vmatpush1.bf16.msra.mxu1 %v4301_v22  ;;  %2956 = vmatprep.subr.bf16.mxu0 %v4302_v38  ;;  %v4314_v22 = vld [vmem:[%s6565_s2 + $0x5c4] ss:$8 sps:$4 sm:$0xff]   ;;  %v4315_v38 = vld [vmem:[%s6565_s2 + $0x5c0] ss:$8 sps:$4 sm:$0xff]  }
 0x1e1   :  { %3009 = vmatprep.subr.bf16.mxu1 %v4303_v1  ;;  %v4316_v1 = vld [vmem:[%s6565_s2 + $0x5b4] ss:$8 sps:$4 sm:$0xff]  }
 0x1e3   :  { %2957 = vmatpush2.bf16.msra.mxu0 %v4304_v17  ;;  %v4317_v17 = vld [vmem:[%s6565_s2 + $0x5b0] ss:$8 sps:$4 sm:$0xff]  }
 0x1e4   :  { %3010 = vmatpush2.bf16.msra.mxu1 %v4305_v41  ;;  %2958 = vmatprep.subr.bf16.mxu0 %v4306_v31  ;;  %v4323_v41 = vld [vmem:[%s6565_s2 + $0x580] ss:$8 sps:$4 sm:$0xff]   ;;  %v4095_v31 = vld [vmem:[%s6564_s1 + $0xc4] ss:$72 sps:$4 sm:$0xff]  }
 0x1e5   :  { %3011 = vmatprep.subr.bf16.mxu1 %v4307_v50 }
 0x1e7   :  { %2959 = vmatpush2.bf16.msra.mxu0 %v4308_v33  ;;  %v4325_v33 = vld [vmem:[%s6565_s2 + $0x770] ss:$8 sps:$4 sm:$0xff]  }
 0x1e8   :  { %3012 = vmatpush2.bf16.msra.mxu1 %v4309_v44  ;;  %2960 = vmatprep.subr.bf16.mxu0 %v4310_v63  ;;  %v4326_v44 = vld [vmem:[%s6565_s2 + $0x764] ss:$8 sps:$4 sm:$0xff]  }
 0x1e9   :  { %3013 = vmatprep.subr.bf16.mxu1 %v4311_v60  ;;  %v4094_v60 = vld [vmem:[%s6564_s1 + $0xb8] ss:$72 sps:$4 sm:$0xff]  }
 0x1eb   :  { %2961 = vmatpush2.bf16.msra.mxu0 %v4312_v27 }
 0x1ec   :  { %3014 = vmatpush2.bf16.msra.mxu1 %v4313_v9  ;;  %2962 = vmatprep.subr.bf16.mxu0 %v4314_v22  ;;  %v4328_v9 = vld [vmem:[%s6565_s2 + $0x754] ss:$8 sps:$4 sm:$0xff]  }
 0x1ed   :  { %3015 = vmatprep.subr.bf16.mxu1 %v5181_v6  ;;  %v4318_v6 = vld [vmem:[%s6565_s2 + $0x5a4] ss:$8 sps:$4 sm:$0xff]  }
 0x1ef   :  { %2963 = vmatpush2.bf16.msra.mxu0 %v4315_v38  ;;  %v4103_v38 = vld [vmem:[%s6564_s1 + $0x44] ss:$72 sps:$4 sm:$0xff]  }
 0x1f0   :  { %3016 = vmatpush2.bf16.msra.mxu1 %v5189_v8  ;;  %2964 = vmatprep.subr.bf16.mxu0 %v4316_v1  ;;  %v4319_v8 = vld [vmem:[%s6565_s2 + $0x5a0] ss:$8 sps:$4 sm:$0xff]  }
 0x1f1   :  { %3017 = vmatprep.subr.bf16.mxu1 %v5198_v10  ;;  %v4320_v10 = vld [vmem:[%s6565_s2 + $0x594] ss:$8 sps:$4 sm:$0xff]  }
 0x1f3   :  { %2965 = vmatpush2.bf16.msra.mxu0 %v4317_v17  ;;  %v4330_v17 = vld [vmem:[%s6565_s2 + $0x744] ss:$8 sps:$4 sm:$0xff]  }
 0x1f4   :  { %3018 = vmatpush2.bf16.msra.mxu1 %v5207_v12  ;;  %2966 = vmatprep.subr.bf16.mxu0 %v4318_v6  ;;  %v4321_v12 = vld [vmem:[%s6565_s2 + $0x590] ss:$8 sps:$4 sm:$0xff]  }
 0x1f5   :  { %3019 = vmatprep.subr.bf16.mxu1 %v5216_v14  ;;  %v4322_v14 = vld [vmem:[%s6565_s2 + $0x584] ss:$8 sps:$4 sm:$0xff]  }
 0x1f7   :  { %2967 = vmatpush2.bf16.msra.mxu0 %v4319_v8 }
 0x1f8   :  { %3020 = vmatpush2.bf16.msra.mxu1 %v5225_v16  ;;  %2968 = vmatprep.subr.bf16.mxu0 %v4320_v10  ;;  %v4086_v16 = vld [vmem:[%s6564_s1 + $0x28] ss:$72 sps:$4 sm:$0xff]  }
 0x1f9   :  { %3021 = vmatprep.subr.bf16.mxu1 %v5234_v19  ;;  %v4089_v19 = vld [vmem:[%s6564_s1 + $0x30] ss:$72 sps:$4 sm:$0xff]  }
 0x1fb   :  { %2969 = vmatpush2.bf16.msra.mxu0 %v4321_v12  ;;  %v4355_v12 = vld [vmem:[%s6565_s2 + $0x780] ss:$8 sps:$4 sm:$0xff]  }
 0x1fc   :  { %3022 = vmatpush2.bf16.msra.mxu1 %v5243_v21  ;;  %2970 = vmatprep.subr.bf16.mxu0 %v4322_v14  ;;  %v4324_v21 = vld [vmem:[%s6565_s2 + $0x774] ss:$8 sps:$4 sm:$0xff]   ;;  %v4108_v14 = vld [vmem:[%s6564_s1 + $0xc8] ss:$72 sps:$4 sm:$0xff]  }
 0x1fd   :  { %3023 = vmatprep.subr.bf16.mxu1 %v5252_v24  ;;  %v4092_v24 = vld [vmem:[%s6564_s1 + $0xbc] ss:$72 sps:$4 sm:$0xff]  }
 0x1ff   :  { %2971 = vmatpush2.bf16.msra.mxu0 %v4323_v41 }
 0x200   :  { %3024 = vmatpush2.bf16.msra.mxu1 %v5261_v26  ;;  %3046 = vmatprep.subr.bf16.mxu0 %v4324_v21 }
 0x201   :  { %3099 = vmatprep.subr.bf16.mxu1 %v5273_v30 }
 0x202   :  { %v2432_v50 = vpop.f32.mrf.mxu0  ;;  %2973 = vmatmul.mubr.bf16.vlgmr.msra.gmra.mxu0 %v4086_v16 }
 0x203   :  { %3026 = vmatmul.mubr.bf16.vlgmr.msra.gmra.mxu1 %v4089_v19  ;;  %v6328_v26 = vadd.f32 %v2432_v50, %v6122_v58  ;;  %3047 = vmatpush1.bf16.msra.mxu0 %v4325_v33  ;;  %v2709_v16 = vpop.f32.mrf.mxu1 }
 0x204   :  { %3100 = vmatpush1.bf16.msra.mxu1 %v5287_v35  ;;  %v2434_v30 = vpop.f32.mrf.mxu0  ;;  %3048 = vmatprep.subr.bf16.mxu0 %v4326_v44  ;;  %v4097_v35 = vld [vmem:[%s6564_s1 + $0xc0] ss:$72 sps:$4 sm:$0xff]  }
 0x205   :  { %6571 = vst [vmem:[#allocation6_spill] sm:$0xff] %v6328_v26  ;;  %3101 = vmatprep.subr.bf16.mxu1 %v5296_v37  ;;  %v6339_v63 = vadd.f32 %v2434_v30, %v6131_v54  ;;  %2982 = vmatprep.mubr.bf16.mxu0 %v4092_v24  ;;  %v4327_v37 = vld [vmem:[%s6565_s2 + $0x760] ss:$8 sps:$4 sm:$0xff]   ;;  %v2711_v19 = vpop.f32.mrf.mxu1 }
 0x206   :  { %3035 = vmatprep.mubr.bf16.mxu1 %v4095_v31  ;;  %v2436_v58 = vpop.f32.mrf.mxu0 }
 0x207   :  { %6572 = vst [vmem:[#allocation7_spill] sm:$0xff] %v6339_v63  ;;  %v6348_v27 = vadd.f32 %v2436_v58, %v6146_v52  ;;  %3049 = vmatpush1.bf16.msra.mxu0 %v4327_v37  ;;  %v4100_v52 = vld [vmem:[%s6564_s1 + $0x3c] ss:$72 sps:$4 sm:$0xff]   ;;  %v2713_v41 = vpop.f32.mrf.mxu1 }
 0x208   :  { %3102 = vmatpush1.bf16.msra.mxu1 %v5314_v45  ;;  %v2438_v54 = vpop.f32.mrf.mxu0  ;;  %3050 = vmatprep.subr.bf16.mxu0 %v4328_v9 }
 0x209   :  { %6573 = vst [vmem:[#allocation8_spill] sm:$0xff] %v6348_v27  ;;  %3103 = vmatprep.subr.bf16.mxu1 %v5323_v49  ;;  %v6359_v22 = vadd.f32 %v2438_v54, %v6155_v47  ;;  %v4329_v49 = vld [vmem:[%s6565_s2 + $0x750] ss:$8 sps:$4 sm:$0xff]   ;;  %v2715_v21 = vpop.f32.mrf.mxu1 }
 0x20a   :  { %v2442_v45 = vpop.f32.mrf.mxu0  ;;  %2983 = vmatmul.mubr.bf16.gmra.mxu0 %v4094_v60 }
 0x20b   :  { %6574 = vst [vmem:[#allocation9_spill] sm:$0xff] %v6359_v22  ;;  %3036 = vmatmul.mubr.bf16.gmra.mxu1 %v4097_v35  ;;  %v6368_v1 = vadd.f32 %v2442_v45, %v6171_v56  ;;  %3051 = vmatpush1.bf16.msra.mxu0 %v4329_v49  ;;  %v2719_v24 = vpop.f32.mrf.mxu1 }
 0x20c   :  { %3104 = vmatpush1.bf16.msra.mxu1 %v5344_v59  ;;  %v2444_v47 = vpop.f32.mrf.mxu0  ;;  %3052 = vmatprep.subr.bf16.mxu0 %v4330_v17  ;;  %v4331_v59 = vld [vmem:[%s6565_s2 + $0x740] ss:$8 sps:$4 sm:$0xff]  }
 0x20d   :  { %6575 = vst [vmem:[#allocation10_spill] sm:$0xff] %v6368_v1  ;;  %3105 = vmatprep.subr.bf16.mxu1 %v5353_v62  ;;  %v6379_v6 = vadd.f32 %v2444_v47, %v6174_v48  ;;  %3078 = vmatprep.mubr.bf16.mxu0 %v4100_v52  ;;  %v4332_v62 = vld [vmem:[%s6565_s2 + $0x734] ss:$8 sps:$4 sm:$0xff]   ;;  %v2721_v31 = vpop.f32.mrf.mxu1 }
 0x20e   :  { %3131 = vmatprep.mubr.bf16.mxu1 %v4103_v38  ;;  %v2446_v56 = vpop.f32.mrf.mxu0 }
 0x20f   :  { %6576 = vst [vmem:[#allocation11_spill] sm:$0xff] %v6379_v6  ;;  %v6382_v8 = vadd.f32 %v2446_v56, %v6189_v40  ;;  %3053 = vmatpush1.bf16.msra.mxu0 %v4331_v59  ;;  %v4333_v40 = vld [vmem:[%s6565_s2 + $0x730] ss:$8 sps:$4 sm:$0xff]   ;;  %v6505_v50 = vpop.f32.mrf.mxu1 }
 0x210   :  { %3106 = vmatpush1.bf16.msra.mxu1 %v5373_v7  ;;  %v2448_v10 = vpop.f32.mrf.mxu0  ;;  %3054 = vmatprep.subr.bf16.mxu0 %v4332_v62  ;;  %v4334_v7 = vld [vmem:[%s6565_s2 + $0x724] ss:$8 sps:$4 sm:$0xff]  }
 0x211   :  { %6577 = vst [vmem:[#allocation12_spill] sm:$0xff] %v6382_v8  ;;  %3107 = vmatprep.subr.bf16.mxu1 %v5382_v11  ;;  %v6393_v48 = vadd.f32 %v2448_v10, %v6191_v4  ;;  %v4335_v11 = vld [vmem:[%s6565_s2 + $0x720] ss:$8 sps:$4 sm:$0xff]   ;;  %v4336_v4 = vld [vmem:[%s6565_s2 + $0x714] ss:$8 sps:$4 sm:$0xff]   ;;  %v6507_v30 = vpop.f32.mrf.mxu1 }
 0x213   :  { %6578 = vst [vmem:[#allocation13_spill] sm:$0xff] %v6393_v48  ;;  %3055 = vmatpush1.bf16.msra.mxu0 %v4333_v40 }
 0x214   :  { %3108 = vmatpush1.bf16.msra.mxu1 %v5391_v15  ;;  %3056 = vmatprep.subr.bf16.mxu0 %v4334_v7  ;;  %v4337_v15 = vld [vmem:[%s6565_s2 + $0x710] ss:$8 sps:$4 sm:$0xff]  }
 0x215   :  { %3109 = vmatprep.subr.bf16.mxu1 %v5400_v18  ;;  %v4338_v18 = vld [vmem:[%s6565_s2 + $0x704] ss:$8 sps:$4 sm:$0xff]  }
 0x217   :  { %3057 = vmatpush1.bf16.msra.mxu0 %v4335_v11 }
 0x218   :  { %3110 = vmatpush1.bf16.msra.mxu1 %v5409_v23  ;;  %3058 = vmatprep.subr.bf16.mxu0 %v4336_v4  ;;  %v4339_v23 = vld [vmem:[%s6565_s2 + $0x700] ss:$8 sps:$4 sm:$0xff]  }
 0x219   :  { %3111 = vmatprep.subr.bf16.mxu1 %v5419_v28  ;;  %v4340_v28 = vld [vmem:[%s6565_s2 + $0x7f4] ss:$8 sps:$4 sm:$0xff]  }
 0x21b   :  { %3059 = vmatpush1.bf16.msra.mxu0 %v4337_v15 }
 0x21c   :  { %3112 = vmatpush1.bf16.msra.mxu1 %v5429_v39  ;;  %3060 = vmatprep.subr.bf16.mxu0 %v4338_v18  ;;  %v4341_v39 = vld [vmem:[%s6565_s2 + $0x7f0] ss:$8 sps:$4 sm:$0xff]  }
 0x21d   :  { %3113 = vmatprep.subr.bf16.mxu1 %v5441_v43  ;;  %v4342_v43 = vld [vmem:[%s6565_s2 + $0x7e4] ss:$8 sps:$4 sm:$0xff]  }
 0x21f   :  { %3061 = vmatpush1.bf16.msra.mxu0 %v4339_v23 }
 0x220   :  { %3114 = vmatpush1.bf16.msra.mxu1 %v5453_v53  ;;  %3062 = vmatprep.subr.bf16.mxu0 %v4340_v28  ;;  %v4343_v53 = vld [vmem:[%s6565_s2 + $0x7e0] ss:$8 sps:$4 sm:$0xff]  }
 0x221   :  { %3115 = vmatprep.subr.bf16.mxu1 %v5464_v57  ;;  %v4344_v57 = vld [vmem:[%s6565_s2 + $0x7d4] ss:$8 sps:$4 sm:$0xff]  }
 0x223   :  { %3063 = vmatpush2.bf16.msra.mxu0 %v4341_v39 }
 0x224   :  { %3116 = vmatpush2.bf16.msra.mxu1 %v5475_v0  ;;  %3064 = vmatprep.subr.bf16.mxu0 %v4342_v43  ;;  %v4345_v0 = vld [vmem:[%s6565_s2 + $0x7d0] ss:$8 sps:$4 sm:$0xff]  }
 0x225   :  { %3117 = vmatprep.subr.bf16.mxu1 %v5484_v2  ;;  %v4346_v2 = vld [vmem:[%s6565_s2 + $0x7c4] ss:$8 sps:$4 sm:$0xff]  }
 0x227   :  { %3065 = vmatpush2.bf16.msra.mxu0 %v4343_v53 }
 0x228   :  { %3118 = vmatpush2.bf16.msra.mxu1 %v5493_v5  ;;  %3066 = vmatprep.subr.bf16.mxu0 %v4344_v57  ;;  %v4347_v5 = vld [vmem:[%s6565_s2 + $0x7c0] ss:$8 sps:$4 sm:$0xff]  }
 0x229   :  { %3119 = vmatprep.subr.bf16.mxu1 %v5502_v13  ;;  %v4348_v13 = vld [vmem:[%s6565_s2 + $0x7b4] ss:$8 sps:$4 sm:$0xff]  }
 0x22b   :  { %3067 = vmatpush2.bf16.msra.mxu0 %v4345_v0 }
 0x22c   :  { %3120 = vmatpush2.bf16.msra.mxu1 %v5511_v20  ;;  %3068 = vmatprep.subr.bf16.mxu0 %v4346_v2  ;;  %v4349_v20 = vld [vmem:[%s6565_s2 + $0x7b0] ss:$8 sps:$4 sm:$0xff]  }
 0x22d   :  { %3121 = vmatprep.subr.bf16.mxu1 %v5520_v25  ;;  %v4350_v25 = vld [vmem:[%s6565_s2 + $0x7a4] ss:$8 sps:$4 sm:$0xff]  }
 0x22f   :  { %3069 = vmatpush2.bf16.msra.mxu0 %v4347_v5 }
 0x230   :  { %3122 = vmatpush2.bf16.msra.mxu1 %v5529_v29  ;;  %3070 = vmatprep.subr.bf16.mxu0 %v4348_v13  ;;  %v4351_v29 = vld [vmem:[%s6565_s2 + $0x7a0] ss:$8 sps:$4 sm:$0xff]  }
 0x231   :  { %3123 = vmatprep.subr.bf16.mxu1 %v5538_v32  ;;  %v4352_v32 = vld [vmem:[%s6565_s2 + $0x794] ss:$8 sps:$4 sm:$0xff]  }
 0x233   :  { %3071 = vmatpush2.bf16.msra.mxu0 %v4349_v20 }
 0x234   :  { %3124 = vmatpush2.bf16.msra.mxu1 %v5547_v36  ;;  %3072 = vmatprep.subr.bf16.mxu0 %v4350_v25  ;;  %v4353_v36 = vld [vmem:[%s6565_s2 + $0x790] ss:$8 sps:$4 sm:$0xff]  }
 0x235   :  { %3125 = vmatprep.subr.bf16.mxu1 %v5556_v42  ;;  %v4354_v42 = vld [vmem:[%s6565_s2 + $0x784] ss:$8 sps:$4 sm:$0xff]  }
 0x237   :  { %3073 = vmatpush2.bf16.msra.mxu0 %v4351_v29 }
 0x238   :  { %3126 = vmatpush2.bf16.msra.mxu1 %v5565_v46  ;;  %3074 = vmatprep.subr.bf16.mxu0 %v4352_v32  ;;  %v4098_v46 = vld [vmem:[%s6564_s1 + $0x38] ss:$72 sps:$4 sm:$0xff]  }
 0x239   :  { %3127 = vmatprep.subr.bf16.mxu1 %v5574_v51  ;;  %v4101_v51 = vld [vmem:[%s6564_s1 + $0x40] ss:$72 sps:$4 sm:$0xff]  }
 0x23b   :  { %3075 = vmatpush2.bf16.msra.mxu0 %v4353_v36  ;;  %v2710_v36 = vadd.f32 %v2709_v16, %v5282_v34  ;;  %v2720_v16 = vadd.f32 %v2719_v24, %v5282_v34 }
 0x23c   :  { %3128 = vmatpush2.bf16.msra.mxu1 %v5583_v55  ;;  %3076 = vmatprep.subr.bf16.mxu0 %v4354_v42  ;;  %v4104_v55 = vld [vmem:[%s6564_s1 + $0xcc] ss:$72 sps:$4 sm:$0xff]  }
 0x23d   :  { %3129 = vmatprep.subr.bf16.mxu1 %v5592_v61  ;;  %v4106_v61 = vld [vmem:[%s6564_s1 + $0xd4] ss:$72 sps:$4 sm:$0xff]  }
 0x23f   :  { %3077 = vmatpush2.bf16.msra.mxu0 %v4355_v12 }
 0x240   :  { %3130 = vmatpush2.bf16.msra.mxu1 %v5601_v3  ;;  %v4109_v3 = vld [vmem:[%s6564_s1 + $0xd0] ss:$72 sps:$4 sm:$0xff]  }
 0x242   :  { %3079 = vmatmul.mubr.bf16.vlgmr.msra.gmra.mxu0 %v4098_v46  ;;  %v2762_v33 = vpop.f32.mrf.mxu0  ;;  %v6581_v46 = vld [vmem:[#allocation5_spill] sm:$0xff] }
 0x243   :  { %3132 = vmatmul.mubr.bf16.vlgmr.msra.gmra.mxu1 %v4101_v51  ;;  %3088 = vmatprep.mubr.bf16.mxu0 %v4104_v55  ;;  %v2815_v58 = vpop.f32.mrf.mxu1  ;;  %v2712_v51 = vadd.f32 %v2711_v19, %v6581_v46  ;;  %v2763_v12 = vadd.f32 %v2762_v33, %v2710_v36  ;;  %v2722_v19 = vadd.f32 %v2721_v31, %v6581_v46 }
 0x244   :  { %3141 = vmatprep.mubr.bf16.mxu1 %v4106_v61  ;;  %v2764_v44 = vpop.f32.mrf.mxu0  ;;  %v2714_v61 = vadd.f32 %v2713_v41, %v5282_v34 }
 0x245   :  { %v2817_v35 = vpop.f32.mrf.mxu1  ;;  %v2816_v6 = vadd.f32 %v2815_v58, %v2763_v12  ;;  %v2724_v58 = vadd.f32 %v6505_v50, %v5282_v34 }
 0x246   :  { %v2766_v60 = vpop.f32.mrf.mxu0 }
 0x247   :  { %v2819_v54 = vpop.f32.mrf.mxu1  ;;  %v2767_v1 = vadd.f32 %v2766_v60, %v2714_v61 }
 0x248   :  { %v2768_v37 = vpop.f32.mrf.mxu0 }
 0x249   :  { %v2821_v52 = vpop.f32.mrf.mxu1  ;;  %v2820_v33 = vadd.f32 %v2819_v54, %v2767_v1 }
 0x24a   :  { %3089 = vmatmul.mubr.bf16.gmra.mxu0 %v4108_v14  ;;  %v2772_v9 = vpop.f32.mrf.mxu0  ;;  %v2765_v14 = vadd.f32 %v2764_v44, %v2712_v51 }
 0x24b   :  { %3142 = vmatmul.mubr.bf16.gmra.mxu1 %v4109_v3  ;;  %v2825_v45 = vpop.f32.mrf.mxu1  ;;  %v2716_v3 = vadd.f32 %v2715_v21, %v6581_v46  ;;  %v2773_v36 = vadd.f32 %v2772_v9, %v2720_v16 }
 0x24c   :  { %v2774_v38 = vpop.f32.mrf.mxu0  ;;  %v2818_v27 = vadd.f32 %v2817_v35, %v2765_v14 }
 0x24d   :  { %v2827_v47 = vpop.f32.mrf.mxu1  ;;  %v2769_v22 = vadd.f32 %v2768_v37, %v2716_v3  ;;  %v2775_v21 = vadd.f32 %v2774_v38, %v2722_v19  ;;  %v2826_v31 = vadd.f32 %v2825_v45, %v2773_v36 }
 0x24e   :  { %v2776_v49 = vpop.f32.mrf.mxu0 }
 0x24f   :  { %v6509_v56 = vpop.f32.mrf.mxu1  ;;  %v2822_v44 = vadd.f32 %v2821_v52, %v2769_v22  ;;  %v2777_v1 = vadd.f32 %v2776_v49, %v2724_v58  ;;  %v2828_v22 = vadd.f32 %v2827_v47, %v2775_v21 }
 0x250   :  { %v2778_v17 = vpop.f32.mrf.mxu0 }
 0x251   :  { %v6511_v10 = vpop.f32.mrf.mxu1 }
 0x282   :  { %v2868_v59 = vpop.f32.mrf.mxu0 }
 0x283   :  { %v2921_v62 = vpop.f32.mrf.mxu1 }
 0x284   :  { %v2870_v40 = vpop.f32.mrf.mxu0 }
 0x285   :  { %v2923_v7 = vpop.f32.mrf.mxu1  ;;  %v2871_v41 = vadd.f32 %v2870_v40, %v2818_v27 }
 0x286   :  { %v2872_v11 = vpop.f32.mrf.mxu0 }
 0x287   :  { %v2925_v4 = vpop.f32.mrf.mxu1  ;;  %v2873_v26 = vadd.f32 %v2872_v11, %v2820_v33  ;;  %v2924_v37 = vadd.f32 %v2923_v7, %v2871_v41 }
 0x288   :  { %v2874_v15 = vpop.f32.mrf.mxu0 }
 0x289   :  { %v2927_v18 = vpop.f32.mrf.mxu1  ;;  %v2875_v60 = vadd.f32 %v2874_v15, %v2822_v44  ;;  %v2926_v54 = vadd.f32 %v2925_v4, %v2873_v26 }
 0x28a   :  { %v2878_v23 = vpop.f32.mrf.mxu0 }
 0x28b   :  { %v6513_v28 = vpop.f32.mrf.mxu1  ;;  %v2928_v52 = vadd.f32 %v2927_v18, %v2875_v60  ;;  %v2879_v38 = vadd.f32 %v2878_v23, %v2826_v31 }
 0x28c   :  { %v2880_v39 = vpop.f32.mrf.mxu0 }
 0x28d   :  { %v6515_v43 = vpop.f32.mrf.mxu1  ;;  %v2881_v34 = vadd.f32 %v2880_v39, %v2828_v22  ;;  %v2932_v47 = vadd.f32 %v6513_v28, %v2879_v38 }
 0x28e   :  { %v6517_v53 = vpop.f32.mrf.mxu0 }
 0x28f   :  { %v6519_v57 = vpop.f32.mrf.mxu1  ;;  %v2934_v23 = vadd.f32 %v6515_v43, %v2881_v34 }
 0x290   :  { %6579 = vst [vmem:[#allocation14_spill] sm:$0xff] %v6519_v57  ;;  %v6521_v0 = vpop.f32.mrf.mxu0 }
 0x291   :  { %v6523_v2 = vpop.f32.mrf.mxu1 }
 0x292   :  { %6580 = vst [vmem:[#allocation15_spill] sm:$0xff] %v6523_v2  ;;  %v2869_v2 = vadd.f32 %v2868_v59, %v2816_v6  ;;  %v2726_v6 = vadd.f32 %v6507_v30, %v6581_v46  ;;  %v2830_v30 = vadd.f32 %v6509_v56, %v2777_v1 }
 0x294   :  { %v2922_v51 = vadd.f32 %v2921_v62, %v2869_v2  ;;  %v2779_v27 = vadd.f32 %v2778_v17, %v2726_v6  ;;  %v2883_v26 = vadd.f32 %v6517_v53, %v2830_v30  ;;  %v6583_v53 = vld [vmem:[#allocation7_spill] sm:$0xff] }
 0x295   :  { %v2452_v3 = vmax.f32 %v6583_v53, 0.0 }
 0x296   :  { %v2832_v15 = vadd.f32 %v6511_v10, %v2779_v27  ;;  %v6587_v27 = vld [vmem:[#allocation9_spill] sm:$0xff] }
 0x297   :  { %v2454_v22 = vmax.f32 %v6587_v27, 0.0 }
 0x298   :  { %v2885_v17 = vadd.f32 %v6521_v0, %v2832_v15  ;;  %v6584_v0 = vld [vmem:[#allocation14_spill] sm:$0xff] }
 0x299   :  { %v2936_v16 = vadd.f32 %v6584_v0, %v2883_v26  ;;  %v6585_v19 = vld [vmem:[#allocation15_spill] sm:$0xff] }
 0x29a   :  { %v2938_v33 = vadd.f32 %v6585_v19, %v2885_v17  ;;  %v6589_v26 = vld [vmem:[#allocation11_spill] sm:$0xff] }
 0x29b   :  { %v2456_v17 = vmax.f32 %v6589_v26, 0.0 }
 0x2c2   :  { %v2974_v5 = vpop.f32.mrf.mxu0 }
 0x2c3   :  { %v3027_v13 = vpop.f32.mrf.mxu1  ;;  %v2975_v59 = vadd.f32 %v2974_v5, %v2922_v51 }
 0x2c4   :  { %v2976_v20 = vpop.f32.mrf.mxu0 }
 0x2c5   :  { %v3029_v25 = vpop.f32.mrf.mxu1  ;;  %v2977_v9 = vadd.f32 %v2976_v20, %v2924_v37  ;;  %v3028_v50 = vadd.f32 %v3027_v13, %v2975_v59  ;;  %v6582_v20 = vld [vmem:[#allocation6_spill] sm:$0xff] }
 0x2c6   :  { %v2978_v29 = vpop.f32.mrf.mxu0  ;;  %v2451_v10 = vmax.f32 %v6582_v20, 0.0 }
 0x2c7   :  { %v3031_v32 = vpop.f32.mrf.mxu1  ;;  %v2979_v11 = vadd.f32 %v2978_v29, %v2926_v54  ;;  %v3030_v45 = vadd.f32 %v3029_v25, %v2977_v9 }
 0x2c8   :  { %v2980_v42 = vpop.f32.mrf.mxu0 }
 0x2c9   :  { %v3033_v55 = vpop.f32.mrf.mxu1  ;;  %v2981_v2 = vadd.f32 %v2980_v42, %v2928_v52  ;;  %v3032_v39 = vadd.f32 %v3031_v32, %v2979_v11 }
 0x2ca   :  { %v2984_v48 = vpop.f32.mrf.mxu0 }
 0x2cb   :  { %v6529_v8 = vpop.f32.mrf.mxu1  ;;  %v3034_v29 = vadd.f32 %v3033_v55, %v2981_v2  ;;  %v2985_v42 = vadd.f32 %v2984_v48, %v2932_v47  ;;  %v6586_v55 = vld [vmem:[#allocation8_spill] sm:$0xff] }
 0x2cc   :  { %v2986_v57 = vpop.f32.mrf.mxu0  ;;  %v2453_v48 = vmax.f32 %v6586_v55, 0.0 }
 0x2cd   :  { %v6532_v63 = vpop.f32.mrf.mxu1  ;;  %v2987_v12 = vadd.f32 %v2986_v57, %v2934_v23  ;;  %v3038_v51 = vadd.f32 %v6529_v8, %v2985_v42 }
 0x2ce   :  { %v2988_v24 = vpop.f32.mrf.mxu0 }
 0x2cf   :  { %v6539_v35 = vpop.f32.mrf.mxu1  ;;  %v2989_v57 = vadd.f32 %v2988_v24, %v2936_v16  ;;  %v3040_v37 = vadd.f32 %v6532_v63, %v2987_v12 }
 0x2d0   :  { %v2990_v62 = vpop.f32.mrf.mxu0 }
 0x2d1   :  { %v3043_v40 = vpop.f32.mrf.mxu1  ;;  %v2991_v58 = vadd.f32 %v2990_v62, %v2938_v33  ;;  %v3042_v8 = vadd.f32 %v6539_v35, %v2989_v57 }
 0x2d3   :  { %v3044_v24 = vadd.f32 %v3043_v40, %v2991_v58 }
 0x302   :  { %v3080_v7 = vpop.f32.mrf.mxu0 }
 0x303   :  { %v3133_v5 = vpop.f32.mrf.mxu1  ;;  %v3081_v49 = vadd.f32 %v3080_v7, %v3028_v50 }
 0x304   :  { %v3082_v4 = vpop.f32.mrf.mxu0 }
 0x305   :  { %v3135_v18 = vpop.f32.mrf.mxu1  ;;  %v3134_v13 = vadd.f32 %v3133_v5, %v3081_v49  ;;  %v3083_v56 = vadd.f32 %v3082_v4, %v3030_v45  ;;  %v6588_v49 = vld [vmem:[#allocation10_spill] sm:$0xff] }
 0x306   :  { %v3084_v46 = vpop.f32.mrf.mxu0  ;;  %v2455_v47 = vmax.f32 %v6588_v49, 0.0 }
 0x307   :  { %v3137_v25 = vpop.f32.mrf.mxu1  ;;  %v3152_v61 = vmax.f32 %v3134_v13, 0.0  ;;  %v3136_v28 = vadd.f32 %v3135_v18, %v3083_v56  ;;  %v3085_v14 = vadd.f32 %v3084_v46, %v3032_v39 }
 0x308   :  { %v3086_v43 = vpop.f32.mrf.mxu0 }
 0x309   :  { %v3139_v32 = vpop.f32.mrf.mxu1  ;;  %v3160_v41 = vsub.f32 %v2451_v10, %v3152_v61  ;;  %v3153_v44 = vmax.f32 %v3136_v28, 0.0  ;;  %v3138_v36 = vadd.f32 %v3137_v25, %v3085_v14  ;;  %v3087_v21 = vadd.f32 %v3086_v43, %v3034_v29  ;;  %v6590_v25 = vld [vmem:[#allocation12_spill] sm:$0xff]  ;;  %v6591_v14 = vld [vmem:[#allocation13_spill] sm:$0xff] }
 0x30a   :  { %v3090_v6 = vpop.f32.mrf.mxu0  ;;  %v2457_v12 = vmax.f32 %v6590_v25, 0.0  ;;  %v2458_v53 = vmax.f32 %v6591_v14, 0.0 }
 0x30b   :  { %v3143_v60 = vpop.f32.mrf.mxu1  ;;  %v3161_v59 = vsub.f32 %v2452_v3, %v3153_v44  ;;  %v3154_v31 = vmax.f32 %v3138_v36, 0.0  ;;  %v3140_v1 = vadd.f32 %v3139_v32, %v3087_v21  ;;  %v3168_v54 = vand.u32 2147483647, %v3160_v41 }
 0x30c   :  { %v3091_v9 = vadd.f32 %v3090_v6, %v3038_v51  ;;  %v3092_v52 = vpop.f32.mrf.mxu0 }
 0x30d   :  { %v3145_v38 = vpop.f32.mrf.mxu1  ;;  %v3169_v34 = vand.u32 2147483647, %v3161_v59  ;;  %v3162_v50 = vsub.f32 %v2453_v48, %v3154_v31  ;;  %v3155_v11 = vmax.f32 %v3140_v1, 0.0  ;;  %v3093_v30 = vadd.f32 %v3092_v52, %v3040_v37 }
 0x30e   :  { %v3144_v62 = vadd.f32 %v3143_v60, %v3091_v9  ;;  %v3094_v15 = vpop.f32.mrf.mxu0 }
 0x30f   :  { %v3147_v2 = vpop.f32.mrf.mxu1  ;;  %v3176_v63 = vadd.f32 %v3169_v34, %v3168_v54  ;;  %v3170_v7 = vand.u32 2147483647, %v3162_v50  ;;  %v3163_v5 = vsub.f32 %v2454_v22, %v3155_v11  ;;  %v3146_v45 = vadd.f32 %v3145_v38, %v3093_v30 }
 0x310   :  { %v3156_v4 = vmax.f32 %v3144_v62, 0.0  ;;  %v3095_v18 = vadd.f32 %v3094_v15, %v3042_v8  ;;  %v3096_v23 = vpop.f32.mrf.mxu0 }
 0x311   :  { %v3177_v39 = vadd.f32 %v3176_v63, %v3170_v7  ;;  %v3171_v13 = vand.u32 2147483647, %v3163_v5  ;;  %v3157_v56 = vmax.f32 %v3146_v45, 0.0  ;;  %v3097_v20 = vadd.f32 %v3096_v23, %v3044_v24  ;;  %v3149_v10 = vpop.f32.mrf.mxu1 }
 0x312   :  { %v3164_v35 = vsub.f32 %v2455_v47, %v3156_v4  ;;  %v3148_v40 = vadd.f32 %v3147_v2, %v3095_v18 }
 0x313   :  { %v3178_v29 = vadd.f32 %v3177_v39, %v3171_v13  ;;  %v3165_v42 = vsub.f32 %v2456_v17, %v3157_v56  ;;  %v3150_v46 = vadd.f32 %v3149_v10, %v3097_v20 }
 0x314   :  { %v3172_v61 = vand.u32 2147483647, %v3164_v35  ;;  %v3158_v28 = vmax.f32 %v3148_v40, 0.0 }
 0x315   :  { %v3173_v3 = vand.u32 2147483647, %v3165_v42  ;;  %v3159_v0 = vmax.f32 %v3150_v46, 0.0 }
 0x316   :  { %v3179_v16 = vadd.f32 %v3178_v29, %v3172_v61  ;;  %v3166_v19 = vsub.f32 %v2457_v12, %v3158_v28 }
 0x317   :  { %v3167_v33 = vsub.f32 %v2458_v53, %v3159_v0 }
 0x318   :  { %v3174_v43 = vand.u32 2147483647, %v3166_v19  ;;  %v3180_v32 = vadd.f32 %v3179_v16, %v3173_v3 }
 0x319   :  { %v3175_v41 = vand.u32 2147483647, %v3167_v33 }
 0x31a   :  { %v3181_v44 = vadd.f32 %v3180_v32, %v3174_v43 }
 0x31c   :  { %v3182_v36 = vadd.f32 %v3181_v44, %v3175_v41 }
 0x31e   :  { %3183 = vadd.xlane.f32.xlu0 %v3182_v36 }
 0x3a7   :  { %v3184_v21 = vpop.xlane.xlu0 %3183 }
 0x3a8   :  { %v3185_v55 = vrot.slane %v3184_v21, 4 }
 0x3aa   :  { %v3186_v48 = vadd.f32 %v3185_v55, %v3184_v21 }
 0x3ac   :  { %v3187_v51 = vrot.slane %v3186_v48, 2 }
 0x3ae   :  { %v3188_v57 = vadd.f32 %v3187_v51, %v3186_v48 }
 0x3b0   :  { %v3189_v58 = vrot.slane %v3188_v57, 1 }
 0x3b2   :  { %v3190_v6 = vadd.f32 %v3189_v58, %v3188_v57 }
 0x3b4   :  { %3567 = vpush %v3190_v6 }
 0x3e5   :  { %s3568_s1 = spop %3567 }
 0x3e6   :  { %3193 = sst [smem:[#allocation2]] %s3568_s1 }
 0x3e7   :  { %3201 = dma.smem_to_hbm %s4366_s17, 16, %s6567_s4, [#allocation3]  }
 0x3e8   :  { %4364 = dma.done.wait [#allocation3], 16  }
 0x3e9   :  { %4365 = vsyncadd [#allocation3], 4294967280 }
 0x3ea   :  { %3205 = sfence }
 0x3eb   :  { %3206 = vsyncpa [#allocation3], 1 }

</bundles_post_ra>
